<compile_context>
chip_gen: v7x
topology: tpu7x:2x2x1
jax: 0.10.0
libtpu: 0.0.40
codegen_flags: <defaults>
</compile_context>

<pallas_src>
import jax
import jax.numpy as jnp
from jax.experimental import pallas as pl
from jax.experimental.pallas import tpu as pltpu


# ---------------------------------------------------------------------------
# BN folding (inference mode)
# ---------------------------------------------------------------------------
def _fold_bn(w, b, gamma, beta, mean, var, eps=1e-5):
    s = gamma / jnp.sqrt(var + eps)
    return w * s[:, None, None, None], (b - mean) * s + beta


# ---------------------------------------------------------------------------
# Wrapper + kernels
# ---------------------------------------------------------------------------
def feat_scale_net(feat, depth, params):
    """feat: (B, Cf, H, W), depth: (B, 1, H, W) -> (B, Co, H//2, W//2)."""
    B, Cf, H, W = feat.shape
    assert H % 2 == 0 and W % 2 == 0, "H and W must be even"
    h2, w2 = H // 2, W // 2
    Ci = Cf + 1
    Co = params["we"].shape[0]
    f32 = jnp.float32

    # pixel geometries (flattened, row pitch keeps 2 junk columns per row)
    W1p = W + 2                     # kernel-1 row pitch
    N1 = H * W1p                    # kernel-1 pixel count (incl. junk cols)
    M1 = (H + 2) * W1p + 2          # flattened zero-padded input length
    WW = w2 + 2                     # kernel-2 parity row pitch
    Npad = h2 * WW                  # kernel-2 pixel count (incl. junk cols)
    Mt = (h2 + 2) * WW + 2          # flattened zero-padded parity-plane length

    # ---- fold BN + weight re-layout (host/XLA, tiny) ----
    w1f, b1f = _fold_bn(params["w1"], params["b1"], *params["bn1"])
    w2f, b2f = _fold_bn(params["w2"], params["b2"], *params["bn2"])
    w3f, b3f = _fold_bn(params["w3"], params["b3"], *params["bn3"])
    wef, bef = _fold_bn(params["we"], params["be"], *params["bne"])

    w1taps = jnp.transpose(w1f, (2, 3, 0, 1)).reshape(9, Cf, Ci)   # per-tap (Cout,Cin)
    w2taps = jnp.transpose(w2f, (2, 3, 0, 1)).reshape(9, Cf, Cf)
    w3col = w3f.reshape(Cf, 1)
    b1c = b1f.reshape(Cf, 1)
    b2c = b2f.reshape(Cf, 1)
    b3c = b3f.reshape(1, 1)
    # embed weight per parity: rows ordered (p, q, cf) -> (4, Co, 9*Cf)
    w6 = wef.reshape(Co, Cf, 2, 3, 2, 3)            # (co, cf, a, p, b, q)
    wpar = jnp.transpose(w6, (2, 4, 0, 3, 5, 1)).reshape(4, Co, 9 * Cf)
    bec = bef.reshape(Co, 1)

    # ---- kernel 1 input: CHW, zero-padded by 1, pixels flattened in lanes ----
    xcat = jnp.concatenate([feat, depth], axis=1)                   # (B, Ci, H, W)
    xpad = jnp.pad(xcat, ((0, 0), (0, 0), (1, 1), (1, 1)))
    x1 = jnp.pad(xpad.reshape(B, Ci, (H + 2) * W1p), ((0, 0), (0, 0), (0, 2)))
    # column-validity mask over the N1 pixel space (zeros junk columns of h1)
    colmask = (jnp.arange(N1) % W1p < W).astype(f32).reshape(1, N1)

    # ------------------------------------------------------------------
    # Kernel 1: scale head (conv3x3 -> conv3x3 -> conv1x1 + 2*sigmoid)
    # ------------------------------------------------------------------
    def scale_head_kernel(x_ref, m_ref, w1_ref, b1_ref, w2_ref, b2_ref,
                          w3_ref, b3_ref, o_ref, h1p_ref):
        # conv1 (3x3, pad=1): 9 accumulated MXU matmuls on lane-shifted slabs
        acc = None
        for t in range(9):
            off = (t // 3) * W1p + (t % 3)
            d = jnp.dot(w1_ref[t], x_ref[0, :, off:off + N1],
                        preferred_element_type=f32)
            acc = d if acc is None else acc + d
        h1 = jnp.maximum(acc + b1_ref[...], 0.0) * m_ref[...]
        # zero-padded copy of h1; only the uncovered border strips are re-zeroed
        h1p_ref[:, 0:W1p + 1] = jnp.zeros((Cf, W1p + 1), f32)
        h1p_ref[:, (H + 1) * W1p + 1:M1] = jnp.zeros((Cf, W1p + 1), f32)
        h1p_ref[:, W1p + 1:W1p + 1 + N1] = h1
        # conv2 (3x3, pad=1)
        acc = None
        for t in range(9):
            off = (t // 3) * W1p + (t % 3)
            d = jnp.dot(w2_ref[t], h1p_ref[:, off:off + N1],
                        preferred_element_type=f32)
            acc = d if acc is None else acc + d
        act2 = jnp.maximum(acc + b2_ref[...], 0.0)
        # conv3 (1x1 -> 1 channel) as a sublane reduction, + 2*sigmoid
        logit = jnp.sum(act2 * w3_ref[...], axis=0, keepdims=True) + b3_ref[...]
        o_ref[0] = 2.0 / (1.0 + jnp.exp(-logit))     # lane-dense (1, N1)

    scale_flat = pl.pallas_call(
        scale_head_kernel,
        out_shape=jax.ShapeDtypeStruct((B, 1, N1), f32),
        grid=(B,),
        in_specs=[
            pl.BlockSpec((1, Ci, M1), lambda b: (b, 0, 0)),
            pl.BlockSpec((1, N1), lambda b: (0, 0)),
            pl.BlockSpec((9, Cf, Ci), lambda b: (0, 0, 0)),
            pl.BlockSpec((Cf, 1), lambda b: (0, 0)),
            pl.BlockSpec((9, Cf, Cf), lambda b: (0, 0, 0)),
            pl.BlockSpec((Cf, 1), lambda b: (0, 0)),
            pl.BlockSpec((Cf, 1), lambda b: (0, 0)),
            pl.BlockSpec((1, 1), lambda b: (0, 0)),
        ],
        out_specs=pl.BlockSpec((1, 1, N1), lambda b: (b, 0, 0)),
        scratch_shapes=[pltpu.VMEM((Cf, M1), f32)],
        compiler_params=pltpu.CompilerParams(dimension_semantics=("parallel",)),
    )(x1, colmask, w1taps, b1c, w2taps, b2c, w3col, b3c)

    scale = scale_flat.reshape(B, H, W1p)[:, :, :W]                 # (B, H, W)

    # ---- glue: parity decomposition, channel-major, pixels flattened ----
    fpad = jnp.pad(feat, ((0, 0), (0, 0), (2, 2), (2, 2)))          # (B,Cf,H+4,W+4)
    fps, sps = [], []
    for a in (0, 1):
        for b in (0, 1):
            fp = fpad[:, :, a::2, b::2].reshape(B, Cf, (h2 + 2) * WW)
            fps.append(jnp.pad(fp, ((0, 0), (0, 0), (0, 2))))
            sp = jnp.pad(scale[:, a::2, b::2], ((0, 0), (0, 0), (0, 2)))
            sps.append(sp.reshape(B, Npad))
    fpar = jnp.stack(fps, axis=1)                                   # (B,4,Cf,Mt)
    spar = jnp.stack(sps, axis=1)                                   # (B,4,Npad)

    # ------------------------------------------------------------------
    # Kernel 2: tent-weighted grid_sample + 6x6/stride-6 embed conv
    # ------------------------------------------------------------------
    def sample_embed_kernel(f_ref, s_ref, w_ref, be_ref, o_ref, pt_ref):
        acc = None
        for a in (0, 1):
            for b in (0, 1):
                pidx = a * 2 + b
                s = s_ref[0, pidx:pidx + 1, :]                      # (1, Npad) f32
                g = (jnp.maximum(1.0 - jnp.abs(s), 0.0),            # tri(s)
                     jnp.maximum(1.0 - jnp.abs(s - 1.0), 0.0),      # tri(s-1)
                     jnp.maximum(1.0 - jnp.abs(s - 2.0), 0.0))      # tri(s-2)

                def slab(ry, rx):
                    # feat[2i+a+ry, 2j+b+rx, :] as a contiguous lane slice
                    ta, tb = (a + ry) % 2, (b + rx) % 2
                    th, tv = (a + ry - ta) // 2, (b + rx - tb) // 2
                    off = (1 + th) * WW + (1 + tv)
                    return f_ref[0, ta * 2 + tb, :, off:off + Npad]  # (Cf, Npad)

                terms = [None] * 9

                def add(k, v):
                    terms[k] = v if terms[k] is None else terms[k] + v

                for ry in (-2, -1, 0, 1, 2):
                    sl = [slab(ry, rx) for rx in (-2, -1, 0, 1, 2)]  # each loaded once
                    cm = (sl[0] * g[2] + sl[1] * g[1] + sl[2] * g[0],   # q=0 (dx=-1)
                          sl[2],                                        # q=1 (dx= 0)
                          sl[2] * g[0] + sl[3] * g[1] + sl[4] * g[2])   # q=2 (dx=+1)
                    if ry == 0:
                        for q in range(3):
                            t0 = cm[q] * g[0]            # shared by p=0 and p=2
                            add(0 * 3 + q, t0)
                            add(2 * 3 + q, t0)
                            add(1 * 3 + q, cm[q])
                        continue
                    p, wy = (0, g[-ry]) if ry < 0 else (2, g[ry])
                    for q in range(3):
                        add(p * 3 + q, cm[q] * wy)

                # sublane-aligned, full-lane-width stores into per-parity pt scratch
                for k in range(9):
                    pt_ref[k * Cf:(k + 1) * Cf, :] = terms[k]
                # per-parity K=144 accumulation of the embed conv (lane-dense output)
                d = jnp.dot(w_ref[pidx], pt_ref[...],
                            preferred_element_type=f32)
                acc = d if acc is None else acc + d
        o_ref[0] = jnp.maximum(acc + be_ref[...], 0.0)               # (Co, Npad)

    out_flat = pl.pallas_call(
        sample_embed_kernel,
        out_shape=jax.ShapeDtypeStruct((B, Co, Npad), f32),
        grid=(B,),
        in_specs=[
            pl.BlockSpec((1, 4, Cf, Mt), lambda b: (b, 0, 0, 0)),
            pl.BlockSpec((1, 4, Npad), lambda b: (b, 0, 0)),
            pl.BlockSpec((4, Co, 9 * Cf), lambda b: (0, 0, 0)),
            pl.BlockSpec((Co, 1), lambda b: (0, 0)),
        ],
        out_specs=pl.BlockSpec((1, Co, Npad), lambda b: (b, 0, 0)),
        scratch_shapes=[pltpu.VMEM((9 * Cf, Npad), f32)],
        compiler_params=pltpu.CompilerParams(dimension_semantics=("parallel",)),
    )(fpar, spar, wpar, bec)

    return out_flat.reshape(B, Co, h2, WW)[:, :, :, :w2]


# ---------------------------------------------------------------------------
# Pure-JAX reference (explicit grid_enlarge + gather grid_sample) for validation
# ---------------------------------------------------------------------------
def _conv_nchw(x, w, b, stride=1, pad=0):
    y = jax.lax.conv_general_dilated(
        x, w, (stride, stride), [(pad, pad), (pad, pad)],
        dimension_numbers=("NCHW", "OIHW", "NCHW"),
        precision=jax.lax.Precision.HIGHEST)
    return y + b[None, :, None, None]


def _bn(x, gamma, beta, mean, var, eps=1e-5):
    return ((x - mean[None, :, None, None])
            / jnp.sqrt(var[None, :, None, None] + eps)
            * gamma[None, :, None, None] + beta[None, :, None, None])


def _grid_sample_ref(img, grid):
    # bilinear, padding_mode='zeros', align_corners=True
    B, C, H, W = img.shape
    Ho, Wo = grid.shape[1], grid.shape[2]
    gx = (grid[..., 0] + 1.0) * 0.5 * (W - 1)
    gy = (grid[..., 1] + 1.0) * 0.5 * (H - 1)
    x0 = jnp.floor(gx)
    y0 = jnp.floor(gy)
    flat = img.reshape(B, C, H * W)

    def corner(yy, xx):
        valid = (xx >= 0) & (xx <= W - 1) & (yy >= 0) & (yy <= H - 1)
        xi = jnp.clip(xx, 0, W - 1).astype(jnp.int32)
        yi = jnp.clip(yy, 0, H - 1).astype(jnp.int32)
        idx = jnp.broadcast_to((yi * W + xi).reshape(B, 1, Ho * Wo), (B, C, Ho * Wo))
        vals = jnp.take_along_axis(flat, idx, axis=2).reshape(B, C, Ho, Wo)
        return jnp.where(valid[:, None, :, :], vals, 0.0)

    wx1 = gx - x0
    wy1 = gy - y0
    return (((1 - wy1) * (1 - wx1))[:, None] * corner(y0, x0)
            + ((1 - wy1) * wx1)[:, None] * corner(y0, x0 + 1)
            + (wy1 * (1 - wx1))[:, None] * corner(y0 + 1, x0)
            + (wy1 * wx1)[:, None] * corner(y0 + 1, x0 + 1))


def _reference(feat, depth, params):
    x = _conv_nchw(jnp.concatenate([feat, depth], axis=1),
                   params["w1"], params["b1"], pad=1)
    x = jnp.maximum(_bn(x, *params["bn1"]), 0.0)
    x = _conv_nchw(x, params["w2"], params["b2"], pad=1)
    x = jnp.maximum(_bn(x, *params["bn2"]), 0.0)
    scale = 2.0 * jax.nn.sigmoid(_bn(_conv_nchw(x, params["w3"], params["b3"]),
                                     *params["bn3"]))
    B, _, h, w = x.shape
    lin_h = jnp.linspace(-1.0, 1.0, h)
    lin_w = jnp.linspace(-1.0, 1.0, w)
    gh = jnp.broadcast_to(lin_h[:, None], (h, w))
    gw = jnp.broadcast_to(lin_w[None, :], (h, w))
    grid = jnp.broadcast_to(jnp.stack([gw, gh], axis=-1)[None], (B, h, w, 2))
    scale_t = jnp.transpose(scale, (0, 2, 3, 1))
    step_x = 2.0 / (h - 1)
    step_y = 2.0 / (w - 1)
    rows = []
    for cy in (-1.0, 0.0, 1.0):
        cols = []
        for cx in (-1.0, 0.0, 1.0):
            off = jnp.concatenate([cx * step_y * scale_t, cy * step_x * scale_t], axis=3)
            cols.append(grid + off)
        rows.append(jnp.stack(cols, axis=3))                    # (B, h, w, 3, 2)
    grid_enlarge = jnp.stack(rows, axis=2).reshape(B, 3 * h, 3 * w, 2)
    feat_enlarge = _grid_sample_ref(feat, grid_enlarge)
    y = _conv_nchw(feat_enlarge, params["we"], params["be"], stride=6, pad=0)
    return jnp.maximum(_bn(y, *params["bne"]), 0.0)


if __name__ == "__main__":
    B, Cin, H, W = 2, 16, 16, 16          # input_dim=16 (module default)
    Co = 32                                # output_dim=32
    key = jax.random.PRNGKey(0)
    ks = list(jax.random.split(key, 10))

    def conv_p(k, co, ci, kh, kw, s=0.1):
        kw_, kb_ = jax.random.split(k)
        return (s * jax.random.normal(kw_, (co, ci, kh, kw), jnp.float32),
                s * jax.random.normal(kb_, (co,), jnp.float32))

    def bn_p(k, c):
        k1, k2, k3, k4 = jax.random.split(k, 4)
        return (1.0 + 0.1 * jax.random.normal(k1, (c,), jnp.float32),
                0.1 * jax.random.normal(k2, (c,), jnp.float32),
                0.1 * jax.random.normal(k3, (c,), jnp.float32),
                0.5 + jnp.abs(jax.random.normal(k4, (c,), jnp.float32)))

    feat = jax.random.normal(ks[0], (B, Cin, H, W), jnp.float32)
    depth = jax.random.normal(ks[1], (B, 1, H, W), jnp.float32)
    w1, b1 = conv_p(ks[2], Cin, Cin + 1, 3, 3)
    w2, b2 = conv_p(ks[3], Cin, Cin, 3, 3)
    w3, b3 = conv_p(ks[4], 1, Cin, 1, 1)
    we, be = conv_p(ks[5], Co, Cin, 6, 6, s=0.05)
    params = dict(w1=w1, b1=b1, bn1=bn_p(ks[6], Cin),
                  w2=w2, b2=b2, bn2=bn_p(ks[7], Cin),
                  w3=w3, b3=b3, bn3=bn_p(ks[8], 1),
                  we=we, be=be, bne=bn_p(ks[9], Co))

    out = jax.jit(feat_scale_net)(feat, depth, params)
    jax.block_until_ready(out)

    ref = _reference(feat, depth, params)
    assert out.shape == (B, Co, H // 2, W // 2), out.shape
    err = float(jnp.max(jnp.abs(out - ref)))
    assert jnp.allclose(out, ref, atol=2e-3, rtol=2e-3), f"max abs err {err}"

    print("KERNEL_OK")
</pallas_src>

<mosaic_0001>
module attributes {stable_mosaic.version = 11 : i64} {
  func.func @scale_head_kernel(%arg0: i32, %arg1: memref<1x17x326xf32, #tpu.memory_space<vmem>>, %arg2: memref<1x288xf32, #tpu.memory_space<vmem>>, %arg3: memref<9x16x17xf32, #tpu.memory_space<vmem>>, %arg4: memref<16x1xf32, #tpu.memory_space<vmem>>, %arg5: memref<9x16x16xf32, #tpu.memory_space<vmem>>, %arg6: memref<16x1xf32, #tpu.memory_space<vmem>>, %arg7: memref<16x1xf32, #tpu.memory_space<vmem>>, %arg8: memref<1x1xf32, #tpu.memory_space<vmem>>, %arg9: memref<1x1x288xf32, #tpu.memory_space<vmem>>, %arg10: memref<16x326xf32, #tpu.memory_space<vmem>>) attributes {dimension_semantics = [#tpu.dimension_semantics<parallel>], iteration_bounds = array<i64: 2>, scalar_prefetch = 0 : i64, scratch_operands = 1 : i64, tpu.core_type = #tpu.core_type<tc>, window_params = [{transform_indices = @transform_0, window_bounds = array<i64: 1, 17, 326>}, {pipeline_mode = #tpu.pipeline_mode<synchronous>, transform_indices = @transform_1, window_bounds = array<i64: 1, 288>}, {pipeline_mode = #tpu.pipeline_mode<synchronous>, transform_indices = @transform_2, window_bounds = array<i64: 9, 16, 17>}, {pipeline_mode = #tpu.pipeline_mode<synchronous>, transform_indices = @transform_3, window_bounds = array<i64: 16, 1>}, {pipeline_mode = #tpu.pipeline_mode<synchronous>, transform_indices = @transform_4, window_bounds = array<i64: 9, 16, 16>}, {pipeline_mode = #tpu.pipeline_mode<synchronous>, transform_indices = @transform_5, window_bounds = array<i64: 16, 1>}, {pipeline_mode = #tpu.pipeline_mode<synchronous>, transform_indices = @transform_6, window_bounds = array<i64: 16, 1>}, {pipeline_mode = #tpu.pipeline_mode<synchronous>, transform_indices = @transform_7, window_bounds = array<i64: 1, 1>}, {transform_indices = @transform_8, window_bounds = array<i64: 1, 1, 288>}]} {
    %c0 = arith.constant 0 : index
    %c0_0 = arith.constant 0 : index
    %c0_1 = arith.constant 0 : index
    %0 = vector.load %arg3[%c0, %c0_0, %c0_1] : memref<9x16x17xf32, #tpu.memory_space<vmem>>, vector<1x16x17xf32>
    %1 = vector.shape_cast %0 : vector<1x16x17xf32> to vector<16x17xf32>
    %c0_2 = arith.constant 0 : index
    %c0_3 = arith.constant 0 : index
    %c0_4 = arith.constant 0 : index
    %2 = vector.load %arg1[%c0_2, %c0_3, %c0_4] : memref<1x17x326xf32, #tpu.memory_space<vmem>>, vector<1x17x288xf32>
    %3 = vector.shape_cast %2 : vector<1x17x288xf32> to vector<17x288xf32>
    %cst = arith.constant dense<0.000000e+00> : vector<16x288xf32>
    %4 = tpu.matmul %1, %3, %cst {dimension_numbers = #tpu.dot_dimension_numbers<[1], [0], [0], [1], [0, 0, 1, 1], [], []>} : vector<16x17xf32>, vector<17x288xf32>, vector<16x288xf32> -> vector<16x288xf32>
    %c1 = arith.constant 1 : index
    %c0_5 = arith.constant 0 : index
    %c0_6 = arith.constant 0 : index
    %5 = vector.load %arg3[%c1, %c0_5, %c0_6] : memref<9x16x17xf32, #tpu.memory_space<vmem>>, vector<1x16x17xf32>
    %6 = vector.shape_cast %5 : vector<1x16x17xf32> to vector<16x17xf32>
    %c0_7 = arith.constant 0 : index
    %c0_8 = arith.constant 0 : index
    %c1_9 = arith.constant 1 : index
    %7 = vector.load %arg1[%c0_7, %c0_8, %c1_9] : memref<1x17x326xf32, #tpu.memory_space<vmem>>, vector<1x17x288xf32>
    %8 = vector.shape_cast %7 : vector<1x17x288xf32> to vector<17x288xf32>
    %cst_10 = arith.constant dense<0.000000e+00> : vector<16x288xf32>
    %9 = tpu.matmul %6, %8, %cst_10 {dimension_numbers = #tpu.dot_dimension_numbers<[1], [0], [0], [1], [0, 0, 1, 1], [], []>} : vector<16x17xf32>, vector<17x288xf32>, vector<16x288xf32> -> vector<16x288xf32>
    %10 = arith.addf %4, %9 : vector<16x288xf32>
    %c2 = arith.constant 2 : index
    %c0_11 = arith.constant 0 : index
    %c0_12 = arith.constant 0 : index
    %11 = vector.load %arg3[%c2, %c0_11, %c0_12] : memref<9x16x17xf32, #tpu.memory_space<vmem>>, vector<1x16x17xf32>
    %12 = vector.shape_cast %11 : vector<1x16x17xf32> to vector<16x17xf32>
    %c0_13 = arith.constant 0 : index
    %c0_14 = arith.constant 0 : index
    %c2_15 = arith.constant 2 : index
    %13 = vector.load %arg1[%c0_13, %c0_14, %c2_15] : memref<1x17x326xf32, #tpu.memory_space<vmem>>, vector<1x17x288xf32>
    %14 = vector.shape_cast %13 : vector<1x17x288xf32> to vector<17x288xf32>
    %cst_16 = arith.constant dense<0.000000e+00> : vector<16x288xf32>
    %15 = tpu.matmul %12, %14, %cst_16 {dimension_numbers = #tpu.dot_dimension_numbers<[1], [0], [0], [1], [0, 0, 1, 1], [], []>} : vector<16x17xf32>, vector<17x288xf32>, vector<16x288xf32> -> vector<16x288xf32>
    %16 = arith.addf %10, %15 : vector<16x288xf32>
    %c3 = arith.constant 3 : index
    %c0_17 = arith.constant 0 : index
    %c0_18 = arith.constant 0 : index
    %17 = vector.load %arg3[%c3, %c0_17, %c0_18] : memref<9x16x17xf32, #tpu.memory_space<vmem>>, vector<1x16x17xf32>
    %18 = vector.shape_cast %17 : vector<1x16x17xf32> to vector<16x17xf32>
    %c0_19 = arith.constant 0 : index
    %c0_20 = arith.constant 0 : index
    %c18 = arith.constant 18 : index
    %19 = vector.load %arg1[%c0_19, %c0_20, %c18] : memref<1x17x326xf32, #tpu.memory_space<vmem>>, vector<1x17x288xf32>
    %20 = vector.shape_cast %19 : vector<1x17x288xf32> to vector<17x288xf32>
    %cst_21 = arith.constant dense<0.000000e+00> : vector<16x288xf32>
    %21 = tpu.matmul %18, %20, %cst_21 {dimension_numbers = #tpu.dot_dimension_numbers<[1], [0], [0], [1], [0, 0, 1, 1], [], []>} : vector<16x17xf32>, vector<17x288xf32>, vector<16x288xf32> -> vector<16x288xf32>
    %22 = arith.addf %16, %21 : vector<16x288xf32>
    %c4 = arith.constant 4 : index
    %c0_22 = arith.constant 0 : index
    %c0_23 = arith.constant 0 : index
    %23 = vector.load %arg3[%c4, %c0_22, %c0_23] : memref<9x16x17xf32, #tpu.memory_space<vmem>>, vector<1x16x17xf32>
    %24 = vector.shape_cast %23 : vector<1x16x17xf32> to vector<16x17xf32>
    %c0_24 = arith.constant 0 : index
    %c0_25 = arith.constant 0 : index
    %c19 = arith.constant 19 : index
    %25 = vector.load %arg1[%c0_24, %c0_25, %c19] : memref<1x17x326xf32, #tpu.memory_space<vmem>>, vector<1x17x288xf32>
    %26 = vector.shape_cast %25 : vector<1x17x288xf32> to vector<17x288xf32>
    %cst_26 = arith.constant dense<0.000000e+00> : vector<16x288xf32>
    %27 = tpu.matmul %24, %26, %cst_26 {dimension_numbers = #tpu.dot_dimension_numbers<[1], [0], [0], [1], [0, 0, 1, 1], [], []>} : vector<16x17xf32>, vector<17x288xf32>, vector<16x288xf32> -> vector<16x288xf32>
    %28 = arith.addf %22, %27 : vector<16x288xf32>
    %c5 = arith.constant 5 : index
    %c0_27 = arith.constant 0 : index
    %c0_28 = arith.constant 0 : index
    %29 = vector.load %arg3[%c5, %c0_27, %c0_28] : memref<9x16x17xf32, #tpu.memory_space<vmem>>, vector<1x16x17xf32>
    %30 = vector.shape_cast %29 : vector<1x16x17xf32> to vector<16x17xf32>
    %c0_29 = arith.constant 0 : index
    %c0_30 = arith.constant 0 : index
    %c20 = arith.constant 20 : index
    %31 = vector.load %arg1[%c0_29, %c0_30, %c20] : memref<1x17x326xf32, #tpu.memory_space<vmem>>, vector<1x17x288xf32>
    %32 = vector.shape_cast %31 : vector<1x17x288xf32> to vector<17x288xf32>
    %cst_31 = arith.constant dense<0.000000e+00> : vector<16x288xf32>
    %33 = tpu.matmul %30, %32, %cst_31 {dimension_numbers = #tpu.dot_dimension_numbers<[1], [0], [0], [1], [0, 0, 1, 1], [], []>} : vector<16x17xf32>, vector<17x288xf32>, vector<16x288xf32> -> vector<16x288xf32>
    %34 = arith.addf %28, %33 : vector<16x288xf32>
    %c6 = arith.constant 6 : index
    %c0_32 = arith.constant 0 : index
    %c0_33 = arith.constant 0 : index
    %35 = vector.load %arg3[%c6, %c0_32, %c0_33] : memref<9x16x17xf32, #tpu.memory_space<vmem>>, vector<1x16x17xf32>
    %36 = vector.shape_cast %35 : vector<1x16x17xf32> to vector<16x17xf32>
    %c0_34 = arith.constant 0 : index
    %c0_35 = arith.constant 0 : index
    %c36 = arith.constant 36 : index
    %37 = vector.load %arg1[%c0_34, %c0_35, %c36] : memref<1x17x326xf32, #tpu.memory_space<vmem>>, vector<1x17x288xf32>
    %38 = vector.shape_cast %37 : vector<1x17x288xf32> to vector<17x288xf32>
    %cst_36 = arith.constant dense<0.000000e+00> : vector<16x288xf32>
    %39 = tpu.matmul %36, %38, %cst_36 {dimension_numbers = #tpu.dot_dimension_numbers<[1], [0], [0], [1], [0, 0, 1, 1], [], []>} : vector<16x17xf32>, vector<17x288xf32>, vector<16x288xf32> -> vector<16x288xf32>
    %40 = arith.addf %34, %39 : vector<16x288xf32>
    %c7 = arith.constant 7 : index
    %c0_37 = arith.constant 0 : index
    %c0_38 = arith.constant 0 : index
    %41 = vector.load %arg3[%c7, %c0_37, %c0_38] : memref<9x16x17xf32, #tpu.memory_space<vmem>>, vector<1x16x17xf32>
    %42 = vector.shape_cast %41 : vector<1x16x17xf32> to vector<16x17xf32>
    %c0_39 = arith.constant 0 : index
    %c0_40 = arith.constant 0 : index
    %c37 = arith.constant 37 : index
    %43 = vector.load %arg1[%c0_39, %c0_40, %c37] : memref<1x17x326xf32, #tpu.memory_space<vmem>>, vector<1x17x288xf32>
    %44 = vector.shape_cast %43 : vector<1x17x288xf32> to vector<17x288xf32>
    %cst_41 = arith.constant dense<0.000000e+00> : vector<16x288xf32>
    %45 = tpu.matmul %42, %44, %cst_41 {dimension_numbers = #tpu.dot_dimension_numbers<[1], [0], [0], [1], [0, 0, 1, 1], [], []>} : vector<16x17xf32>, vector<17x288xf32>, vector<16x288xf32> -> vector<16x288xf32>
    %46 = arith.addf %40, %45 : vector<16x288xf32>
    %c8 = arith.constant 8 : index
    %c0_42 = arith.constant 0 : index
    %c0_43 = arith.constant 0 : index
    %47 = vector.load %arg3[%c8, %c0_42, %c0_43] : memref<9x16x17xf32, #tpu.memory_space<vmem>>, vector<1x16x17xf32>
    %48 = vector.shape_cast %47 : vector<1x16x17xf32> to vector<16x17xf32>
    %c0_44 = arith.constant 0 : index
    %c0_45 = arith.constant 0 : index
    %c38 = arith.constant 38 : index
    %49 = vector.load %arg1[%c0_44, %c0_45, %c38] : memref<1x17x326xf32, #tpu.memory_space<vmem>>, vector<1x17x288xf32>
    %50 = vector.shape_cast %49 : vector<1x17x288xf32> to vector<17x288xf32>
    %cst_46 = arith.constant dense<0.000000e+00> : vector<16x288xf32>
    %51 = tpu.matmul %48, %50, %cst_46 {dimension_numbers = #tpu.dot_dimension_numbers<[1], [0], [0], [1], [0, 0, 1, 1], [], []>} : vector<16x17xf32>, vector<17x288xf32>, vector<16x288xf32> -> vector<16x288xf32>
    %52 = arith.addf %46, %51 : vector<16x288xf32>
    %c0_47 = arith.constant 0 : index
    %c0_48 = arith.constant 0 : index
    %53 = vector.load %arg4[%c0_47, %c0_48] : memref<16x1xf32, #tpu.memory_space<vmem>>, vector<16x1xf32>
    %54 = vector.broadcast %53 : vector<16x1xf32> to vector<16x288xf32>
    %55 = arith.addf %52, %54 : vector<16x288xf32>
    %cst_49 = arith.constant 0.000000e+00 : f32
    %56 = vector.broadcast %cst_49 : f32 to vector<16x288xf32>
    %57 = arith.maximumf %55, %56 : vector<16x288xf32>
    %c0_50 = arith.constant 0 : index
    %c0_51 = arith.constant 0 : index
    %58 = vector.load %arg2[%c0_50, %c0_51] : memref<1x288xf32, #tpu.memory_space<vmem>>, vector<1x288xf32>
    %59 = vector.broadcast %58 : vector<1x288xf32> to vector<16x288xf32>
    %60 = arith.mulf %57, %59 : vector<16x288xf32>
    %cst_52 = arith.constant 0.000000e+00 : f32
    %61 = vector.broadcast %cst_52 : f32 to vector<16x19xf32>
    %c0_53 = arith.constant 0 : index
    %c0_54 = arith.constant 0 : index
    %62 = vector.load %arg10[%c0_53, %c0_54] : memref<16x326xf32, #tpu.memory_space<vmem>>, vector<16x19xf32>
    tpu.vector_store %arg10[%c0_53, %c0_54], %61 {strides = array<i32>} : memref<16x326xf32, #tpu.memory_space<vmem>>, vector<16x19xf32>,
    %cst_55 = arith.constant 0.000000e+00 : f32
    %63 = vector.broadcast %cst_55 : f32 to vector<16x19xf32>
    %c0_56 = arith.constant 0 : index
    %c307 = arith.constant 307 : index
    %64 = vector.load %arg10[%c0_56, %c307] : memref<16x326xf32, #tpu.memory_space<vmem>>, vector<16x19xf32>
    tpu.vector_store %arg10[%c0_56, %c307], %63 {strides = array<i32>} : memref<16x326xf32, #tpu.memory_space<vmem>>, vector<16x19xf32>,
    %c0_57 = arith.constant 0 : index
    %c19_58 = arith.constant 19 : index
    %65 = vector.load %arg10[%c0_57, %c19_58] : memref<16x326xf32, #tpu.memory_space<vmem>>, vector<16x288xf32>
    tpu.vector_store %arg10[%c0_57, %c19_58], %60 {strides = array<i32>} : memref<16x326xf32, #tpu.memory_space<vmem>>, vector<16x288xf32>,
    %c0_59 = arith.constant 0 : index
    %c0_60 = arith.constant 0 : index
    %c0_61 = arith.constant 0 : index
    %66 = vector.load %arg5[%c0_59, %c0_60, %c0_61] : memref<9x16x16xf32, #tpu.memory_space<vmem>>, vector<1x16x16xf32>
    %67 = vector.shape_cast %66 : vector<1x16x16xf32> to vector<16x16xf32>
    %c0_62 = arith.constant 0 : index
    %c0_63 = arith.constant 0 : index
    %68 = vector.load %arg10[%c0_62, %c0_63] : memref<16x326xf32, #tpu.memory_space<vmem>>, vector<16x288xf32>
    %cst_64 = arith.constant dense<0.000000e+00> : vector<16x288xf32>
    %69 = tpu.matmul %67, %68, %cst_64 {dimension_numbers = #tpu.dot_dimension_numbers<[1], [0], [0], [1], [0, 0, 1, 1], [], []>} : vector<16x16xf32>, vector<16x288xf32>, vector<16x288xf32> -> vector<16x288xf32>
    %c1_65 = arith.constant 1 : index
    %c0_66 = arith.constant 0 : index
    %c0_67 = arith.constant 0 : index
    %70 = vector.load %arg5[%c1_65, %c0_66, %c0_67] : memref<9x16x16xf32, #tpu.memory_space<vmem>>, vector<1x16x16xf32>
    %71 = vector.shape_cast %70 : vector<1x16x16xf32> to vector<16x16xf32>
    %c0_68 = arith.constant 0 : index
    %c1_69 = arith.constant 1 : index
    %72 = vector.load %arg10[%c0_68, %c1_69] : memref<16x326xf32, #tpu.memory_space<vmem>>, vector<16x288xf32>
    %cst_70 = arith.constant dense<0.000000e+00> : vector<16x288xf32>
    %73 = tpu.matmul %71, %72, %cst_70 {dimension_numbers = #tpu.dot_dimension_numbers<[1], [0], [0], [1], [0, 0, 1, 1], [], []>} : vector<16x16xf32>, vector<16x288xf32>, vector<16x288xf32> -> vector<16x288xf32>
    %74 = arith.addf %69, %73 : vector<16x288xf32>
    %c2_71 = arith.constant 2 : index
    %c0_72 = arith.constant 0 : index
    %c0_73 = arith.constant 0 : index
    %75 = vector.load %arg5[%c2_71, %c0_72, %c0_73] : memref<9x16x16xf32, #tpu.memory_space<vmem>>, vector<1x16x16xf32>
    %76 = vector.shape_cast %75 : vector<1x16x16xf32> to vector<16x16xf32>
    %c0_74 = arith.constant 0 : index
    %c2_75 = arith.constant 2 : index
    %77 = vector.load %arg10[%c0_74, %c2_75] : memref<16x326xf32, #tpu.memory_space<vmem>>, vector<16x288xf32>
    %cst_76 = arith.constant dense<0.000000e+00> : vector<16x288xf32>
    %78 = tpu.matmul %76, %77, %cst_76 {dimension_numbers = #tpu.dot_dimension_numbers<[1], [0], [0], [1], [0, 0, 1, 1], [], []>} : vector<16x16xf32>, vector<16x288xf32>, vector<16x288xf32> -> vector<16x288xf32>
    %79 = arith.addf %74, %78 : vector<16x288xf32>
    %c3_77 = arith.constant 3 : index
    %c0_78 = arith.constant 0 : index
    %c0_79 = arith.constant 0 : index
    %80 = vector.load %arg5[%c3_77, %c0_78, %c0_79] : memref<9x16x16xf32, #tpu.memory_space<vmem>>, vector<1x16x16xf32>
    %81 = vector.shape_cast %80 : vector<1x16x16xf32> to vector<16x16xf32>
    %c0_80 = arith.constant 0 : index
    %c18_81 = arith.constant 18 : index
    %82 = vector.load %arg10[%c0_80, %c18_81] : memref<16x326xf32, #tpu.memory_space<vmem>>, vector<16x288xf32>
    %cst_82 = arith.constant dense<0.000000e+00> : vector<16x288xf32>
    %83 = tpu.matmul %81, %82, %cst_82 {dimension_numbers = #tpu.dot_dimension_numbers<[1], [0], [0], [1], [0, 0, 1, 1], [], []>} : vector<16x16xf32>, vector<16x288xf32>, vector<16x288xf32> -> vector<16x288xf32>
    %84 = arith.addf %79, %83 : vector<16x288xf32>
    %c4_83 = arith.constant 4 : index
    %c0_84 = arith.constant 0 : index
    %c0_85 = arith.constant 0 : index
    %85 = vector.load %arg5[%c4_83, %c0_84, %c0_85] : memref<9x16x16xf32, #tpu.memory_space<vmem>>, vector<1x16x16xf32>
    %86 = vector.shape_cast %85 : vector<1x16x16xf32> to vector<16x16xf32>
    %c0_86 = arith.constant 0 : index
    %c19_87 = arith.constant 19 : index
    %87 = vector.load %arg10[%c0_86, %c19_87] : memref<16x326xf32, #tpu.memory_space<vmem>>, vector<16x288xf32>
    %cst_88 = arith.constant dense<0.000000e+00> : vector<16x288xf32>
    %88 = tpu.matmul %86, %87, %cst_88 {dimension_numbers = #tpu.dot_dimension_numbers<[1], [0], [0], [1], [0, 0, 1, 1], [], []>} : vector<16x16xf32>, vector<16x288xf32>, vector<16x288xf32> -> vector<16x288xf32>
    %89 = arith.addf %84, %88 : vector<16x288xf32>
    %c5_89 = arith.constant 5 : index
    %c0_90 = arith.constant 0 : index
    %c0_91 = arith.constant 0 : index
    %90 = vector.load %arg5[%c5_89, %c0_90, %c0_91] : memref<9x16x16xf32, #tpu.memory_space<vmem>>, vector<1x16x16xf32>
    %91 = vector.shape_cast %90 : vector<1x16x16xf32> to vector<16x16xf32>
    %c0_92 = arith.constant 0 : index
    %c20_93 = arith.constant 20 : index
    %92 = vector.load %arg10[%c0_92, %c20_93] : memref<16x326xf32, #tpu.memory_space<vmem>>, vector<16x288xf32>
    %cst_94 = arith.constant dense<0.000000e+00> : vector<16x288xf32>
    %93 = tpu.matmul %91, %92, %cst_94 {dimension_numbers = #tpu.dot_dimension_numbers<[1], [0], [0], [1], [0, 0, 1, 1], [], []>} : vector<16x16xf32>, vector<16x288xf32>, vector<16x288xf32> -> vector<16x288xf32>
    %94 = arith.addf %89, %93 : vector<16x288xf32>
    %c6_95 = arith.constant 6 : index
    %c0_96 = arith.constant 0 : index
    %c0_97 = arith.constant 0 : index
    %95 = vector.load %arg5[%c6_95, %c0_96, %c0_97] : memref<9x16x16xf32, #tpu.memory_space<vmem>>, vector<1x16x16xf32>
    %96 = vector.shape_cast %95 : vector<1x16x16xf32> to vector<16x16xf32>
    %c0_98 = arith.constant 0 : index
    %c36_99 = arith.constant 36 : index
    %97 = vector.load %arg10[%c0_98, %c36_99] : memref<16x326xf32, #tpu.memory_space<vmem>>, vector<16x288xf32>
    %cst_100 = arith.constant dense<0.000000e+00> : vector<16x288xf32>
    %98 = tpu.matmul %96, %97, %cst_100 {dimension_numbers = #tpu.dot_dimension_numbers<[1], [0], [0], [1], [0, 0, 1, 1], [], []>} : vector<16x16xf32>, vector<16x288xf32>, vector<16x288xf32> -> vector<16x288xf32>
    %99 = arith.addf %94, %98 : vector<16x288xf32>
    %c7_101 = arith.constant 7 : index
    %c0_102 = arith.constant 0 : index
    %c0_103 = arith.constant 0 : index
    %100 = vector.load %arg5[%c7_101, %c0_102, %c0_103] : memref<9x16x16xf32, #tpu.memory_space<vmem>>, vector<1x16x16xf32>
    %101 = vector.shape_cast %100 : vector<1x16x16xf32> to vector<16x16xf32>
    %c0_104 = arith.constant 0 : index
    %c37_105 = arith.constant 37 : index
    %102 = vector.load %arg10[%c0_104, %c37_105] : memref<16x326xf32, #tpu.memory_space<vmem>>, vector<16x288xf32>
    %cst_106 = arith.constant dense<0.000000e+00> : vector<16x288xf32>
    %103 = tpu.matmul %101, %102, %cst_106 {dimension_numbers = #tpu.dot_dimension_numbers<[1], [0], [0], [1], [0, 0, 1, 1], [], []>} : vector<16x16xf32>, vector<16x288xf32>, vector<16x288xf32> -> vector<16x288xf32>
    %104 = arith.addf %99, %103 : vector<16x288xf32>
    %c8_107 = arith.constant 8 : index
    %c0_108 = arith.constant 0 : index
    %c0_109 = arith.constant 0 : index
    %105 = vector.load %arg5[%c8_107, %c0_108, %c0_109] : memref<9x16x16xf32, #tpu.memory_space<vmem>>, vector<1x16x16xf32>
    %106 = vector.shape_cast %105 : vector<1x16x16xf32> to vector<16x16xf32>
    %c0_110 = arith.constant 0 : index
    %c38_111 = arith.constant 38 : index
    %107 = vector.load %arg10[%c0_110, %c38_111] : memref<16x326xf32, #tpu.memory_space<vmem>>, vector<16x288xf32>
    %cst_112 = arith.constant dense<0.000000e+00> : vector<16x288xf32>
    %108 = tpu.matmul %106, %107, %cst_112 {dimension_numbers = #tpu.dot_dimension_numbers<[1], [0], [0], [1], [0, 0, 1, 1], [], []>} : vector<16x16xf32>, vector<16x288xf32>, vector<16x288xf32> -> vector<16x288xf32>
    %109 = arith.addf %104, %108 : vector<16x288xf32>
    %c0_113 = arith.constant 0 : index
    %c0_114 = arith.constant 0 : index
    %110 = vector.load %arg6[%c0_113, %c0_114] : memref<16x1xf32, #tpu.memory_space<vmem>>, vector<16x1xf32>
    %111 = vector.broadcast %110 : vector<16x1xf32> to vector<16x288xf32>
    %112 = arith.addf %109, %111 : vector<16x288xf32>
    %cst_115 = arith.constant 0.000000e+00 : f32
    %113 = vector.broadcast %cst_115 : f32 to vector<16x288xf32>
    %114 = arith.maximumf %112, %113 : vector<16x288xf32>
    %c0_116 = arith.constant 0 : index
    %c0_117 = arith.constant 0 : index
    %115 = vector.load %arg7[%c0_116, %c0_117] : memref<16x1xf32, #tpu.memory_space<vmem>>, vector<16x1xf32>
    %116 = vector.broadcast %115 : vector<16x1xf32> to vector<16x288xf32>
    %117 = arith.mulf %114, %116 : vector<16x288xf32>
    %cst_118 = arith.constant dense<0.000000e+00> : vector<288xf32>
    %118 = vector.multi_reduction <add>, %117, %cst_118 [0] : vector<16x288xf32> to vector<288xf32>
    %119 = vector.shape_cast %118 : vector<288xf32> to vector<1x288xf32>
    %c0_119 = arith.constant 0 : index
    %c0_120 = arith.constant 0 : index
    %120 = vector.load %arg8[%c0_119, %c0_120] : memref<1x1xf32, #tpu.memory_space<vmem>>, vector<1x1xf32>
    %121 = vector.broadcast %120 : vector<1x1xf32> to vector<1x288xf32>
    %122 = arith.addf %119, %121 : vector<1x288xf32>
    %cst_121 = arith.constant 0.000000e+00 : f32
    %123 = vector.broadcast %cst_121 : f32 to vector<1x288xf32>
    %124 = arith.subf %123, %122 : vector<1x288xf32>
    %125 = math.exp %124 : vector<1x288xf32>
    %cst_122 = arith.constant 1.000000e+00 : f32
    %126 = vector.broadcast %cst_122 : f32 to vector<1x288xf32>
    %127 = arith.addf %126, %125 : vector<1x288xf32>
    %cst_123 = arith.constant 2.000000e+00 : f32
    %128 = vector.broadcast %cst_123 : f32 to vector<1x288xf32>
    %129 = arith.divf %128, %127 : vector<1x288xf32>
    %c0_124 = arith.constant 0 : index
    %c0_125 = arith.constant 0 : index
    %c0_126 = arith.constant 0 : index
    %130 = vector.load %arg9[%c0_124, %c0_125, %c0_126] : memref<1x1x288xf32, #tpu.memory_space<vmem>>, vector<1x1x288xf32>
    %131 = vector.shape_cast %130 : vector<1x1x288xf32> to vector<1x288xf32>
    %132 = vector.shape_cast %129 : vector<1x288xf32> to vector<1x1x288xf32>
    tpu.vector_store %arg9[%c0_124, %c0_125, %c0_126], %132 {strides = array<i32>} : memref<1x1x288xf32, #tpu.memory_space<vmem>>, vector<1x1x288xf32>,
    return
  }
  func.func @transform_0(%arg0: i32) -> (i32, i32, i32) {
    %c0_i32 = arith.constant 0 : i32
    %c0_i32_0 = arith.constant 0 : i32
    %c0_i32_1 = arith.constant 0 : i32
    return %arg0, %c0_i32, %c0_i32_0 : i32, i32, i32
  }
  func.func @transform_1(%arg0: i32) -> (i32, i32) {
    %c0_i32 = arith.constant 0 : i32
    %c0_i32_0 = arith.constant 0 : i32
    %c0_i32_1 = arith.constant 0 : i32
    return %c0_i32, %c0_i32_0 : i32, i32
  }
  func.func @transform_2(%arg0: i32) -> (i32, i32, i32) {
    %c0_i32 = arith.constant 0 : i32
    %c0_i32_0 = arith.constant 0 : i32
    %c0_i32_1 = arith.constant 0 : i32
    %c0_i32_2 = arith.constant 0 : i32
    return %c0_i32, %c0_i32_0, %c0_i32_1 : i32, i32, i32
  }
  func.func @transform_3(%arg0: i32) -> (i32, i32) {
    %c0_i32 = arith.constant 0 : i32
    %c0_i32_0 = arith.constant 0 : i32
    %c0_i32_1 = arith.constant 0 : i32
    return %c0_i32, %c0_i32_0 : i32, i32
  }
  func.func @transform_4(%arg0: i32) -> (i32, i32, i32) {
    %c0_i32 = arith.constant 0 : i32
    %c0_i32_0 = arith.constant 0 : i32
    %c0_i32_1 = arith.constant 0 : i32
    %c0_i32_2 = arith.constant 0 : i32
    return %c0_i32, %c0_i32_0, %c0_i32_1 : i32, i32, i32
  }
  func.func @transform_5(%arg0: i32) -> (i32, i32) {
    %c0_i32 = arith.constant 0 : i32
    %c0_i32_0 = arith.constant 0 : i32
    %c0_i32_1 = arith.constant 0 : i32
    return %c0_i32, %c0_i32_0 : i32, i32
  }
  func.func @transform_6(%arg0: i32) -> (i32, i32) {
    %c0_i32 = arith.constant 0 : i32
    %c0_i32_0 = arith.constant 0 : i32
    %c0_i32_1 = arith.constant 0 : i32
    return %c0_i32, %c0_i32_0 : i32, i32
  }
  func.func @transform_7(%arg0: i32) -> (i32, i32) {
    %c0_i32 = arith.constant 0 : i32
    %c0_i32_0 = arith.constant 0 : i32
    %c0_i32_1 = arith.constant 0 : i32
    return %c0_i32, %c0_i32_0 : i32, i32
  }
  func.func @transform_8(%arg0: i32) -> (i32, i32, i32) {
    %c0_i32 = arith.constant 0 : i32
    %c0_i32_0 = arith.constant 0 : i32
    %c0_i32_1 = arith.constant 0 : i32
    return %arg0, %c0_i32, %c0_i32_0 : i32, i32, i32
  }
}

module attributes {stable_mosaic.version = 11 : i64} {
  func.func @sample_embed_kernel(%arg0: i32, %arg1: memref<1x4x16x102xf32, #tpu.memory_space<vmem>>, %arg2: memref<1x4x80xf32, #tpu.memory_space<vmem>>, %arg3: memref<4x32x144xf32, #tpu.memory_space<vmem>>, %arg4: memref<32x1xf32, #tpu.memory_space<vmem>>, %arg5: memref<1x32x80xf32, #tpu.memory_space<vmem>>, %arg6: memref<144x80xf32, #tpu.memory_space<vmem>>) attributes {dimension_semantics = [#tpu.dimension_semantics<parallel>], iteration_bounds = array<i64: 2>, scalar_prefetch = 0 : i64, scratch_operands = 1 : i64, tpu.core_type = #tpu.core_type<tc>, window_params = [{transform_indices = @transform_0, window_bounds = array<i64: 1, 4, 16, 102>}, {transform_indices = @transform_1, window_bounds = array<i64: 1, 4, 80>}, {pipeline_mode = #tpu.pipeline_mode<synchronous>, transform_indices = @transform_2, window_bounds = array<i64: 4, 32, 144>}, {pipeline_mode = #tpu.pipeline_mode<synchronous>, transform_indices = @transform_3, window_bounds = array<i64: 32, 1>}, {transform_indices = @transform_4, window_bounds = array<i64: 1, 32, 80>}]} {
    %c0 = arith.constant 0 : index
    %c0_0 = arith.constant 0 : index
    %c0_1 = arith.constant 0 : index
    %0 = vector.load %arg2[%c0, %c0_0, %c0_1] : memref<1x4x80xf32, #tpu.memory_space<vmem>>, vector<1x1x80xf32>
    %1 = vector.shape_cast %0 : vector<1x1x80xf32> to vector<1x80xf32>
    %2 = math.absf %1 : vector<1x80xf32>
    %cst = arith.constant 1.000000e+00 : f32
    %3 = vector.broadcast %cst : f32 to vector<1x80xf32>
    %4 = arith.subf %3, %2 : vector<1x80xf32>
    %cst_2 = arith.constant 0.000000e+00 : f32
    %5 = vector.broadcast %cst_2 : f32 to vector<1x80xf32>
    %6 = arith.maximumf %4, %5 : vector<1x80xf32>
    %cst_3 = arith.constant 1.000000e+00 : f32
    %7 = vector.broadcast %cst_3 : f32 to vector<1x80xf32>
    %8 = arith.subf %1, %7 : vector<1x80xf32>
    %9 = math.absf %8 : vector<1x80xf32>
    %cst_4 = arith.constant 1.000000e+00 : f32
    %10 = vector.broadcast %cst_4 : f32 to vector<1x80xf32>
    %11 = arith.subf %10, %9 : vector<1x80xf32>
    %cst_5 = arith.constant 0.000000e+00 : f32
    %12 = vector.broadcast %cst_5 : f32 to vector<1x80xf32>
    %13 = arith.maximumf %11, %12 : vector<1x80xf32>
    %cst_6 = arith.constant 2.000000e+00 : f32
    %14 = vector.broadcast %cst_6 : f32 to vector<1x80xf32>
    %15 = arith.subf %1, %14 : vector<1x80xf32>
    %16 = math.absf %15 : vector<1x80xf32>
    %cst_7 = arith.constant 1.000000e+00 : f32
    %17 = vector.broadcast %cst_7 : f32 to vector<1x80xf32>
    %18 = arith.subf %17, %16 : vector<1x80xf32>
    %cst_8 = arith.constant 0.000000e+00 : f32
    %19 = vector.broadcast %cst_8 : f32 to vector<1x80xf32>
    %20 = arith.maximumf %18, %19 : vector<1x80xf32>
    %c0_9 = arith.constant 0 : index
    %c0_10 = arith.constant 0 : index
    %c0_11 = arith.constant 0 : index
    %c0_12 = arith.constant 0 : index
    %21 = vector.load %arg1[%c0_9, %c0_10, %c0_11, %c0_12] : memref<1x4x16x102xf32, #tpu.memory_space<vmem>>, vector<1x1x16x80xf32>
    %22 = vector.shape_cast %21 : vector<1x1x16x80xf32> to vector<16x80xf32>
    %c0_13 = arith.constant 0 : index
    %c1 = arith.constant 1 : index
    %c0_14 = arith.constant 0 : index
    %c0_15 = arith.constant 0 : index
    %23 = vector.load %arg1[%c0_13, %c1, %c0_14, %c0_15] : memref<1x4x16x102xf32, #tpu.memory_space<vmem>>, vector<1x1x16x80xf32>
    %24 = vector.shape_cast %23 : vector<1x1x16x80xf32> to vector<16x80xf32>
    %c0_16 = arith.constant 0 : index
    %c0_17 = arith.constant 0 : index
    %c0_18 = arith.constant 0 : index
    %c1_19 = arith.constant 1 : index
    %25 = vector.load %arg1[%c0_16, %c0_17, %c0_18, %c1_19] : memref<1x4x16x102xf32, #tpu.memory_space<vmem>>, vector<1x1x16x80xf32>
    %26 = vector.shape_cast %25 : vector<1x1x16x80xf32> to vector<16x80xf32>
    %c0_20 = arith.constant 0 : index
    %c1_21 = arith.constant 1 : index
    %c0_22 = arith.constant 0 : index
    %c1_23 = arith.constant 1 : index
    %27 = vector.load %arg1[%c0_20, %c1_21, %c0_22, %c1_23] : memref<1x4x16x102xf32, #tpu.memory_space<vmem>>, vector<1x1x16x80xf32>
    %28 = vector.shape_cast %27 : vector<1x1x16x80xf32> to vector<16x80xf32>
    %c0_24 = arith.constant 0 : index
    %c0_25 = arith.constant 0 : index
    %c0_26 = arith.constant 0 : index
    %c2 = arith.constant 2 : index
    %29 = vector.load %arg1[%c0_24, %c0_25, %c0_26, %c2] : memref<1x4x16x102xf32, #tpu.memory_space<vmem>>, vector<1x1x16x80xf32>
    %30 = vector.shape_cast %29 : vector<1x1x16x80xf32> to vector<16x80xf32>
    %31 = vector.broadcast %20 : vector<1x80xf32> to vector<16x80xf32>
    %32 = arith.mulf %22, %31 : vector<16x80xf32>
    %33 = vector.broadcast %13 : vector<1x80xf32> to vector<16x80xf32>
    %34 = arith.mulf %24, %33 : vector<16x80xf32>
    %35 = arith.addf %32, %34 : vector<16x80xf32>
    %36 = vector.broadcast %6 : vector<1x80xf32> to vector<16x80xf32>
    %37 = arith.mulf %26, %36 : vector<16x80xf32>
    %38 = arith.addf %35, %37 : vector<16x80xf32>
    %39 = vector.broadcast %6 : vector<1x80xf32> to vector<16x80xf32>
    %40 = arith.mulf %26, %39 : vector<16x80xf32>
    %41 = vector.broadcast %13 : vector<1x80xf32> to vector<16x80xf32>
    %42 = arith.mulf %28, %41 : vector<16x80xf32>
    %43 = arith.addf %40, %42 : vector<16x80xf32>
    %44 = vector.broadcast %20 : vector<1x80xf32> to vector<16x80xf32>
    %45 = arith.mulf %30, %44 : vector<16x80xf32>
    %46 = arith.addf %43, %45 : vector<16x80xf32>
    %47 = vector.broadcast %20 : vector<1x80xf32> to vector<16x80xf32>
    %48 = arith.mulf %38, %47 : vector<16x80xf32>
    %49 = vector.broadcast %20 : vector<1x80xf32> to vector<16x80xf32>
    %50 = arith.mulf %26, %49 : vector<16x80xf32>
    %51 = vector.broadcast %20 : vector<1x80xf32> to vector<16x80xf32>
    %52 = arith.mulf %46, %51 : vector<16x80xf32>
    %c0_27 = arith.constant 0 : index
    %c2_28 = arith.constant 2 : index
    %c0_29 = arith.constant 0 : index
    %c0_30 = arith.constant 0 : index
    %53 = vector.load %arg1[%c0_27, %c2_28, %c0_29, %c0_30] : memref<1x4x16x102xf32, #tpu.memory_space<vmem>>, vector<1x1x16x80xf32>
    %54 = vector.shape_cast %53 : vector<1x1x16x80xf32> to vector<16x80xf32>
    %c0_31 = arith.constant 0 : index
    %c3 = arith.constant 3 : index
    %c0_32 = arith.constant 0 : index
    %c0_33 = arith.constant 0 : index
    %55 = vector.load %arg1[%c0_31, %c3, %c0_32, %c0_33] : memref<1x4x16x102xf32, #tpu.memory_space<vmem>>, vector<1x1x16x80xf32>
    %56 = vector.shape_cast %55 : vector<1x1x16x80xf32> to vector<16x80xf32>
    %c0_34 = arith.constant 0 : index
    %c2_35 = arith.constant 2 : index
    %c0_36 = arith.constant 0 : index
    %c1_37 = arith.constant 1 : index
    %57 = vector.load %arg1[%c0_34, %c2_35, %c0_36, %c1_37] : memref<1x4x16x102xf32, #tpu.memory_space<vmem>>, vector<1x1x16x80xf32>
    %58 = vector.shape_cast %57 : vector<1x1x16x80xf32> to vector<16x80xf32>
    %c0_38 = arith.constant 0 : index
    %c3_39 = arith.constant 3 : index
    %c0_40 = arith.constant 0 : index
    %c1_41 = arith.constant 1 : index
    %59 = vector.load %arg1[%c0_38, %c3_39, %c0_40, %c1_41] : memref<1x4x16x102xf32, #tpu.memory_space<vmem>>, vector<1x1x16x80xf32>
    %60 = vector.shape_cast %59 : vector<1x1x16x80xf32> to vector<16x80xf32>
    %c0_42 = arith.constant 0 : index
    %c2_43 = arith.constant 2 : index
    %c0_44 = arith.constant 0 : index
    %c2_45 = arith.constant 2 : index
    %61 = vector.load %arg1[%c0_42, %c2_43, %c0_44, %c2_45] : memref<1x4x16x102xf32, #tpu.memory_space<vmem>>, vector<1x1x16x80xf32>
    %62 = vector.shape_cast %61 : vector<1x1x16x80xf32> to vector<16x80xf32>
    %63 = vector.broadcast %20 : vector<1x80xf32> to vector<16x80xf32>
    %64 = arith.mulf %54, %63 : vector<16x80xf32>
    %65 = vector.broadcast %13 : vector<1x80xf32> to vector<16x80xf32>
    %66 = arith.mulf %56, %65 : vector<16x80xf32>
    %67 = arith.addf %64, %66 : vector<16x80xf32>
    %68 = vector.broadcast %6 : vector<1x80xf32> to vector<16x80xf32>
    %69 = arith.mulf %58, %68 : vector<16x80xf32>
    %70 = arith.addf %67, %69 : vector<16x80xf32>
    %71 = vector.broadcast %6 : vector<1x80xf32> to vector<16x80xf32>
    %72 = arith.mulf %58, %71 : vector<16x80xf32>
    %73 = vector.broadcast %13 : vector<1x80xf32> to vector<16x80xf32>
    %74 = arith.mulf %60, %73 : vector<16x80xf32>
    %75 = arith.addf %72, %74 : vector<16x80xf32>
    %76 = vector.broadcast %20 : vector<1x80xf32> to vector<16x80xf32>
    %77 = arith.mulf %62, %76 : vector<16x80xf32>
    %78 = arith.addf %75, %77 : vector<16x80xf32>
    %79 = vector.broadcast %13 : vector<1x80xf32> to vector<16x80xf32>
    %80 = arith.mulf %70, %79 : vector<16x80xf32>
    %81 = arith.addf %48, %80 : vector<16x80xf32>
    %82 = vector.broadcast %13 : vector<1x80xf32> to vector<16x80xf32>
    %83 = arith.mulf %58, %82 : vector<16x80xf32>
    %84 = arith.addf %50, %83 : vector<16x80xf32>
    %85 = vector.broadcast %13 : vector<1x80xf32> to vector<16x80xf32>
    %86 = arith.mulf %78, %85 : vector<16x80xf32>
    %87 = arith.addf %52, %86 : vector<16x80xf32>
    %c0_46 = arith.constant 0 : index
    %c0_47 = arith.constant 0 : index
    %c0_48 = arith.constant 0 : index
    %c10 = arith.constant 10 : index
    %88 = vector.load %arg1[%c0_46, %c0_47, %c0_48, %c10] : memref<1x4x16x102xf32, #tpu.memory_space<vmem>>, vector<1x1x16x80xf32>
    %89 = vector.shape_cast %88 : vector<1x1x16x80xf32> to vector<16x80xf32>
    %c0_49 = arith.constant 0 : index
    %c1_50 = arith.constant 1 : index
    %c0_51 = arith.constant 0 : index
    %c10_52 = arith.constant 10 : index
    %90 = vector.load %arg1[%c0_49, %c1_50, %c0_51, %c10_52] : memref<1x4x16x102xf32, #tpu.memory_space<vmem>>, vector<1x1x16x80xf32>
    %91 = vector.shape_cast %90 : vector<1x1x16x80xf32> to vector<16x80xf32>
    %c0_53 = arith.constant 0 : index
    %c0_54 = arith.constant 0 : index
    %c0_55 = arith.constant 0 : index
    %c11 = arith.constant 11 : index
    %92 = vector.load %arg1[%c0_53, %c0_54, %c0_55, %c11] : memref<1x4x16x102xf32, #tpu.memory_space<vmem>>, vector<1x1x16x80xf32>
    %93 = vector.shape_cast %92 : vector<1x1x16x80xf32> to vector<16x80xf32>
    %c0_56 = arith.constant 0 : index
    %c1_57 = arith.constant 1 : index
    %c0_58 = arith.constant 0 : index
    %c11_59 = arith.constant 11 : index
    %94 = vector.load %arg1[%c0_56, %c1_57, %c0_58, %c11_59] : memref<1x4x16x102xf32, #tpu.memory_space<vmem>>, vector<1x1x16x80xf32>
    %95 = vector.shape_cast %94 : vector<1x1x16x80xf32> to vector<16x80xf32>
    %c0_60 = arith.constant 0 : index
    %c0_61 = arith.constant 0 : index
    %c0_62 = arith.constant 0 : index
    %c12 = arith.constant 12 : index
    %96 = vector.load %arg1[%c0_60, %c0_61, %c0_62, %c12] : memref<1x4x16x102xf32, #tpu.memory_space<vmem>>, vector<1x1x16x80xf32>
    %97 = vector.shape_cast %96 : vector<1x1x16x80xf32> to vector<16x80xf32>
    %98 = vector.broadcast %20 : vector<1x80xf32> to vector<16x80xf32>
    %99 = arith.mulf %89, %98 : vector<16x80xf32>
    %100 = vector.broadcast %13 : vector<1x80xf32> to vector<16x80xf32>
    %101 = arith.mulf %91, %100 : vector<16x80xf32>
    %102 = arith.addf %99, %101 : vector<16x80xf32>
    %103 = vector.broadcast %6 : vector<1x80xf32> to vector<16x80xf32>
    %104 = arith.mulf %93, %103 : vector<16x80xf32>
    %105 = arith.addf %102, %104 : vector<16x80xf32>
    %106 = vector.broadcast %6 : vector<1x80xf32> to vector<16x80xf32>
    %107 = arith.mulf %93, %106 : vector<16x80xf32>
    %108 = vector.broadcast %13 : vector<1x80xf32> to vector<16x80xf32>
    %109 = arith.mulf %95, %108 : vector<16x80xf32>
    %110 = arith.addf %107, %109 : vector<16x80xf32>
    %111 = vector.broadcast %20 : vector<1x80xf32> to vector<16x80xf32>
    %112 = arith.mulf %97, %111 : vector<16x80xf32>
    %113 = arith.addf %110, %112 : vector<16x80xf32>
    %114 = vector.broadcast %6 : vector<1x80xf32> to vector<16x80xf32>
    %115 = arith.mulf %105, %114 : vector<16x80xf32>
    %116 = arith.addf %81, %115 : vector<16x80xf32>
    %117 = vector.broadcast %6 : vector<1x80xf32> to vector<16x80xf32>
    %118 = arith.mulf %93, %117 : vector<16x80xf32>
    %119 = arith.addf %84, %118 : vector<16x80xf32>
    %120 = vector.broadcast %6 : vector<1x80xf32> to vector<16x80xf32>
    %121 = arith.mulf %113, %120 : vector<16x80xf32>
    %122 = arith.addf %87, %121 : vector<16x80xf32>
    %c0_63 = arith.constant 0 : index
    %c2_64 = arith.constant 2 : index
    %c0_65 = arith.constant 0 : index
    %c10_66 = arith.constant 10 : index
    %123 = vector.load %arg1[%c0_63, %c2_64, %c0_65, %c10_66] : memref<1x4x16x102xf32, #tpu.memory_space<vmem>>, vector<1x1x16x80xf32>
    %124 = vector.shape_cast %123 : vector<1x1x16x80xf32> to vector<16x80xf32>
    %c0_67 = arith.constant 0 : index
    %c3_68 = arith.constant 3 : index
    %c0_69 = arith.constant 0 : index
    %c10_70 = arith.constant 10 : index
    %125 = vector.load %arg1[%c0_67, %c3_68, %c0_69, %c10_70] : memref<1x4x16x102xf32, #tpu.memory_space<vmem>>, vector<1x1x16x80xf32>
    %126 = vector.shape_cast %125 : vector<1x1x16x80xf32> to vector<16x80xf32>
    %c0_71 = arith.constant 0 : index
    %c2_72 = arith.constant 2 : index
    %c0_73 = arith.constant 0 : index
    %c11_74 = arith.constant 11 : index
    %127 = vector.load %arg1[%c0_71, %c2_72, %c0_73, %c11_74] : memref<1x4x16x102xf32, #tpu.memory_space<vmem>>, vector<1x1x16x80xf32>
    %128 = vector.shape_cast %127 : vector<1x1x16x80xf32> to vector<16x80xf32>
    %c0_75 = arith.constant 0 : index
    %c3_76 = arith.constant 3 : index
    %c0_77 = arith.constant 0 : index
    %c11_78 = arith.constant 11 : index
    %129 = vector.load %arg1[%c0_75, %c3_76, %c0_77, %c11_78] : memref<1x4x16x102xf32, #tpu.memory_space<vmem>>, vector<1x1x16x80xf32>
    %130 = vector.shape_cast %129 : vector<1x1x16x80xf32> to vector<16x80xf32>
    %c0_79 = arith.constant 0 : index
    %c2_80 = arith.constant 2 : index
    %c0_81 = arith.constant 0 : index
    %c12_82 = arith.constant 12 : index
    %131 = vector.load %arg1[%c0_79, %c2_80, %c0_81, %c12_82] : memref<1x4x16x102xf32, #tpu.memory_space<vmem>>, vector<1x1x16x80xf32>
    %132 = vector.shape_cast %131 : vector<1x1x16x80xf32> to vector<16x80xf32>
    %133 = vector.broadcast %20 : vector<1x80xf32> to vector<16x80xf32>
    %134 = arith.mulf %124, %133 : vector<16x80xf32>
    %135 = vector.broadcast %13 : vector<1x80xf32> to vector<16x80xf32>
    %136 = arith.mulf %126, %135 : vector<16x80xf32>
    %137 = arith.addf %134, %136 : vector<16x80xf32>
    %138 = vector.broadcast %6 : vector<1x80xf32> to vector<16x80xf32>
    %139 = arith.mulf %128, %138 : vector<16x80xf32>
    %140 = arith.addf %137, %139 : vector<16x80xf32>
    %141 = vector.broadcast %6 : vector<1x80xf32> to vector<16x80xf32>
    %142 = arith.mulf %128, %141 : vector<16x80xf32>
    %143 = vector.broadcast %13 : vector<1x80xf32> to vector<16x80xf32>
    %144 = arith.mulf %130, %143 : vector<16x80xf32>
    %145 = arith.addf %142, %144 : vector<16x80xf32>
    %146 = vector.broadcast %20 : vector<1x80xf32> to vector<16x80xf32>
    %147 = arith.mulf %132, %146 : vector<16x80xf32>
    %148 = arith.addf %145, %147 : vector<16x80xf32>
    %149 = vector.broadcast %13 : vector<1x80xf32> to vector<16x80xf32>
    %150 = arith.mulf %140, %149 : vector<16x80xf32>
    %151 = arith.addf %115, %150 : vector<16x80xf32>
    %152 = vector.broadcast %13 : vector<1x80xf32> to vector<16x80xf32>
    %153 = arith.mulf %128, %152 : vector<16x80xf32>
    %154 = arith.addf %118, %153 : vector<16x80xf32>
    %155 = vector.broadcast %13 : vector<1x80xf32> to vector<16x80xf32>
    %156 = arith.mulf %148, %155 : vector<16x80xf32>
    %157 = arith.addf %121, %156 : vector<16x80xf32>
    %c0_83 = arith.constant 0 : index
    %c0_84 = arith.constant 0 : index
    %c0_85 = arith.constant 0 : index
    %c20 = arith.constant 20 : index
    %158 = vector.load %arg1[%c0_83, %c0_84, %c0_85, %c20] : memref<1x4x16x102xf32, #tpu.memory_space<vmem>>, vector<1x1x16x80xf32>
    %159 = vector.shape_cast %158 : vector<1x1x16x80xf32> to vector<16x80xf32>
    %c0_86 = arith.constant 0 : index
    %c1_87 = arith.constant 1 : index
    %c0_88 = arith.constant 0 : index
    %c20_89 = arith.constant 20 : index
    %160 = vector.load %arg1[%c0_86, %c1_87, %c0_88, %c20_89] : memref<1x4x16x102xf32, #tpu.memory_space<vmem>>, vector<1x1x16x80xf32>
    %161 = vector.shape_cast %160 : vector<1x1x16x80xf32> to vector<16x80xf32>
    %c0_90 = arith.constant 0 : index
    %c0_91 = arith.constant 0 : index
    %c0_92 = arith.constant 0 : index
    %c21 = arith.constant 21 : index
    %162 = vector.load %arg1[%c0_90, %c0_91, %c0_92, %c21] : memref<1x4x16x102xf32, #tpu.memory_space<vmem>>, vector<1x1x16x80xf32>
    %163 = vector.shape_cast %162 : vector<1x1x16x80xf32> to vector<16x80xf32>
    %c0_93 = arith.constant 0 : index
    %c1_94 = arith.constant 1 : index
    %c0_95 = arith.constant 0 : index
    %c21_96 = arith.constant 21 : index
    %164 = vector.load %arg1[%c0_93, %c1_94, %c0_95, %c21_96] : memref<1x4x16x102xf32, #tpu.memory_space<vmem>>, vector<1x1x16x80xf32>
    %165 = vector.shape_cast %164 : vector<1x1x16x80xf32> to vector<16x80xf32>
    %c0_97 = arith.constant 0 : index
    %c0_98 = arith.constant 0 : index
    %c0_99 = arith.constant 0 : index
    %c22 = arith.constant 22 : index
    %166 = vector.load %arg1[%c0_97, %c0_98, %c0_99, %c22] : memref<1x4x16x102xf32, #tpu.memory_space<vmem>>, vector<1x1x16x80xf32>
    %167 = vector.shape_cast %166 : vector<1x1x16x80xf32> to vector<16x80xf32>
    %168 = vector.broadcast %20 : vector<1x80xf32> to vector<16x80xf32>
    %169 = arith.mulf %159, %168 : vector<16x80xf32>
    %170 = vector.broadcast %13 : vector<1x80xf32> to vector<16x80xf32>
    %171 = arith.mulf %161, %170 : vector<16x80xf32>
    %172 = arith.addf %169, %171 : vector<16x80xf32>
    %173 = vector.broadcast %6 : vector<1x80xf32> to vector<16x80xf32>
    %174 = arith.mulf %163, %173 : vector<16x80xf32>
    %175 = arith.addf %172, %174 : vector<16x80xf32>
    %176 = vector.broadcast %6 : vector<1x80xf32> to vector<16x80xf32>
    %177 = arith.mulf %163, %176 : vector<16x80xf32>
    %178 = vector.broadcast %13 : vector<1x80xf32> to vector<16x80xf32>
    %179 = arith.mulf %165, %178 : vector<16x80xf32>
    %180 = arith.addf %177, %179 : vector<16x80xf32>
    %181 = vector.broadcast %20 : vector<1x80xf32> to vector<16x80xf32>
    %182 = arith.mulf %167, %181 : vector<16x80xf32>
    %183 = arith.addf %180, %182 : vector<16x80xf32>
    %184 = vector.broadcast %20 : vector<1x80xf32> to vector<16x80xf32>
    %185 = arith.mulf %175, %184 : vector<16x80xf32>
    %186 = arith.addf %151, %185 : vector<16x80xf32>
    %187 = vector.broadcast %20 : vector<1x80xf32> to vector<16x80xf32>
    %188 = arith.mulf %163, %187 : vector<16x80xf32>
    %189 = arith.addf %154, %188 : vector<16x80xf32>
    %190 = vector.broadcast %20 : vector<1x80xf32> to vector<16x80xf32>
    %191 = arith.mulf %183, %190 : vector<16x80xf32>
    %192 = arith.addf %157, %191 : vector<16x80xf32>
    %c0_100 = arith.constant 0 : index
    %c0_101 = arith.constant 0 : index
    %193 = vector.load %arg6[%c0_100, %c0_101] : memref<144x80xf32, #tpu.memory_space<vmem>>, vector<16x80xf32>
    tpu.vector_store %arg6[%c0_100, %c0_101], %116 {strides = array<i32>} : memref<144x80xf32, #tpu.memory_space<vmem>>, vector<16x80xf32>,
    %c16 = arith.constant 16 : index
    %c0_102 = arith.constant 0 : index
    %194 = vector.load %arg6[%c16, %c0_102] : memref<144x80xf32, #tpu.memory_space<vmem>>, vector<16x80xf32>
    tpu.vector_store %arg6[%c16, %c0_102], %119 {strides = array<i32>} : memref<144x80xf32, #tpu.memory_space<vmem>>, vector<16x80xf32>,
    %c32 = arith.constant 32 : index
    %c0_103 = arith.constant 0 : index
    %195 = vector.load %arg6[%c32, %c0_103] : memref<144x80xf32, #tpu.memory_space<vmem>>, vector<16x80xf32>
    tpu.vector_store %arg6[%c32, %c0_103], %122 {strides = array<i32>} : memref<144x80xf32, #tpu.memory_space<vmem>>, vector<16x80xf32>,
    %c48 = arith.constant 48 : index
    %c0_104 = arith.constant 0 : index
    %196 = vector.load %arg6[%c48, %c0_104] : memref<144x80xf32, #tpu.memory_space<vmem>>, vector<16x80xf32>
    tpu.vector_store %arg6[%c48, %c0_104], %105 {strides = array<i32>} : memref<144x80xf32, #tpu.memory_space<vmem>>, vector<16x80xf32>,
    %c64 = arith.constant 64 : index
    %c0_105 = arith.constant 0 : index
    %197 = vector.load %arg6[%c64, %c0_105] : memref<144x80xf32, #tpu.memory_space<vmem>>, vector<16x80xf32>
    tpu.vector_store %arg6[%c64, %c0_105], %93 {strides = array<i32>} : memref<144x80xf32, #tpu.memory_space<vmem>>, vector<16x80xf32>,
    %c80 = arith.constant 80 : index
    %c0_106 = arith.constant 0 : index
    %198 = vector.load %arg6[%c80, %c0_106] : memref<144x80xf32, #tpu.memory_space<vmem>>, vector<16x80xf32>
    tpu.vector_store %arg6[%c80, %c0_106], %113 {strides = array<i32>} : memref<144x80xf32, #tpu.memory_space<vmem>>, vector<16x80xf32>,
    %c96 = arith.constant 96 : index
    %c0_107 = arith.constant 0 : index
    %199 = vector.load %arg6[%c96, %c0_107] : memref<144x80xf32, #tpu.memory_space<vmem>>, vector<16x80xf32>
    tpu.vector_store %arg6[%c96, %c0_107], %186 {strides = array<i32>} : memref<144x80xf32, #tpu.memory_space<vmem>>, vector<16x80xf32>,
    %c112 = arith.constant 112 : index
    %c0_108 = arith.constant 0 : index
    %200 = vector.load %arg6[%c112, %c0_108] : memref<144x80xf32, #tpu.memory_space<vmem>>, vector<16x80xf32>
    tpu.vector_store %arg6[%c112, %c0_108], %189 {strides = array<i32>} : memref<144x80xf32, #tpu.memory_space<vmem>>, vector<16x80xf32>,
    %c128 = arith.constant 128 : index
    %c0_109 = arith.constant 0 : index
    %201 = vector.load %arg6[%c128, %c0_109] : memref<144x80xf32, #tpu.memory_space<vmem>>, vector<16x80xf32>
    tpu.vector_store %arg6[%c128, %c0_109], %192 {strides = array<i32>} : memref<144x80xf32, #tpu.memory_space<vmem>>, vector<16x80xf32>,
    %c0_110 = arith.constant 0 : index
    %c0_111 = arith.constant 0 : index
    %c0_112 = arith.constant 0 : index
    %202 = vector.load %arg3[%c0_110, %c0_111, %c0_112] : memref<4x32x144xf32, #tpu.memory_space<vmem>>, vector<1x32x144xf32>
    %203 = vector.shape_cast %202 : vector<1x32x144xf32> to vector<32x144xf32>
    %c0_113 = arith.constant 0 : index
    %c0_114 = arith.constant 0 : index
    %204 = vector.load %arg6[%c0_113, %c0_114] : memref<144x80xf32, #tpu.memory_space<vmem>>, vector<144x80xf32>
    %cst_115 = arith.constant dense<0.000000e+00> : vector<32x80xf32>
    %205 = tpu.matmul %203, %204, %cst_115 {dimension_numbers = #tpu.dot_dimension_numbers<[1], [0], [0], [1], [0, 0, 1, 1], [], []>} : vector<32x144xf32>, vector<144x80xf32>, vector<32x80xf32> -> vector<32x80xf32>
    %c0_116 = arith.constant 0 : index
    %c1_117 = arith.constant 1 : index
    %c0_118 = arith.constant 0 : index
    %206 = vector.load %arg2[%c0_116, %c1_117, %c0_118] : memref<1x4x80xf32, #tpu.memory_space<vmem>>, vector<1x1x80xf32>
    %207 = vector.shape_cast %206 : vector<1x1x80xf32> to vector<1x80xf32>
    %208 = math.absf %207 : vector<1x80xf32>
    %cst_119 = arith.constant 1.000000e+00 : f32
    %209 = vector.broadcast %cst_119 : f32 to vector<1x80xf32>
    %210 = arith.subf %209, %208 : vector<1x80xf32>
    %cst_120 = arith.constant 0.000000e+00 : f32
    %211 = vector.broadcast %cst_120 : f32 to vector<1x80xf32>
    %212 = arith.maximumf %210, %211 : vector<1x80xf32>
    %cst_121 = arith.constant 1.000000e+00 : f32
    %213 = vector.broadcast %cst_121 : f32 to vector<1x80xf32>
    %214 = arith.subf %207, %213 : vector<1x80xf32>
    %215 = math.absf %214 : vector<1x80xf32>
    %cst_122 = arith.constant 1.000000e+00 : f32
    %216 = vector.broadcast %cst_122 : f32 to vector<1x80xf32>
    %217 = arith.subf %216, %215 : vector<1x80xf32>
    %cst_123 = arith.constant 0.000000e+00 : f32
    %218 = vector.broadcast %cst_123 : f32 to vector<1x80xf32>
    %219 = arith.maximumf %217, %218 : vector<1x80xf32>
    %cst_124 = arith.constant 2.000000e+00 : f32
    %220 = vector.broadcast %cst_124 : f32 to vector<1x80xf32>
    %221 = arith.subf %207, %220 : vector<1x80xf32>
    %222 = math.absf %221 : vector<1x80xf32>
    %cst_125 = arith.constant 1.000000e+00 : f32
    %223 = vector.broadcast %cst_125 : f32 to vector<1x80xf32>
    %224 = arith.subf %223, %222 : vector<1x80xf32>
    %cst_126 = arith.constant 0.000000e+00 : f32
    %225 = vector.broadcast %cst_126 : f32 to vector<1x80xf32>
    %226 = arith.maximumf %224, %225 : vector<1x80xf32>
    %c0_127 = arith.constant 0 : index
    %c1_128 = arith.constant 1 : index
    %c0_129 = arith.constant 0 : index
    %c0_130 = arith.constant 0 : index
    %227 = vector.load %arg1[%c0_127, %c1_128, %c0_129, %c0_130] : memref<1x4x16x102xf32, #tpu.memory_space<vmem>>, vector<1x1x16x80xf32>
    %228 = vector.shape_cast %227 : vector<1x1x16x80xf32> to vector<16x80xf32>
    %c0_131 = arith.constant 0 : index
    %c0_132 = arith.constant 0 : index
    %c0_133 = arith.constant 0 : index
    %c1_134 = arith.constant 1 : index
    %229 = vector.load %arg1[%c0_131, %c0_132, %c0_133, %c1_134] : memref<1x4x16x102xf32, #tpu.memory_space<vmem>>, vector<1x1x16x80xf32>
    %230 = vector.shape_cast %229 : vector<1x1x16x80xf32> to vector<16x80xf32>
    %c0_135 = arith.constant 0 : index
    %c1_136 = arith.constant 1 : index
    %c0_137 = arith.constant 0 : index
    %c1_138 = arith.constant 1 : index
    %231 = vector.load %arg1[%c0_135, %c1_136, %c0_137, %c1_138] : memref<1x4x16x102xf32, #tpu.memory_space<vmem>>, vector<1x1x16x80xf32>
    %232 = vector.shape_cast %231 : vector<1x1x16x80xf32> to vector<16x80xf32>
    %c0_139 = arith.constant 0 : index
    %c0_140 = arith.constant 0 : index
    %c0_141 = arith.constant 0 : index
    %c2_142 = arith.constant 2 : index
    %233 = vector.load %arg1[%c0_139, %c0_140, %c0_141, %c2_142] : memref<1x4x16x102xf32, #tpu.memory_space<vmem>>, vector<1x1x16x80xf32>
    %234 = vector.shape_cast %233 : vector<1x1x16x80xf32> to vector<16x80xf32>
    %c0_143 = arith.constant 0 : index
    %c1_144 = arith.constant 1 : index
    %c0_145 = arith.constant 0 : index
    %c2_146 = arith.constant 2 : index
    %235 = vector.load %arg1[%c0_143, %c1_144, %c0_145, %c2_146] : memref<1x4x16x102xf32, #tpu.memory_space<vmem>>, vector<1x1x16x80xf32>
    %236 = vector.shape_cast %235 : vector<1x1x16x80xf32> to vector<16x80xf32>
    %237 = vector.broadcast %226 : vector<1x80xf32> to vector<16x80xf32>
    %238 = arith.mulf %228, %237 : vector<16x80xf32>
    %239 = vector.broadcast %219 : vector<1x80xf32> to vector<16x80xf32>
    %240 = arith.mulf %230, %239 : vector<16x80xf32>
    %241 = arith.addf %238, %240 : vector<16x80xf32>
    %242 = vector.broadcast %212 : vector<1x80xf32> to vector<16x80xf32>
    %243 = arith.mulf %232, %242 : vector<16x80xf32>
    %244 = arith.addf %241, %243 : vector<16x80xf32>
    %245 = vector.broadcast %212 : vector<1x80xf32> to vector<16x80xf32>
    %246 = arith.mulf %232, %245 : vector<16x80xf32>
    %247 = vector.broadcast %219 : vector<1x80xf32> to vector<16x80xf32>
    %248 = arith.mulf %234, %247 : vector<16x80xf32>
    %249 = arith.addf %246, %248 : vector<16x80xf32>
    %250 = vector.broadcast %226 : vector<1x80xf32> to vector<16x80xf32>
    %251 = arith.mulf %236, %250 : vector<16x80xf32>
    %252 = arith.addf %249, %251 : vector<16x80xf32>
    %253 = vector.broadcast %226 : vector<1x80xf32> to vector<16x80xf32>
    %254 = arith.mulf %244, %253 : vector<16x80xf32>
    %255 = vector.broadcast %226 : vector<1x80xf32> to vector<16x80xf32>
    %256 = arith.mulf %232, %255 : vector<16x80xf32>
    %257 = vector.broadcast %226 : vector<1x80xf32> to vector<16x80xf32>
    %258 = arith.mulf %252, %257 : vector<16x80xf32>
    %c0_147 = arith.constant 0 : index
    %c3_148 = arith.constant 3 : index
    %c0_149 = arith.constant 0 : index
    %c0_150 = arith.constant 0 : index
    %259 = vector.load %arg1[%c0_147, %c3_148, %c0_149, %c0_150] : memref<1x4x16x102xf32, #tpu.memory_space<vmem>>, vector<1x1x16x80xf32>
    %260 = vector.shape_cast %259 : vector<1x1x16x80xf32> to vector<16x80xf32>
    %c0_151 = arith.constant 0 : index
    %c2_152 = arith.constant 2 : index
    %c0_153 = arith.constant 0 : index
    %c1_154 = arith.constant 1 : index
    %261 = vector.load %arg1[%c0_151, %c2_152, %c0_153, %c1_154] : memref<1x4x16x102xf32, #tpu.memory_space<vmem>>, vector<1x1x16x80xf32>
    %262 = vector.shape_cast %261 : vector<1x1x16x80xf32> to vector<16x80xf32>
    %c0_155 = arith.constant 0 : index
    %c3_156 = arith.constant 3 : index
    %c0_157 = arith.constant 0 : index
    %c1_158 = arith.constant 1 : index
    %263 = vector.load %arg1[%c0_155, %c3_156, %c0_157, %c1_158] : memref<1x4x16x102xf32, #tpu.memory_space<vmem>>, vector<1x1x16x80xf32>
    %264 = vector.shape_cast %263 : vector<1x1x16x80xf32> to vector<16x80xf32>
    %c0_159 = arith.constant 0 : index
    %c2_160 = arith.constant 2 : index
    %c0_161 = arith.constant 0 : index
    %c2_162 = arith.constant 2 : index
    %265 = vector.load %arg1[%c0_159, %c2_160, %c0_161, %c2_162] : memref<1x4x16x102xf32, #tpu.memory_space<vmem>>, vector<1x1x16x80xf32>
    %266 = vector.shape_cast %265 : vector<1x1x16x80xf32> to vector<16x80xf32>
    %c0_163 = arith.constant 0 : index
    %c3_164 = arith.constant 3 : index
    %c0_165 = arith.constant 0 : index
    %c2_166 = arith.constant 2 : index
    %267 = vector.load %arg1[%c0_163, %c3_164, %c0_165, %c2_166] : memref<1x4x16x102xf32, #tpu.memory_space<vmem>>, vector<1x1x16x80xf32>
    %268 = vector.shape_cast %267 : vector<1x1x16x80xf32> to vector<16x80xf32>
    %269 = vector.broadcast %226 : vector<1x80xf32> to vector<16x80xf32>
    %270 = arith.mulf %260, %269 : vector<16x80xf32>
    %271 = vector.broadcast %219 : vector<1x80xf32> to vector<16x80xf32>
    %272 = arith.mulf %262, %271 : vector<16x80xf32>
    %273 = arith.addf %270, %272 : vector<16x80xf32>
    %274 = vector.broadcast %212 : vector<1x80xf32> to vector<16x80xf32>
    %275 = arith.mulf %264, %274 : vector<16x80xf32>
    %276 = arith.addf %273, %275 : vector<16x80xf32>
    %277 = vector.broadcast %212 : vector<1x80xf32> to vector<16x80xf32>
    %278 = arith.mulf %264, %277 : vector<16x80xf32>
    %279 = vector.broadcast %219 : vector<1x80xf32> to vector<16x80xf32>
    %280 = arith.mulf %266, %279 : vector<16x80xf32>
    %281 = arith.addf %278, %280 : vector<16x80xf32>
    %282 = vector.broadcast %226 : vector<1x80xf32> to vector<16x80xf32>
    %283 = arith.mulf %268, %282 : vector<16x80xf32>
    %284 = arith.addf %281, %283 : vector<16x80xf32>
    %285 = vector.broadcast %219 : vector<1x80xf32> to vector<16x80xf32>
    %286 = arith.mulf %276, %285 : vector<16x80xf32>
    %287 = arith.addf %254, %286 : vector<16x80xf32>
    %288 = vector.broadcast %219 : vector<1x80xf32> to vector<16x80xf32>
    %289 = arith.mulf %264, %288 : vector<16x80xf32>
    %290 = arith.addf %256, %289 : vector<16x80xf32>
    %291 = vector.broadcast %219 : vector<1x80xf32> to vector<16x80xf32>
    %292 = arith.mulf %284, %291 : vector<16x80xf32>
    %293 = arith.addf %258, %292 : vector<16x80xf32>
    %c0_167 = arith.constant 0 : index
    %c1_168 = arith.constant 1 : index
    %c0_169 = arith.constant 0 : index
    %c10_170 = arith.constant 10 : index
    %294 = vector.load %arg1[%c0_167, %c1_168, %c0_169, %c10_170] : memref<1x4x16x102xf32, #tpu.memory_space<vmem>>, vector<1x1x16x80xf32>
    %295 = vector.shape_cast %294 : vector<1x1x16x80xf32> to vector<16x80xf32>
    %c0_171 = arith.constant 0 : index
    %c0_172 = arith.constant 0 : index
    %c0_173 = arith.constant 0 : index
    %c11_174 = arith.constant 11 : index
    %296 = vector.load %arg1[%c0_171, %c0_172, %c0_173, %c11_174] : memref<1x4x16x102xf32, #tpu.memory_space<vmem>>, vector<1x1x16x80xf32>
    %297 = vector.shape_cast %296 : vector<1x1x16x80xf32> to vector<16x80xf32>
    %c0_175 = arith.constant 0 : index
    %c1_176 = arith.constant 1 : index
    %c0_177 = arith.constant 0 : index
    %c11_178 = arith.constant 11 : index
    %298 = vector.load %arg1[%c0_175, %c1_176, %c0_177, %c11_178] : memref<1x4x16x102xf32, #tpu.memory_space<vmem>>, vector<1x1x16x80xf32>
    %299 = vector.shape_cast %298 : vector<1x1x16x80xf32> to vector<16x80xf32>
    %c0_179 = arith.constant 0 : index
    %c0_180 = arith.constant 0 : index
    %c0_181 = arith.constant 0 : index
    %c12_182 = arith.constant 12 : index
    %300 = vector.load %arg1[%c0_179, %c0_180, %c0_181, %c12_182] : memref<1x4x16x102xf32, #tpu.memory_space<vmem>>, vector<1x1x16x80xf32>
    %301 = vector.shape_cast %300 : vector<1x1x16x80xf32> to vector<16x80xf32>
    %c0_183 = arith.constant 0 : index
    %c1_184 = arith.constant 1 : index
    %c0_185 = arith.constant 0 : index
    %c12_186 = arith.constant 12 : index
    %302 = vector.load %arg1[%c0_183, %c1_184, %c0_185, %c12_186] : memref<1x4x16x102xf32, #tpu.memory_space<vmem>>, vector<1x1x16x80xf32>
    %303 = vector.shape_cast %302 : vector<1x1x16x80xf32> to vector<16x80xf32>
    %304 = vector.broadcast %226 : vector<1x80xf32> to vector<16x80xf32>
    %305 = arith.mulf %295, %304 : vector<16x80xf32>
    %306 = vector.broadcast %219 : vector<1x80xf32> to vector<16x80xf32>
    %307 = arith.mulf %297, %306 : vector<16x80xf32>
    %308 = arith.addf %305, %307 : vector<16x80xf32>
    %309 = vector.broadcast %212 : vector<1x80xf32> to vector<16x80xf32>
    %310 = arith.mulf %299, %309 : vector<16x80xf32>
    %311 = arith.addf %308, %310 : vector<16x80xf32>
    %312 = vector.broadcast %212 : vector<1x80xf32> to vector<16x80xf32>
    %313 = arith.mulf %299, %312 : vector<16x80xf32>
    %314 = vector.broadcast %219 : vector<1x80xf32> to vector<16x80xf32>
    %315 = arith.mulf %301, %314 : vector<16x80xf32>
    %316 = arith.addf %313, %315 : vector<16x80xf32>
    %317 = vector.broadcast %226 : vector<1x80xf32> to vector<16x80xf32>
    %318 = arith.mulf %303, %317 : vector<16x80xf32>
    %319 = arith.addf %316, %318 : vector<16x80xf32>
    %320 = vector.broadcast %212 : vector<1x80xf32> to vector<16x80xf32>
    %321 = arith.mulf %311, %320 : vector<16x80xf32>
    %322 = arith.addf %287, %321 : vector<16x80xf32>
    %323 = vector.broadcast %212 : vector<1x80xf32> to vector<16x80xf32>
    %324 = arith.mulf %299, %323 : vector<16x80xf32>
    %325 = arith.addf %290, %324 : vector<16x80xf32>
    %326 = vector.broadcast %212 : vector<1x80xf32> to vector<16x80xf32>
    %327 = arith.mulf %319, %326 : vector<16x80xf32>
    %328 = arith.addf %293, %327 : vector<16x80xf32>
    %c0_187 = arith.constant 0 : index
    %c3_188 = arith.constant 3 : index
    %c0_189 = arith.constant 0 : index
    %c10_190 = arith.constant 10 : index
    %329 = vector.load %arg1[%c0_187, %c3_188, %c0_189, %c10_190] : memref<1x4x16x102xf32, #tpu.memory_space<vmem>>, vector<1x1x16x80xf32>
    %330 = vector.shape_cast %329 : vector<1x1x16x80xf32> to vector<16x80xf32>
    %c0_191 = arith.constant 0 : index
    %c2_192 = arith.constant 2 : index
    %c0_193 = arith.constant 0 : index
    %c11_194 = arith.constant 11 : index
    %331 = vector.load %arg1[%c0_191, %c2_192, %c0_193, %c11_194] : memref<1x4x16x102xf32, #tpu.memory_space<vmem>>, vector<1x1x16x80xf32>
    %332 = vector.shape_cast %331 : vector<1x1x16x80xf32> to vector<16x80xf32>
    %c0_195 = arith.constant 0 : index
    %c3_196 = arith.constant 3 : index
    %c0_197 = arith.constant 0 : index
    %c11_198 = arith.constant 11 : index
    %333 = vector.load %arg1[%c0_195, %c3_196, %c0_197, %c11_198] : memref<1x4x16x102xf32, #tpu.memory_space<vmem>>, vector<1x1x16x80xf32>
    %334 = vector.shape_cast %333 : vector<1x1x16x80xf32> to vector<16x80xf32>
    %c0_199 = arith.constant 0 : index
    %c2_200 = arith.constant 2 : index
    %c0_201 = arith.constant 0 : index
    %c12_202 = arith.constant 12 : index
    %335 = vector.load %arg1[%c0_199, %c2_200, %c0_201, %c12_202] : memref<1x4x16x102xf32, #tpu.memory_space<vmem>>, vector<1x1x16x80xf32>
    %336 = vector.shape_cast %335 : vector<1x1x16x80xf32> to vector<16x80xf32>
    %c0_203 = arith.constant 0 : index
    %c3_204 = arith.constant 3 : index
    %c0_205 = arith.constant 0 : index
    %c12_206 = arith.constant 12 : index
    %337 = vector.load %arg1[%c0_203, %c3_204, %c0_205, %c12_206] : memref<1x4x16x102xf32, #tpu.memory_space<vmem>>, vector<1x1x16x80xf32>
    %338 = vector.shape_cast %337 : vector<1x1x16x80xf32> to vector<16x80xf32>
    %339 = vector.broadcast %226 : vector<1x80xf32> to vector<16x80xf32>
    %340 = arith.mulf %330, %339 : vector<16x80xf32>
    %341 = vector.broadcast %219 : vector<1x80xf32> to vector<16x80xf32>
    %342 = arith.mulf %332, %341 : vector<16x80xf32>
    %343 = arith.addf %340, %342 : vector<16x80xf32>
    %344 = vector.broadcast %212 : vector<1x80xf32> to vector<16x80xf32>
    %345 = arith.mulf %334, %344 : vector<16x80xf32>
    %346 = arith.addf %343, %345 : vector<16x80xf32>
    %347 = vector.broadcast %212 : vector<1x80xf32> to vector<16x80xf32>
    %348 = arith.mulf %334, %347 : vector<16x80xf32>
    %349 = vector.broadcast %219 : vector<1x80xf32> to vector<16x80xf32>
    %350 = arith.mulf %336, %349 : vector<16x80xf32>
    %351 = arith.addf %348, %350 : vector<16x80xf32>
    %352 = vector.broadcast %226 : vector<1x80xf32> to vector<16x80xf32>
    %353 = arith.mulf %338, %352 : vector<16x80xf32>
    %354 = arith.addf %351, %353 : vector<16x80xf32>
    %355 = vector.broadcast %219 : vector<1x80xf32> to vector<16x80xf32>
    %356 = arith.mulf %346, %355 : vector<16x80xf32>
    %357 = arith.addf %321, %356 : vector<16x80xf32>
    %358 = vector.broadcast %219 : vector<1x80xf32> to vector<16x80xf32>
    %359 = arith.mulf %334, %358 : vector<16x80xf32>
    %360 = arith.addf %324, %359 : vector<16x80xf32>
    %361 = vector.broadcast %219 : vector<1x80xf32> to vector<16x80xf32>
    %362 = arith.mulf %354, %361 : vector<16x80xf32>
    %363 = arith.addf %327, %362 : vector<16x80xf32>
    %c0_207 = arith.constant 0 : index
    %c1_208 = arith.constant 1 : index
    %c0_209 = arith.constant 0 : index
    %c20_210 = arith.constant 20 : index
    %364 = vector.load %arg1[%c0_207, %c1_208, %c0_209, %c20_210] : memref<1x4x16x102xf32, #tpu.memory_space<vmem>>, vector<1x1x16x80xf32>
    %365 = vector.shape_cast %364 : vector<1x1x16x80xf32> to vector<16x80xf32>
    %c0_211 = arith.constant 0 : index
    %c0_212 = arith.constant 0 : index
    %c0_213 = arith.constant 0 : index
    %c21_214 = arith.constant 21 : index
    %366 = vector.load %arg1[%c0_211, %c0_212, %c0_213, %c21_214] : memref<1x4x16x102xf32, #tpu.memory_space<vmem>>, vector<1x1x16x80xf32>
    %367 = vector.shape_cast %366 : vector<1x1x16x80xf32> to vector<16x80xf32>
    %c0_215 = arith.constant 0 : index
    %c1_216 = arith.constant 1 : index
    %c0_217 = arith.constant 0 : index
    %c21_218 = arith.constant 21 : index
    %368 = vector.load %arg1[%c0_215, %c1_216, %c0_217, %c21_218] : memref<1x4x16x102xf32, #tpu.memory_space<vmem>>, vector<1x1x16x80xf32>
    %369 = vector.shape_cast %368 : vector<1x1x16x80xf32> to vector<16x80xf32>
    %c0_219 = arith.constant 0 : index
    %c0_220 = arith.constant 0 : index
    %c0_221 = arith.constant 0 : index
    %c22_222 = arith.constant 22 : index
    %370 = vector.load %arg1[%c0_219, %c0_220, %c0_221, %c22_222] : memref<1x4x16x102xf32, #tpu.memory_space<vmem>>, vector<1x1x16x80xf32>
    %371 = vector.shape_cast %370 : vector<1x1x16x80xf32> to vector<16x80xf32>
    %c0_223 = arith.constant 0 : index
    %c1_224 = arith.constant 1 : index
    %c0_225 = arith.constant 0 : index
    %c22_226 = arith.constant 22 : index
    %372 = vector.load %arg1[%c0_223, %c1_224, %c0_225, %c22_226] : memref<1x4x16x102xf32, #tpu.memory_space<vmem>>, vector<1x1x16x80xf32>
    %373 = vector.shape_cast %372 : vector<1x1x16x80xf32> to vector<16x80xf32>
    %374 = vector.broadcast %226 : vector<1x80xf32> to vector<16x80xf32>
    %375 = arith.mulf %365, %374 : vector<16x80xf32>
    %376 = vector.broadcast %219 : vector<1x80xf32> to vector<16x80xf32>
    %377 = arith.mulf %367, %376 : vector<16x80xf32>
    %378 = arith.addf %375, %377 : vector<16x80xf32>
    %379 = vector.broadcast %212 : vector<1x80xf32> to vector<16x80xf32>
    %380 = arith.mulf %369, %379 : vector<16x80xf32>
    %381 = arith.addf %378, %380 : vector<16x80xf32>
    %382 = vector.broadcast %212 : vector<1x80xf32> to vector<16x80xf32>
    %383 = arith.mulf %369, %382 : vector<16x80xf32>
    %384 = vector.broadcast %219 : vector<1x80xf32> to vector<16x80xf32>
    %385 = arith.mulf %371, %384 : vector<16x80xf32>
    %386 = arith.addf %383, %385 : vector<16x80xf32>
    %387 = vector.broadcast %226 : vector<1x80xf32> to vector<16x80xf32>
    %388 = arith.mulf %373, %387 : vector<16x80xf32>
    %389 = arith.addf %386, %388 : vector<16x80xf32>
    %390 = vector.broadcast %226 : vector<1x80xf32> to vector<16x80xf32>
    %391 = arith.mulf %381, %390 : vector<16x80xf32>
    %392 = arith.addf %357, %391 : vector<16x80xf32>
    %393 = vector.broadcast %226 : vector<1x80xf32> to vector<16x80xf32>
    %394 = arith.mulf %369, %393 : vector<16x80xf32>
    %395 = arith.addf %360, %394 : vector<16x80xf32>
    %396 = vector.broadcast %226 : vector<1x80xf32> to vector<16x80xf32>
    %397 = arith.mulf %389, %396 : vector<16x80xf32>
    %398 = arith.addf %363, %397 : vector<16x80xf32>
    %c0_227 = arith.constant 0 : index
    %c0_228 = arith.constant 0 : index
    %399 = vector.load %arg6[%c0_227, %c0_228] : memref<144x80xf32, #tpu.memory_space<vmem>>, vector<16x80xf32>
    tpu.vector_store %arg6[%c0_227, %c0_228], %322 {strides = array<i32>} : memref<144x80xf32, #tpu.memory_space<vmem>>, vector<16x80xf32>,
    %c16_229 = arith.constant 16 : index
    %c0_230 = arith.constant 0 : index
    %400 = vector.load %arg6[%c16_229, %c0_230] : memref<144x80xf32, #tpu.memory_space<vmem>>, vector<16x80xf32>
    tpu.vector_store %arg6[%c16_229, %c0_230], %325 {strides = array<i32>} : memref<144x80xf32, #tpu.memory_space<vmem>>, vector<16x80xf32>,
    %c32_231 = arith.constant 32 : index
    %c0_232 = arith.constant 0 : index
    %401 = vector.load %arg6[%c32_231, %c0_232] : memref<144x80xf32, #tpu.memory_space<vmem>>, vector<16x80xf32>
    tpu.vector_store %arg6[%c32_231, %c0_232], %328 {strides = array<i32>} : memref<144x80xf32, #tpu.memory_space<vmem>>, vector<16x80xf32>,
    %c48_233 = arith.constant 48 : index
    %c0_234 = arith.constant 0 : index
    %402 = vector.load %arg6[%c48_233, %c0_234] : memref<144x80xf32, #tpu.memory_space<vmem>>, vector<16x80xf32>
    tpu.vector_store %arg6[%c48_233, %c0_234], %311 {strides = array<i32>} : memref<144x80xf32, #tpu.memory_space<vmem>>, vector<16x80xf32>,
    %c64_235 = arith.constant 64 : index
    %c0_236 = arith.constant 0 : index
    %403 = vector.load %arg6[%c64_235, %c0_236] : memref<144x80xf32, #tpu.memory_space<vmem>>, vector<16x80xf32>
    tpu.vector_store %arg6[%c64_235, %c0_236], %299 {strides = array<i32>} : memref<144x80xf32, #tpu.memory_space<vmem>>, vector<16x80xf32>,
    %c80_237 = arith.constant 80 : index
    %c0_238 = arith.constant 0 : index
    %404 = vector.load %arg6[%c80_237, %c0_238] : memref<144x80xf32, #tpu.memory_space<vmem>>, vector<16x80xf32>
    tpu.vector_store %arg6[%c80_237, %c0_238], %319 {strides = array<i32>} : memref<144x80xf32, #tpu.memory_space<vmem>>, vector<16x80xf32>,
    %c96_239 = arith.constant 96 : index
    %c0_240 = arith.constant 0 : index
    %405 = vector.load %arg6[%c96_239, %c0_240] : memref<144x80xf32, #tpu.memory_space<vmem>>, vector<16x80xf32>
    tpu.vector_store %arg6[%c96_239, %c0_240], %392 {strides = array<i32>} : memref<144x80xf32, #tpu.memory_space<vmem>>, vector<16x80xf32>,
    %c112_241 = arith.constant 112 : index
    %c0_242 = arith.constant 0 : index
    %406 = vector.load %arg6[%c112_241, %c0_242] : memref<144x80xf32, #tpu.memory_space<vmem>>, vector<16x80xf32>
    tpu.vector_store %arg6[%c112_241, %c0_242], %395 {strides = array<i32>} : memref<144x80xf32, #tpu.memory_space<vmem>>, vector<16x80xf32>,
    %c128_243 = arith.constant 128 : index
    %c0_244 = arith.constant 0 : index
    %407 = vector.load %arg6[%c128_243, %c0_244] : memref<144x80xf32, #tpu.memory_space<vmem>>, vector<16x80xf32>
    tpu.vector_store %arg6[%c128_243, %c0_244], %398 {strides = array<i32>} : memref<144x80xf32, #tpu.memory_space<vmem>>, vector<16x80xf32>,
    %c1_245 = arith.constant 1 : index
    %c0_246 = arith.constant 0 : index
    %c0_247 = arith.constant 0 : index
    %408 = vector.load %arg3[%c1_245, %c0_246, %c0_247] : memref<4x32x144xf32, #tpu.memory_space<vmem>>, vector<1x32x144xf32>
    %409 = vector.shape_cast %408 : vector<1x32x144xf32> to vector<32x144xf32>
    %c0_248 = arith.constant 0 : index
    %c0_249 = arith.constant 0 : index
    %410 = vector.load %arg6[%c0_248, %c0_249] : memref<144x80xf32, #tpu.memory_space<vmem>>, vector<144x80xf32>
    %cst_250 = arith.constant dense<0.000000e+00> : vector<32x80xf32>
    %411 = tpu.matmul %409, %410, %cst_250 {dimension_numbers = #tpu.dot_dimension_numbers<[1], [0], [0], [1], [0, 0, 1, 1], [], []>} : vector<32x144xf32>, vector<144x80xf32>, vector<32x80xf32> -> vector<32x80xf32>
    %412 = arith.addf %205, %411 : vector<32x80xf32>
    %c0_251 = arith.constant 0 : index
    %c2_252 = arith.constant 2 : index
    %c0_253 = arith.constant 0 : index
    %413 = vector.load %arg2[%c0_251, %c2_252, %c0_253] : memref<1x4x80xf32, #tpu.memory_space<vmem>>, vector<1x1x80xf32>
    %414 = vector.shape_cast %413 : vector<1x1x80xf32> to vector<1x80xf32>
    %415 = math.absf %414 : vector<1x80xf32>
    %cst_254 = arith.constant 1.000000e+00 : f32
    %416 = vector.broadcast %cst_254 : f32 to vector<1x80xf32>
    %417 = arith.subf %416, %415 : vector<1x80xf32>
    %cst_255 = arith.constant 0.000000e+00 : f32
    %418 = vector.broadcast %cst_255 : f32 to vector<1x80xf32>
    %419 = arith.maximumf %417, %418 : vector<1x80xf32>
    %cst_256 = arith.constant 1.000000e+00 : f32
    %420 = vector.broadcast %cst_256 : f32 to vector<1x80xf32>
    %421 = arith.subf %414, %420 : vector<1x80xf32>
    %422 = math.absf %421 : vector<1x80xf32>
    %cst_257 = arith.constant 1.000000e+00 : f32
    %423 = vector.broadcast %cst_257 : f32 to vector<1x80xf32>
    %424 = arith.subf %423, %422 : vector<1x80xf32>
    %cst_258 = arith.constant 0.000000e+00 : f32
    %425 = vector.broadcast %cst_258 : f32 to vector<1x80xf32>
    %426 = arith.maximumf %424, %425 : vector<1x80xf32>
    %cst_259 = arith.constant 2.000000e+00 : f32
    %427 = vector.broadcast %cst_259 : f32 to vector<1x80xf32>
    %428 = arith.subf %414, %427 : vector<1x80xf32>
    %429 = math.absf %428 : vector<1x80xf32>
    %cst_260 = arith.constant 1.000000e+00 : f32
    %430 = vector.broadcast %cst_260 : f32 to vector<1x80xf32>
    %431 = arith.subf %430, %429 : vector<1x80xf32>
    %cst_261 = arith.constant 0.000000e+00 : f32
    %432 = vector.broadcast %cst_261 : f32 to vector<1x80xf32>
    %433 = arith.maximumf %431, %432 : vector<1x80xf32>
    %c0_262 = arith.constant 0 : index
    %c2_263 = arith.constant 2 : index
    %c0_264 = arith.constant 0 : index
    %c0_265 = arith.constant 0 : index
    %434 = vector.load %arg1[%c0_262, %c2_263, %c0_264, %c0_265] : memref<1x4x16x102xf32, #tpu.memory_space<vmem>>, vector<1x1x16x80xf32>
    %435 = vector.shape_cast %434 : vector<1x1x16x80xf32> to vector<16x80xf32>
    %c0_266 = arith.constant 0 : index
    %c3_267 = arith.constant 3 : index
    %c0_268 = arith.constant 0 : index
    %c0_269 = arith.constant 0 : index
    %436 = vector.load %arg1[%c0_266, %c3_267, %c0_268, %c0_269] : memref<1x4x16x102xf32, #tpu.memory_space<vmem>>, vector<1x1x16x80xf32>
    %437 = vector.shape_cast %436 : vector<1x1x16x80xf32> to vector<16x80xf32>
    %c0_270 = arith.constant 0 : index
    %c2_271 = arith.constant 2 : index
    %c0_272 = arith.constant 0 : index
    %c1_273 = arith.constant 1 : index
    %438 = vector.load %arg1[%c0_270, %c2_271, %c0_272, %c1_273] : memref<1x4x16x102xf32, #tpu.memory_space<vmem>>, vector<1x1x16x80xf32>
    %439 = vector.shape_cast %438 : vector<1x1x16x80xf32> to vector<16x80xf32>
    %c0_274 = arith.constant 0 : index
    %c3_275 = arith.constant 3 : index
    %c0_276 = arith.constant 0 : index
    %c1_277 = arith.constant 1 : index
    %440 = vector.load %arg1[%c0_274, %c3_275, %c0_276, %c1_277] : memref<1x4x16x102xf32, #tpu.memory_space<vmem>>, vector<1x1x16x80xf32>
    %441 = vector.shape_cast %440 : vector<1x1x16x80xf32> to vector<16x80xf32>
    %c0_278 = arith.constant 0 : index
    %c2_279 = arith.constant 2 : index
    %c0_280 = arith.constant 0 : index
    %c2_281 = arith.constant 2 : index
    %442 = vector.load %arg1[%c0_278, %c2_279, %c0_280, %c2_281] : memref<1x4x16x102xf32, #tpu.memory_space<vmem>>, vector<1x1x16x80xf32>
    %443 = vector.shape_cast %442 : vector<1x1x16x80xf32> to vector<16x80xf32>
    %444 = vector.broadcast %433 : vector<1x80xf32> to vector<16x80xf32>
    %445 = arith.mulf %435, %444 : vector<16x80xf32>
    %446 = vector.broadcast %426 : vector<1x80xf32> to vector<16x80xf32>
    %447 = arith.mulf %437, %446 : vector<16x80xf32>
    %448 = arith.addf %445, %447 : vector<16x80xf32>
    %449 = vector.broadcast %419 : vector<1x80xf32> to vector<16x80xf32>
    %450 = arith.mulf %439, %449 : vector<16x80xf32>
    %451 = arith.addf %448, %450 : vector<16x80xf32>
    %452 = vector.broadcast %419 : vector<1x80xf32> to vector<16x80xf32>
    %453 = arith.mulf %439, %452 : vector<16x80xf32>
    %454 = vector.broadcast %426 : vector<1x80xf32> to vector<16x80xf32>
    %455 = arith.mulf %441, %454 : vector<16x80xf32>
    %456 = arith.addf %453, %455 : vector<16x80xf32>
    %457 = vector.broadcast %433 : vector<1x80xf32> to vector<16x80xf32>
    %458 = arith.mulf %443, %457 : vector<16x80xf32>
    %459 = arith.addf %456, %458 : vector<16x80xf32>
    %460 = vector.broadcast %433 : vector<1x80xf32> to vector<16x80xf32>
    %461 = arith.mulf %451, %460 : vector<16x80xf32>
    %462 = vector.broadcast %433 : vector<1x80xf32> to vector<16x80xf32>
    %463 = arith.mulf %439, %462 : vector<16x80xf32>
    %464 = vector.broadcast %433 : vector<1x80xf32> to vector<16x80xf32>
    %465 = arith.mulf %459, %464 : vector<16x80xf32>
    %c0_282 = arith.constant 0 : index
    %c0_283 = arith.constant 0 : index
    %c0_284 = arith.constant 0 : index
    %c10_285 = arith.constant 10 : index
    %466 = vector.load %arg1[%c0_282, %c0_283, %c0_284, %c10_285] : memref<1x4x16x102xf32, #tpu.memory_space<vmem>>, vector<1x1x16x80xf32>
    %467 = vector.shape_cast %466 : vector<1x1x16x80xf32> to vector<16x80xf32>
    %c0_286 = arith.constant 0 : index
    %c1_287 = arith.constant 1 : index
    %c0_288 = arith.constant 0 : index
    %c10_289 = arith.constant 10 : index
    %468 = vector.load %arg1[%c0_286, %c1_287, %c0_288, %c10_289] : memref<1x4x16x102xf32, #tpu.memory_space<vmem>>, vector<1x1x16x80xf32>
    %469 = vector.shape_cast %468 : vector<1x1x16x80xf32> to vector<16x80xf32>
    %c0_290 = arith.constant 0 : index
    %c0_291 = arith.constant 0 : index
    %c0_292 = arith.constant 0 : index
    %c11_293 = arith.constant 11 : index
    %470 = vector.load %arg1[%c0_290, %c0_291, %c0_292, %c11_293] : memref<1x4x16x102xf32, #tpu.memory_space<vmem>>, vector<1x1x16x80xf32>
    %471 = vector.shape_cast %470 : vector<1x1x16x80xf32> to vector<16x80xf32>
    %c0_294 = arith.constant 0 : index
    %c1_295 = arith.constant 1 : index
    %c0_296 = arith.constant 0 : index
    %c11_297 = arith.constant 11 : index
    %472 = vector.load %arg1[%c0_294, %c1_295, %c0_296, %c11_297] : memref<1x4x16x102xf32, #tpu.memory_space<vmem>>, vector<1x1x16x80xf32>
    %473 = vector.shape_cast %472 : vector<1x1x16x80xf32> to vector<16x80xf32>
    %c0_298 = arith.constant 0 : index
    %c0_299 = arith.constant 0 : index
    %c0_300 = arith.constant 0 : index
    %c12_301 = arith.constant 12 : index
    %474 = vector.load %arg1[%c0_298, %c0_299, %c0_300, %c12_301] : memref<1x4x16x102xf32, #tpu.memory_space<vmem>>, vector<1x1x16x80xf32>
    %475 = vector.shape_cast %474 : vector<1x1x16x80xf32> to vector<16x80xf32>
    %476 = vector.broadcast %433 : vector<1x80xf32> to vector<16x80xf32>
    %477 = arith.mulf %467, %476 : vector<16x80xf32>
    %478 = vector.broadcast %426 : vector<1x80xf32> to vector<16x80xf32>
    %479 = arith.mulf %469, %478 : vector<16x80xf32>
    %480 = arith.addf %477, %479 : vector<16x80xf32>
    %481 = vector.broadcast %419 : vector<1x80xf32> to vector<16x80xf32>
    %482 = arith.mulf %471, %481 : vector<16x80xf32>
    %483 = arith.addf %480, %482 : vector<16x80xf32>
    %484 = vector.broadcast %419 : vector<1x80xf32> to vector<16x80xf32>
    %485 = arith.mulf %471, %484 : vector<16x80xf32>
    %486 = vector.broadcast %426 : vector<1x80xf32> to vector<16x80xf32>
    %487 = arith.mulf %473, %486 : vector<16x80xf32>
    %488 = arith.addf %485, %487 : vector<16x80xf32>
    %489 = vector.broadcast %433 : vector<1x80xf32> to vector<16x80xf32>
    %490 = arith.mulf %475, %489 : vector<16x80xf32>
    %491 = arith.addf %488, %490 : vector<16x80xf32>
    %492 = vector.broadcast %426 : vector<1x80xf32> to vector<16x80xf32>
    %493 = arith.mulf %483, %492 : vector<16x80xf32>
    %494 = arith.addf %461, %493 : vector<16x80xf32>
    %495 = vector.broadcast %426 : vector<1x80xf32> to vector<16x80xf32>
    %496 = arith.mulf %471, %495 : vector<16x80xf32>
    %497 = arith.addf %463, %496 : vector<16x80xf32>
    %498 = vector.broadcast %426 : vector<1x80xf32> to vector<16x80xf32>
    %499 = arith.mulf %491, %498 : vector<16x80xf32>
    %500 = arith.addf %465, %499 : vector<16x80xf32>
    %c0_302 = arith.constant 0 : index
    %c2_303 = arith.constant 2 : index
    %c0_304 = arith.constant 0 : index
    %c10_305 = arith.constant 10 : index
    %501 = vector.load %arg1[%c0_302, %c2_303, %c0_304, %c10_305] : memref<1x4x16x102xf32, #tpu.memory_space<vmem>>, vector<1x1x16x80xf32>
    %502 = vector.shape_cast %501 : vector<1x1x16x80xf32> to vector<16x80xf32>
    %c0_306 = arith.constant 0 : index
    %c3_307 = arith.constant 3 : index
    %c0_308 = arith.constant 0 : index
    %c10_309 = arith.constant 10 : index
    %503 = vector.load %arg1[%c0_306, %c3_307, %c0_308, %c10_309] : memref<1x4x16x102xf32, #tpu.memory_space<vmem>>, vector<1x1x16x80xf32>
    %504 = vector.shape_cast %503 : vector<1x1x16x80xf32> to vector<16x80xf32>
    %c0_310 = arith.constant 0 : index
    %c2_311 = arith.constant 2 : index
    %c0_312 = arith.constant 0 : index
    %c11_313 = arith.constant 11 : index
    %505 = vector.load %arg1[%c0_310, %c2_311, %c0_312, %c11_313] : memref<1x4x16x102xf32, #tpu.memory_space<vmem>>, vector<1x1x16x80xf32>
    %506 = vector.shape_cast %505 : vector<1x1x16x80xf32> to vector<16x80xf32>
    %c0_314 = arith.constant 0 : index
    %c3_315 = arith.constant 3 : index
    %c0_316 = arith.constant 0 : index
    %c11_317 = arith.constant 11 : index
    %507 = vector.load %arg1[%c0_314, %c3_315, %c0_316, %c11_317] : memref<1x4x16x102xf32, #tpu.memory_space<vmem>>, vector<1x1x16x80xf32>
    %508 = vector.shape_cast %507 : vector<1x1x16x80xf32> to vector<16x80xf32>
    %c0_318 = arith.constant 0 : index
    %c2_319 = arith.constant 2 : index
    %c0_320 = arith.constant 0 : index
    %c12_321 = arith.constant 12 : index
    %509 = vector.load %arg1[%c0_318, %c2_319, %c0_320, %c12_321] : memref<1x4x16x102xf32, #tpu.memory_space<vmem>>, vector<1x1x16x80xf32>
    %510 = vector.shape_cast %509 : vector<1x1x16x80xf32> to vector<16x80xf32>
    %511 = vector.broadcast %433 : vector<1x80xf32> to vector<16x80xf32>
    %512 = arith.mulf %502, %511 : vector<16x80xf32>
    %513 = vector.broadcast %426 : vector<1x80xf32> to vector<16x80xf32>
    %514 = arith.mulf %504, %513 : vector<16x80xf32>
    %515 = arith.addf %512, %514 : vector<16x80xf32>
    %516 = vector.broadcast %419 : vector<1x80xf32> to vector<16x80xf32>
    %517 = arith.mulf %506, %516 : vector<16x80xf32>
    %518 = arith.addf %515, %517 : vector<16x80xf32>
    %519 = vector.broadcast %419 : vector<1x80xf32> to vector<16x80xf32>
    %520 = arith.mulf %506, %519 : vector<16x80xf32>
    %521 = vector.broadcast %426 : vector<1x80xf32> to vector<16x80xf32>
    %522 = arith.mulf %508, %521 : vector<16x80xf32>
    %523 = arith.addf %520, %522 : vector<16x80xf32>
    %524 = vector.broadcast %433 : vector<1x80xf32> to vector<16x80xf32>
    %525 = arith.mulf %510, %524 : vector<16x80xf32>
    %526 = arith.addf %523, %525 : vector<16x80xf32>
    %527 = vector.broadcast %419 : vector<1x80xf32> to vector<16x80xf32>
    %528 = arith.mulf %518, %527 : vector<16x80xf32>
    %529 = arith.addf %494, %528 : vector<16x80xf32>
    %530 = vector.broadcast %419 : vector<1x80xf32> to vector<16x80xf32>
    %531 = arith.mulf %506, %530 : vector<16x80xf32>
    %532 = arith.addf %497, %531 : vector<16x80xf32>
    %533 = vector.broadcast %419 : vector<1x80xf32> to vector<16x80xf32>
    %534 = arith.mulf %526, %533 : vector<16x80xf32>
    %535 = arith.addf %500, %534 : vector<16x80xf32>
    %c0_322 = arith.constant 0 : index
    %c0_323 = arith.constant 0 : index
    %c0_324 = arith.constant 0 : index
    %c20_325 = arith.constant 20 : index
    %536 = vector.load %arg1[%c0_322, %c0_323, %c0_324, %c20_325] : memref<1x4x16x102xf32, #tpu.memory_space<vmem>>, vector<1x1x16x80xf32>
    %537 = vector.shape_cast %536 : vector<1x1x16x80xf32> to vector<16x80xf32>
    %c0_326 = arith.constant 0 : index
    %c1_327 = arith.constant 1 : index
    %c0_328 = arith.constant 0 : index
    %c20_329 = arith.constant 20 : index
    %538 = vector.load %arg1[%c0_326, %c1_327, %c0_328, %c20_329] : memref<1x4x16x102xf32, #tpu.memory_space<vmem>>, vector<1x1x16x80xf32>
    %539 = vector.shape_cast %538 : vector<1x1x16x80xf32> to vector<16x80xf32>
    %c0_330 = arith.constant 0 : index
    %c0_331 = arith.constant 0 : index
    %c0_332 = arith.constant 0 : index
    %c21_333 = arith.constant 21 : index
    %540 = vector.load %arg1[%c0_330, %c0_331, %c0_332, %c21_333] : memref<1x4x16x102xf32, #tpu.memory_space<vmem>>, vector<1x1x16x80xf32>
    %541 = vector.shape_cast %540 : vector<1x1x16x80xf32> to vector<16x80xf32>
    %c0_334 = arith.constant 0 : index
    %c1_335 = arith.constant 1 : index
    %c0_336 = arith.constant 0 : index
    %c21_337 = arith.constant 21 : index
    %542 = vector.load %arg1[%c0_334, %c1_335, %c0_336, %c21_337] : memref<1x4x16x102xf32, #tpu.memory_space<vmem>>, vector<1x1x16x80xf32>
    %543 = vector.shape_cast %542 : vector<1x1x16x80xf32> to vector<16x80xf32>
    %c0_338 = arith.constant 0 : index
    %c0_339 = arith.constant 0 : index
    %c0_340 = arith.constant 0 : index
    %c22_341 = arith.constant 22 : index
    %544 = vector.load %arg1[%c0_338, %c0_339, %c0_340, %c22_341] : memref<1x4x16x102xf32, #tpu.memory_space<vmem>>, vector<1x1x16x80xf32>
    %545 = vector.shape_cast %544 : vector<1x1x16x80xf32> to vector<16x80xf32>
    %546 = vector.broadcast %433 : vector<1x80xf32> to vector<16x80xf32>
    %547 = arith.mulf %537, %546 : vector<16x80xf32>
    %548 = vector.broadcast %426 : vector<1x80xf32> to vector<16x80xf32>
    %549 = arith.mulf %539, %548 : vector<16x80xf32>
    %550 = arith.addf %547, %549 : vector<16x80xf32>
    %551 = vector.broadcast %419 : vector<1x80xf32> to vector<16x80xf32>
    %552 = arith.mulf %541, %551 : vector<16x80xf32>
    %553 = arith.addf %550, %552 : vector<16x80xf32>
    %554 = vector.broadcast %419 : vector<1x80xf32> to vector<16x80xf32>
    %555 = arith.mulf %541, %554 : vector<16x80xf32>
    %556 = vector.broadcast %426 : vector<1x80xf32> to vector<16x80xf32>
    %557 = arith.mulf %543, %556 : vector<16x80xf32>
    %558 = arith.addf %555, %557 : vector<16x80xf32>
    %559 = vector.broadcast %433 : vector<1x80xf32> to vector<16x80xf32>
    %560 = arith.mulf %545, %559 : vector<16x80xf32>
    %561 = arith.addf %558, %560 : vector<16x80xf32>
    %562 = vector.broadcast %426 : vector<1x80xf32> to vector<16x80xf32>
    %563 = arith.mulf %553, %562 : vector<16x80xf32>
    %564 = arith.addf %528, %563 : vector<16x80xf32>
    %565 = vector.broadcast %426 : vector<1x80xf32> to vector<16x80xf32>
    %566 = arith.mulf %541, %565 : vector<16x80xf32>
    %567 = arith.addf %531, %566 : vector<16x80xf32>
    %568 = vector.broadcast %426 : vector<1x80xf32> to vector<16x80xf32>
    %569 = arith.mulf %561, %568 : vector<16x80xf32>
    %570 = arith.addf %534, %569 : vector<16x80xf32>
    %c0_342 = arith.constant 0 : index
    %c2_343 = arith.constant 2 : index
    %c0_344 = arith.constant 0 : index
    %c20_345 = arith.constant 20 : index
    %571 = vector.load %arg1[%c0_342, %c2_343, %c0_344, %c20_345] : memref<1x4x16x102xf32, #tpu.memory_space<vmem>>, vector<1x1x16x80xf32>
    %572 = vector.shape_cast %571 : vector<1x1x16x80xf32> to vector<16x80xf32>
    %c0_346 = arith.constant 0 : index
    %c3_347 = arith.constant 3 : index
    %c0_348 = arith.constant 0 : index
    %c20_349 = arith.constant 20 : index
    %573 = vector.load %arg1[%c0_346, %c3_347, %c0_348, %c20_349] : memref<1x4x16x102xf32, #tpu.memory_space<vmem>>, vector<1x1x16x80xf32>
    %574 = vector.shape_cast %573 : vector<1x1x16x80xf32> to vector<16x80xf32>
    %c0_350 = arith.constant 0 : index
    %c2_351 = arith.constant 2 : index
    %c0_352 = arith.constant 0 : index
    %c21_353 = arith.constant 21 : index
    %575 = vector.load %arg1[%c0_350, %c2_351, %c0_352, %c21_353] : memref<1x4x16x102xf32, #tpu.memory_space<vmem>>, vector<1x1x16x80xf32>
    %576 = vector.shape_cast %575 : vector<1x1x16x80xf32> to vector<16x80xf32>
    %c0_354 = arith.constant 0 : index
    %c3_355 = arith.constant 3 : index
    %c0_356 = arith.constant 0 : index
    %c21_357 = arith.constant 21 : index
    %577 = vector.load %arg1[%c0_354, %c3_355, %c0_356, %c21_357] : memref<1x4x16x102xf32, #tpu.memory_space<vmem>>, vector<1x1x16x80xf32>
    %578 = vector.shape_cast %577 : vector<1x1x16x80xf32> to vector<16x80xf32>
    %c0_358 = arith.constant 0 : index
    %c2_359 = arith.constant 2 : index
    %c0_360 = arith.constant 0 : index
    %c22_361 = arith.constant 22 : index
    %579 = vector.load %arg1[%c0_358, %c2_359, %c0_360, %c22_361] : memref<1x4x16x102xf32, #tpu.memory_space<vmem>>, vector<1x1x16x80xf32>
    %580 = vector.shape_cast %579 : vector<1x1x16x80xf32> to vector<16x80xf32>
    %581 = vector.broadcast %433 : vector<1x80xf32> to vector<16x80xf32>
    %582 = arith.mulf %572, %581 : vector<16x80xf32>
    %583 = vector.broadcast %426 : vector<1x80xf32> to vector<16x80xf32>
    %584 = arith.mulf %574, %583 : vector<16x80xf32>
    %585 = arith.addf %582, %584 : vector<16x80xf32>
    %586 = vector.broadcast %419 : vector<1x80xf32> to vector<16x80xf32>
    %587 = arith.mulf %576, %586 : vector<16x80xf32>
    %588 = arith.addf %585, %587 : vector<16x80xf32>
    %589 = vector.broadcast %419 : vector<1x80xf32> to vector<16x80xf32>
    %590 = arith.mulf %576, %589 : vector<16x80xf32>
    %591 = vector.broadcast %426 : vector<1x80xf32> to vector<16x80xf32>
    %592 = arith.mulf %578, %591 : vector<16x80xf32>
    %593 = arith.addf %590, %592 : vector<16x80xf32>
    %594 = vector.broadcast %433 : vector<1x80xf32> to vector<16x80xf32>
    %595 = arith.mulf %580, %594 : vector<16x80xf32>
    %596 = arith.addf %593, %595 : vector<16x80xf32>
    %597 = vector.broadcast %433 : vector<1x80xf32> to vector<16x80xf32>
    %598 = arith.mulf %588, %597 : vector<16x80xf32>
    %599 = arith.addf %564, %598 : vector<16x80xf32>
    %600 = vector.broadcast %433 : vector<1x80xf32> to vector<16x80xf32>
    %601 = arith.mulf %576, %600 : vector<16x80xf32>
    %602 = arith.addf %567, %601 : vector<16x80xf32>
    %603 = vector.broadcast %433 : vector<1x80xf32> to vector<16x80xf32>
    %604 = arith.mulf %596, %603 : vector<16x80xf32>
    %605 = arith.addf %570, %604 : vector<16x80xf32>
    %c0_362 = arith.constant 0 : index
    %c0_363 = arith.constant 0 : index
    %606 = vector.load %arg6[%c0_362, %c0_363] : memref<144x80xf32, #tpu.memory_space<vmem>>, vector<16x80xf32>
    tpu.vector_store %arg6[%c0_362, %c0_363], %529 {strides = array<i32>} : memref<144x80xf32, #tpu.memory_space<vmem>>, vector<16x80xf32>,
    %c16_364 = arith.constant 16 : index
    %c0_365 = arith.constant 0 : index
    %607 = vector.load %arg6[%c16_364, %c0_365] : memref<144x80xf32, #tpu.memory_space<vmem>>, vector<16x80xf32>
    tpu.vector_store %arg6[%c16_364, %c0_365], %532 {strides = array<i32>} : memref<144x80xf32, #tpu.memory_space<vmem>>, vector<16x80xf32>,
    %c32_366 = arith.constant 32 : index
    %c0_367 = arith.constant 0 : index
    %608 = vector.load %arg6[%c32_366, %c0_367] : memref<144x80xf32, #tpu.memory_space<vmem>>, vector<16x80xf32>
    tpu.vector_store %arg6[%c32_366, %c0_367], %535 {strides = array<i32>} : memref<144x80xf32, #tpu.memory_space<vmem>>, vector<16x80xf32>,
    %c48_368 = arith.constant 48 : index
    %c0_369 = arith.constant 0 : index
    %609 = vector.load %arg6[%c48_368, %c0_369] : memref<144x80xf32, #tpu.memory_space<vmem>>, vector<16x80xf32>
    tpu.vector_store %arg6[%c48_368, %c0_369], %518 {strides = array<i32>} : memref<144x80xf32, #tpu.memory_space<vmem>>, vector<16x80xf32>,
    %c64_370 = arith.constant 64 : index
    %c0_371 = arith.constant 0 : index
    %610 = vector.load %arg6[%c64_370, %c0_371] : memref<144x80xf32, #tpu.memory_space<vmem>>, vector<16x80xf32>
    tpu.vector_store %arg6[%c64_370, %c0_371], %506 {strides = array<i32>} : memref<144x80xf32, #tpu.memory_space<vmem>>, vector<16x80xf32>,
    %c80_372 = arith.constant 80 : index
    %c0_373 = arith.constant 0 : index
    %611 = vector.load %arg6[%c80_372, %c0_373] : memref<144x80xf32, #tpu.memory_space<vmem>>, vector<16x80xf32>
    tpu.vector_store %arg6[%c80_372, %c0_373], %526 {strides = array<i32>} : memref<144x80xf32, #tpu.memory_space<vmem>>, vector<16x80xf32>,
    %c96_374 = arith.constant 96 : index
    %c0_375 = arith.constant 0 : index
    %612 = vector.load %arg6[%c96_374, %c0_375] : memref<144x80xf32, #tpu.memory_space<vmem>>, vector<16x80xf32>
    tpu.vector_store %arg6[%c96_374, %c0_375], %599 {strides = array<i32>} : memref<144x80xf32, #tpu.memory_space<vmem>>, vector<16x80xf32>,
    %c112_376 = arith.constant 112 : index
    %c0_377 = arith.constant 0 : index
    %613 = vector.load %arg6[%c112_376, %c0_377] : memref<144x80xf32, #tpu.memory_space<vmem>>, vector<16x80xf32>
    tpu.vector_store %arg6[%c112_376, %c0_377], %602 {strides = array<i32>} : memref<144x80xf32, #tpu.memory_space<vmem>>, vector<16x80xf32>,
    %c128_378 = arith.constant 128 : index
    %c0_379 = arith.constant 0 : index
    %614 = vector.load %arg6[%c128_378, %c0_379] : memref<144x80xf32, #tpu.memory_space<vmem>>, vector<16x80xf32>
    tpu.vector_store %arg6[%c128_378, %c0_379], %605 {strides = array<i32>} : memref<144x80xf32, #tpu.memory_space<vmem>>, vector<16x80xf32>,
    %c2_380 = arith.constant 2 : index
    %c0_381 = arith.constant 0 : index
    %c0_382 = arith.constant 0 : index
    %615 = vector.load %arg3[%c2_380, %c0_381, %c0_382] : memref<4x32x144xf32, #tpu.memory_space<vmem>>, vector<1x32x144xf32>
    %616 = vector.shape_cast %615 : vector<1x32x144xf32> to vector<32x144xf32>
    %c0_383 = arith.constant 0 : index
    %c0_384 = arith.constant 0 : index
    %617 = vector.load %arg6[%c0_383, %c0_384] : memref<144x80xf32, #tpu.memory_space<vmem>>, vector<144x80xf32>
    %cst_385 = arith.constant dense<0.000000e+00> : vector<32x80xf32>
    %618 = tpu.matmul %616, %617, %cst_385 {dimension_numbers = #tpu.dot_dimension_numbers<[1], [0], [0], [1], [0, 0, 1, 1], [], []>} : vector<32x144xf32>, vector<144x80xf32>, vector<32x80xf32> -> vector<32x80xf32>
    %619 = arith.addf %412, %618 : vector<32x80xf32>
    %c0_386 = arith.constant 0 : index
    %c3_387 = arith.constant 3 : index
    %c0_388 = arith.constant 0 : index
    %620 = vector.load %arg2[%c0_386, %c3_387, %c0_388] : memref<1x4x80xf32, #tpu.memory_space<vmem>>, vector<1x1x80xf32>
    %621 = vector.shape_cast %620 : vector<1x1x80xf32> to vector<1x80xf32>
    %622 = math.absf %621 : vector<1x80xf32>
    %cst_389 = arith.constant 1.000000e+00 : f32
    %623 = vector.broadcast %cst_389 : f32 to vector<1x80xf32>
    %624 = arith.subf %623, %622 : vector<1x80xf32>
    %cst_390 = arith.constant 0.000000e+00 : f32
    %625 = vector.broadcast %cst_390 : f32 to vector<1x80xf32>
    %626 = arith.maximumf %624, %625 : vector<1x80xf32>
    %cst_391 = arith.constant 1.000000e+00 : f32
    %627 = vector.broadcast %cst_391 : f32 to vector<1x80xf32>
    %628 = arith.subf %621, %627 : vector<1x80xf32>
    %629 = math.absf %628 : vector<1x80xf32>
    %cst_392 = arith.constant 1.000000e+00 : f32
    %630 = vector.broadcast %cst_392 : f32 to vector<1x80xf32>
    %631 = arith.subf %630, %629 : vector<1x80xf32>
    %cst_393 = arith.constant 0.000000e+00 : f32
    %632 = vector.broadcast %cst_393 : f32 to vector<1x80xf32>
    %633 = arith.maximumf %631, %632 : vector<1x80xf32>
    %cst_394 = arith.constant 2.000000e+00 : f32
    %634 = vector.broadcast %cst_394 : f32 to vector<1x80xf32>
    %635 = arith.subf %621, %634 : vector<1x80xf32>
    %636 = math.absf %635 : vector<1x80xf32>
    %cst_395 = arith.constant 1.000000e+00 : f32
    %637 = vector.broadcast %cst_395 : f32 to vector<1x80xf32>
    %638 = arith.subf %637, %636 : vector<1x80xf32>
    %cst_396 = arith.constant 0.000000e+00 : f32
    %639 = vector.broadcast %cst_396 : f32 to vector<1x80xf32>
    %640 = arith.maximumf %638, %639 : vector<1x80xf32>
    %c0_397 = arith.constant 0 : index
    %c3_398 = arith.constant 3 : index
    %c0_399 = arith.constant 0 : index
    %c0_400 = arith.constant 0 : index
    %641 = vector.load %arg1[%c0_397, %c3_398, %c0_399, %c0_400] : memref<1x4x16x102xf32, #tpu.memory_space<vmem>>, vector<1x1x16x80xf32>
    %642 = vector.shape_cast %641 : vector<1x1x16x80xf32> to vector<16x80xf32>
    %c0_401 = arith.constant 0 : index
    %c2_402 = arith.constant 2 : index
    %c0_403 = arith.constant 0 : index
    %c1_404 = arith.constant 1 : index
    %643 = vector.load %arg1[%c0_401, %c2_402, %c0_403, %c1_404] : memref<1x4x16x102xf32, #tpu.memory_space<vmem>>, vector<1x1x16x80xf32>
    %644 = vector.shape_cast %643 : vector<1x1x16x80xf32> to vector<16x80xf32>
    %c0_405 = arith.constant 0 : index
    %c3_406 = arith.constant 3 : index
    %c0_407 = arith.constant 0 : index
    %c1_408 = arith.constant 1 : index
    %645 = vector.load %arg1[%c0_405, %c3_406, %c0_407, %c1_408] : memref<1x4x16x102xf32, #tpu.memory_space<vmem>>, vector<1x1x16x80xf32>
    %646 = vector.shape_cast %645 : vector<1x1x16x80xf32> to vector<16x80xf32>
    %c0_409 = arith.constant 0 : index
    %c2_410 = arith.constant 2 : index
    %c0_411 = arith.constant 0 : index
    %c2_412 = arith.constant 2 : index
    %647 = vector.load %arg1[%c0_409, %c2_410, %c0_411, %c2_412] : memref<1x4x16x102xf32, #tpu.memory_space<vmem>>, vector<1x1x16x80xf32>
    %648 = vector.shape_cast %647 : vector<1x1x16x80xf32> to vector<16x80xf32>
    %c0_413 = arith.constant 0 : index
    %c3_414 = arith.constant 3 : index
    %c0_415 = arith.constant 0 : index
    %c2_416 = arith.constant 2 : index
    %649 = vector.load %arg1[%c0_413, %c3_414, %c0_415, %c2_416] : memref<1x4x16x102xf32, #tpu.memory_space<vmem>>, vector<1x1x16x80xf32>
    %650 = vector.shape_cast %649 : vector<1x1x16x80xf32> to vector<16x80xf32>
    %651 = vector.broadcast %640 : vector<1x80xf32> to vector<16x80xf32>
    %652 = arith.mulf %642, %651 : vector<16x80xf32>
    %653 = vector.broadcast %633 : vector<1x80xf32> to vector<16x80xf32>
    %654 = arith.mulf %644, %653 : vector<16x80xf32>
    %655 = arith.addf %652, %654 : vector<16x80xf32>
    %656 = vector.broadcast %626 : vector<1x80xf32> to vector<16x80xf32>
    %657 = arith.mulf %646, %656 : vector<16x80xf32>
    %658 = arith.addf %655, %657 : vector<16x80xf32>
    %659 = vector.broadcast %626 : vector<1x80xf32> to vector<16x80xf32>
    %660 = arith.mulf %646, %659 : vector<16x80xf32>
    %661 = vector.broadcast %633 : vector<1x80xf32> to vector<16x80xf32>
    %662 = arith.mulf %648, %661 : vector<16x80xf32>
    %663 = arith.addf %660, %662 : vector<16x80xf32>
    %664 = vector.broadcast %640 : vector<1x80xf32> to vector<16x80xf32>
    %665 = arith.mulf %650, %664 : vector<16x80xf32>
    %666 = arith.addf %663, %665 : vector<16x80xf32>
    %667 = vector.broadcast %640 : vector<1x80xf32> to vector<16x80xf32>
    %668 = arith.mulf %658, %667 : vector<16x80xf32>
    %669 = vector.broadcast %640 : vector<1x80xf32> to vector<16x80xf32>
    %670 = arith.mulf %646, %669 : vector<16x80xf32>
    %671 = vector.broadcast %640 : vector<1x80xf32> to vector<16x80xf32>
    %672 = arith.mulf %666, %671 : vector<16x80xf32>
    %c0_417 = arith.constant 0 : index
    %c1_418 = arith.constant 1 : index
    %c0_419 = arith.constant 0 : index
    %c10_420 = arith.constant 10 : index
    %673 = vector.load %arg1[%c0_417, %c1_418, %c0_419, %c10_420] : memref<1x4x16x102xf32, #tpu.memory_space<vmem>>, vector<1x1x16x80xf32>
    %674 = vector.shape_cast %673 : vector<1x1x16x80xf32> to vector<16x80xf32>
    %c0_421 = arith.constant 0 : index
    %c0_422 = arith.constant 0 : index
    %c0_423 = arith.constant 0 : index
    %c11_424 = arith.constant 11 : index
    %675 = vector.load %arg1[%c0_421, %c0_422, %c0_423, %c11_424] : memref<1x4x16x102xf32, #tpu.memory_space<vmem>>, vector<1x1x16x80xf32>
    %676 = vector.shape_cast %675 : vector<1x1x16x80xf32> to vector<16x80xf32>
    %c0_425 = arith.constant 0 : index
    %c1_426 = arith.constant 1 : index
    %c0_427 = arith.constant 0 : index
    %c11_428 = arith.constant 11 : index
    %677 = vector.load %arg1[%c0_425, %c1_426, %c0_427, %c11_428] : memref<1x4x16x102xf32, #tpu.memory_space<vmem>>, vector<1x1x16x80xf32>
    %678 = vector.shape_cast %677 : vector<1x1x16x80xf32> to vector<16x80xf32>
    %c0_429 = arith.constant 0 : index
    %c0_430 = arith.constant 0 : index
    %c0_431 = arith.constant 0 : index
    %c12_432 = arith.constant 12 : index
    %679 = vector.load %arg1[%c0_429, %c0_430, %c0_431, %c12_432] : memref<1x4x16x102xf32, #tpu.memory_space<vmem>>, vector<1x1x16x80xf32>
    %680 = vector.shape_cast %679 : vector<1x1x16x80xf32> to vector<16x80xf32>
    %c0_433 = arith.constant 0 : index
    %c1_434 = arith.constant 1 : index
    %c0_435 = arith.constant 0 : index
    %c12_436 = arith.constant 12 : index
    %681 = vector.load %arg1[%c0_433, %c1_434, %c0_435, %c12_436] : memref<1x4x16x102xf32, #tpu.memory_space<vmem>>, vector<1x1x16x80xf32>
    %682 = vector.shape_cast %681 : vector<1x1x16x80xf32> to vector<16x80xf32>
    %683 = vector.broadcast %640 : vector<1x80xf32> to vector<16x80xf32>
    %684 = arith.mulf %674, %683 : vector<16x80xf32>
    %685 = vector.broadcast %633 : vector<1x80xf32> to vector<16x80xf32>
    %686 = arith.mulf %676, %685 : vector<16x80xf32>
    %687 = arith.addf %684, %686 : vector<16x80xf32>
    %688 = vector.broadcast %626 : vector<1x80xf32> to vector<16x80xf32>
    %689 = arith.mulf %678, %688 : vector<16x80xf32>
    %690 = arith.addf %687, %689 : vector<16x80xf32>
    %691 = vector.broadcast %626 : vector<1x80xf32> to vector<16x80xf32>
    %692 = arith.mulf %678, %691 : vector<16x80xf32>
    %693 = vector.broadcast %633 : vector<1x80xf32> to vector<16x80xf32>
    %694 = arith.mulf %680, %693 : vector<16x80xf32>
    %695 = arith.addf %692, %694 : vector<16x80xf32>
    %696 = vector.broadcast %640 : vector<1x80xf32> to vector<16x80xf32>
    %697 = arith.mulf %682, %696 : vector<16x80xf32>
    %698 = arith.addf %695, %697 : vector<16x80xf32>
    %699 = vector.broadcast %633 : vector<1x80xf32> to vector<16x80xf32>
    %700 = arith.mulf %690, %699 : vector<16x80xf32>
    %701 = arith.addf %668, %700 : vector<16x80xf32>
    %702 = vector.broadcast %633 : vector<1x80xf32> to vector<16x80xf32>
    %703 = arith.mulf %678, %702 : vector<16x80xf32>
    %704 = arith.addf %670, %703 : vector<16x80xf32>
    %705 = vector.broadcast %633 : vector<1x80xf32> to vector<16x80xf32>
    %706 = arith.mulf %698, %705 : vector<16x80xf32>
    %707 = arith.addf %672, %706 : vector<16x80xf32>
    %c0_437 = arith.constant 0 : index
    %c3_438 = arith.constant 3 : index
    %c0_439 = arith.constant 0 : index
    %c10_440 = arith.constant 10 : index
    %708 = vector.load %arg1[%c0_437, %c3_438, %c0_439, %c10_440] : memref<1x4x16x102xf32, #tpu.memory_space<vmem>>, vector<1x1x16x80xf32>
    %709 = vector.shape_cast %708 : vector<1x1x16x80xf32> to vector<16x80xf32>
    %c0_441 = arith.constant 0 : index
    %c2_442 = arith.constant 2 : index
    %c0_443 = arith.constant 0 : index
    %c11_444 = arith.constant 11 : index
    %710 = vector.load %arg1[%c0_441, %c2_442, %c0_443, %c11_444] : memref<1x4x16x102xf32, #tpu.memory_space<vmem>>, vector<1x1x16x80xf32>
    %711 = vector.shape_cast %710 : vector<1x1x16x80xf32> to vector<16x80xf32>
    %c0_445 = arith.constant 0 : index
    %c3_446 = arith.constant 3 : index
    %c0_447 = arith.constant 0 : index
    %c11_448 = arith.constant 11 : index
    %712 = vector.load %arg1[%c0_445, %c3_446, %c0_447, %c11_448] : memref<1x4x16x102xf32, #tpu.memory_space<vmem>>, vector<1x1x16x80xf32>
    %713 = vector.shape_cast %712 : vector<1x1x16x80xf32> to vector<16x80xf32>
    %c0_449 = arith.constant 0 : index
    %c2_450 = arith.constant 2 : index
    %c0_451 = arith.constant 0 : index
    %c12_452 = arith.constant 12 : index
    %714 = vector.load %arg1[%c0_449, %c2_450, %c0_451, %c12_452] : memref<1x4x16x102xf32, #tpu.memory_space<vmem>>, vector<1x1x16x80xf32>
    %715 = vector.shape_cast %714 : vector<1x1x16x80xf32> to vector<16x80xf32>
    %c0_453 = arith.constant 0 : index
    %c3_454 = arith.constant 3 : index
    %c0_455 = arith.constant 0 : index
    %c12_456 = arith.constant 12 : index
    %716 = vector.load %arg1[%c0_453, %c3_454, %c0_455, %c12_456] : memref<1x4x16x102xf32, #tpu.memory_space<vmem>>, vector<1x1x16x80xf32>
    %717 = vector.shape_cast %716 : vector<1x1x16x80xf32> to vector<16x80xf32>
    %718 = vector.broadcast %640 : vector<1x80xf32> to vector<16x80xf32>
    %719 = arith.mulf %709, %718 : vector<16x80xf32>
    %720 = vector.broadcast %633 : vector<1x80xf32> to vector<16x80xf32>
    %721 = arith.mulf %711, %720 : vector<16x80xf32>
    %722 = arith.addf %719, %721 : vector<16x80xf32>
    %723 = vector.broadcast %626 : vector<1x80xf32> to vector<16x80xf32>
    %724 = arith.mulf %713, %723 : vector<16x80xf32>
    %725 = arith.addf %722, %724 : vector<16x80xf32>
    %726 = vector.broadcast %626 : vector<1x80xf32> to vector<16x80xf32>
    %727 = arith.mulf %713, %726 : vector<16x80xf32>
    %728 = vector.broadcast %633 : vector<1x80xf32> to vector<16x80xf32>
    %729 = arith.mulf %715, %728 : vector<16x80xf32>
    %730 = arith.addf %727, %729 : vector<16x80xf32>
    %731 = vector.broadcast %640 : vector<1x80xf32> to vector<16x80xf32>
    %732 = arith.mulf %717, %731 : vector<16x80xf32>
    %733 = arith.addf %730, %732 : vector<16x80xf32>
    %734 = vector.broadcast %626 : vector<1x80xf32> to vector<16x80xf32>
    %735 = arith.mulf %725, %734 : vector<16x80xf32>
    %736 = arith.addf %701, %735 : vector<16x80xf32>
    %737 = vector.broadcast %626 : vector<1x80xf32> to vector<16x80xf32>
    %738 = arith.mulf %713, %737 : vector<16x80xf32>
    %739 = arith.addf %704, %738 : vector<16x80xf32>
    %740 = vector.broadcast %626 : vector<1x80xf32> to vector<16x80xf32>
    %741 = arith.mulf %733, %740 : vector<16x80xf32>
    %742 = arith.addf %707, %741 : vector<16x80xf32>
    %c0_457 = arith.constant 0 : index
    %c1_458 = arith.constant 1 : index
    %c0_459 = arith.constant 0 : index
    %c20_460 = arith.constant 20 : index
    %743 = vector.load %arg1[%c0_457, %c1_458, %c0_459, %c20_460] : memref<1x4x16x102xf32, #tpu.memory_space<vmem>>, vector<1x1x16x80xf32>
    %744 = vector.shape_cast %743 : vector<1x1x16x80xf32> to vector<16x80xf32>
    %c0_461 = arith.constant 0 : index
    %c0_462 = arith.constant 0 : index
    %c0_463 = arith.constant 0 : index
    %c21_464 = arith.constant 21 : index
    %745 = vector.load %arg1[%c0_461, %c0_462, %c0_463, %c21_464] : memref<1x4x16x102xf32, #tpu.memory_space<vmem>>, vector<1x1x16x80xf32>
    %746 = vector.shape_cast %745 : vector<1x1x16x80xf32> to vector<16x80xf32>
    %c0_465 = arith.constant 0 : index
    %c1_466 = arith.constant 1 : index
    %c0_467 = arith.constant 0 : index
    %c21_468 = arith.constant 21 : index
    %747 = vector.load %arg1[%c0_465, %c1_466, %c0_467, %c21_468] : memref<1x4x16x102xf32, #tpu.memory_space<vmem>>, vector<1x1x16x80xf32>
    %748 = vector.shape_cast %747 : vector<1x1x16x80xf32> to vector<16x80xf32>
    %c0_469 = arith.constant 0 : index
    %c0_470 = arith.constant 0 : index
    %c0_471 = arith.constant 0 : index
    %c22_472 = arith.constant 22 : index
    %749 = vector.load %arg1[%c0_469, %c0_470, %c0_471, %c22_472] : memref<1x4x16x102xf32, #tpu.memory_space<vmem>>, vector<1x1x16x80xf32>
    %750 = vector.shape_cast %749 : vector<1x1x16x80xf32> to vector<16x80xf32>
    %c0_473 = arith.constant 0 : index
    %c1_474 = arith.constant 1 : index
    %c0_475 = arith.constant 0 : index
    %c22_476 = arith.constant 22 : index
    %751 = vector.load %arg1[%c0_473, %c1_474, %c0_475, %c22_476] : memref<1x4x16x102xf32, #tpu.memory_space<vmem>>, vector<1x1x16x80xf32>
    %752 = vector.shape_cast %751 : vector<1x1x16x80xf32> to vector<16x80xf32>
    %753 = vector.broadcast %640 : vector<1x80xf32> to vector<16x80xf32>
    %754 = arith.mulf %744, %753 : vector<16x80xf32>
    %755 = vector.broadcast %633 : vector<1x80xf32> to vector<16x80xf32>
    %756 = arith.mulf %746, %755 : vector<16x80xf32>
    %757 = arith.addf %754, %756 : vector<16x80xf32>
    %758 = vector.broadcast %626 : vector<1x80xf32> to vector<16x80xf32>
    %759 = arith.mulf %748, %758 : vector<16x80xf32>
    %760 = arith.addf %757, %759 : vector<16x80xf32>
    %761 = vector.broadcast %626 : vector<1x80xf32> to vector<16x80xf32>
    %762 = arith.mulf %748, %761 : vector<16x80xf32>
    %763 = vector.broadcast %633 : vector<1x80xf32> to vector<16x80xf32>
    %764 = arith.mulf %750, %763 : vector<16x80xf32>
    %765 = arith.addf %762, %764 : vector<16x80xf32>
    %766 = vector.broadcast %640 : vector<1x80xf32> to vector<16x80xf32>
    %767 = arith.mulf %752, %766 : vector<16x80xf32>
    %768 = arith.addf %765, %767 : vector<16x80xf32>
    %769 = vector.broadcast %633 : vector<1x80xf32> to vector<16x80xf32>
    %770 = arith.mulf %760, %769 : vector<16x80xf32>
    %771 = arith.addf %735, %770 : vector<16x80xf32>
    %772 = vector.broadcast %633 : vector<1x80xf32> to vector<16x80xf32>
    %773 = arith.mulf %748, %772 : vector<16x80xf32>
    %774 = arith.addf %738, %773 : vector<16x80xf32>
    %775 = vector.broadcast %633 : vector<1x80xf32> to vector<16x80xf32>
    %776 = arith.mulf %768, %775 : vector<16x80xf32>
    %777 = arith.addf %741, %776 : vector<16x80xf32>
    %c0_477 = arith.constant 0 : index
    %c3_478 = arith.constant 3 : index
    %c0_479 = arith.constant 0 : index
    %c20_480 = arith.constant 20 : index
    %778 = vector.load %arg1[%c0_477, %c3_478, %c0_479, %c20_480] : memref<1x4x16x102xf32, #tpu.memory_space<vmem>>, vector<1x1x16x80xf32>
    %779 = vector.shape_cast %778 : vector<1x1x16x80xf32> to vector<16x80xf32>
    %c0_481 = arith.constant 0 : index
    %c2_482 = arith.constant 2 : index
    %c0_483 = arith.constant 0 : index
    %c21_484 = arith.constant 21 : index
    %780 = vector.load %arg1[%c0_481, %c2_482, %c0_483, %c21_484] : memref<1x4x16x102xf32, #tpu.memory_space<vmem>>, vector<1x1x16x80xf32>
    %781 = vector.shape_cast %780 : vector<1x1x16x80xf32> to vector<16x80xf32>
    %c0_485 = arith.constant 0 : index
    %c3_486 = arith.constant 3 : index
    %c0_487 = arith.constant 0 : index
    %c21_488 = arith.constant 21 : index
    %782 = vector.load %arg1[%c0_485, %c3_486, %c0_487, %c21_488] : memref<1x4x16x102xf32, #tpu.memory_space<vmem>>, vector<1x1x16x80xf32>
    %783 = vector.shape_cast %782 : vector<1x1x16x80xf32> to vector<16x80xf32>
    %c0_489 = arith.constant 0 : index
    %c2_490 = arith.constant 2 : index
    %c0_491 = arith.constant 0 : index
    %c22_492 = arith.constant 22 : index
    %784 = vector.load %arg1[%c0_489, %c2_490, %c0_491, %c22_492] : memref<1x4x16x102xf32, #tpu.memory_space<vmem>>, vector<1x1x16x80xf32>
    %785 = vector.shape_cast %784 : vector<1x1x16x80xf32> to vector<16x80xf32>
    %c0_493 = arith.constant 0 : index
    %c3_494 = arith.constant 3 : index
    %c0_495 = arith.constant 0 : index
    %c22_496 = arith.constant 22 : index
    %786 = vector.load %arg1[%c0_493, %c3_494, %c0_495, %c22_496] : memref<1x4x16x102xf32, #tpu.memory_space<vmem>>, vector<1x1x16x80xf32>
    %787 = vector.shape_cast %786 : vector<1x1x16x80xf32> to vector<16x80xf32>
    %788 = vector.broadcast %640 : vector<1x80xf32> to vector<16x80xf32>
    %789 = arith.mulf %779, %788 : vector<16x80xf32>
    %790 = vector.broadcast %633 : vector<1x80xf32> to vector<16x80xf32>
    %791 = arith.mulf %781, %790 : vector<16x80xf32>
    %792 = arith.addf %789, %791 : vector<16x80xf32>
    %793 = vector.broadcast %626 : vector<1x80xf32> to vector<16x80xf32>
    %794 = arith.mulf %783, %793 : vector<16x80xf32>
    %795 = arith.addf %792, %794 : vector<16x80xf32>
    %796 = vector.broadcast %626 : vector<1x80xf32> to vector<16x80xf32>
    %797 = arith.mulf %783, %796 : vector<16x80xf32>
    %798 = vector.broadcast %633 : vector<1x80xf32> to vector<16x80xf32>
    %799 = arith.mulf %785, %798 : vector<16x80xf32>
    %800 = arith.addf %797, %799 : vector<16x80xf32>
    %801 = vector.broadcast %640 : vector<1x80xf32> to vector<16x80xf32>
    %802 = arith.mulf %787, %801 : vector<16x80xf32>
    %803 = arith.addf %800, %802 : vector<16x80xf32>
    %804 = vector.broadcast %640 : vector<1x80xf32> to vector<16x80xf32>
    %805 = arith.mulf %795, %804 : vector<16x80xf32>
    %806 = arith.addf %771, %805 : vector<16x80xf32>
    %807 = vector.broadcast %640 : vector<1x80xf32> to vector<16x80xf32>
    %808 = arith.mulf %783, %807 : vector<16x80xf32>
    %809 = arith.addf %774, %808 : vector<16x80xf32>
    %810 = vector.broadcast %640 : vector<1x80xf32> to vector<16x80xf32>
    %811 = arith.mulf %803, %810 : vector<16x80xf32>
    %812 = arith.addf %777, %811 : vector<16x80xf32>
    %c0_497 = arith.constant 0 : index
    %c0_498 = arith.constant 0 : index
    %813 = vector.load %arg6[%c0_497, %c0_498] : memref<144x80xf32, #tpu.memory_space<vmem>>, vector<16x80xf32>
    tpu.vector_store %arg6[%c0_497, %c0_498], %736 {strides = array<i32>} : memref<144x80xf32, #tpu.memory_space<vmem>>, vector<16x80xf32>,
    %c16_499 = arith.constant 16 : index
    %c0_500 = arith.constant 0 : index
    %814 = vector.load %arg6[%c16_499, %c0_500] : memref<144x80xf32, #tpu.memory_space<vmem>>, vector<16x80xf32>
    tpu.vector_store %arg6[%c16_499, %c0_500], %739 {strides = array<i32>} : memref<144x80xf32, #tpu.memory_space<vmem>>, vector<16x80xf32>,
    %c32_501 = arith.constant 32 : index
    %c0_502 = arith.constant 0 : index
    %815 = vector.load %arg6[%c32_501, %c0_502] : memref<144x80xf32, #tpu.memory_space<vmem>>, vector<16x80xf32>
    tpu.vector_store %arg6[%c32_501, %c0_502], %742 {strides = array<i32>} : memref<144x80xf32, #tpu.memory_space<vmem>>, vector<16x80xf32>,
    %c48_503 = arith.constant 48 : index
    %c0_504 = arith.constant 0 : index
    %816 = vector.load %arg6[%c48_503, %c0_504] : memref<144x80xf32, #tpu.memory_space<vmem>>, vector<16x80xf32>
    tpu.vector_store %arg6[%c48_503, %c0_504], %725 {strides = array<i32>} : memref<144x80xf32, #tpu.memory_space<vmem>>, vector<16x80xf32>,
    %c64_505 = arith.constant 64 : index
    %c0_506 = arith.constant 0 : index
    %817 = vector.load %arg6[%c64_505, %c0_506] : memref<144x80xf32, #tpu.memory_space<vmem>>, vector<16x80xf32>
    tpu.vector_store %arg6[%c64_505, %c0_506], %713 {strides = array<i32>} : memref<144x80xf32, #tpu.memory_space<vmem>>, vector<16x80xf32>,
    %c80_507 = arith.constant 80 : index
    %c0_508 = arith.constant 0 : index
    %818 = vector.load %arg6[%c80_507, %c0_508] : memref<144x80xf32, #tpu.memory_space<vmem>>, vector<16x80xf32>
    tpu.vector_store %arg6[%c80_507, %c0_508], %733 {strides = array<i32>} : memref<144x80xf32, #tpu.memory_space<vmem>>, vector<16x80xf32>,
    %c96_509 = arith.constant 96 : index
    %c0_510 = arith.constant 0 : index
    %819 = vector.load %arg6[%c96_509, %c0_510] : memref<144x80xf32, #tpu.memory_space<vmem>>, vector<16x80xf32>
    tpu.vector_store %arg6[%c96_509, %c0_510], %806 {strides = array<i32>} : memref<144x80xf32, #tpu.memory_space<vmem>>, vector<16x80xf32>,
    %c112_511 = arith.constant 112 : index
    %c0_512 = arith.constant 0 : index
    %820 = vector.load %arg6[%c112_511, %c0_512] : memref<144x80xf32, #tpu.memory_space<vmem>>, vector<16x80xf32>
    tpu.vector_store %arg6[%c112_511, %c0_512], %809 {strides = array<i32>} : memref<144x80xf32, #tpu.memory_space<vmem>>, vector<16x80xf32>,
    %c128_513 = arith.constant 128 : index
    %c0_514 = arith.constant 0 : index
    %821 = vector.load %arg6[%c128_513, %c0_514] : memref<144x80xf32, #tpu.memory_space<vmem>>, vector<16x80xf32>
    tpu.vector_store %arg6[%c128_513, %c0_514], %812 {strides = array<i32>} : memref<144x80xf32, #tpu.memory_space<vmem>>, vector<16x80xf32>,
    %c3_515 = arith.constant 3 : index
    %c0_516 = arith.constant 0 : index
    %c0_517 = arith.constant 0 : index
    %822 = vector.load %arg3[%c3_515, %c0_516, %c0_517] : memref<4x32x144xf32, #tpu.memory_space<vmem>>, vector<1x32x144xf32>
    %823 = vector.shape_cast %822 : vector<1x32x144xf32> to vector<32x144xf32>
    %c0_518 = arith.constant 0 : index
    %c0_519 = arith.constant 0 : index
    %824 = vector.load %arg6[%c0_518, %c0_519] : memref<144x80xf32, #tpu.memory_space<vmem>>, vector<144x80xf32>
    %cst_520 = arith.constant dense<0.000000e+00> : vector<32x80xf32>
    %825 = tpu.matmul %823, %824, %cst_520 {dimension_numbers = #tpu.dot_dimension_numbers<[1], [0], [0], [1], [0, 0, 1, 1], [], []>} : vector<32x144xf32>, vector<144x80xf32>, vector<32x80xf32> -> vector<32x80xf32>
    %826 = arith.addf %619, %825 : vector<32x80xf32>
    %c0_521 = arith.constant 0 : index
    %c0_522 = arith.constant 0 : index
    %827 = vector.load %arg4[%c0_521, %c0_522] : memref<32x1xf32, #tpu.memory_space<vmem>>, vector<32x1xf32>
    %828 = vector.broadcast %827 : vector<32x1xf32> to vector<32x80xf32>
    %829 = arith.addf %826, %828 : vector<32x80xf32>
    %cst_523 = arith.constant 0.000000e+00 : f32
    %830 = vector.broadcast %cst_523 : f32 to vector<32x80xf32>
    %831 = arith.maximumf %829, %830 : vector<32x80xf32>
    %c0_524 = arith.constant 0 : index
    %c0_525 = arith.constant 0 : index
    %c0_526 = arith.constant 0 : index
    %832 = vector.load %arg5[%c0_524, %c0_525, %c0_526] : memref<1x32x80xf32, #tpu.memory_space<vmem>>, vector<1x32x80xf32>
    %833 = vector.shape_cast %832 : vector<1x32x80xf32> to vector<32x80xf32>
    %834 = vector.shape_cast %831 : vector<32x80xf32> to vector<1x32x80xf32>
    tpu.vector_store %arg5[%c0_524, %c0_525, %c0_526], %834 {strides = array<i32>} : memref<1x32x80xf32, #tpu.memory_space<vmem>>, vector<1x32x80xf32>,
    return
  }
  func.func @transform_0(%arg0: i32) -> (i32, i32, i32, i32) {
    %c0_i32 = arith.constant 0 : i32
    %c0_i32_0 = arith.constant 0 : i32
    %c0_i32_1 = arith.constant 0 : i32
    %c0_i32_2 = arith.constant 0 : i32
    return %arg0, %c0_i32, %c0_i32_0, %c0_i32_1 : i32, i32, i32, i32
  }
  func.func @transform_1(%arg0: i32) -> (i32, i32, i32) {
    %c0_i32 = arith.constant 0 : i32
    %c0_i32_0 = arith.constant 0 : i32
    %c0_i32_1 = arith.constant 0 : i32
    return %arg0, %c0_i32, %c0_i32_0 : i32, i32, i32
  }
  func.func @transform_2(%arg0: i32) -> (i32, i32, i32) {
    %c0_i32 = arith.constant 0 : i32
    %c0_i32_0 = arith.constant 0 : i32
    %c0_i32_1 = arith.constant 0 : i32
    %c0_i32_2 = arith.constant 0 : i32
    return %c0_i32, %c0_i32_0, %c0_i32_1 : i32, i32, i32
  }
  func.func @transform_3(%arg0: i32) -> (i32, i32) {
    %c0_i32 = arith.constant 0 : i32
    %c0_i32_0 = arith.constant 0 : i32
    %c0_i32_1 = arith.constant 0 : i32
    return %c0_i32, %c0_i32_0 : i32, i32
  }
  func.func @transform_4(%arg0: i32) -> (i32, i32, i32) {
    %c0_i32 = arith.constant 0 : i32
    %c0_i32_0 = arith.constant 0 : i32
    %c0_i32_1 = arith.constant 0 : i32
    return %arg0, %c0_i32, %c0_i32_0 : i32, i32, i32
  }
}

</mosaic_0001>

<bundles_post_ra>
// kernel: feat_scale_net.2
= control target key start
LH: loop header
LB: loop body
LE: loop exit
PB: predicated region body
PF: predicated region fallthrough
CT: control target
= control target key end

     0   :  { %s5016_s29 = smov 0   ;;  %s5716_s0 = inlined_call_operand.vmem [shape: f32[2,17,326], index: 0, kind: input, shape index: {}]   ;;  %s5717_s1 = inlined_call_operand.vmem [shape: f32[1,288], index: 1, kind: input, shape index: {}]   ;;  %s5718_s2 = inlined_call_operand.vmem [shape: f32[9,16,17], index: 2, kind: input, shape index: {}]   ;;  %s5719_s3 = inlined_call_operand.vmem [shape: f32[16,1], index: 3, kind: input, shape index: {}]   ;;  %s5720_s4 = inlined_call_operand.vmem [shape: f32[9,16,16], index: 4, kind: input, shape index: {}]   ;;  %s5721_s5 = inlined_call_operand.vmem [shape: f32[16,1], index: 5, kind: input, shape index: {}]   ;;  %s5722_s6 = inlined_call_operand.vmem [shape: f32[16,1], index: 6, kind: input, shape index: {}]   ;;  %s5723_s7 = inlined_call_operand.<no memory space> [shape: f32[1,1], index: 7, kind: input, shape index: {}]   ;;  %s5724_s8 = inlined_call_operand.vmem [shape: f32[2,1,288], index: 8, kind: output, shape index: {}]  }
   0x1   :  { %v13_v0 = vstv %s5723_s7 }
   0x2   :  { %14 = vst [vmem:[#allocation3] sm:$0x1] %v13_v0 }
   0x3 LB: > { %s4068_s30 = sadd.s32 4294967295, %s4954_s29   ;;  %p4072_p0 = scmp.ge.s32.totalorder %s4954_s29, 1  ;;  %s4954_s29 = sphi %s5016_s29, %s20_s29  }
   0x4   : > { %p264_p1 = scmp.lt.s32.totalorder %s4954_s29, 3 }
   0x6   : > { %p265_p2 = pnand %p4072_p0, %p264_p1 }
   0x7   : > { %p297_p3 = scmp.lt.s32.totalorder (!%p265_p2), %s4068_s30, 1  ;;  %s4956_s12 = smov (!%p265_p2), 127   ;;  %v5055_v11 = vld [vmem:[%s5718_s2 + $0x10] sm:$0xff] (!%p265_p2)  ;;  %vm360_vm0 = vcmask (!%p265_p2), 138240   ;;  %v4957_v17 = vmov (!%p265_p2), 0.0   ;;  %v2118_v18 = vld [vmem:[%s5719_s3] sm:$0xff] (!%p265_p2) }
   0x8   : > { %268 = sbr.rel (%p265_p2) target bundleno = 1070 (0x42e), region = 52  ;;  %4294 = vmatprep.mubr.msk.f32.mxu1 (!%p265_p2), %vm360_vm0, %v5055_v11  ;;  %438 = vmatprep.mubr.f32.mxu0 (!%p265_p2), %v4957_v17  ;;  %s4958_s15 = smov (!%p265_p2), 126   ;;  %v4965_v19 = vmov (!%p265_p2), 0   ;;  %v2119_v20 = vld [vmem:[%s5719_s3 + $0x8] sm:$0xff] (!%p265_p2)  ;;  %vm347_vm1 = vcmask (!%p265_p2), 1039360   ;;  %vm367_vm2 = vcmask (!%p265_p2), 1040384  }
   0x9   : > { %s4959_s16 = smov (!%p265_p2), 110   ;;  %s4960_s17 = smov (!%p265_p2), 109   ;;  %4814 = vset.pattern.permute.xlu0 (!%p265_p2), %v4965_v19  ;;  %4815 = vset.pattern.permute.xlu1 (!%p265_p2), %v4965_v19  ;;  %v4075_v42 = vld [vmem:[%s5718_s2 + $0x18] sm:$0xff] (!%p265_p2)  ;;  %vm711_vm3 = vcmask (!%p265_p2), 1031168   ;;  %v306_v53 = vld [vmem:[%s5718_s2] sm:$0xff] (!%p265_p2)  ;;  %v307_v60 = vld [vmem:[%s5718_s2 + $0x8] sm:$0xff] (!%p265_p2) }
   0xa   : > { %s4961_s18 = smov (!%p265_p2), 108   ;;  %s4962_s19 = smov (!%p265_p2), 92   ;;  %vm915_vm4 = vcmask (!%p265_p2), 900096   ;;  %vm1119_vm5 = vcmask (!%p265_p2), 891904   ;;  %vm1323_vm6 = vcmask (!%p265_p2), 883712   ;;  %vm1527_vm7 = vcmask (!%p265_p2), 752640  }
   0xb   : > { %s4963_s20 = smov (!%p265_p2), 91   ;;  %s4964_s21 = smov (!%p265_p2), 90   ;;  %vm1731_vm8 = vcmask (!%p265_p2), 744448   ;;  %vm1935_vm9 = vcmask (!%p265_p2), 736256   ;;  %vm2165_vm10 = vcmask (!%p265_p2), 154624   ;;  %vm2168_vm11 = vcmask (!%p265_p2), 572824  }
   0xc   : > { %2166 = vst.msk [vmem:[#allocation2] sm:$0xff] (!%p265_p2), %vm2165_vm10, %v4957_v17  ;;  %2167 = vst.msk [vmem:[#allocation2 + $0x18] sm:$0xff] (!%p265_p2), %vm2165_vm10, %v4957_v17  ;;  %s4966_s23 = smov (!%p265_p2), 19   ;;  %vm2199_vm12 = vcmask (!%p265_p2), 1047704   ;;  %vm2202_vm13 = vcmask (!%p265_p2), 416768   ;;  %vm2246_vm14 = vcmask (!%p265_p2), 130048  }
   0xd   : > { %2169 = vst.msk [vmem:[#allocation2 + $0x10] sm:$0xff] (!%p265_p2), %vm2168_vm11, %v4957_v17  ;;  %2170 = vst.msk [vmem:[#allocation2 + $0x28] sm:$0xff] (!%p265_p2), %vm2168_vm11, %v4957_v17  ;;  %vm3942_vm15 = vcmask (!%p265_p2), 261120  }
   0xf   : > { %s5726_s30 = smov (!%p297_p3, %s4068_s30), 1 }
  0x10   : > { %s4672_s7 = smul.u32 72, %s5726_s30 }
  0x12   : > { %s301_s11 = scalar_lea.vmem %s5716_s0, %s4672_s7 }
  0x13   : > { %v5030_v1 = vld [vmem:[%s301_s11 + $0x8] sm:$0xff]  ;;  %v310_v2 = vld [vmem:[%s301_s11 + $0x10] sm:$0xff]  ;;  %v5032_v3 = vld [vmem:[%s301_s11] sm:$0xff] }
  0x14   : > { %v5035_v4 = vpack.i.bf16 %v310_v2, %v5030_v1  ;;  %v5037_v5 = vld [vmem:[%s301_s11 + $0x18] sm:$0xff]  ;;  %v5039_v6 = vld [vmem:[%s301_s11 + $0x20] sm:$0xff]  ;;  %v313_v7 = vld [vmem:[%s301_s11 + $0x28] sm:$0xff] }
  0x15   : > { %v5043_v8 = vpack.i.bf16 %v5037_v5, %v5032_v3  ;;  %v4699_v9 = vpack.i.bf16 %v313_v7, %v5039_v6  ;;  %v5050_v10 = vld [vmem:[%s301_s11 + $0x38] sm:$0x1]  ;;  %v5058_v12 = vpack.c.bf16 %v313_v7, %v310_v2  ;;  %v5062_v13 = vld [vmem:[%s301_s11 + $0x40] sm:$0x1]  ;;  %v4440_v14 = vpack.c.bf16 %v5039_v6, %v5030_v1  ;;  %v5070_v16 = vld [vmem:[%s301_s11 + $0x30] sm:$0x1] }
  0x16   : > { %4695 = vrot.lane.b32.xlu0 %v5035_v4, %s4956_s12  ;;  %v4442_v15 = vpack.c.bf16 %v5037_v5, %v5032_v3  ;;  %v4090_v1 = vld [vmem:[%s5718_s2 + $0x20] sm:$0xff] }
  0x17   : > { %4705 = vrot.lane.b32.xlu1 %v5043_v8, %s4956_s12 }
  0x1a   : > { %4700 = vrot.lane.b32.xlu0 %v4699_v9, %s4956_s12 }
  0x1b   : > { %343 = vrot.lane.b32.xlu1 %v5050_v10, %s4956_s12 }
  0x1e   : > { %345 = vrot.lane.b32.xlu0 %v5062_v13, %s4956_s12 }
  0x1f   : > { %341 = vrot.lane.b32.xlu1 %v5070_v16, %s4956_s12 }
  0x22   : > { %4710 = vrot.lane.b32.xlu0 %v5035_v4, %s4958_s15 }
  0x23   : > { %4715 = vrot.lane.b32.xlu1 %v4699_v9, %s4958_s15 }
  0x26   : > { %4720 = vrot.lane.b32.xlu0 %v5043_v8, %s4958_s15 }
  0x27   : > { %707 = vrot.lane.b32.xlu1 %v5050_v10, %s4958_s15 }
  0x2a   : > { %709 = vrot.lane.b32.xlu0 %v5062_v13, %s4958_s15 }
  0x2b   : > { %705 = vrot.lane.b32.xlu1 %v5070_v16, %s4958_s15 }
  0x2e   : > { %4725 = vrot.lane.b32.xlu0 %v5035_v4, %s4959_s16 }
  0x2f   : > { %4730 = vrot.lane.b32.xlu1 %v4699_v9, %s4959_s16 }
  0x32   : > { %4735 = vrot.lane.b32.xlu0 %v5043_v8, %s4959_s16 }
  0x33   : > { %911 = vrot.lane.b32.xlu1 %v5050_v10, %s4959_s16 }
  0x36   : > { %913 = vrot.lane.b32.xlu0 %v5062_v13, %s4959_s16 }
  0x37   : > { %909 = vrot.lane.b32.xlu1 %v5070_v16, %s4959_s16 }
  0x3a   : > { %4740 = vrot.lane.b32.xlu0 %v5035_v4, %s4960_s17 }
  0x3b   : > { %4745 = vrot.lane.b32.xlu1 %v4699_v9, %s4960_s17 }
  0x3e   : > { %4750 = vrot.lane.b32.xlu0 %v5043_v8, %s4960_s17 }
  0x3f   : > { %1115 = vrot.lane.b32.xlu1 %v5050_v10, %s4960_s17 }
  0x42   : > { %1117 = vrot.lane.b32.xlu0 %v5062_v13, %s4960_s17 }
  0x43   : > { %1113 = vrot.lane.b32.xlu1 %v5070_v16, %s4960_s17 }
  0x46   : > { %4755 = vrot.lane.b32.xlu0 %v5035_v4, %s4961_s18 }
  0x47   : > { %4760 = vrot.lane.b32.xlu1 %v4699_v9, %s4961_s18 }
  0x4a   : > { %4765 = vrot.lane.b32.xlu0 %v5043_v8, %s4961_s18 }
  0x4b   : > { %1319 = vrot.lane.b32.xlu1 %v5050_v10, %s4961_s18 }
  0x4e   : > { %1321 = vrot.lane.b32.xlu0 %v5062_v13, %s4961_s18 }
  0x4f   : > { %1317 = vrot.lane.b32.xlu1 %v5070_v16, %s4961_s18 }
  0x52   : > { %4770 = vrot.lane.b32.xlu0 %v5035_v4, %s4962_s19 }
  0x53   : > { %4775 = vrot.lane.b32.xlu1 %v4699_v9, %s4962_s19 }
  0x56   : > { %4780 = vrot.lane.b32.xlu0 %v5043_v8, %s4962_s19 }
  0x57   : > { %1523 = vrot.lane.b32.xlu1 %v5050_v10, %s4962_s19 }
  0x5a   : > { %1525 = vrot.lane.b32.xlu0 %v5062_v13, %s4962_s19 }
  0x5b   : > { %1521 = vrot.lane.b32.xlu1 %v5070_v16, %s4962_s19 }
  0x5e   : > { %4785 = vrot.lane.b32.xlu0 %v5035_v4, %s4963_s20 }
  0x5f   : > { %4790 = vrot.lane.b32.xlu1 %v4699_v9, %s4963_s20 }
  0x62   : > { %4795 = vrot.lane.b32.xlu0 %v5043_v8, %s4963_s20 }
  0x63   : > { %1727 = vrot.lane.b32.xlu1 %v5050_v10, %s4963_s20 }
  0x66   : > { %1729 = vrot.lane.b32.xlu0 %v5062_v13, %s4963_s20 }
  0x67   : > { %1725 = vrot.lane.b32.xlu1 %v5070_v16, %s4963_s20 }
  0x6a   : > { %4800 = vrot.lane.b32.xlu0 %v5035_v4, %s4964_s21 }
  0x6b   : > { %4805 = vrot.lane.b32.xlu1 %v4699_v9, %s4964_s21 }
  0x6e   : > { %4810 = vrot.lane.b32.xlu0 %v5043_v8, %s4964_s21 }
  0x6f   : > { %1931 = vrot.lane.b32.xlu1 %v5050_v10, %s4964_s21 }
  0x72   : > { %1933 = vrot.lane.b32.xlu0 %v5062_v13, %s4964_s21 }
  0x73   : > { %1929 = vrot.lane.b32.xlu1 %v5070_v16, %s4964_s21 }
  0x76   : > { %2122 = vperm.xlu0 %4814, %v2118_v18  }
  0x77   : > { %2127 = vperm.xlu1 %4815, %v2119_v20  }
  0x88   : > { %v4696_v21 = vpop.permute.xlu0 %4695 }
  0x89   : > { %v4706_v22 = vpop.permute.xlu1 %4705  ;;  %v4698_v23 = vunpack.i.h.bf16 %v4696_v21  ;;  %v4697_v24 = vunpack.i.l.bf16 %v4696_v21  ;;  %v4099_v21 = vld [vmem:[%s5718_s2 + $0x30] sm:$0xff] }
  0x8a   : > { %v4708_v25 = vunpack.i.h.bf16 %v4706_v22  ;;  %v4707_v26 = vunpack.i.l.bf16 %v4706_v22 }
  0x8b   : > { %v349_v31 = vsel %vm347_vm1, %v4697_v24, %v4698_v23 }
  0x8c   : > { %v4701_v27 = vpop.permute.xlu0 %4700  ;;  %v348_v34 = vsel %vm347_vm1, %v4707_v26, %v4697_v24 }
  0x8d   : > { %v4703_v28 = vunpack.i.h.bf16 %v4701_v27  ;;  %v4702_v29 = vunpack.i.l.bf16 %v4701_v27  ;;  %v344_v30 = vpop.permute.xlu1 %343  ;;  %v4100_v27 = vld [vmem:[%s5718_s2 + $0x38] sm:$0xff] }
  0x8f   : > { %v4436_v32 = vpack.c.bf16 %v4703_v28, %v4698_v23  ;;  %v351_v33 = vsel %vm347_vm1, %v4702_v29, %v4703_v28  ;;  %v350_v35 = vsel %vm347_vm1, %v4708_v25, %v4702_v29 }
  0x90   : > { %v346_v36 = vpop.permute.xlu0 %345  ;;  %v4432_v37 = vpack.c.bf16 %v351_v33, %v349_v31  ;;  %v4434_v38 = vpack.c.bf16 %v350_v35, %v348_v34 }
  0x91   : > { %v342_v39 = vpop.permute.xlu1 %341  ;;  %4437 = vmatprep.subr.bf16.mxu1 %v4436_v32  ;;  %v353_v40 = vsel %vm347_vm1, %v344_v30, %v346_v36 }
  0x92   : > { %4433 = vmatprep.subr.bf16.mxu0 %v4432_v37  ;;  %4439 = vmatpush3.bf16.msra.mxu1 %v4436_v32  ;;  %v352_v43 = vsel %vm347_vm1, %v342_v39, %v344_v30  ;;  %v4108_v32 = vld [vmem:[%s5718_s2 + $0x40] sm:$0xff] }
  0x93   : > { %4435 = vmatpush1.bf16.msra.mxu0 %v4434_v38  ;;  %4292 = vmatprep.subr.msk.mxu1 %vm367_vm2, %v346_v36 }
  0x94   : > { %v4711_v41 = vpop.permute.xlu0 %4710  ;;  %4076 = vmatprep.subr.msk.mxu0 %vm367_vm2, %v353_v40 }
  0x95   : > { %v4716_v44 = vpop.permute.xlu1 %4715  ;;  %v4713_v45 = vunpack.i.h.bf16 %v4711_v41  ;;  %v4712_v46 = vunpack.i.l.bf16 %v4711_v41 }
  0x96   : > { %v4718_v47 = vunpack.i.h.bf16 %v4716_v44  ;;  %v4717_v48 = vunpack.i.l.bf16 %v4716_v44  ;;  %4293 = vmatpush3.msk.msra.mxu1 %vm367_vm2, %v346_v36 }
  0x97   : > { %4077 = vmatpush1.msk.msra.mxu0 %vm367_vm2, %v352_v43  ;;  %4295 = vmatmul.mubr.msk.f32.vlgmr.msra.gmra.mrb[0].mxu1 %vm360_vm0, %v4075_v42  ;;  %v713_v54 = vsel %vm711_vm3, %v4712_v46, %v4713_v45 }
  0x98   : > { %4445 = vmatprep.subr.bf16.mxu1 %v5058_v12  ;;  %v4721_v49 = vpop.permute.xlu0 %4720  ;;  %4078 = vmatmul.mubr.msk.f32.vlgmr.msra.gmra.mrb[0].mxu0 %vm360_vm0, %v5055_v11  ;;  %v715_v55 = vsel %vm711_vm3, %v4717_v48, %v4718_v47  ;;  %v4452_v56 = vpack.c.bf16 %v4718_v47, %v4713_v45 }
  0x99   : > { %4447 = vmatpush3.bf16.msra.mxu1 %v5058_v12  ;;  %v4723_v50 = vunpack.i.h.bf16 %v4721_v49  ;;  %v4722_v51 = vunpack.i.l.bf16 %v4721_v49  ;;  %v708_v52 = vpop.permute.xlu1 %707  ;;  %4441 = vmatprep.subr.bf16.mxu0 %v4440_v14  ;;  %v4448_v62 = vpack.c.bf16 %v715_v55, %v713_v54  ;;  %v4109_v49 = vld [vmem:[%s5718_s2 + $0x48] sm:$0xff] }
  0x9a   : > { %4443 = vmatpush1.bf16.msra.mxu0 %v4442_v15  ;;  %444 = vmatprep.mubr.f32.mxu0 %v4957_v17 }
  0x9b   : > { %4301 = vmatprep.subr.msk.mxu1 %vm367_vm2, %v5062_v13  ;;  %4083 = vmatprep.subr.msk.mxu0 %vm367_vm2, %v5050_v10  ;;  %v712_v57 = vsel %vm711_vm3, %v4722_v51, %v4712_v46  ;;  %v714_v58 = vsel %vm711_vm3, %v4723_v50, %v4717_v48  ;;  %v4117_v50 = vld [vmem:[%s5718_s2 + $0x50] sm:$0xff] }
  0x9c   : > { %v710_v59 = vpop.permute.xlu0 %709  ;;  %4079 = vmatmul.mubr.msk.f32.gmra.mrb[2].mxu0 %vm360_vm0, %v4075_v42  ;;  %4303 = vmatprep.mubr.msk.f32.mxu1 %vm360_vm0, %v306_v53  ;;  %v4450_v63 = vpack.c.bf16 %v714_v58, %v712_v57 }
  0x9d   : > { %4302 = vmatpush3.msk.msra.mxu1 %vm367_vm2, %v5062_v13  ;;  %v706_v61 = vpop.permute.xlu1 %705  ;;  %602 = vmatprep.mubr.f32.mxu0 %v4957_v17  ;;  %v717_v5 = vsel %vm711_vm3, %v708_v52, %v710_v59  ;;  %v4091_v13 = vld [vmem:[%s5718_s2 + $0x28] sm:$0xff] }
  0x9e   : > { %4084 = vmatpush1.msk.msra.mxu0 %vm367_vm2, %v5070_v16  ;;  %4453 = vmatprep.subr.bf16.mxu1 %v4452_v56  ;;  %v716_v9 = vsel %vm711_vm3, %v706_v61, %v708_v52 }
  0x9f   : > { %4449 = vmatprep.subr.bf16.mxu0 %v4448_v62  ;;  %4304 = vmatmul.mubr.msk.f32.vlgmr.msra.gmra.mrb[0].mxu1 %vm360_vm0, %v307_v60 }
  0xa0   : > { %4455 = vmatpush3.bf16.msra.mxu1 %v4452_v56  ;;  %v4726_v0 = vpop.permute.xlu0 %4725  ;;  %4085 = vmatmul.mubr.msk.f32.vlgmr.msra.gmra.mrb[0].mxu0 %vm360_vm0, %v306_v53 }
  0xa1   : > { %v4728_v2 = vunpack.i.h.bf16 %v4726_v0  ;;  %v4727_v3 = vunpack.i.l.bf16 %v4726_v0  ;;  %v4731_v4 = vpop.permute.xlu1 %4730  ;;  %4451 = vmatpush1.bf16.msra.mxu0 %v4450_v63  ;;  %4310 = vmatprep.subr.msk.mxu1 %vm367_vm2, %v710_v59 }
  0xa2   : > { %v4733_v6 = vunpack.i.h.bf16 %v4731_v4  ;;  %v4732_v7 = vunpack.i.l.bf16 %v4731_v4  ;;  %4092 = vmatprep.subr.msk.mxu0 %vm367_vm2, %v717_v5  ;;  %608 = vmatprep.mubr.f32.mxu0 %v4957_v17 }
  0xa3   : > { %4312 = vmatprep.mubr.msk.f32.mxu1 %vm360_vm0, %v4090_v1  ;;  %v917_v8 = vsel %vm915_vm4, %v4727_v3, %v4728_v2 }
  0xa4   : > { %v4460_v10 = vpack.c.bf16 %v4733_v6, %v4728_v2  ;;  %4311 = vmatpush3.msk.msra.mxu1 %vm367_vm2, %v710_v59  ;;  %v4736_v11 = vpop.permute.xlu0 %4735  ;;  %4086 = vmatmul.mubr.msk.f32.gmra.mrb[2].mxu0 %vm360_vm0, %v307_v60  ;;  %v919_v12 = vsel %vm915_vm4, %v4732_v7, %v4733_v6 }
  0xa5   : > { %v4738_v14 = vunpack.i.h.bf16 %v4736_v11  ;;  %v4737_v15 = vunpack.i.l.bf16 %v4736_v11  ;;  %v912_v16 = vpop.permute.xlu1 %911  ;;  %4093 = vmatpush1.msk.msra.mxu0 %vm367_vm2, %v716_v9  ;;  %v4456_v18 = vpack.c.bf16 %v919_v12, %v917_v8  ;;  %800 = vmatprep.mubr.f32.mxu0 %v4957_v17  ;;  %v4118_v8 = vld [vmem:[%s5718_s2 + $0x58] sm:$0xff]  ;;  %v4126_v9 = vld [vmem:[%s5718_s2 + $0x60] sm:$0xff] }
  0xa6   : > { %4461 = vmatprep.subr.bf16.mxu1 %v4460_v10 }
  0xa7   : > { %v916_v19 = vsel %vm915_vm4, %v4737_v15, %v4727_v3  ;;  %v918_v20 = vsel %vm915_vm4, %v4738_v14, %v4732_v7  ;;  %4457 = vmatprep.subr.bf16.mxu0 %v4456_v18  ;;  %4313 = vmatmul.mubr.msk.f32.vlgmr.msra.gmra.mrb[0].mxu1 %vm360_vm0, %v4091_v13 }
  0xa8   : > { %v4458_v22 = vpack.c.bf16 %v918_v20, %v916_v19  ;;  %4463 = vmatpush3.bf16.msra.mxu1 %v4460_v10  ;;  %v914_v23 = vpop.permute.xlu0 %913  ;;  %4094 = vmatmul.mubr.msk.f32.vlgmr.msra.gmra.mrb[0].mxu0 %vm360_vm0, %v4090_v1 }
  0xa9   : > { %v910_v24 = vpop.permute.xlu1 %909  ;;  %4319 = vmatprep.subr.msk.mxu1 %vm367_vm2, %v914_v23  ;;  %v921_v25 = vsel %vm915_vm4, %v912_v16, %v914_v23  ;;  %806 = vmatprep.mubr.f32.mxu0 %v4957_v17 }
  0xaa   : > { %4459 = vmatpush1.bf16.msra.mxu0 %v4458_v22  ;;  %4321 = vmatprep.mubr.msk.f32.mxu1 %vm360_vm0, %v4099_v21  ;;  %v920_v28 = vsel %vm915_vm4, %v910_v24, %v912_v16 }
  0xab   : > { %4101 = vmatprep.subr.msk.mxu0 %vm367_vm2, %v921_v25 }
  0xac   : > { %4320 = vmatpush3.msk.msra.mxu1 %vm367_vm2, %v914_v23  ;;  %v4741_v26 = vpop.permute.xlu0 %4740  ;;  %4095 = vmatmul.mubr.msk.f32.gmra.mrb[2].mxu0 %vm360_vm0, %v4091_v13 }
  0xad   : > { %v4743_v29 = vunpack.i.h.bf16 %v4741_v26  ;;  %v4742_v30 = vunpack.i.l.bf16 %v4741_v26  ;;  %v4746_v31 = vpop.permute.xlu1 %4745  ;;  %1004 = vmatprep.mubr.f32.mxu0 %v4957_v17 }
  0xae   : > { %v4748_v33 = vunpack.i.h.bf16 %v4746_v31  ;;  %v4747_v34 = vunpack.i.l.bf16 %v4746_v31  ;;  %4102 = vmatpush1.msk.msra.mxu0 %vm367_vm2, %v920_v28 }
  0xaf   : > { %4322 = vmatmul.mubr.msk.f32.vlgmr.msra.gmra.mrb[0].mxu1 %vm360_vm0, %v4100_v27  ;;  %v1121_v35 = vsel %vm1119_vm5, %v4742_v30, %v4743_v29 }
  0xb0   : > { %v4468_v36 = vpack.c.bf16 %v4748_v33, %v4743_v29  ;;  %v4751_v37 = vpop.permute.xlu0 %4750  ;;  %v1123_v38 = vsel %vm1119_vm5, %v4747_v34, %v4748_v33  ;;  %4103 = vmatmul.mubr.msk.f32.vlgmr.msra.gmra.mrb[0].mxu0 %vm360_vm0, %v4099_v21  ;;  %4330 = vmatprep.mubr.msk.f32.mxu1 %vm360_vm0, %v4108_v32  ;;  %v4135_v33 = vld [vmem:[%s5718_s2 + $0x70] sm:$0xff] }
  0xb1   : > { %v4753_v39 = vunpack.i.h.bf16 %v4751_v37  ;;  %v4752_v40 = vunpack.i.l.bf16 %v4751_v37  ;;  %v1116_v41 = vpop.permute.xlu1 %1115  ;;  %v4464_v42 = vpack.c.bf16 %v1123_v38, %v1121_v35  ;;  %1010 = vmatprep.mubr.f32.mxu0 %v4957_v17 }
  0xb2   : > { %4469 = vmatprep.subr.bf16.mxu1 %v4468_v36 }
  0xb3   : > { %v1120_v43 = vsel %vm1119_vm5, %v4752_v40, %v4742_v30  ;;  %v1122_v44 = vsel %vm1119_vm5, %v4753_v39, %v4747_v34  ;;  %4465 = vmatprep.subr.bf16.mxu0 %v4464_v42  ;;  %4471 = vmatpush3.bf16.msra.mxu1 %v4468_v36 }
  0xb4   : > { %v4466_v45 = vpack.c.bf16 %v1122_v44, %v1120_v43  ;;  %v1118_v46 = vpop.permute.xlu0 %1117  ;;  %4104 = vmatmul.mubr.msk.f32.gmra.mrb[2].mxu0 %vm360_vm0, %v4100_v27 }
  0xb5   : > { %v1114_v47 = vpop.permute.xlu1 %1113  ;;  %4328 = vmatprep.subr.msk.mxu1 %vm367_vm2, %v1118_v46  ;;  %v1125_v48 = vsel %vm1119_vm5, %v1116_v41, %v1118_v46  ;;  %1208 = vmatprep.mubr.f32.mxu0 %v4957_v17 }
  0xb6   : > { %4467 = vmatpush1.bf16.msra.mxu0 %v4466_v45  ;;  %v1124_v52 = vsel %vm1119_vm5, %v1114_v47, %v1116_v41 }
  0xb7   : > { %4329 = vmatpush3.msk.msra.mxu1 %vm367_vm2, %v1118_v46  ;;  %4110 = vmatprep.subr.msk.mxu0 %vm367_vm2, %v1125_v48 }
  0xb8   : > { %v4756_v51 = vpop.permute.xlu0 %4755  ;;  %4331 = vmatmul.mubr.msk.f32.vlgmr.msra.gmra.mrb[0].mxu1 %vm360_vm0, %v4109_v49 }
  0xb9   : > { %v4758_v53 = vunpack.i.h.bf16 %v4756_v51  ;;  %v4757_v54 = vunpack.i.l.bf16 %v4756_v51  ;;  %v4761_v55 = vpop.permute.xlu1 %4760  ;;  %4339 = vmatprep.mubr.msk.f32.mxu1 %vm360_vm0, %v4117_v50 }
  0xba   : > { %v4763_v56 = vunpack.i.h.bf16 %v4761_v55  ;;  %v4762_v57 = vunpack.i.l.bf16 %v4761_v55  ;;  %4111 = vmatpush1.msk.msra.mxu0 %vm367_vm2, %v1124_v52  ;;  %v4136_v55 = vld [vmem:[%s5718_s2 + $0x78] sm:$0xff] }
  0xbb   : > { %v1325_v58 = vsel %vm1323_vm6, %v4757_v54, %v4758_v53  ;;  %4112 = vmatmul.mubr.msk.f32.vlgmr.msra.gmra.mrb[0].mxu0 %vm360_vm0, %v4108_v32  ;;  %v4127_v32 = vld [vmem:[%s5718_s2 + $0x68] sm:$0xff] }
  0xbc   : > { %v4476_v59 = vpack.c.bf16 %v4763_v56, %v4758_v53  ;;  %v4766_v60 = vpop.permute.xlu0 %4765  ;;  %v1327_v61 = vsel %vm1323_vm6, %v4762_v57, %v4763_v56  ;;  %1214 = vmatprep.mubr.f32.mxu0 %v4957_v17 }
  0xbd   : > { %v4768_v62 = vunpack.i.h.bf16 %v4766_v60  ;;  %v4767_v63 = vunpack.i.l.bf16 %v4766_v60  ;;  %v1320_v0 = vpop.permute.xlu1 %1319  ;;  %v4472_v1 = vpack.c.bf16 %v1327_v61, %v1325_v58 }
  0xbe   : > { %4477 = vmatprep.subr.bf16.mxu1 %v4476_v59 }
  0xbf   : > { %v1324_v2 = vsel %vm1323_vm6, %v4767_v63, %v4757_v54  ;;  %v1326_v3 = vsel %vm1323_vm6, %v4768_v62, %v4762_v57  ;;  %4473 = vmatprep.subr.bf16.mxu0 %v4472_v1  ;;  %4479 = vmatpush3.bf16.msra.mxu1 %v4476_v59 }
  0xc0   : > { %v4474_v4 = vpack.c.bf16 %v1326_v3, %v1324_v2  ;;  %v1322_v5 = vpop.permute.xlu0 %1321  ;;  %4113 = vmatmul.mubr.msk.f32.gmra.mrb[2].mxu0 %vm360_vm0, %v4109_v49 }
  0xc1   : > { %v1318_v6 = vpop.permute.xlu1 %1317  ;;  %4337 = vmatprep.subr.msk.mxu1 %vm367_vm2, %v1322_v5  ;;  %v1329_v7 = vsel %vm1323_vm6, %v1320_v0, %v1322_v5  ;;  %1412 = vmatprep.mubr.f32.mxu0 %v4957_v17 }
  0xc2   : > { %4475 = vmatpush1.bf16.msra.mxu0 %v4474_v4  ;;  %v1328_v11 = vsel %vm1323_vm6, %v1318_v6, %v1320_v0 }
  0xc3   : > { %4338 = vmatpush3.msk.msra.mxu1 %vm367_vm2, %v1322_v5  ;;  %4119 = vmatprep.subr.msk.mxu0 %vm367_vm2, %v1329_v7 }
  0xc4   : > { %v4771_v10 = vpop.permute.xlu0 %4770  ;;  %4340 = vmatmul.mubr.msk.f32.vlgmr.msra.gmra.mrb[0].mxu1 %vm360_vm0, %v4118_v8 }
  0xc5   : > { %v4773_v12 = vunpack.i.h.bf16 %v4771_v10  ;;  %v4772_v13 = vunpack.i.l.bf16 %v4771_v10  ;;  %v4776_v14 = vpop.permute.xlu1 %4775  ;;  %4348 = vmatprep.mubr.msk.f32.mxu1 %vm360_vm0, %v4126_v9 }
  0xc6   : > { %v4778_v15 = vunpack.i.h.bf16 %v4776_v14  ;;  %v4777_v16 = vunpack.i.l.bf16 %v4776_v14  ;;  %4120 = vmatpush1.msk.msra.mxu0 %vm367_vm2, %v1328_v11 }
  0xc7   : > { %v1529_v18 = vsel %vm1527_vm7, %v4772_v13, %v4773_v12  ;;  %4121 = vmatmul.mubr.msk.f32.vlgmr.msra.gmra.mrb[0].mxu0 %vm360_vm0, %v4117_v50 }
  0xc8   : > { %v4484_v19 = vpack.c.bf16 %v4778_v15, %v4773_v12  ;;  %v4781_v20 = vpop.permute.xlu0 %4780  ;;  %v1531_v21 = vsel %vm1527_vm7, %v4777_v16, %v4778_v15  ;;  %1418 = vmatprep.mubr.f32.mxu0 %v4957_v17  ;;  %v4144_v12 = vld [vmem:[%s5718_s2 + $0x80] sm:$0xff]  ;;  %v4145_v15 = vld [vmem:[%s5718_s2 + $0x88] sm:$0xff] }
  0xc9   : > { %v4783_v22 = vunpack.i.h.bf16 %v4781_v20  ;;  %v4782_v23 = vunpack.i.l.bf16 %v4781_v20  ;;  %v1524_v24 = vpop.permute.xlu1 %1523  ;;  %v4480_v25 = vpack.c.bf16 %v1531_v21, %v1529_v18 }
  0xca   : > { %4485 = vmatprep.subr.bf16.mxu1 %v4484_v19 }
  0xcb   : > { %v1528_v26 = vsel %vm1527_vm7, %v4782_v23, %v4772_v13  ;;  %v1530_v27 = vsel %vm1527_vm7, %v4783_v22, %v4777_v16  ;;  %4481 = vmatprep.subr.bf16.mxu0 %v4480_v25  ;;  %4487 = vmatpush3.bf16.msra.mxu1 %v4484_v19  ;;  %v2144_v19 = vlaneseq  ;;  %v2142_v23 = vld [vmem:[%s5717_s1] sm:$0x7] }
  0xcc   : > { %v4482_v28 = vpack.c.bf16 %v1530_v27, %v1528_v26  ;;  %v1526_v29 = vpop.permute.xlu0 %1525  ;;  %4122 = vmatmul.mubr.msk.f32.gmra.mrb[2].mxu0 %vm360_vm0, %v4118_v8 }
  0xcd   : > { %v1522_v30 = vpop.permute.xlu1 %1521  ;;  %4346 = vmatprep.subr.msk.mxu1 %vm367_vm2, %v1526_v29  ;;  %v1533_v31 = vsel %vm1527_vm7, %v1524_v24, %v1526_v29  ;;  %1616 = vmatprep.mubr.f32.mxu0 %v4957_v17  ;;  %v5362_v20 = vshrl.u32 %v2144_v19, 7 }
  0xce   : > { %4483 = vmatpush1.bf16.msra.mxu0 %v4482_v28  ;;  %v1532_v35 = vsel %vm1527_vm7, %v1522_v30, %v1524_v24 }
  0xcf   : > { %4347 = vmatpush3.msk.msra.mxu1 %vm367_vm2, %v1526_v29  ;;  %4128 = vmatprep.subr.msk.mxu0 %vm367_vm2, %v1533_v31  ;;  %v2150_v21 = vsub.s32 1, %v5362_v20 }
  0xd0   : > { %v4786_v34 = vpop.permute.xlu0 %4785  ;;  %4349 = vmatmul.mubr.msk.f32.vlgmr.msra.gmra.mrb[0].mxu1 %vm360_vm0, %v4127_v32 }
  0xd1   : > { %v4788_v36 = vunpack.i.h.bf16 %v4786_v34  ;;  %v4787_v37 = vunpack.i.l.bf16 %v4786_v34  ;;  %v4791_v38 = vpop.permute.xlu1 %4790  ;;  %4357 = vmatprep.mubr.msk.f32.mxu1 %vm360_vm0, %v4135_v33  ;;  %v2151_v27 = vrot.slane %v2142_v23, %v2150_v21  ;;  %v3911_v21 = vld [vmem:[%s5722_s6 + $0x8] sm:$0xff] }
  0xd2   : > { %v4793_v39 = vunpack.i.h.bf16 %v4791_v38  ;;  %v4792_v40 = vunpack.i.l.bf16 %v4791_v38  ;;  %4129 = vmatpush1.msk.msra.mxu0 %vm367_vm2, %v1532_v35  ;;  %v2154_v38 = vsub.s32 2, %v5362_v20 }
  0xd3   : > { %v1733_v41 = vsel %vm1731_vm8, %v4787_v37, %v4788_v36  ;;  %4130 = vmatmul.mubr.msk.f32.vlgmr.msra.gmra.mrb[0].mxu0 %vm360_vm0, %v4126_v9 }
  0xd4   : > { %v4492_v42 = vpack.c.bf16 %v4793_v39, %v4788_v36  ;;  %v4796_v43 = vpop.permute.xlu0 %4795  ;;  %v1735_v44 = vsel %vm1731_vm8, %v4792_v40, %v4793_v39  ;;  %1622 = vmatprep.mubr.f32.mxu0 %v4957_v17 }
  0xd5   : > { %v4798_v45 = vunpack.i.h.bf16 %v4796_v43  ;;  %v4797_v46 = vunpack.i.l.bf16 %v4796_v43  ;;  %v1728_v47 = vpop.permute.xlu1 %1727  ;;  %v4488_v48 = vpack.c.bf16 %v1735_v44, %v1733_v41 }
  0xd6   : > { %4493 = vmatprep.subr.bf16.mxu1 %v4492_v42 }
  0xd7   : > { %v1732_v49 = vsel %vm1731_vm8, %v4797_v46, %v4787_v37  ;;  %v1734_v50 = vsel %vm1731_vm8, %v4798_v45, %v4792_v40  ;;  %4489 = vmatprep.subr.bf16.mxu0 %v4488_v48  ;;  %4495 = vmatpush3.bf16.msra.mxu1 %v4492_v42 }
  0xd8   : > { %v4490_v51 = vpack.c.bf16 %v1734_v50, %v1732_v49  ;;  %v1730_v52 = vpop.permute.xlu0 %1729  ;;  %4131 = vmatmul.mubr.msk.f32.gmra.mrb[2].mxu0 %vm360_vm0, %v4127_v32 }
  0xd9   : > { %v1726_v53 = vpop.permute.xlu1 %1725  ;;  %4355 = vmatprep.subr.msk.mxu1 %vm367_vm2, %v1730_v52  ;;  %v1737_v54 = vsel %vm1731_vm8, %v1728_v47, %v1730_v52  ;;  %1820 = vmatprep.mubr.f32.mxu0 %v4957_v17 }
  0xda   : > { %4491 = vmatpush1.bf16.msra.mxu0 %v4490_v51  ;;  %v1736_v57 = vsel %vm1731_vm8, %v1726_v53, %v1728_v47  ;;  %v2155_v47 = vrot.slane %v2142_v23, %v2154_v38 }
  0xdb   : > { %4356 = vmatpush3.msk.msra.mxu1 %vm367_vm2, %v1730_v52  ;;  %4137 = vmatprep.subr.msk.mxu0 %vm367_vm2, %v1737_v54 }
  0xdc   : > { %4358 = vmatmul.mubr.msk.f32.vlgmr.msra.gmra.mrb[0].mxu1 %vm360_vm0, %v4136_v55  ;;  %v4801_v56 = vpop.permute.xlu0 %4800 }
  0xdd   : > { %v4803_v58 = vunpack.i.h.bf16 %v4801_v56  ;;  %v4802_v59 = vunpack.i.l.bf16 %v4801_v56  ;;  %v4806_v60 = vpop.permute.xlu1 %4805 }
  0xde   : > { %v4808_v61 = vunpack.i.h.bf16 %v4806_v60  ;;  %v4807_v62 = vunpack.i.l.bf16 %v4806_v60  ;;  %4138 = vmatpush1.msk.msra.mxu0 %vm367_vm2, %v1736_v57 }
  0xdf   : > { %v1937_v63 = vsel %vm1935_vm9, %v4802_v59, %v4803_v58  ;;  %4139 = vmatmul.mubr.msk.f32.vlgmr.msra.gmra.mrb[0].mxu0 %vm360_vm0, %v4135_v33  ;;  %v2146_v33 = vsub.s32 0, %v5362_v20 }
  0xe0   : > { %v4811_v0 = vpop.permute.xlu0 %4810  ;;  %v1939_v1 = vsel %vm1935_vm9, %v4807_v62, %v4808_v61  ;;  %1826 = vmatprep.mubr.f32.mxu0 %v4957_v17  ;;  %v4500_v13 = vpack.c.bf16 %v4808_v61, %v4803_v58 }
  0xe1   : > { %v4813_v2 = vunpack.i.h.bf16 %v4811_v0  ;;  %v4812_v3 = vunpack.i.l.bf16 %v4811_v0  ;;  %v1932_v4 = vpop.permute.xlu1 %1931  ;;  %v4496_v5 = vpack.c.bf16 %v1939_v1, %v1937_v63  ;;  %v2147_v42 = vrot.slane %v2142_v23, %v2146_v33 }
  0xe3   : > { %v1936_v6 = vsel %vm1935_vm9, %v4812_v3, %v4802_v59  ;;  %v1938_v7 = vsel %vm1935_vm9, %v4813_v2, %v4807_v62  ;;  %4497 = vmatprep.subr.bf16.mxu0 %v4496_v5  ;;  %4140 = vmatmul.mubr.msk.f32.gmra.mrb[2].mxu0 %vm360_vm0, %v4136_v55  ;;  %v5389_v2 = vld [vmem:[%s5720_s4 + $0x10] sm:$0xff] }
  0xe4   : > { %v4498_v8 = vpack.c.bf16 %v1938_v7, %v1936_v6  ;;  %v1934_v9 = vpop.permute.xlu0 %1933  ;;  %2024 = vmatprep.mubr.f32.mxu0 %v4957_v17  ;;  %4373 = vmatprep.mubr.msk.f32.mxu1 %vm2246_vm14, %v5389_v2 }
  0xe5   : > { %v1941_v10 = vsel %vm1935_vm9, %v1932_v4, %v1934_v9  ;;  %v1930_v11 = vpop.permute.xlu1 %1929 }
  0xe6   : > { %4499 = vmatpush1.bf16.msra.mxu0 %v4498_v8  ;;  %v1940_v14 = vsel %vm1935_vm9, %v1930_v11, %v1932_v4 }
  0xe7   : > { %4146 = vmatprep.subr.msk.mxu0 %vm367_vm2, %v1941_v10 }
  0xea   : > { %4147 = vmatpush1.msk.msra.mxu0 %vm367_vm2, %v1940_v14 }
  0xeb   : > { %4148 = vmatmul.mubr.msk.f32.vlgmr.msra.gmra.mrb[0].mxu0 %vm360_vm0, %v4144_v12  ;;  %4501 = vmatprep.subr.bf16.mxu0 %v4500_v13 }
  0xec   : > { %4503 = vmatpush3.bf16.msra.mxu0 %v4500_v13  ;;  %2030 = vmatprep.mubr.f32.mxu0 %v4957_v17 }
  0xed   : > { %4364 = vmatprep.subr.msk.mxu0 %vm367_vm2, %v1934_v9 }
  0xef   : > { %4149 = vmatmul.mubr.msk.f32.gmra.mrb[2].mxu0 %vm360_vm0, %v4145_v15 }
  0xf0   : > { %4365 = vmatpush3.msk.msra.mxu0 %vm367_vm2, %v1934_v9  ;;  %4366 = vmatprep.mubr.msk.f32.mxu0 %vm360_vm0, %v4144_v12 }
  0xf3   : > { %4367 = vmatmul.mubr.msk.f32.vlgmr.msra.gmra.mrb[4].mxu0 %vm360_vm0, %v4145_v15  ;;  %v3886_v15 = vld [vmem:[%s5721_s5] sm:$0xff]  ;;  %vm4012_vm0 = vcmp.lt.s32.totalorder %v2144_v19, 288 }
  0xf4   : > { %2317 = vmatprep.mubr.f32.mxu0 %v4957_v17 }
  0xf5   : > { %v2123_v22 = vpop.permute.xlu0 %2122 }
  0xf6   : > { %v2128_v28 = vpop.permute.xlu1 %2127 }
 0x1af   : > { %v4359_v16 = vpop.f32.mrb[0].mxu1 }
 0x1b0   : > { %v1899_v18 = vpop.f32.mrb[1].mxu1 }
 0x1be   : > { %v2026_v24 = vpop.f32.mrb[0].mxu0 }
 0x1bf   : > { %v2028_v25 = vpop.f32.mrb[1].mxu0  ;;  %v2130_v32 = vadd.f32 %v2123_v22, %v2026_v24 }
 0x1c0   : > { %v2131_v26 = vadd.f32 %v2123_v22, %v2028_v25 }
 0x1c1   : > { %v2136_v41 = vmax.f32 %v2130_v32, 0.0  ;;  %v5454_v32 = vld [vmem:[%s5720_s4 + $0x18] sm:$0xff] }
 0x1c2   : > { %v2137_v29 = vmax.f32 %v2131_v26, 0.0  ;;  %v2032_v30 = vpop.f32.mrb[2].mxu0 }
 0x1c3   : > { %v2034_v31 = vpop.f32.mrb[3].mxu0  ;;  %v2159_v48 = vmul.f32 %v2147_v42, %v2136_v41  ;;  %v2133_v50 = vadd.f32 %v2128_v28, %v2032_v30 }
 0x1c4   : > { %v2160_v34 = vmul.f32 %v2151_v27, %v2137_v29  ;;  %v2134_v35 = vadd.f32 %v2128_v28, %v2034_v31 }
 0x1c5   : > { %v2139_v53 = vmax.f32 %v2133_v50, 0.0  ;;  %v5489_v50 = vld [vmem:[%s5720_s4 + $0x20] sm:$0xff] }
 0x1c6   : > { %v2140_v36 = vmax.f32 %v2134_v35, 0.0  ;;  %2179 = vrot.lane.b32.xlu1 %v2160_v34, %s4966_s23  ;;  %v4368_v37 = vpop.f32.mrb[4].mxu0  ;;  %v5459_v34 = vld [vmem:[%s5720_s4] sm:$0xff] }
 0x1c7   : > { %v4576_v39 = vadd.f32 %v4368_v37, %v4359_v16  ;;  %v2103_v40 = vpop.f32.mrb[5].mxu0  ;;  %v2162_v55 = vmul.f32 %v2147_v42, %v2139_v53  ;;  %v3887_v16 = vld [vmem:[%s5721_s5 + $0x8] sm:$0xff] }
 0x1c8   : > { %v2163_v43 = vmul.f32 %v2151_v27, %v2140_v36  ;;  %v4577_v44 = vadd.f32 %v2103_v40, %v1899_v18  ;;  %v3910_v18 = vld [vmem:[%s5722_s6] sm:$0xff] }
 0x1c9   : > { %v2135_v45 = vadd.f32 %v4576_v39, %v2128_v28 }
 0x1ca   : > { %v2132_v46 = vadd.f32 %v4577_v44, %v2123_v22  ;;  %2185 = vrot.lane.b32.xlu1 %v2163_v43, %s4966_s23  ;;  %v3952_v22 = vld [vmem:[#allocation3] sm:$0x1]  ;;  %v5480_v44 = vld [vmem:[%s5720_s4 + $0x8] sm:$0xff] }
 0x1cb   : > { %v2141_v51 = vmax.f32 %v2135_v45, 0.0 }
 0x1cc   : > { %v2138_v49 = vmax.f32 %v2132_v46, 0.0 }
 0x1cd   : > { %v2164_v54 = vmul.f32 %v2155_v47, %v2141_v51 }
 0x1ce   : > { %2177 = vrot.lane.b32.xlu1 %v2159_v48, %s4966_s23  ;;  %v2161_v52 = vmul.f32 %v2155_v47, %v2138_v49 }
 0x1d0   : > { %2181 = vrot.lane.b32.xlu0 %v2161_v52, %s4966_s23 }
 0x1d4   : > { %2187 = vrot.lane.b32.xlu0 %v2164_v54, %s4966_s23 }
 0x1d8   : > { %2183 = vrot.lane.b32.xlu0 %v2162_v55, %s4966_s23 }
 0x238   : > { %v2180_v56 = vpop.permute.xlu1 %2179 }
 0x23c   : > { %v2186_v57 = vpop.permute.xlu1 %2185 }
 0x240   : > { %v2178_v58 = vpop.permute.xlu1 %2177 }
 0x241   : > { %v5379_v59 = vsel %vm2165_vm10, %v2178_v58, %v2180_v56  ;;  %2200 = vst.msk [vmem:[#allocation2] sm:$0xff] %vm2199_vm12, %v2178_v58 }
 0x242   : > { %v2182_v60 = vpop.permute.xlu0 %2181 }
 0x243   : > { %v2190_v61 = vsel %vm2165_vm10, %v2180_v56, %v2182_v60 }
 0x244   : > { %2203 = vst.msk [vmem:[#allocation2 + $0x10] sm:$0xff] %vm2202_vm13, %v2190_v61 }
 0x246   : > { %v2188_v62 = vpop.permute.xlu0 %2187 }
 0x247   : > { %v2192_v63 = vsel %vm2165_vm10, %v2186_v57, %v2188_v62  ;;  %v5510_v62 = vld [vmem:[%s5720_s4 + $0x28] sm:$0xff] }
 0x248   : > { %2206 = vst.msk [vmem:[#allocation2 + $0x28] sm:$0xff] %vm2202_vm13, %v2192_v63  ;;  %v5399_v9 = vld [vmem:[#allocation2] sm:$0xff] }
 0x24a   : > { %v2184_v0 = vpop.permute.xlu0 %2183 }
 0x24b   : > { %v5384_v1 = vsel %vm2165_vm10, %v2184_v0, %v2186_v57  ;;  %2204 = vst.msk [vmem:[#allocation2 + $0x18] sm:$0xff] %vm2199_vm12, %v2184_v0  ;;  %v2211_v4 = vld [vmem:[#allocation2 + $0x10] sm:$0xff] }
 0x24c   : > { %v4512_v3 = vpack.c.bf16 %v5384_v1, %v5379_v59  ;;  %v4841_v11 = vpack.i.bf16 %v2211_v4, %v5379_v59  ;;  %v4851_v14 = vpack.i.bf16 %v5384_v1, %v5379_v59  ;;  %v5526_v59 = vld [vmem:[%s5720_s4 + $0x30] sm:$0xff] }
 0x24f   : > { %v2214_v5 = vld [vmem:[#allocation2 + $0x28] sm:$0xff] }
 0x250   : > { %v4821_v6 = vpack.i.bf16 %v2214_v5, %v2211_v4  ;;  %v4516_v7 = vpack.c.bf16 %v2214_v5, %v2211_v4  ;;  %v4836_v12 = vpack.i.bf16 %v2214_v5, %v5384_v1 }
 0x252   : > { %4822 = vrot.lane.b32.xlu0 %v4821_v6, %s4958_s15  ;;  %4817 = vrot.lane.b32.xlu1 %v4821_v6, %s4956_s12  ;;  %v5397_v8 = vld [vmem:[#allocation2 + $0x18] sm:$0xff] }
 0x253   : > { %v4514_v10 = vpack.c.bf16 %v5397_v8, %v5399_v9  ;;  %v4846_v13 = vpack.i.bf16 %v5397_v8, %v5399_v9 }
 0x256   : > { %4832 = vrot.lane.b32.xlu0 %v4821_v6, %s4960_s17  ;;  %4827 = vrot.lane.b32.xlu1 %v4821_v6, %s4959_s16 }
 0x25a   : > { %4842 = vrot.lane.b32.xlu1 %v4841_v11, %s4961_s18  ;;  %4837 = vrot.lane.b32.xlu0 %v4836_v12, %s4961_s18 }
 0x25e   : > { %4847 = vrot.lane.b32.xlu1 %v4846_v13, %s4961_s18  ;;  %4852 = vrot.lane.b32.xlu0 %v4851_v14, %s4956_s12 }
 0x262   : > { %4857 = vrot.lane.b32.xlu1 %v4846_v13, %s4956_s12  ;;  %4867 = vrot.lane.b32.xlu0 %v4841_v11, %s4962_s19  ;;  %s4673_s12 = smul.u32 3, %s5726_s30 }
 0x266   : > { %4862 = vrot.lane.b32.xlu1 %v4836_v12, %s4962_s19  ;;  %4872 = vrot.lane.b32.xlu0 %v4846_v13, %s4962_s19  ;;  %s305_s19 = scalar_lea.vmem %s5724_s8, %s4673_s12 }
 0x26a   : > { %4877 = vrot.lane.b32.xlu1 %v4851_v14, %s4958_s15  ;;  %4882 = vrot.lane.b32.xlu0 %v4846_v13, %s4958_s15 }
 0x26e   : > { %4892 = vrot.lane.b32.xlu1 %v4841_v11, %s4963_s20  ;;  %4887 = vrot.lane.b32.xlu0 %v4836_v12, %s4963_s20 }
 0x272   : > { %4897 = vrot.lane.b32.xlu1 %v4846_v13, %s4963_s20  ;;  %4902 = vrot.lane.b32.xlu0 %v4851_v14, %s4959_s16 }
 0x276   : > { %4907 = vrot.lane.b32.xlu1 %v4846_v13, %s4959_s16  ;;  %4917 = vrot.lane.b32.xlu0 %v4851_v14, %s4960_s17 }
 0x27a   : > { %4912 = vrot.lane.b32.xlu1 %v4836_v12, %s4964_s21  ;;  %4927 = vrot.lane.b32.xlu0 %v4841_v11, %s4964_s21 }
 0x27e   : > { %4922 = vrot.lane.b32.xlu1 %v4846_v13, %s4964_s21  ;;  %4932 = vrot.lane.b32.xlu0 %v4846_v13, %s4960_s17 }
 0x282   : > { %3890 = vperm.xlu1 %4815, %v3886_v15   ;;  %3895 = vperm.xlu0 %4814, %v3887_v16  }
 0x286   : > { %3914 = vperm.xlu1 %4815, %v3910_v18   ;;  %3919 = vperm.xlu0 %4814, %v3911_v21   ;;  %v5556_v18 = vld [vmem:[%s5720_s4 + $0x38] sm:$0xff] }
 0x28a   : > { %3955 = vperm.xlu1 %4815, %v3952_v22  }
 0x2c4   : > { %v4818_v23 = vpop.permute.xlu1 %4817  ;;  %v5443_v24 = vpop.permute.xlu0 %4822 }
 0x2c5   : > { %v4820_v25 = vunpack.i.h.bf16 %v4818_v23  ;;  %v4819_v26 = vunpack.i.l.bf16 %v4818_v23  ;;  %v4825_v30 = vunpack.i.h.bf16 %v5443_v24  ;;  %v4824_v31 = vunpack.i.l.bf16 %v5443_v24 }
 0x2c7   : > { %v4508_v27 = vpack.c.bf16 %v4820_v25, %v4819_v26  ;;  %v4524_v37 = vpack.c.bf16 %v4825_v30, %v4824_v31 }
 0x2c8   : > { %v5445_v28 = vpop.permute.xlu1 %4827  ;;  %v5447_v29 = vpop.permute.xlu0 %4832 }
 0x2c9   : > { %4509 = vmatprep.subr.bf16.mxu1 %v4508_v27  ;;  %v4830_v40 = vunpack.i.h.bf16 %v5445_v28  ;;  %v4829_v41 = vunpack.i.l.bf16 %v5445_v28  ;;  %v4835_v56 = vunpack.i.h.bf16 %v5447_v29  ;;  %v4834_v57 = vunpack.i.l.bf16 %v5447_v29  ;;  %v5596_v28 = vld [vmem:[%s5720_s4 + $0x48] sm:$0xff]  ;;  %v4181_v29 = vld [vmem:[%s5720_s4 + $0x50] sm:$0xff] }
 0x2ca   : > { %4511 = vmatpush3.bf16.msra.mxu1 %v4508_v27 }
 0x2cb   : > { %4517 = vmatprep.subr.bf16.mxu1 %v4516_v7  ;;  %v4532_v51 = vpack.c.bf16 %v4830_v40, %v4829_v41  ;;  %v4540_v63 = vpack.c.bf16 %v4835_v56, %v4834_v57 }
 0x2cc   : > { %v5461_v35 = vpop.permute.xlu1 %4842  ;;  %v5463_v36 = vpop.permute.xlu0 %4837 }
 0x2cd   : > { %4374 = vmatmul.mubr.msk.f32.vlgmr.msra.gmra.mrb[2].mxu1 %vm2246_vm14, %v5454_v32  ;;  %v4845_v1 = vunpack.i.h.bf16 %v5461_v35  ;;  %v4840_v12 = vunpack.i.h.bf16 %v5463_v36  ;;  %v4839_v13 = vunpack.i.l.bf16 %v5463_v36 }
 0x2ce   : > { %4519 = vmatpush3.bf16.msra.mxu1 %v4516_v7  ;;  %4380 = vmatprep.mubr.msk.f32.mxu1 %vm2246_vm14, %v5459_v34 }
 0x2cf   : > { %4525 = vmatprep.subr.bf16.mxu1 %v4524_v37  ;;  %v3148_v22 = vsel %vm1323_vm6, %v4839_v13, %v4840_v12 }
 0x2d0   : > { %v5473_v38 = vpop.permute.xlu1 %4847  ;;  %v4853_v39 = vpop.permute.xlu0 %4852 }
 0x2d1   : > { %v4855_v42 = vunpack.i.h.bf16 %v4853_v39  ;;  %v4854_v43 = vunpack.i.l.bf16 %v4853_v39  ;;  %v4850_v23 = vunpack.i.h.bf16 %v5473_v38  ;;  %v4849_v24 = vunpack.i.l.bf16 %v5473_v38 }
 0x2d3   : > { %v2237_v45 = vsel %vm347_vm1, %v4854_v43, %v4819_v26  ;;  %v2239_v46 = vsel %vm347_vm1, %v4855_v42, %v4820_v25  ;;  %v3147_v39 = vsel %vm1323_vm6, %v4850_v23, %v4839_v13 }
 0x2d4   : > { %v4858_v47 = vpop.permute.xlu1 %4857  ;;  %v5484_v48 = vpop.permute.xlu0 %4867  ;;  %v4504_v49 = vpack.c.bf16 %v2239_v46, %v2237_v45 }
 0x2d5   : > { %v4860_v52 = vunpack.i.h.bf16 %v4858_v47  ;;  %v4859_v53 = vunpack.i.l.bf16 %v4858_v47  ;;  %4381 = vmatmul.mubr.msk.f32.vlgmr.msra.gmra.mrb[2].mxu1 %vm2246_vm14, %v5480_v44 }
 0x2d6   : > { %4527 = vmatpush3.bf16.msra.mxu1 %v4524_v37  ;;  %4505 = vmatprep.subr.bf16.mxu0 %v4504_v49  ;;  %v5575_v37 = vld [vmem:[%s5720_s4 + $0x40] sm:$0xff] }
 0x2d7   : > { %v2236_v54 = vsel %vm347_vm1, %v4859_v53, %v4854_v43  ;;  %v2238_v55 = vsel %vm347_vm1, %v4860_v52, %v4855_v42  ;;  %4533 = vmatprep.subr.bf16.mxu1 %v4532_v51  ;;  %4387 = vmatprep.mubr.msk.f32.mxu1 %vm2246_vm14, %v5489_v50 }
 0x2d8   : > { %v4506_v58 = vpack.c.bf16 %v2238_v55, %v2236_v54  ;;  %v5503_v60 = vpop.permute.xlu1 %4862  ;;  %v5505_v61 = vpop.permute.xlu0 %4872 }
 0x2d9   : > { %v4865_v53 = vunpack.i.h.bf16 %v5503_v60 }
 0x2da   : > { %4507 = vmatpush1.bf16.msra.mxu0 %v4506_v58 }
 0x2db   : > { %4513 = vmatprep.subr.bf16.mxu0 %v4512_v3  ;;  %v4844_v3 = vunpack.i.l.bf16 %v5461_v35  ;;  %v4875_v35 = vunpack.i.h.bf16 %v5505_v61 }
 0x2dc   : > { %v4878_v0 = vpop.permute.xlu1 %4877  ;;  %v4883_v4 = vpop.permute.xlu0 %4882 }
 0x2dd   : > { %v4880_v5 = vunpack.i.h.bf16 %v4878_v0  ;;  %v4879_v6 = vunpack.i.l.bf16 %v4878_v0  ;;  %v4885_v7 = vunpack.i.h.bf16 %v4883_v4  ;;  %v4884_v11 = vunpack.i.l.bf16 %v4883_v4  ;;  %4155 = vmatmul.mubr.msk.f32.vlgmr.msra.gmra.mrb[6].mxu0 %vm2246_vm14, %v5389_v2  ;;  %4388 = vmatmul.mubr.msk.f32.vlgmr.msra.gmra.mrb[2].mxu1 %vm2246_vm14, %v5510_v62 }
 0x2de   : > { %4535 = vmatpush3.bf16.msra.mxu1 %v4532_v51  ;;  %4515 = vmatpush1.bf16.msra.mxu0 %v4514_v10  ;;  %v3146_v21 = vsel %vm1323_vm6, %v4844_v3, %v4845_v1  ;;  %v3145_v38 = vsel %vm1323_vm6, %v4849_v24, %v4844_v3  ;;  %v4188_v24 = vld [vmem:[%s5720_s4 + $0x68] sm:$0xff] }
 0x2df   : > { %4541 = vmatprep.subr.bf16.mxu1 %v4540_v63  ;;  %2323 = vmatprep.mubr.f32.mxu0 %v4957_v17  ;;  %v2579_v2 = vsel %vm711_vm3, %v4879_v6, %v4824_v31  ;;  %v2581_v16 = vsel %vm711_vm3, %v4880_v5, %v4825_v30  ;;  %v2580_v8 = vsel %vm711_vm3, %v4885_v7, %v4880_v5 }
 0x2e0   : > { %v5539_v14 = vpop.permute.xlu1 %4892  ;;  %v5541_v15 = vpop.permute.xlu0 %4887  ;;  %4394 = vmatprep.mubr.msk.f32.mxu1 %vm2246_vm14, %v5526_v59  ;;  %v2578_v9 = vsel %vm711_vm3, %v4884_v11, %v4879_v6  ;;  %v4520_v10 = vpack.c.bf16 %v2581_v16, %v2579_v2  ;;  %v4546_v52 = vpack.c.bf16 %v3147_v39, %v3145_v38  ;;  %v4548_v6 = vpack.c.bf16 %v4840_v12, %v4845_v1  ;;  %v4182_v1 = vld [vmem:[%s5720_s4 + $0x58] sm:$0xff] }
 0x2e1   : > { %4156 = vmatmul.mubr.msk.f32.gmra.mrb[8].mxu0 %vm2246_vm14, %v5454_v32  ;;  %v4522_v25 = vpack.c.bf16 %v2580_v8, %v2578_v9  ;;  %v4544_v32 = vpack.c.bf16 %v3148_v22, %v3146_v21  ;;  %v4895_v2 = vunpack.i.h.bf16 %v5539_v14  ;;  %v4894_v16 = vunpack.i.l.bf16 %v5539_v14 }
 0x2e2   : > { %2475 = vmatprep.mubr.f32.mxu0 %v4957_v17  ;;  %4521 = vmatprep.subr.bf16.mxu0 %v4520_v10  ;;  %v4890_v8 = vunpack.i.h.bf16 %v5541_v15  ;;  %v4889_v9 = vunpack.i.l.bf16 %v5541_v15 }
 0x2e3   : > { %v3524_v14 = vsel %vm1731_vm8, %v4894_v16, %v4895_v2 }
 0x2e4   : > { %v5566_v26 = vpop.permute.xlu1 %4897  ;;  %v4903_v27 = vpop.permute.xlu0 %4902  ;;  %v3526_v15 = vsel %vm1731_vm8, %v4889_v9, %v4890_v8  ;;  %v4564_v39 = vpack.c.bf16 %v4890_v8, %v4895_v2 }
 0x2e5   : > { %v4905_v30 = vunpack.i.h.bf16 %v4903_v27  ;;  %v4904_v31 = vunpack.i.l.bf16 %v4903_v27  ;;  %4159 = vmatmul.mubr.msk.f32.vlgmr.msra.gmra.mrb[6].mxu0 %vm2246_vm14, %v5459_v34  ;;  %4395 = vmatmul.mubr.msk.f32.vlgmr.msra.gmra.mrb[2].mxu1 %vm2246_vm14, %v5556_v18  ;;  %v4900_v22 = vunpack.i.h.bf16 %v5566_v26  ;;  %v4560_v23 = vpack.c.bf16 %v3526_v15, %v3524_v14 }
 0x2e6   : > { %4523 = vmatpush1.bf16.msra.mxu0 %v4522_v25  ;;  %4543 = vmatpush3.bf16.msra.mxu1 %v4540_v63  ;;  %v4869_v63 = vunpack.i.l.bf16 %v5484_v48 }
 0x2e7   : > { %4545 = vmatprep.subr.bf16.mxu1 %v4544_v32  ;;  %2481 = vmatprep.mubr.f32.mxu0 %v4957_v17  ;;  %v2768_v34 = vsel %vm915_vm4, %v4904_v31, %v4829_v41  ;;  %v2770_v45 = vsel %vm915_vm4, %v4905_v30, %v4830_v40  ;;  %v4864_v41 = vunpack.i.l.bf16 %v5503_v60  ;;  %v4870_v60 = vunpack.i.h.bf16 %v5484_v48 }
 0x2e8   : > { %v4908_v42 = vpop.permute.xlu1 %4907  ;;  %v4918_v43 = vpop.permute.xlu0 %4917  ;;  %4401 = vmatprep.mubr.msk.f32.mxu1 %vm2246_vm14, %v5575_v37  ;;  %v4528_v54 = vpack.c.bf16 %v2770_v45, %v2768_v34 }
 0x2e9   : > { %v4910_v46 = vunpack.i.h.bf16 %v4908_v42  ;;  %v4909_v47 = vunpack.i.l.bf16 %v4908_v42  ;;  %v4920_v49 = vunpack.i.h.bf16 %v4918_v43  ;;  %v4919_v51 = vunpack.i.l.bf16 %v4918_v43  ;;  %4160 = vmatmul.mubr.msk.f32.gmra.mrb[8].mxu0 %vm2246_vm14, %v5480_v44  ;;  %v4193_v42 = vld [vmem:[%s5720_s4 + $0x70] sm:$0xff] }
 0x2ea   : > { %2658 = vmatprep.mubr.f32.mxu0 %v4957_v17  ;;  %4529 = vmatprep.subr.bf16.mxu0 %v4528_v54  ;;  %v3337_v48 = vsel %vm1527_vm7, %v4864_v41, %v4865_v53  ;;  %v4556_v21 = vpack.c.bf16 %v4865_v53, %v4870_v60 }
 0x2eb   : > { %v2767_v40 = vsel %vm915_vm4, %v4909_v47, %v4904_v31  ;;  %v2769_v55 = vsel %vm915_vm4, %v4910_v46, %v4905_v30  ;;  %v2957_v44 = vsel %vm1119_vm5, %v4919_v51, %v4834_v57  ;;  %v2959_v58 = vsel %vm1119_vm5, %v4920_v49, %v4835_v56 }
 0x2ec   : > { %v4530_v0 = vpack.c.bf16 %v2769_v55, %v2767_v40  ;;  %v5608_v4 = vpop.permute.xlu0 %4927  ;;  %v4536_v5 = vpack.c.bf16 %v2959_v58, %v2957_v44  ;;  %v4874_v56 = vunpack.i.l.bf16 %v5505_v61  ;;  %v4913_v25 = vpop.permute.xlu1 %4912  ;;  %v4200_v40 = vld [vmem:[%s5720_s4 + $0x88] sm:$0xff] }
 0x2ed   : > { %4165 = vmatmul.mubr.msk.f32.vlgmr.msra.gmra.mrb[6].mxu0 %vm2246_vm14, %v5489_v50  ;;  %4402 = vmatmul.mubr.msk.f32.vlgmr.msra.gmra.mrb[2].mxu1 %vm2246_vm14, %v5596_v28  ;;  %v3335_v50 = vsel %vm1527_vm7, %v4869_v63, %v4870_v60  ;;  %v4915_v30 = vunpack.i.h.bf16 %v4913_v25  ;;  %v4914_v31 = vunpack.i.l.bf16 %v4913_v25  ;;  %v4930_v32 = vunpack.i.h.bf16 %v5608_v4 }
 0x2ee   : > { %4547 = vmatpush1.bf16.msra.mxu1 %v4546_v52  ;;  %4531 = vmatpush1.bf16.msra.mxu0 %v4530_v0  ;;  %v4552_v11 = vpack.c.bf16 %v3337_v48, %v3335_v50  ;;  %v3334_v13 = vsel %vm1527_vm7, %v4874_v56, %v4869_v63 }
 0x2ef   : > { %4549 = vmatprep.subr.bf16.mxu1 %v4548_v6  ;;  %4537 = vmatprep.subr.bf16.mxu0 %v4536_v5  ;;  %v3715_v45 = vsel %vm1935_vm9, %v4914_v31, %v4915_v30  ;;  %v4572_v54 = vpack.c.bf16 %v4915_v30, %v4930_v32 }
 0x2f0   : > { %v4933_v36 = vpop.permute.xlu0 %4932  ;;  %2664 = vmatprep.mubr.f32.mxu0 %v4957_v17  ;;  %3225 = vmatprep.mubr.f32.mxu1 %v4957_v17  ;;  %v4923_v34 = vpop.permute.xlu1 %4922 }
 0x2f1   : > { %v4935_v57 = vunpack.i.h.bf16 %v4933_v36  ;;  %v4934_v7 = vunpack.i.l.bf16 %v4933_v36  ;;  %4166 = vmatmul.mubr.msk.f32.gmra.mrb[8].mxu0 %vm2246_vm14, %v5510_v62  ;;  %4183 = vmatmul.mubr.msk.f32.vlgmr.msra.gmra.mrb[4].mxu1 %vm2246_vm14, %v4181_v29  ;;  %v3336_v62 = vsel %vm1527_vm7, %v4875_v35, %v4864_v41  ;;  %v4925_v46 = vunpack.i.h.bf16 %v4923_v34 }
 0x2f2   : > { %4551 = vmatpush3.bf16.msra.mxu1 %v4548_v6  ;;  %2847 = vmatprep.mubr.f32.mxu0 %v4957_v17  ;;  %v4554_v10 = vpack.c.bf16 %v3336_v62, %v3334_v13  ;;  %v4924_v47 = vunpack.i.l.bf16 %v4923_v34 }
 0x2f3   : > { %v2956_v3 = vsel %vm1119_vm5, %v4934_v7, %v4919_v51  ;;  %v2958_v12 = vsel %vm1119_vm5, %v4935_v57, %v4920_v49  ;;  %4553 = vmatprep.subr.bf16.mxu1 %v4552_v11  ;;  %3231 = vmatprep.mubr.f32.mxu1 %v4957_v17  ;;  %v4194_v51 = vld [vmem:[%s5720_s4 + $0x78] sm:$0xff]  ;;  %v3714_v53 = vsel %vm1935_vm9, %v4925_v46, %v4914_v31 }
 0x2f4   : > { %v4538_v61 = vpack.c.bf16 %v2958_v12, %v2956_v3 }
 0x2f5   : > { %4171 = vmatmul.mubr.msk.f32.vlgmr.msra.gmra.mrb[6].mxu0 %vm2246_vm14, %v5526_v59  ;;  %4184 = vmatmul.mubr.msk.f32.gmra.mrb[6].mxu1 %vm2246_vm14, %v4182_v1  ;;  %v4187_v59 = vld [vmem:[%s5720_s4 + $0x60] sm:$0xff] }
 0x2f6   : > { %4539 = vmatpush1.bf16.msra.mxu0 %v4538_v61  ;;  %2853 = vmatprep.mubr.f32.mxu0 %v4957_v17 }
 0x2f7   : > { %4408 = vmatprep.mubr.msk.f32.mxu1 %vm2246_vm14, %v4181_v29 }
 0x2f9   : > { %4172 = vmatmul.mubr.msk.f32.gmra.mrb[8].mxu0 %vm2246_vm14, %v5556_v18  ;;  %4409 = vmatmul.mubr.msk.f32.vlgmr.msra.gmra.mrb[2].mxu1 %vm2246_vm14, %v4182_v1  ;;  %v4899_v18 = vunpack.i.l.bf16 %v5566_v26  ;;  %v3525_v26 = vsel %vm1731_vm8, %v4900_v22, %v4889_v9 }
 0x2fa   : > { %4555 = vmatpush1.bf16.msra.mxu1 %v4554_v10  ;;  %3036 = vmatprep.mubr.f32.mxu0 %v4957_v17 }
 0x2fb   : > { %4557 = vmatprep.subr.bf16.mxu1 %v4556_v21  ;;  %3414 = vmatprep.mubr.f32.mxu1 %v4957_v17  ;;  %v3523_v27 = vsel %vm1731_vm8, %v4899_v18, %v4894_v16 }
 0x2fc   : > { %v4562_v38 = vpack.c.bf16 %v3525_v26, %v3523_v27 }
 0x2fd   : > { %4177 = vmatmul.mubr.msk.f32.vlgmr.msra.gmra.mrb[6].mxu0 %vm2246_vm14, %v5575_v37  ;;  %4189 = vmatmul.mubr.msk.f32.vlgmr.msra.gmra.mrb[4].mxu1 %vm2246_vm14, %v4187_v59  ;;  %v4929_v37 = vunpack.i.l.bf16 %v5608_v4 }
 0x2fe   : > { %4559 = vmatpush3.bf16.msra.mxu1 %v4556_v21  ;;  %3042 = vmatprep.mubr.f32.mxu0 %v4957_v17 }
 0x2ff   : > { %4561 = vmatprep.subr.bf16.mxu1 %v4560_v23  ;;  %3420 = vmatprep.mubr.f32.mxu1 %v4957_v17  ;;  %v3713_v43 = vsel %vm1935_vm9, %v4929_v37, %v4930_v32  ;;  %v3712_v52 = vsel %vm1935_vm9, %v4924_v47, %v4929_v37 }
 0x300   : > { %v4568_v49 = vpack.c.bf16 %v3715_v45, %v3713_v43  ;;  %v4570_v41 = vpack.c.bf16 %v3714_v53, %v3712_v52 }
 0x301   : > { %4178 = vmatmul.mubr.msk.f32.gmra.mrb[8].mxu0 %vm2246_vm14, %v5596_v28  ;;  %4190 = vmatmul.mubr.msk.f32.gmra.mrb[6].mxu1 %vm2246_vm14, %v4188_v24  ;;  %v4199_v28 = vld [vmem:[%s5720_s4 + $0x80] sm:$0xff]  ;;  %v3891_v5 = vpop.permute.xlu1 %3890  ;;  %v3896_v29 = vpop.permute.xlu0 %3895 }
 0x302   : > { %4415 = vmatprep.mubr.msk.f32.mxu1 %vm2246_vm14, %v4187_v59 }
 0x305   : > { %4416 = vmatmul.mubr.msk.f32.vlgmr.msra.gmra.mrb[2].mxu1 %vm2246_vm14, %v4188_v24  ;;  %v3915_v13 = vpop.permute.xlu1 %3914  ;;  %v3920_v2 = vpop.permute.xlu0 %3919 }
 0x306   : > { %4563 = vmatpush1.bf16.msra.mxu1 %v4562_v38  ;;  %3603 = vmatprep.mubr.f32.mxu1 %v4957_v17 }
 0x307   : > { %4565 = vmatprep.subr.bf16.mxu1 %v4564_v39 }
 0x309   : > { %4195 = vmatmul.mubr.msk.f32.vlgmr.msra.gmra.mrb[4].mxu1 %vm2246_vm14, %v4193_v42  ;;  %v3956_v45 = vpop.permute.xlu1 %3955 }
 0x30a   : > { %4567 = vmatpush3.bf16.msra.mxu1 %v4564_v39  ;;  %3609 = vmatprep.mubr.f32.mxu1 %v4957_v17  ;;  %v3961_v52 = vrot.slane %v3956_v45, %v2146_v33 }
 0x30b   : > { %4569 = vmatprep.subr.bf16.mxu1 %v4568_v49 }
 0x30d   : > { %4196 = vmatmul.mubr.msk.f32.gmra.mrb[6].mxu1 %vm2246_vm14, %v4194_v51 }
 0x30e   : > { %4422 = vmatprep.mubr.msk.f32.mxu1 %vm2246_vm14, %v4193_v42 }
 0x311   : > { %4423 = vmatmul.mubr.msk.f32.vlgmr.msra.gmra.mrb[2].mxu1 %vm2246_vm14, %v4194_v51 }
 0x312   : > { %4571 = vmatpush1.bf16.msra.mxu1 %v4570_v41  ;;  %3792 = vmatprep.mubr.f32.mxu1 %v4957_v17 }
 0x313   : > { %4573 = vmatprep.subr.bf16.mxu1 %v4572_v54 }
 0x315   : > { %4201 = vmatmul.mubr.msk.f32.vlgmr.msra.gmra.mrb[4].mxu1 %vm2246_vm14, %v4199_v28 }
 0x316   : > { %4575 = vmatpush3.bf16.msra.mxu1 %v4572_v54  ;;  %3798 = vmatprep.mubr.f32.mxu1 %v4957_v17 }
 0x319   : > { %4202 = vmatmul.mubr.msk.f32.gmra.mrb[6].mxu1 %vm2246_vm14, %v4200_v40 }
 0x31a   : > { %4429 = vmatprep.mubr.msk.f32.mxu1 %vm2246_vm14, %v4199_v28 }
 0x31d   : > { %4430 = vmatmul.mubr.msk.f32.vlgmr.msra.gmra.mrb[2].mxu1 %vm2246_vm14, %v4200_v40 }
 0x3d0   : > { %v3038_v55 = vpop.f32.mrb[6].mxu0 }
 0x3d1   : > { %v3040_v44 = vpop.f32.mrb[7].mxu0 }
 0x3d4   : > { %v3044_v58 = vpop.f32.mrb[8].mxu0 }
 0x3d5   : > { %v3046_v60 = vpop.f32.mrb[9].mxu0 }
 0x3e8   : > { %v3794_v63 = vpop.f32.mrb[4].mxu1 }
 0x3e9   : > { %v4578_v0 = vadd.f32 %v3794_v63, %v3038_v55  ;;  %v3796_v4 = vpop.f32.mrb[5].mxu1 }
 0x3ea   : > { %v4579_v6 = vadd.f32 %v3796_v4, %v3040_v44 }
 0x3eb   : > { %v3898_v17 = vadd.f32 %v4578_v0, %v3891_v5 }
 0x3ec   : > { %v3899_v48 = vadd.f32 %v4579_v6, %v3891_v5  ;;  %v3800_v35 = vpop.f32.mrb[6].mxu1 }
 0x3ed   : > { %v4580_v36 = vadd.f32 %v3800_v35, %v3044_v58  ;;  %v3802_v50 = vpop.f32.mrb[7].mxu1  ;;  %v3904_v57 = vmax.f32 %v3898_v17, 0.0 }
 0x3ee   : > { %v4581_v56 = vadd.f32 %v3802_v50, %v3046_v60  ;;  %v3905_v11 = vmax.f32 %v3899_v48, 0.0  ;;  %v4967_v50 = vmov 1966171168  }
 0x3ef   : > { %v3901_v7 = vadd.f32 %v4580_v36, %v3896_v29  ;;  %v3922_v9 = vmul.f32 %v3915_v13, %v3904_v57 }
 0x3f0   : > { %v3902_v1 = vadd.f32 %v4581_v56, %v3896_v29  ;;  %v4431_v3 = vpop.f32.mrb[2].mxu1  ;;  %v3923_v59 = vmul.f32 %v3915_v13, %v3905_v11  ;;  %v3988_v56 = vunpack.c.l.s4 %v4967_v50 }
 0x3f1   : > { %v3907_v12 = vmax.f32 %v3901_v7, 0.0  ;;  %v3903_v61 = vadd.f32 %v4431_v3, %v3896_v29  ;;  %v3871_v62 = vpop.f32.mrb[3].mxu1 }
 0x3f2   : > { %v3908_v16 = vmax.f32 %v3902_v1, 0.0  ;;  %v3900_v8 = vadd.f32 %v3891_v5, %v3871_v62  ;;  %v3989_v57 = vunpack.c.0.s8 %v3988_v56 }
 0x3f3   : > { %v3925_v10 = vmul.f32 %v3920_v2, %v3907_v12  ;;  %v3909_v21 = vmax.f32 %v3903_v61, 0.0 }
 0x3f4   : > { %v3926_v14 = vmul.f32 %v3920_v2, %v3908_v16  ;;  %v3906_v15 = vmax.f32 %v3900_v8, 0.0  ;;  %v3992_v3 = vsub.s32 %v3989_v57, %v5362_v20 }
 0x3f5   : > { %v3928_v22 = vadd.f32 %v3925_v10, %v3922_v9  ;;  %v3927_v18 = vmul.f32 %v3920_v2, %v3909_v21 }
 0x3f6   : > { %v3935_v23 = vadd.f32 %v3926_v14, %v3923_v59  ;;  %v3924_v24 = vmul.f32 %v3915_v13, %v3906_v15 }
 0x3f7   : > { %v3929_v25 = vrot.slane %v3928_v22, 4  ;;  %v3944_v27 = vsel %vm3942_vm15, %v3927_v18, 0.0 }
 0x3f8   : > { %v3936_v26 = vrot.slane %v3935_v23, 4  ;;  %v3943_v30 = vsel %vm3942_vm15, %v3924_v24, 0.0 }
 0x3f9   : > { %v3930_v31 = vadd.f32 %v3929_v25, %v3928_v22  ;;  %v3945_v32 = vadd.f32 %v3944_v27, %v3943_v30 }
 0x3fa   : > { %v3937_v37 = vadd.f32 %v3936_v26, %v3935_v23 }
 0x3fb   : > { %v3931_v38 = vrot.slane %v3930_v31, 2  ;;  %v3946_v39 = vrot.slane %v3945_v32, 4 }
 0x3fc   : > { %v3938_v34 = vrot.slane %v3937_v37, 2 }
 0x3fd   : > { %v3932_v42 = vadd.f32 %v3931_v38, %v3930_v31  ;;  %v3947_v43 = vadd.f32 %v3946_v39, %v3945_v32 }
 0x3fe   : > { %v3939_v46 = vadd.f32 %v3938_v34, %v3937_v37 }
 0x3ff   : > { %v3933_v47 = vrot.slane %v3932_v42, 1  ;;  %v3948_v49 = vrot.slane %v3947_v43, 2 }
 0x400   : > { %v3940_v51 = vrot.slane %v3939_v46, 1 }
 0x401   : > { %v3934_v53 = vadd.f32 %v3933_v47, %v3932_v42  ;;  %v3949_v41 = vadd.f32 %v3948_v49, %v3947_v43 }
 0x402   : > { %v3941_v54 = vadd.f32 %v3940_v51, %v3939_v46 }
 0x403   : > { %v3962_v28 = vadd.f32 %v3961_v52, %v3934_v53  ;;  %v3950_v40 = vrot.slane %v3949_v41, 1 }
 0x404   : > { %v3963_v55 = vadd.f32 %v3961_v52, %v3941_v54 }
 0x405   : > { %v3965_v44 = vsub.f32 0.0, %v3962_v28  ;;  %v3951_v58 = vadd.f32 %v3950_v40, %v3949_v41 }
 0x406   : > { %v3966_v60 = vsub.f32 0.0, %v3963_v55 }
 0x407   : > { %v3968_v63 = vmul.f32 1.442695, %v3965_v44  ;;  %v3964_v0 = vadd.f32 %v3961_v52, %v3951_v58 }
 0x408   : > { %v3970_v4 = vmul.f32 1.442695, %v3966_v60 }
 0x409   : > { %4936 = vpow2.f32 %v3968_v63  ;;  %v3967_v5 = vsub.f32 0.0, %v3964_v0 }
 0x40a   : > { %4938 = vpow2.f32 %v3970_v4 }
 0x40b   : > { %v3972_v6 = vmul.f32 1.442695, %v3967_v5 }
 0x40d   : > { %4940 = vpow2.f32 %v3972_v6 }
 0x413   : > { %v4937_v17 = vpop.eup %4936 }
 0x414   : > { %v4939_v29 = vpop.eup %4938  ;;  %v3974_v33 = vadd.f32 1.0, %v4937_v17 }
 0x415   : > { %v3975_v48 = vadd.f32 1.0, %v4939_v29 }
 0x416   : > { %4942 = vrcp.f32 %v3974_v33 }
 0x417   : > { %v4941_v35 = vpop.eup %4940  ;;  %4944 = vrcp.f32 %v3975_v48 }
 0x418   : > { %v3976_v36 = vadd.f32 1.0, %v4941_v35 }
 0x41a   : > { %4946 = vrcp.f32 %v3976_v36 }
 0x420   : > { %v4943_v7 = vpop.eup %4942 }
 0x421   : > { %v4945_v11 = vpop.eup %4944  ;;  %v3978_v1 = vmul.f32 2.0, %v4943_v7 }
 0x422   : > { %v3980_v12 = vmul.f32 2.0, %v4945_v11 }
 0x424   : > { %v4947_v61 = vpop.eup %4946  ;;  %v3986_v62 = vcombine.low %v3978_v1, %v3980_v12 }
 0x425   : > { %v3982_v13 = vmul.f32 2.0, %v4947_v61 }
 0x426   : > { %v3993_v2 = vrot.slane %v3986_v62, %v3992_v3 }
 0x427   : > { %v4000_v16 = vrot.slane %v3982_v13, %v3992_v3 }
 0x429   : > { %v4001_v8 = vcombine.low %v3993_v2, %v4000_v16 }
 0x42b   : > { %v4008_v9 = vrot.slane %v4001_v8, %v3992_v3 }
 0x42d   : > { %4014 = vst.msk [vmem:[%s305_s19] sm:$0x7] %vm4012_vm0, %v4008_v9 }
 0x42e PF: > { %s20_s29 = sadd.s32 1, %s4954_s29  }
 0x42f   : > { %p17_p4 = scmp.ge.s32.totalorder %s20_s29, 4  }
 0x431   :  { %19 = sbr.rel (!%p17_p4) target bundleno = 3 (0x3), region = 98 }

// kernel: feat_scale_net.3
= control target key start
LH: loop header
LB: loop body
LE: loop exit
PB: predicated region body
PF: predicated region fallthrough
CT: control target
= control target key end

     0   :  { %s3104_s15 = smov 0   ;;  %s5191_s0 = inlined_call_operand.vmem [shape: f32[2,4,16,102], index: 0, kind: input, shape index: {}]   ;;  %s5192_s1 = inlined_call_operand.vmem [shape: f32[2,4,80], index: 1, kind: input, shape index: {}]   ;;  %s5193_s2 = inlined_call_operand.vmem [shape: f32[4,32,144], index: 2, kind: input, shape index: {}]   ;;  %s5194_s3 = inlined_call_operand.vmem [shape: f32[32,1], index: 3, kind: input, shape index: {}]   ;;  %s5195_s4 = inlined_call_operand.vmem [shape: f32[2,32,80], index: 4, kind: output, shape index: {}]  }
   0x1 LB: > { %s2829_s16 = sadd.s32 4294967295, %s3064_s15   ;;  %p2833_p0 = scmp.ge.s32.totalorder %s3064_s15, 1  ;;  %s3064_s15 = sphi %s3104_s15, %s14_s15  }
   0x2   : > { %p171_p1 = scmp.lt.s32.totalorder %s3064_s15, 3 }
   0x4   : > { %p172_p2 = pnand %p2833_p0, %p171_p1 }
   0x6   : > { %175 = sbr.rel (%p172_p2) target bundleno = 1107 (0x453), region = 36 }
   0xd   : > { %p201_p3 = scmp.lt.s32.totalorder %s2829_s16, 1  ;;  %v232_v0 = vlaneseq  ;;  %s3066_s21 = smov 1   ;;  %vm569_vm0 = vcmask 654336   ;;  %vm1224_vm1 = vcmask 130048  }
   0xe   : > { %s3067_s22 = smov 11   ;;  %s3068_s23 = smov 2  }
   0xf   : > { %s5461_s16 = smov (!%p201_p3, %s2829_s16), 1  ;;  %v233_v1 = vshrl.u32 %v232_v0, 7  ;;  %s3069_s24 = smov 10  }
  0x10   : > { %s2836_s17 = sshll.u32 %s5461_s16, 2  ;;  %s3070_s25 = smov 12  }
  0x11   : > { %s3118_s20 = scalar_lea.vmem %s5192_s1, %s2836_s17  ;;  %v3121_v9 = vsub.s32 0, %v233_v1  ;;  %s3071_s26 = smov 20  }
  0x12   : > { %v215_v2 = vld [vmem:[%s3118_s20] sm:$0x1]  ;;  %v678_v18 = vld [vmem:[%s3118_s20 + $0x1] sm:$0x1]  ;;  %s2913_s27 = sshll.u32 %s5461_s16, 6  ;;  %s3072_s28 = smov 21  }
  0x13   : > { %v216_v3 = vand.u32 2147483647, %v215_v2  ;;  %v2839_v4 = vadd.f32 -1.0, %v215_v2  ;;  %v2840_v5 = vadd.f32 -2.0, %v215_v2  ;;  %v2847_v19 = vadd.f32 -1.0, %v678_v18  ;;  %s3157_s5 = scalar_lea.vmem %s5191_s0, %s2913_s27  ;;  %s3073_s6 = smov 22  }
  0x14   : > { %v2848_v20 = vadd.f32 -2.0, %v678_v18  ;;  %v679_v25 = vand.u32 2147483647, %v678_v18  ;;  %v2028_v27 = vld [vmem:[%s3118_s20 + $0x3] sm:$0x1]  ;;  %v3173_v32 = vld [vmem:[%s3157_s5 + $0x8] sm:$0xff] }
  0x15   : > { %v217_v6 = vsub.f32 1.0, %v216_v3  ;;  %v220_v7 = vand.u32 2147483647, %v2839_v4  ;;  %v224_v8 = vand.u32 2147483647, %v2840_v5  ;;  %v3165_v28 = vld [vmem:[%s3157_s5] sm:$0xff] }
  0x16   : > { %v683_v21 = vand.u32 2147483647, %v2847_v19  ;;  %v687_v22 = vand.u32 2147483647, %v2848_v20  ;;  %v680_v30 = vsub.f32 1.0, %v679_v25  ;;  %v2891_v34 = vadd.f32 -1.0, %v2028_v27 }
  0x17   : > { %v218_v10 = vmax.f32 %v217_v6, 0.0  ;;  %v221_v11 = vsub.f32 1.0, %v220_v7  ;;  %v225_v12 = vsub.f32 1.0, %v224_v8  ;;  %v3170_v31 = vld [vmem:[%s3118_s20 + $0x2] sm:$0x1]  ;;  %s3074_s7 = smov 117  }
  0x18   : > { %v684_v23 = vsub.f32 1.0, %v683_v21  ;;  %v688_v24 = vsub.f32 1.0, %v687_v22  ;;  %v2872_v36 = vadd.f32 -2.0, %v3170_v31  ;;  %v681_v37 = vmax.f32 %v680_v30, 0.0  ;;  %v3252_v0 = vld [vmem:[%s3157_s5 + $0x28] sm:$0xff]  ;;  %v3255_v1 = vld [vmem:[%s3157_s5 + $0x20] sm:$0xff] }
  0x19   : > { %v222_v13 = vmax.f32 %v221_v11, 0.0  ;;  %v226_v14 = vmax.f32 %v225_v12, 0.0  ;;  %v249_v15 = vrot.slane %v218_v10, %v3121_v9  ;;  %v2033_v38 = vand.u32 2147483647, %v2891_v34  ;;  %s3075_s8 = smov 127   ;;  %s3076_s9 = smov 118  }
  0x1a   : > { %v685_v26 = vmax.f32 %v684_v23, 0.0  ;;  %v689_v29 = vmax.f32 %v688_v24, 0.0  ;;  %v1428_v39 = vand.u32 2147483647, %v2872_v36  ;;  %v3191_v40 = vrot.slane %v681_v37, %v3121_v9  ;;  %s2914_s11 = sshll.u32 %s5461_s16, 5 }
  0x1b   : > { %v3125_v16 = vrot.slane %v222_v13, %v3121_v9  ;;  %251 = vrot.lane.b32.xlu0 %v249_v15, %s3066_s21  ;;  %v3129_v17 = vrot.slane %v226_v14, %v3121_v9  ;;  %v2034_v41 = vsub.f32 1.0, %v2033_v38  ;;  %v2892_v43 = vadd.f32 -2.0, %v2028_v27  ;;  %s214_s14 = scalar_lea.vmem %s5195_s4, %s2914_s11 }
  0x1c   : > { %v3176_v33 = vrot.slane %v685_v26, %v3121_v9  ;;  %v3181_v35 = vrot.slane %v689_v29, %v3121_v9  ;;  %v1429_v42 = vsub.f32 1.0, %v1428_v39  ;;  %v1420_v50 = vand.u32 2147483647, %v3170_v31 }
  0x1d   : > { %5266 = vst [vmem:[#allocation3_spill] sm:$0xff] %v3125_v16  ;;  %5267 = vst [vmem:[#allocation4_spill] sm:$0xff] %v3129_v17  ;;  %267 = vrot.lane.b32.xlu1 %v3125_v16, %s3066_s21  ;;  %v2035_v44 = vmax.f32 %v2034_v41, 0.0  ;;  %v2037_v46 = vand.u32 2147483647, %v2892_v43  ;;  %v3347_v43 = vld [vmem:[%s3157_s5 + $0x10] sm:$0xff] }
  0x1e   : > { %5268 = vst [vmem:[#allocation5_spill] sm:$0xff] %v3176_v33  ;;  %5269 = vst [vmem:[#allocation6_spill] sm:$0xff] %v3181_v35  ;;  %v1430_v45 = vmax.f32 %v1429_v42, 0.0  ;;  %v1421_v52 = vsub.f32 1.0, %v1420_v50  ;;  %v2029_v56 = vand.u32 2147483647, %v2028_v27 }
  0x1f   : > { %363 = vrot.lane.b32.xlu0 %v249_v15, %s3067_s22  ;;  %v3202_v47 = vrot.slane %v2035_v44, %v3121_v9  ;;  %v2038_v49 = vsub.f32 1.0, %v2037_v46  ;;  %v3363_v50 = vld [vmem:[%s3157_s5 + $0x18] sm:$0xff] }
  0x20   : > { %v3207_v48 = vrot.slane %v1430_v45, %v3121_v9  ;;  %v1422_v54 = vmax.f32 %v1421_v52, 0.0  ;;  %v2030_v57 = vsub.f32 1.0, %v2029_v56 }
  0x21   : > { %292 = vrot.lane.b32.xlu1 %v3129_v17, %s3066_s21  ;;  %v2039_v51 = vmax.f32 %v2038_v49, 0.0 }
  0x22   : > { %5270 = vst [vmem:[#allocation7_spill] sm:$0xff] %v3207_v48  ;;  %v3228_v55 = vrot.slane %v1422_v54, %v3121_v9  ;;  %v2031_v58 = vmax.f32 %v2030_v57, 0.0 }
  0x23   : > { %275 = vrot.lane.b32.xlu0 %v3129_v17, %s3068_s23  ;;  %v3219_v53 = vrot.slane %v2039_v51, %v3121_v9 }
  0x24   : > { %5272 = vst [vmem:[#allocation9_spill] sm:$0xff] %v3228_v55  ;;  %v3239_v59 = vrot.slane %v2031_v58, %v3121_v9 }
  0x25   : > { %356 = vrot.lane.b32.xlu1 %v3125_v16, %s3069_s24  ;;  %5271 = vst [vmem:[#allocation8_spill] sm:$0xff] %v3219_v53 }
  0x26   : > { %5273 = vst [vmem:[#allocation10_spill] sm:$0xff] %v3239_v59 }
  0x27   : > { %351 = vrot.lane.b32.xlu0 %v3129_v17, %s3069_s24 }
  0x29   : > { %378 = vrot.lane.b32.xlu1 %v3125_v16, %s3067_s22 }
  0x2b   : > { %385 = vrot.lane.b32.xlu0 %v3129_v17, %s3070_s25 }
  0x2d   : > { %400 = vrot.lane.b32.xlu1 %v249_v15, %s3069_s24 }
  0x2f   : > { %481 = vrot.lane.b32.xlu0 %v3129_v17, %s3071_s26 }
  0x31   : > { %486 = vrot.lane.b32.xlu1 %v3125_v16, %s3071_s26 }
  0x33   : > { %493 = vrot.lane.b32.xlu0 %v249_v15, %s3072_s28 }
  0x35   : > { %508 = vrot.lane.b32.xlu1 %v3125_v16, %s3072_s28 }
  0x37   : > { %515 = vrot.lane.b32.xlu0 %v3129_v17, %s3073_s6 }
  0x39   : > { %542 = vrot.lane.b32.xlu1 %v3129_v17, %s3072_s28 }
  0x3b   : > { %604 = vrot.lane.b32.xlu0 %v3165_v28, %s3074_s7 }
  0x3d   : > { %606 = vrot.lane.b32.xlu1 %v3173_v32, %s3074_s7 }
  0x3f   : > { %881 = vrot.lane.b32.xlu0 %v3176_v33, %s3070_s25 }
  0x41   : > { %896 = vrot.lane.b32.xlu1 %v3181_v35, %s3070_s25 }
  0x43   : > { %705 = vrot.lane.b32.xlu0 %v3176_v33, %s3066_s21 }
  0x45   : > { %1031 = vrot.lane.b32.xlu1 %v3191_v40, %s3072_s28 }
  0x47   : > { %1016 = vrot.lane.b32.xlu0 %v3176_v33, %s3072_s28 }
  0x49   : > { %725 = vrot.lane.b32.xlu1 %v3191_v40, %s3066_s21 }
  0x4b   : > { %1046 = vrot.lane.b32.xlu0 %v3176_v33, %s3073_s6 }
  0x4d   : > { %1061 = vrot.lane.b32.xlu1 %v3181_v35, %s3073_s6 }
  0x4f   : > { %2169 = vrot.lane.b32.xlu0 %v3202_v47, %s3070_s25 }
  0x51   : > { %1540 = vrot.lane.b32.xlu1 %v3207_v48, %s3070_s25 }
  0x53   : > { %756 = vrot.lane.b32.xlu0 %v3181_v35, %s3068_s23 }
  0x55   : > { %740 = vrot.lane.b32.xlu1 %v3176_v33, %s3068_s23 }
  0x57   : > { %866 = vrot.lane.b32.xlu0 %v3191_v40, %s3067_s22 }
  0x59   : > { %2184 = vrot.lane.b32.xlu1 %v3219_v53, %s3070_s25 }
  0x5b   : > { %1694 = vrot.lane.b32.xlu0 %v3207_v48, %s3073_s6 }
  0x5d   : > { %1672 = vrot.lane.b32.xlu1 %v3228_v55, %s3072_s28 }
  0x61   : > { %851 = vrot.lane.b32.xlu1 %v3176_v33, %s3067_s22 }
  0x65   : > { %2328 = vrot.lane.b32.xlu1 %v3202_v47, %s3072_s28 }
  0x69   : > { %2343 = vrot.lane.b32.xlu1 %v3239_v59, %s3072_s28 }
  0x8d   : > { %v252_v60 = vpop.permute.xlu0 %251 }
  0x8e   : > { %v3244_v61 = vmul.f32 %v252_v60, %v3173_v32  ;;  %v3247_v62 = vmul.f32 %v252_v60, %v3165_v28  ;;  %v3264_v3 = vmul.f32 %v3252_v0, %v252_v60  ;;  %v3267_v4 = vmul.f32 %v3255_v1, %v252_v60 }
  0x8f   : > { %v3249_v63 = vpop.permute.xlu1 %267 }
  0x90   : > { %260 = vrot.lane.b32.xlu1 %v3244_v61, %s3075_s8  ;;  %258 = vrot.lane.b32.xlu0 %v3247_v62, %s3075_s8 }
  0x91   : > { %v3261_v2 = vpop.permute.xlu0 %363 }
  0x92   : > { %v3277_v6 = vmul.f32 %v3261_v2, %v3165_v28  ;;  %v3281_v7 = vmul.f32 %v3261_v2, %v3173_v32  ;;  %v3299_v14 = vmul.f32 %v3252_v0, %v3261_v2  ;;  %v3303_v15 = vmul.f32 %v3255_v1, %v3261_v2 }
  0x93   : > { %v3269_v5 = vpop.permute.xlu1 %292 }
  0x94   : > { %317 = vrot.lane.b32.xlu1 %v3264_v3, %s3075_s8  ;;  %315 = vrot.lane.b32.xlu0 %v3267_v4, %s3075_s8 }
  0x95   : > { %v276_v8 = vpop.permute.xlu0 %275 }
  0x96   : > { %v278_v26 = vmul.f32 %v276_v8, %v3165_v28  ;;  %v328_v30 = vmul.f32 %v3252_v0, %v276_v8  ;;  %v279_v57 = vmul.f32 %v276_v8, %v3173_v32 }
  0x97   : > { %v3283_v10 = vpop.permute.xlu1 %356 }
  0x98   : > { %370 = vrot.lane.b32.xlu1 %v3277_v6, %s3075_s8  ;;  %372 = vrot.lane.b32.xlu0 %v3281_v7, %s3075_s8 }
  0x99   : > { %v3289_v11 = vpop.permute.xlu0 %351 }
  0x9b   : > { %v3291_v12 = vpop.permute.xlu1 %378 }
  0x9c   : > { %417 = vrot.lane.b32.xlu1 %v3281_v7, %s3076_s9  ;;  %415 = vrot.lane.b32.xlu0 %v3277_v6, %s3076_s9 }
  0x9d   : > { %v386_v13 = vpop.permute.xlu0 %385 }
  0x9e   : > { %v388_v36 = vmul.f32 %v386_v13, %v3165_v28  ;;  %v458_v38 = vmul.f32 %v3252_v0, %v386_v13 }
  0x9f   : > { %v3305_v18 = vpop.permute.xlu1 %400 }
  0xa0   : > { %447 = vrot.lane.b32.xlu1 %v3299_v14, %s3075_s8  ;;  %445 = vrot.lane.b32.xlu0 %v3303_v15, %s3075_s8 }
  0xa1   : > { %v3311_v19 = vpop.permute.xlu0 %481 }
  0xa3   : > { %v3313_v20 = vpop.permute.xlu1 %486 }
  0xa5   : > { %v494_v21 = vpop.permute.xlu0 %493 }
  0xa6   : > { %v3316_v22 = vmul.f32 %v494_v21, %v3165_v28  ;;  %v3319_v23 = vmul.f32 %v494_v21, %v3173_v32  ;;  %v327_v21 = vmul.f32 %v3255_v1, %v276_v8 }
  0xa7   : > { %v3321_v24 = vpop.permute.xlu1 %508 }
  0xa8   : > { %500 = vrot.lane.b32.xlu1 %v3316_v22, %s3075_s8  ;;  %502 = vrot.lane.b32.xlu0 %v3319_v23, %s3075_s8 }
  0xa9   : > { %v516_v25 = vpop.permute.xlu0 %515 }
  0xaa   : > { %v518_v42 = vmul.f32 %v516_v25, %v3165_v28 }
  0xab   : > { %v3328_v27 = vpop.permute.xlu1 %542 }
  0xac   : > { %282 = vrot.lane.b32.xlu1 %v278_v26, %s3075_s8  ;;  %v546_v49 = vmul.f32 %v3328_v27, %v3173_v32 }
  0xad   : > { %v605_v29 = vpop.permute.xlu0 %604 }
  0xae   : > { %610 = vst.msk [vmem:[#allocation2 + $0x40] sm:$0xff] %vm569_vm0, %v605_v29  ;;  %v389_v29 = vmul.f32 %v386_v13, %v3173_v32 }
  0xaf   : > { %v607_v34 = vpop.permute.xlu1 %606 }
  0xb0   : > { %611 = vst.msk [vmem:[#allocation2 + $0x48] sm:$0xff] %vm569_vm0, %v607_v34  ;;  %333 = vrot.lane.b32.xlu1 %v328_v30, %s3075_s8 }
  0xb1   : > { %v3342_v41 = vpop.permute.xlu0 %881 }
  0xb2   : > { %5275 = vst [vmem:[#allocation12_spill] sm:$0xff] %v3342_v41  ;;  %v885_v26 = vmul.f32 %v3342_v41, %v3173_v32 }
  0xb3   : > { %v3336_v37 = vpop.permute.xlu1 %896 }
  0xb4   : > { %5274 = vst [vmem:[#allocation11_spill] sm:$0xff] %v3336_v37  ;;  %392 = vrot.lane.b32.xlu1 %v388_v36, %s3075_s8  ;;  %v899_v34 = vmul.f32 %v3347_v43, %v3336_v37  ;;  %v457_v36 = vmul.f32 %v3255_v1, %v386_v13 }
  0xb5   : > { %v3356_v46 = vpop.permute.xlu0 %705 }
  0xb6   : > { %5278 = vst [vmem:[#allocation15_spill] sm:$0xff] %v3356_v46  ;;  %v708_v54 = vmul.f32 %v3356_v46, %v3165_v28 }
  0xb7   : > { %v3340_v39 = vpop.permute.xlu1 %1031 }
  0xb8   : > { %463 = vrot.lane.b32.xlu1 %v458_v38, %s3075_s8  ;;  %v519_v38 = vmul.f32 %v516_v25, %v3173_v32  ;;  %v709_v25 = vmul.f32 %v3356_v46, %v3173_v32 }
  0xb9   : > { %v1017_v30 = vpop.permute.xlu0 %1016 }
  0xba   : > { %v1020_v13 = vmul.f32 %v1017_v30, %v3173_v32 }
  0xbb   : > { %v3349_v44 = vpop.permute.xlu1 %725 }
  0xbc   : > { %5276 = vst [vmem:[#allocation13_spill] sm:$0xff] %v3349_v44  ;;  %522 = vrot.lane.b32.xlu1 %v518_v42, %s3075_s8  ;;  %v3354_v45 = vmul.f32 %v3347_v43, %v3349_v44  ;;  %v3370_v52 = vmul.f32 %v3363_v50, %v3349_v44  ;;  %v545_v42 = vmul.f32 %v3328_v27, %v3165_v28 }
  0xbd   : > { %v1047_v8 = vpop.permute.xlu0 %1046 }
  0xbe   : > { %5277 = vst [vmem:[#allocation14_spill] sm:$0xff] %v3354_v45  ;;  %732 = vrot.lane.b32.xlu0 %v3354_v45, %s3075_s8  ;;  %5279 = vst [vmem:[#allocation16_spill] sm:$0xff] %v3370_v52 }
  0xbf   : > { %v3365_v51 = vpop.permute.xlu1 %1061 }
  0xc0   : > { %551 = vrot.lane.b32.xlu1 %v546_v49, %s3076_s9  ;;  %v1064_v45 = vmul.f32 %v3347_v43, %v3365_v51 }
  0xc1   : > { %v3404_v49 = vpop.permute.xlu0 %2169 }
  0xc2   : > { %734 = vrot.lane.b32.xlu0 %v3370_v52, %s3075_s8 }
  0xc3   : > { %v3376_v56 = vpop.permute.xlu1 %1540 }
  0xc4   : > { %712 = vrot.lane.b32.xlu1 %v708_v54, %s3075_s8 }
  0xc6   : > { %284 = vrot.lane.b32.xlu0 %v279_v57, %s3075_s8  ;;  %v3416_v57 = vpop.permute.xlu0 %756 }
  0xc7   : > { %v3381_v58 = vpop.permute.xlu1 %740 }
  0xc8   : > { %v744_v60 = vmul.f32 %v3381_v58, %v3173_v32  ;;  %v743_v54 = vmul.f32 %v3381_v58, %v3165_v28 }
  0xca   : > { %749 = vrot.lane.b32.xlu1 %v744_v60, %s3075_s8  ;;  %331 = vrot.lane.b32.xlu0 %v327_v21, %s3075_s8  ;;  %v3420_v60 = vmul.f32 %v3363_v50, %v3340_v39  ;;  %v759_v21 = vmul.f32 %v3347_v43, %v3416_v57 }
  0xcc   : > { %5280 = vst [vmem:[#allocation17_spill] sm:$0xff] %v3420_v60 }
  0xce   : > { %890 = vrot.lane.b32.xlu1 %v885_v26, %s3075_s8  ;;  %394 = vrot.lane.b32.xlu0 %v389_v29, %s3075_s8  ;;  %v1049_v26 = vmul.f32 %v1047_v8, %v3165_v28  ;;  %v3428_v29 = vpop.permute.xlu1 %2184 }
  0xd2   : > { %903 = vrot.lane.b32.xlu1 %v899_v34, %s3075_s8  ;;  %461 = vrot.lane.b32.xlu0 %v457_v36, %s3075_s8  ;;  %v884_v34 = vmul.f32 %v3342_v41, %v3165_v28  ;;  %v3437_v36 = vpop.permute.xlu1 %1672 }
  0xd6   : > { %2373 = vrot.lane.b32.xlu1 %v3219_v53, %s3073_s6  ;;  %524 = vrot.lane.b32.xlu0 %v519_v38, %s3075_s8  ;;  %v1065_v38 = vmul.f32 %v3363_v50, %v3365_v51 }
  0xda   : > { %1011 = vrot.lane.b32.xlu1 %v3181_v35, %s3071_s26  ;;  %549 = vrot.lane.b32.xlu0 %v545_v42, %s3076_s9  ;;  %v900_v42 = vmul.f32 %v3363_v50, %v3336_v37 }
  0xde   : > { %1025 = vrot.lane.b32.xlu1 %v1020_v13, %s3075_s8  ;;  %714 = vrot.lane.b32.xlu0 %v709_v25, %s3075_s8  ;;  %v3446_v13 = vpop.permute.xlu1 %851  ;;  %v760_v25 = vmul.f32 %v3363_v50, %v3416_v57 }
  0xdf   : > { %5281 = vst [vmem:[#allocation18_spill] sm:$0xff] %v3446_v13 }
  0xe2   : > { %1040 = vrot.lane.b32.xlu1 %v3420_v60, %s3075_s8  ;;  %747 = vrot.lane.b32.xlu0 %v743_v54, %s3075_s8  ;;  %v3456_v54 = vpop.permute.xlu1 %2328  ;;  %v3538_v60 = vmul.f32 %v3255_v1, %v3437_v36 }
  0xe3   : > { %5282 = vst [vmem:[#allocation19_spill] sm:$0xff] %v3456_v54 }
  0xe4   : > { %5292 = vst [vmem:[#allocation29_spill] sm:$0xff] %v3538_v60 }
  0xe6   : > { %1053 = vrot.lane.b32.xlu1 %v1049_v26, %s3075_s8  ;;  %763 = vrot.lane.b32.xlu0 %v759_v21, %s3075_s8  ;;  %v1019_v21 = vmul.f32 %v1017_v30, %v3165_v28  ;;  %v1544_v26 = vmul.f32 %v3376_v56, %v3173_v32 }
  0xea   : > { %1088 = vrot.lane.b32.xlu1 %v3181_v35, %s3072_s28  ;;  %888 = vrot.lane.b32.xlu0 %v884_v34, %s3075_s8  ;;  %v2871_v34 = vadd.f32 -1.0, %v3170_v31 }
  0xec   : > { %v1424_v52 = vand.u32 2147483647, %v2871_v34 }
  0xee   : > { %1070 = vrot.lane.b32.xlu1 %v1065_v38, %s3075_s8  ;;  %2358 = vrot.lane.b32.xlu0 %v3202_v47, %s3073_s6  ;;  %v3466_v38 = vmul.f32 %v3347_v43, %v3340_v39  ;;  %v1425_v31 = vsub.f32 1.0, %v1424_v52  ;;  %v1050_v39 = vmul.f32 %v1047_v8, %v3173_v32  ;;  %v2188_v52 = vmul.f32 %v3363_v50, %v3428_v29 }
  0xf0   : > { %5283 = vst [vmem:[#allocation20_spill] sm:$0xff] %v3466_v38  ;;  %v1426_v34 = vmax.f32 %v1425_v31, 0.0 }
  0xf2   : > { %2139 = vrot.lane.b32.xlu1 %v3202_v47, %s3067_s22  ;;  %905 = vrot.lane.b32.xlu0 %v900_v42, %s3075_s8  ;;  %v3468_v42 = vpop.permute.xlu1 %2343  ;;  %v3501_v31 = vrot.slane %v1426_v34, %v3121_v9  ;;  %v1543_v9 = vmul.f32 %v3376_v56, %v3165_v28 }
  0xf4   : > { %5286 = vst [vmem:[#allocation23_spill] sm:$0xff] %v3501_v31 }
  0xf6   : > { %2154 = vrot.lane.b32.xlu1 %v3239_v59, %s3067_s22  ;;  %765 = vrot.lane.b32.xlu0 %v760_v25, %s3075_s8  ;;  %v1614_v25 = vmul.f32 %v3252_v0, %v3376_v56 }
  0xfa   : > { %1549 = vrot.lane.b32.xlu1 %v1544_v26, %s3075_s8  ;;  %1023 = vrot.lane.b32.xlu0 %v1019_v21, %s3075_s8  ;;  %v3482_v21 = vpop.permute.xlu0 %866  ;;  %v2173_v26 = vmul.f32 %v3404_v49, %v3173_v32 }
  0xfe   : > { %1619 = vrot.lane.b32.xlu1 %v1614_v25, %s3075_s8  ;;  %1038 = vrot.lane.b32.xlu0 %v3466_v38, %s3075_s8  ;;  %v3494_v44 = vpop.permute.xlu0 %1694 }
 0x102   : > { %v3475_v30 = vpop.permute.xlu1 %260  ;;  %2106 = vrot.lane.b32.xlu1 %v3219_v53, %s3068_s23  ;;  %1518 = vrot.lane.b32.xlu0 %v3228_v55, %s3067_s22  ;;  %v3513_v46 = vpop.permute.xlu0 %258  ;;  %v2187_v55 = vmul.f32 %v3347_v43, %v3428_v29 }
 0x103   : > { %5284 = vst [vmem:[#allocation21_spill] sm:$0xff] %v3475_v30  ;;  %5288 = vst [vmem:[#allocation25_spill] sm:$0xff] %v3513_v46  ;;  %v360_v46 = vmul.f32 %v3363_v50, %v3283_v10 }
 0x106   : > { %v3486_v25 = vpop.permute.xlu1 %317  ;;  %2178 = vrot.lane.b32.xlu1 %v2173_v26, %s3075_s8  ;;  %1055 = vrot.lane.b32.xlu0 %v1050_v39, %s3075_s8  ;;  %v2265_v39 = vmul.f32 %v3252_v0, %v3404_v49  ;;  %v3506_v26 = vld [vmem:[%s3157_s5 + $0x38] sm:$0xff] }
 0x107   : > { %5285 = vst [vmem:[#allocation22_spill] sm:$0xff] %v3486_v25  ;;  %5287 = vst [vmem:[#allocation24_spill] sm:$0xff] %v3506_v26  ;;  %v2277_v51 = vmul.f32 %v3506_v26, %v3428_v29  ;;  %v489_v25 = vmul.f32 %v3347_v43, %v3313_v20 }
 0x10a   : > { %v3496_v8 = vpop.permute.xlu1 %370  ;;  %2193 = vrot.lane.b32.xlu1 %v2188_v52, %s3075_s8  ;;  %1068 = vrot.lane.b32.xlu0 %v1064_v45, %s3075_s8  ;;  %v3520_v45 = vpop.permute.xlu0 %315 }
 0x10b   : > { %5289 = vst [vmem:[#allocation26_spill] sm:$0xff] %v3520_v45 }
 0x10e   : > { %2270 = vrot.lane.b32.xlu1 %v2265_v39, %s3075_s8  ;;  %1533 = vrot.lane.b32.xlu0 %v3501_v31, %s3067_s22  ;;  %v418_v52 = vpop.permute.xlu1 %417  ;;  %v3529_v39 = vmul.f32 %v3437_v36, %v3173_v32  ;;  %v373_v59 = vpop.permute.xlu0 %372 }
 0x110   : > { %5291 = vst [vmem:[#allocation28_spill] sm:$0xff] %v3529_v39 }
 0x112   : > { %2282 = vrot.lane.b32.xlu1 %v2277_v51, %s3075_s8  ;;  %1478 = vrot.lane.b32.xlu0 %v3207_v48, %s3068_s23  ;;  %v3522_v34 = vpop.permute.xlu1 %447  ;;  %v1613_v51 = vmul.f32 %v3255_v1, %v3376_v56  ;;  %v344_v56 = vmul.f32 %v3252_v0, %v3249_v63  ;;  %v3554_v45 = vpop.permute.xlu0 %415 }
 0x113   : > { %5290 = vst [vmem:[#allocation27_spill] sm:$0xff] %v3522_v34  ;;  %v355_v34 = vmul.f32 %v3289_v11, %v3173_v32 }
 0x115   : > { %v362_v30 = vadd.f32 %v360_v46, %v355_v34  ;;  %v3577_v46 = vld [vmem:[%s3157_s5 + $0x30] sm:$0xff] }
 0x116   : > { %1665 = vrot.lane.b32.xlu1 %v3501_v31, %s3071_s26  ;;  %1547 = vrot.lane.b32.xlu0 %v1543_v9, %s3075_s8  ;;  %v296_v9 = vmul.f32 %v3269_v5, %v3173_v32 }
 0x118   : > { %v346_v33 = vadd.f32 %v344_v56, %v296_v9  ;;  %v484_v9 = vmul.f32 %v3311_v19, %v3165_v28 }
 0x11a   : > { %v501_v38 = vpop.permute.xlu1 %500  ;;  %1681 = vrot.lane.b32.xlu1 %v3529_v39, %s3075_s8  ;;  %1617 = vrot.lane.b32.xlu0 %v1613_v51, %s3075_s8  ;;  %v854_v51 = vmul.f32 %v3446_v13, %v3165_v28  ;;  %v2172_v39 = vmul.f32 %v3404_v49, %v3165_v28  ;;  %v422_v41 = vadd.f32 %v418_v52, %v346_v33 }
 0x11b   : > { %v2264_v33 = vmul.f32 %v3255_v1, %v3404_v49  ;;  %v491_v52 = vadd.f32 %v489_v25, %v484_v9  ;;  %v324_v25 = vmul.f32 %v3506_v26, %v3249_v63 }
 0x11d   : > { %v506_v34 = vadd.f32 %v501_v38, %v491_v52  ;;  %v326_v52 = vadd.f32 %v324_v25, %v3264_v3  ;;  %v454_v3 = vmul.f32 %v3506_v26, %v3291_v12  ;;  %v354_v26 = vmul.f32 %v3289_v11, %v3165_v28 }
 0x11e   : > { %1755 = vrot.lane.b32.xlu1 %v3538_v60, %s3075_s8  ;;  %v283_v37 = vpop.permute.xlu1 %282  ;;  %2090 = vrot.lane.b32.xlu0 %v3202_v47, %s3068_s23 }
 0x11f   : > { %v530_v49 = vmul.f32 %v506_v34, %v3311_v19  ;;  %v323_v34 = vmul.f32 %v3577_v46, %v3249_v63 }
 0x122   : > { %858 = vrot.lane.b32.xlu1 %v854_v51, %s3075_s8  ;;  %v334_v60 = vpop.permute.xlu1 %333  ;;  %2176 = vrot.lane.b32.xlu0 %v2172_v39, %s3075_s8  ;;  %v377_v39 = vadd.f32 %v373_v59, %v362_v30  ;;  %v3570_v51 = vpop.permute.xlu0 %445 }
 0x123   : > { %5293 = vst [vmem:[#allocation30_spill] sm:$0xff] %v3570_v51 }
 0x126   : > { %576 = vrot.lane.b32.xlu1 %v422_v41, %s3075_s8  ;;  %v3567_v56 = vpop.permute.xlu1 %392  ;;  %2191 = vrot.lane.b32.xlu0 %v2187_v55, %s3075_s8  ;;  %v3580_v41 = vmul.f32 %v3305_v18, %v377_v39  ;;  %v3582_v16 = vpop.permute.xlu0 %502  ;;  %v2276_v55 = vmul.f32 %v3577_v46, %v3428_v29  ;;  %v271_v29 = vmul.f32 %v3363_v50, %v3249_v63 }
 0x128   : > { %5294 = vst [vmem:[#allocation31_spill] sm:$0xff] %v3580_v41 }
 0x12a   : > { %v464_v17 = vpop.permute.xlu1 %463  ;;  %2268 = vrot.lane.b32.xlu0 %v2264_v33, %s3075_s8  ;;  %596 = vrot.lane.b32.xlu1 %v377_v39, %s3076_s9  ;;  %v3605_v39 = vmul.f32 %v3437_v36, %v3165_v28  ;;  %v270_v33 = vmul.f32 %v3347_v43, %v3249_v63 }
 0x12c   : > { %5297 = vst [vmem:[#allocation34_spill] sm:$0xff] %v3605_v39  ;;  %v272_v51 = vadd.f32 %v270_v33, %v3247_v62  ;;  %v382_v62 = vmul.f32 %v3363_v50, %v3291_v12 }
 0x12e   : > { %v3586_v59 = vpop.permute.xlu1 %522  ;;  %2280 = vrot.lane.b32.xlu0 %v2276_v55, %s3075_s8  ;;  %409 = vrot.lane.b32.xlu1 %v3580_v41, %s3076_s9  ;;  %v338_v55 = vadd.f32 %v334_v60, %v326_v52  ;;  %v288_v60 = vadd.f32 %v283_v37, %v272_v51 }
 0x130   : > { %v3592_v30 = vpop.permute.xlu0 %732 }
 0x131   : > { %5295 = vst [vmem:[#allocation32_spill] sm:$0xff] %v3592_v30 }
 0x132   : > { %v552_v38 = vpop.permute.xlu1 %551  ;;  %1660 = vrot.lane.b32.xlu0 %v3207_v48, %s3071_s26  ;;  %534 = vrot.lane.b32.xlu1 %v530_v49, %s3076_s9  ;;  %v273_v49 = vadd.f32 %v271_v29, %v3244_v61  ;;  %v325_v61 = vadd.f32 %v323_v34, %v3267_v4  ;;  %v348_v29 = vmul.f32 %v338_v55, %v3249_v63 }
 0x133   : > { %v456_v4 = vadd.f32 %v454_v3, %v3299_v14  ;;  %v359_v34 = vmul.f32 %v3347_v43, %v3283_v10  ;;  %v297_v14 = vmul.f32 %v3269_v5, %v288_v60 }
 0x134   : > { %v3601_v9 = vpop.permute.xlu0 %734 }
 0x135   : > { %5296 = vst [vmem:[#allocation33_spill] sm:$0xff] %v3601_v9  ;;  %v295_v9 = vmul.f32 %v3269_v5, %v3165_v28  ;;  %v468_v55 = vadd.f32 %v464_v17, %v456_v4 }
 0x136   : > { %1679 = vrot.lane.b32.xlu0 %v3605_v39, %s3075_s8  ;;  %v3617_v30 = vpop.permute.xlu1 %712  ;;  %v343_v39 = vmul.f32 %v3255_v1, %v3249_v63 }
 0x137   : > { %5298 = vst [vmem:[#allocation35_spill] sm:$0xff] %v3617_v30 }
 0x138   : > { %v285_v41 = vpop.permute.xlu0 %284  ;;  %v345_v33 = vadd.f32 %v343_v39, %v295_v9  ;;  %v381_v9 = vmul.f32 %v3347_v43, %v3291_v12  ;;  %v474_v39 = vmul.f32 %v3252_v0, %v3291_v12 }
 0x139   : > { %v289_v25 = vadd.f32 %v285_v41, %v273_v49  ;;  %v3635_v49 = vmul.f32 %v3252_v0, %v3437_v36  ;;  %v453_v36 = vmul.f32 %v3577_v46, %v3291_v12 }
 0x13a   : > { %846 = vrot.lane.b32.xlu0 %v3181_v35, %s3069_s24  ;;  %v383_v17 = vadd.f32 %v381_v9, %v3277_v6 }
 0x13b   : > { %v298_v52 = vmul.f32 %v3269_v5, %v289_v25  ;;  %5300 = vst [vmem:[#allocation37_spill] sm:$0xff] %v3635_v49  ;;  %v384_v25 = vadd.f32 %v382_v62, %v3281_v7  ;;  %v485_v5 = vmul.f32 %v3311_v19, %v3173_v32 }
 0x13c   : > { %v3631_v30 = vpop.permute.xlu1 %749  ;;  %v332_v41 = vpop.permute.xlu0 %331 }
 0x13d   : > { %5299 = vst [vmem:[#allocation36_spill] sm:$0xff] %v3631_v30  ;;  %v337_v37 = vadd.f32 %v332_v41, %v325_v61  ;;  %v3640_v51 = vadd.f32 %v348_v29, %v298_v52  ;;  %v421_v61 = vadd.f32 %v3554_v45, %v345_v33  ;;  %v361_v41 = vadd.f32 %v359_v34, %v354_v26 }
 0x13e   : > { %1757 = vrot.lane.b32.xlu0 %v3635_v49, %s3075_s8  ;;  %v490_v49 = vmul.f32 %v3363_v50, %v3313_v20  ;;  %v512_v45 = vmul.f32 %v3363_v50, %v3321_v24  ;;  %v478_v26 = vmul.f32 %v468_v55, %v3291_v12  ;;  %v455_v20 = vadd.f32 %v453_v36, %v3303_v15 }
 0x13f   : > { %5301 = vst [vmem:[#allocation38_spill] sm:$0xff] %v3640_v51  ;;  %v347_v3 = vmul.f32 %v337_v37, %v3249_v63  ;;  %v476_v63 = vadd.f32 %v474_v39, %v3281_v7  ;;  %v376_v62 = vadd.f32 %v3496_v8, %v361_v41  ;;  %v398_v33 = vadd.f32 %v3567_v56, %v383_v17 }
 0x140   : > { %v3656_v29 = vpop.permute.xlu1 %890  ;;  %v395_v52 = vpop.permute.xlu0 %394  ;;  %v492_v39 = vadd.f32 %v490_v49, %v485_v5  ;;  %v514_v15 = vadd.f32 %v512_v45, %v3319_v23  ;;  %v5225_v55 = vmov 0.0|0.0   ;;  %v511_v41 = vmul.f32 %v3347_v43, %v3321_v24 }
 0x141   : > { %v399_v30 = vadd.f32 %v395_v52, %v384_v25  ;;  %v3658_v51 = vadd.f32 %v347_v3, %v297_v14  ;;  %v556_v37 = vadd.f32 %v552_v38, %v476_v63  ;;  %v3684_v8 = vmul.f32 %v3305_v18, %v376_v62  ;;  %2942 = vmatprep.subr.bf16.mxu1 %v5225_v55 }
 0x142   : > { %574 = vrot.lane.b32.xlu0 %v421_v61, %s3075_s8  ;;  %v507_v56 = vadd.f32 %v3582_v16, %v492_v39  ;;  %2915 = vmatprep.subr.bf16.mxu0 %v5225_v55  ;;  %v473_v25 = vmul.f32 %v3255_v1, %v3291_v12  ;;  %v3721_v63 = vmul.f32 %v3347_v43, %v3482_v21 }
 0x143   : > { %v424_v60 = vmul.f32 %v399_v30, %v3261_v2  ;;  %616 = vrot.lane.b32.xlu1 %v399_v30, %s3074_s7  ;;  %v423_v30 = vmul.f32 %v398_v33, %v3261_v2  ;;  %v513_v45 = vadd.f32 %v511_v41, %v3316_v22  ;;  %v3768_v39 = vmul.f32 %v3363_v50, %v3482_v21 }
 0x144   : > { %v3675_v4 = vpop.permute.xlu1 %903  ;;  %v462_v7 = vpop.permute.xlu0 %461  ;;  %v531_v16 = vmul.f32 %v507_v56, %v3311_v19  ;;  %v475_v19 = vadd.f32 %v473_v25, %v3277_v6  ;;  %5304 = vst [vmem:[#allocation41_spill] sm:$0xff] %v3721_v63  ;;  %v2429_v56 = vmul.f32 %v3255_v1, %v3456_v54  ;;  %v811_v25 = vmul.f32 %v3252_v0, %v3381_v58 }
 0x145   : > { %v467_v34 = vadd.f32 %v462_v7, %v455_v20  ;;  %v3677_v9 = vadd.f32 %v478_v26, %v424_v60  ;;  %v528_v6 = vadd.f32 %v3586_v59, %v513_v45  ;;  %v855_v7 = vmul.f32 %v3446_v13, %v3173_v32  ;;  %5307 = vst [vmem:[#allocation44_spill] sm:$0xff] %v3768_v39 }
 0x146   : > { %594 = vrot.lane.b32.xlu0 %v376_v62, %s3076_s9 }
 0x147   : > { %v477_v14 = vmul.f32 %v467_v34, %v3291_v12  ;;  %636 = vrot.lane.b32.xlu1 %v556_v37, %s3074_s7  ;;  %v557_v22 = vmul.f32 %v3328_v27, %v528_v6  ;;  %v1698_v37 = vmul.f32 %v3494_v44, %v3173_v32 }
 0x148   : > { %v3688_v38 = vpop.permute.xlu1 %2373  ;;  %v525_v36 = vpop.permute.xlu0 %524 }
 0x149   : > { %v529_v49 = vadd.f32 %v525_v36, %v514_v15  ;;  %v3694_v23 = vadd.f32 %v477_v14, %v423_v30 }
 0x14a   : > { %407 = vrot.lane.b32.xlu0 %v3684_v8, %s3076_s9 }
 0x14b   : > { %429 = vrot.lane.b32.xlu1 %v424_v60, %s3076_s9  ;;  %v558_v3 = vmul.f32 %v3328_v27, %v529_v49  ;;  %v2331_v60 = vmul.f32 %v3456_v54, %v3165_v28  ;;  %v2332_v49 = vmul.f32 %v3456_v54, %v3173_v32 }
 0x14c   : > { %v3698_v18 = vpop.permute.xlu1 %1011  ;;  %v550_v2 = vpop.permute.xlu0 %549 }
 0x14d   : > { %v555_v5 = vadd.f32 %v550_v2, %v475_v19 }
 0x14e   : > { %536 = vrot.lane.b32.xlu0 %v531_v16, %s3076_s9 }
 0x14f   : > { %563 = vrot.lane.b32.xlu1 %v558_v3, %s3076_s9  ;;  %v1697_v3 = vmul.f32 %v3494_v44, %v3165_v28 }
 0x150   : > { %v3705_v61 = vpop.permute.xlu1 %1025  ;;  %v3707_v52 = vpop.permute.xlu0 %714 }
 0x151   : > { %5302 = vst [vmem:[#allocation39_spill] sm:$0xff] %v3707_v52 }
 0x152   : > { %614 = vrot.lane.b32.xlu0 %v398_v33, %s3074_s7 }
 0x153   : > { %1687 = vrot.lane.b32.xlu1 %v3501_v31, %s3072_s28 }
 0x154   : > { %v3715_v12 = vpop.permute.xlu1 %1040  ;;  %v3717_v17 = vpop.permute.xlu0 %747 }
 0x155   : > { %5303 = vst [vmem:[#allocation40_spill] sm:$0xff] %v3717_v17 }
 0x156   : > { %634 = vrot.lane.b32.xlu0 %v555_v5, %s3074_s7  ;;  %v1768_v5 = vmul.f32 %v3252_v0, %v3494_v44 }
 0x157   : > { %873 = vrot.lane.b32.xlu1 %v3721_v63, %s3075_s8 }
 0x158   : > { %v3728_v24 = vpop.permute.xlu1 %1053  ;;  %v3730_v26 = vpop.permute.xlu0 %763 }
 0x159   : > { %5305 = vst [vmem:[#allocation42_spill] sm:$0xff] %v3730_v26  ;;  %v5319_v26 = vld [vmem:[#allocation4_spill] sm:$0xff] }
 0x15a   : > { %427 = vrot.lane.b32.xlu0 %v423_v30, %s3076_s9 }
 0x15b   : > { %2335 = vrot.lane.b32.xlu1 %v2331_v60, %s3075_s8  ;;  %v3813_v60 = vmul.f32 %v3363_v50, %v3468_v42 }
 0x15c   : > { %v3737_v20 = vpop.permute.xlu1 %1088  ;;  %v3739_v62 = vpop.permute.xlu0 %888 }
 0x15d   : > { %5310 = vst [vmem:[#allocation47_spill] sm:$0xff] %v3813_v60 }
 0x15e   : > { %561 = vrot.lane.b32.xlu0 %v557_v22, %s3076_s9  ;;  %v3817_v22 = vmul.f32 %v3577_v46, %v3468_v42 }
 0x15f   : > { %911 = vrot.lane.b32.xlu1 %v3191_v40, %s3069_s24  ;;  %v3760_v40 = vmul.f32 %v3347_v43, %v3468_v42 }
 0x160   : > { %v3744_v59 = vpop.permute.xlu1 %1070  ;;  %v3746_v33 = vpop.permute.xlu0 %2358  ;;  %5311 = vst [vmem:[#allocation48_spill] sm:$0xff] %v3817_v22 }
 0x161   : > { %5306 = vst [vmem:[#allocation43_spill] sm:$0xff] %v3760_v40 }
 0x162   : > { %860 = vrot.lane.b32.xlu0 %v855_v7, %s3075_s8 }
 0x163   : > { %1703 = vrot.lane.b32.xlu1 %v1698_v37, %s3075_s8 }
 0x164   : > { %v3754_v27 = vpop.permute.xlu1 %2139  ;;  %v3756_v34 = vpop.permute.xlu0 %905 }
 0x166   : > { %2323 = vrot.lane.b32.xlu0 %v3219_v53, %s3071_s26 }
 0x167   : > { %2350 = vrot.lane.b32.xlu1 %v3760_v40, %s3075_s8 }
 0x168   : > { %v3770_v14 = vpop.permute.xlu1 %2154  ;;  %v3772_v15 = vpop.permute.xlu0 %765 }
 0x169   : > { %5308 = vst [vmem:[#allocation45_spill] sm:$0xff] %v3772_v15 }
 0x16a   : > { %875 = vrot.lane.b32.xlu0 %v3768_v39, %s3075_s8 }
 0x16b   : > { %2433 = vrot.lane.b32.xlu1 %v2429_v56, %s3075_s8  ;;  %v2430_v56 = vmul.f32 %v3252_v0, %v3456_v54  ;;  %v306_v54 = vmul.f32 %v3252_v0, %v5319_v26 }
 0x16c   : > { %v3779_v30 = vpop.permute.xlu1 %1549  ;;  %v3781_v36 = vpop.permute.xlu0 %1023 }
 0x16e   : > { %2337 = vrot.lane.b32.xlu0 %v2332_v49, %s3075_s8  ;;  %v822_v49 = vmul.f32 %v3577_v46, %v3416_v57 }
 0x16f   : > { %773 = vrot.lane.b32.xlu1 %v3181_v35, %s3066_s21  ;;  %v2376_v35 = vmul.f32 %v3347_v43, %v3688_v38 }
 0x170   : > { %v3788_v16 = vpop.permute.xlu1 %1619  ;;  %v3790_v2 = vpop.permute.xlu0 %1038 }
 0x172   : > { %1701 = vrot.lane.b32.xlu0 %v1697_v3, %s3075_s8 }
 0x173   : > { %816 = vrot.lane.b32.xlu1 %v811_v25, %s3075_s8 }
 0x174   : > { %v3798_v41 = vpop.permute.xlu1 %2106  ;;  %v3800_v19 = vpop.permute.xlu0 %1518 }
 0x176   : > { %1791 = vrot.lane.b32.xlu0 %v3207_v48, %s3072_s28 }
 0x177   : > { %1773 = vrot.lane.b32.xlu1 %v1768_v5, %s3075_s8  ;;  %v810_v5 = vmul.f32 %v3255_v1, %v3381_v58 }
 0x178   : > { %v3807_v45 = vpop.permute.xlu1 %2178  ;;  %v3809_v6 = vpop.permute.xlu0 %1055 }
 0x179   : > { %5309 = vst [vmem:[#allocation46_spill] sm:$0xff] %v3807_v45 }
 0x17a   : > { %2352 = vrot.lane.b32.xlu0 %v3813_v60, %s3075_s8 }
 0x17b   : > { %2445 = vrot.lane.b32.xlu1 %v3817_v22, %s3075_s8  ;;  %v5318_v22 = vld [vmem:[#allocation3_spill] sm:$0xff] }
 0x17c   : > { %v3823_v7 = vpop.permute.xlu1 %2193  ;;  %v3825_v37 = vpop.permute.xlu0 %1068  ;;  %v243_v40 = vmul.f32 %v3363_v50, %v5318_v22 }
 0x17d   : > { %5312 = vst [vmem:[#allocation49_spill] sm:$0xff] %v3823_v7 }
 0x17e   : > { %2435 = vrot.lane.b32.xlu0 %v2430_v56, %s3075_s8  ;;  %v1767_v56 = vmul.f32 %v3255_v1, %v3494_v44 }
 0x17f   : > { %826 = vrot.lane.b32.xlu1 %v822_v49, %s3075_s8  ;;  %v2361_v49 = vmul.f32 %v3746_v33, %v3165_v28 }
 0x180   : > { %v3833_v3 = vpop.permute.xlu1 %2270  ;;  %v3835_v25 = vpop.permute.xlu0 %1533 }
 0x181   : > { %5313 = vst [vmem:[#allocation50_spill] sm:$0xff] %v3833_v3 }
 0x182   : > { %814 = vrot.lane.b32.xlu0 %v810_v5, %s3075_s8 }
 0x183   : > { %926 = vrot.lane.b32.xlu1 %v3721_v63, %s3076_s9 }
 0x184   : > { %v3842_v55 = vpop.permute.xlu1 %2282  ;;  %v3844_v52 = vpop.permute.xlu0 %1478 }
 0x185   : > { %5314 = vst [vmem:[#allocation51_spill] sm:$0xff] %v3842_v55 }
 0x186   : > { %1771 = vrot.lane.b32.xlu0 %v1767_v56, %s3075_s8  ;;  %v5316_v56 = vld [vmem:[#allocation24_spill] sm:$0xff] }
 0x187   : > { %2365 = vrot.lane.b32.xlu1 %v2361_v49, %s3075_s8  ;;  %v3867_v15 = vmul.f32 %v5316_v56, %v3468_v42  ;;  %v2453_v49 = vmul.f32 %v3255_v1, %v3746_v33  ;;  %v308_v17 = vmul.f32 %v5316_v56, %v5318_v22  ;;  %v895_v42 = vadd.f32 %v3656_v29, %v3768_v39 }
 0x188   : > { %v3852_v58 = vpop.permute.xlu1 %1665  ;;  %v3854_v5 = vpop.permute.xlu0 %1547 }
 0x189   : > { %5317 = vst [vmem:[#allocation24_spill] sm:$0xff] %v3867_v15  ;;  %v3891_v3 = vadd.f32 %v3756_v34, %v895_v42  ;;  %v310_v45 = vadd.f32 %v308_v17, %v306_v54  ;;  %v5324_v42 = vld [vmem:[#allocation22_spill] sm:$0xff] }
 0x18a   : > { %2388 = vrot.lane.b32.xlu0 %v3202_v47, %s3071_s26 }
 0x18b   : > { %2380 = vrot.lane.b32.xlu1 %v2376_v35, %s3075_s8  ;;  %v237_v35 = vmul.f32 %v5319_v26, %v3173_v32  ;;  %5321 = vst [vmem:[#allocation4_spill] sm:$0xff] %v3891_v3 }
 0x18c   : > { %v3861_v44 = vpop.permute.xlu1 %1681  ;;  %v3863_v60 = vpop.permute.xlu0 %1617 }
 0x18d   : > { %5315 = vst [vmem:[#allocation52_spill] sm:$0xff] %v3861_v44  ;;  %v245_v7 = vadd.f32 %v243_v40, %v237_v35  ;;  %v2362_v40 = vmul.f32 %v3746_v33, %v3173_v32  ;;  %v2466_v35 = vmul.f32 %v5316_v56, %v3688_v38  ;;  %v2377_v32 = vmul.f32 %v3363_v50, %v3688_v38 }
 0x18e   : > { %2447 = vrot.lane.b32.xlu0 %v3867_v15, %s3075_s8  ;;  %v823_v15 = vmul.f32 %v5316_v56, %v3416_v57  ;;  %v5323_v57 = vld [vmem:[#allocation21_spill] sm:$0xff] }
 0x18f   : > { %2457 = vrot.lane.b32.xlu1 %v2453_v49, %s3075_s8  ;;  %v265_v34 = vadd.f32 %v5323_v57, %v245_v7  ;;  %v894_v57 = vadd.f32 %v3739_v62, %v3721_v63 }
 0x190   : > { %v3884_v44 = vpop.permute.xlu1 %1755  ;;  %v3886_v55 = vpop.permute.xlu0 %2090 }
 0x191   : > { %5320 = vst [vmem:[#allocation3_spill] sm:$0xff] %v3884_v44  ;;  %v3902_v44 = vmul.f32 %v3891_v3, %v3482_v21  ;;  %v291_v7 = vmul.f32 %v265_v34, %v5319_v26 }
 0x192   : > { %828 = vrot.lane.b32.xlu0 %v823_v15, %s3075_s8  ;;  %v322_v15 = vadd.f32 %v5324_v42, %v310_v45 }
 0x193   : > { %2489 = vrot.lane.b32.xlu1 %v3219_v53, %s3072_s28  ;;  %5322 = vst [vmem:[#allocation53_spill] sm:$0xff] %v3902_v44 }
 0x194   : > { %v3896_v29 = vpop.permute.xlu1 %858  ;;  %v3898_v49 = vpop.permute.xlu0 %2176  ;;  %v340_v45 = vmul.f32 %v322_v15, %v5318_v22  ;;  %v3933_v15 = vadd.f32 %v3675_v4, %v894_v57  ;;  %v242_v57 = vmul.f32 %v3347_v43, %v5318_v22 }
 0x196   : > { %928 = vrot.lane.b32.xlu0 %v3768_v39, %s3076_s9  ;;  %v342_v34 = vadd.f32 %v340_v45, %v291_v7  ;;  %5325 = vst [vmem:[#allocation21_spill] sm:$0xff] %v3933_v15  ;;  %v3949_v4 = vmul.f32 %v3933_v15, %v3482_v21  ;;  %v4002_v15 = vld [vmem:[%s3157_s5 + $0x8] sm:$0xff] }
 0x197   : > { %940 = vrot.lane.b32.xlu1 %v3902_v44, %s3076_s9 }
 0x198   : > { %v577_v54 = vpop.permute.xlu1 %576  ;;  %v3910_v17 = vpop.permute.xlu0 %2191  ;;  %5327 = vst [vmem:[#allocation54_spill] sm:$0xff] %v3949_v4 }
 0x199   : > { %581 = vst.msk [vmem:[#allocation2 + $0x18] sm:$0xff] %vm569_vm0, %v577_v54  ;;  %v949_v54 = vmul.f32 %v3252_v0, %v3446_v13 }
 0x19a   : > { %2367 = vrot.lane.b32.xlu0 %v2362_v40, %s3075_s8 }
 0x19b   : > { %2471 = vrot.lane.b32.xlu1 %v2466_v35, %s3075_s8  ;;  %v2454_v35 = vmul.f32 %v3252_v0, %v3746_v33  ;;  %v1015_v33 = vmul.f32 %v3363_v50, %v3698_v18 }
 0x19c   : > { %v597_v42 = vpop.permute.xlu1 %596  ;;  %v3923_v44 = vpop.permute.xlu0 %2268 }
 0x19d   : > { %601 = vst.msk [vmem:[#allocation2 + $0x38] sm:$0xff] %vm569_vm0, %v597_v42  ;;  %v3941_v42 = vmul.f32 %v5316_v56, %v3482_v21 }
 0x19e   : > { %2382 = vrot.lane.b32.xlu0 %v2377_v32, %s3075_s8  ;;  %v236_v32 = vmul.f32 %v5319_v26, %v3165_v28 }
 0x19f   : > { %954 = vrot.lane.b32.xlu1 %v949_v54, %s3075_s8  ;;  %5326 = vst [vmem:[#allocation22_spill] sm:$0xff] %v3941_v42  ;;  %v305_v54 = vmul.f32 %v3255_v1, %v5319_v26 }
 0x1a0   : > { %v410_v62 = vpop.permute.xlu1 %409  ;;  %v3935_v40 = vpop.permute.xlu0 %2280  ;;  %v244_v3 = vadd.f32 %v242_v57, %v236_v32  ;;  %v5333_v32 = vld [vmem:[#allocation26_spill] sm:$0xff] }
 0x1a1   : > { %v414_v39 = vadd.f32 %v410_v62, %v342_v34  ;;  %v307_v34 = vmul.f32 %v3577_v46, %v5318_v22  ;;  %v1030_v62 = vadd.f32 %v3705_v61, %v1015_v33  ;;  %v3988_v33 = vmul.f32 %v3577_v46, %v3482_v21 }
 0x1a2   : > { %2459 = vrot.lane.b32.xlu0 %v2454_v35, %s3075_s8  ;;  %v5328_v35 = vld [vmem:[#allocation9_spill] sm:$0xff] }
 0x1a3   : > { %571 = vst.msk [vmem:[#allocation2 + $0x8] sm:$0xff] %vm569_vm0, %v414_v39  ;;  %966 = vrot.lane.b32.xlu1 %v3941_v42, %s3075_s8  ;;  %v2465_v39 = vmul.f32 %v3577_v46, %v3688_v38  ;;  %v948_v42 = vmul.f32 %v3255_v1, %v3446_v13  ;;  %v309_v63 = vadd.f32 %v307_v34, %v305_v54 }
 0x1a4   : > { %v3951_v7 = vpop.permute.xlu0 %1660  ;;  %v436_v13 = vmul.f32 %v3252_v0, %v3289_v11  ;;  %v438_v34 = vmul.f32 %v5316_v56, %v3283_v10 }
 0x1a5   : > { %v321_v54 = vadd.f32 %v5333_v32, %v309_v63  ;;  %v5334_v63 = vld [vmem:[#allocation5_spill] sm:$0xff] }
 0x1a6   : > { %938 = vrot.lane.b32.xlu0 %v3949_v4, %s3076_s9  ;;  %v5329_v4 = vld [vmem:[#allocation12_spill] sm:$0xff] }
 0x1a7   : > { %1506 = vrot.lane.b32.xlu1 %v3207_v48, %s3069_s24  ;;  %v973_v28 = vmul.f32 %v3252_v0, %v5329_v4  ;;  %5331 = vst [vmem:[#allocation12_spill] sm:$0xff] %v3988_v33 }
 0x1a8   : > { %v3959_v45 = vpop.permute.xlu0 %1679 }
 0x1aa   : > { %2469 = vrot.lane.b32.xlu0 %v2465_v39, %s3075_s8  ;;  %v1045_v39 = vadd.f32 %v3715_v12, %v1030_v62  ;;  %v535_v62 = vpop.permute.xlu1 %534 }
 0x1ab   : > { %1454 = vrot.lane.b32.xlu1 %v5328_v35, %s3066_s21 }
 0x1ac   : > { %v3975_v38 = vpop.permute.xlu0 %846  ;;  %v1077_v12 = vmul.f32 %v1045_v39, %v3698_v18  ;;  %v4006_v39 = vmul.f32 %v4002_v15, %v3800_v19 }
 0x1ae   : > { %952 = vrot.lane.b32.xlu0 %v948_v42, %s3075_s8  ;;  %v5332_v42 = vld [vmem:[#allocation25_spill] sm:$0xff] }
 0x1af   : > { %978 = vrot.lane.b32.xlu1 %v973_v28, %s3075_s8  ;;  %v264_v57 = vadd.f32 %v5332_v42, %v244_v3  ;;  %v440_v28 = vadd.f32 %v438_v34, %v436_v13  ;;  %v1014_v3 = vmul.f32 %v3347_v43, %v3698_v18  ;;  %v339_v13 = vmul.f32 %v321_v54, %v5318_v22  ;;  %v5335_v42 = vld [vmem:[#allocation27_spill] sm:$0xff] }
 0x1b0   : > { %v3984_v61 = vpop.permute.xlu0 %1757  ;;  %v435_v34 = vmul.f32 %v3255_v1, %v3289_v11 }
 0x1b1   : > { %5330 = vst [vmem:[#allocation9_spill] sm:$0xff] %v3984_v61  ;;  %v452_v32 = vadd.f32 %v5335_v42, %v440_v28  ;;  %v972_v28 = vmul.f32 %v3255_v1, %v5329_v4  ;;  %v5336_v61 = vld [vmem:[#allocation30_spill] sm:$0xff]  ;;  %v4040_v1 = vld [vmem:[%s3157_s5] sm:$0xff] }
 0x1b2   : > { %964 = vrot.lane.b32.xlu0 %v3988_v33, %s3075_s8  ;;  %v4044_v4 = vmul.f32 %v4040_v1, %v3800_v19 }
 0x1b3   : > { %1082 = vrot.lane.b32.xlu1 %v1077_v12, %s3076_s9  ;;  %v290_v12 = vmul.f32 %v264_v57, %v5319_v26  ;;  %v470_v26 = vmul.f32 %v452_v32, %v3283_v10 }
 0x1b4   : > { %v575_v21 = vpop.permute.xlu0 %574 }
 0x1b5   : > { %580 = vst.msk [vmem:[#allocation2 + $0x10] sm:$0xff] %vm569_vm0, %v575_v21  ;;  %v617_v0 = vpop.permute.xlu1 %616  ;;  %v341_v22 = vadd.f32 %v339_v13, %v290_v12 }
 0x1b6   : > { %621 = vst.msk [vmem:[#allocation2 + $0x58] sm:$0xff] %vm569_vm0, %v617_v0  ;;  %996 = vrot.lane.b32.xlu0 %v5334_v63, %s3069_s24  ;;  %v437_v0 = vmul.f32 %v3577_v46, %v3283_v10  ;;  %v1029_v63 = vadd.f32 %v3781_v36, %v1014_v3 }
 0x1b7   : > { %1527 = vrot.lane.b32.xlu1 %v4006_v39, %s3075_s8 }
 0x1b8   : > { %v595_v21 = vpop.permute.xlu0 %594  ;;  %v439_v57 = vadd.f32 %v437_v0, %v435_v34  ;;  %v1044_v11 = vadd.f32 %v3790_v2, %v1029_v63  ;;  %v5338_v34 = vld [vmem:[#allocation38_spill] sm:$0xff] }
 0x1b9   : > { %600 = vst.msk [vmem:[#allocation2 + $0x30] sm:$0xff] %vm569_vm0, %v595_v21  ;;  %v637_v33 = vpop.permute.xlu1 %636 }
 0x1ba   : > { %641 = vst.msk [vmem:[#allocation2 + $0x78] sm:$0xff] %vm569_vm0, %v637_v33  ;;  %1511 = vrot.lane.b32.xlu0 %v3501_v31, %s3069_s24  ;;  %v451_v36 = vadd.f32 %v5336_v61, %v439_v57  ;;  %v5337_v33 = vld [vmem:[#allocation31_spill] sm:$0xff]  ;;  %v1076_v12 = vmul.f32 %v1044_v11, %v3698_v18 }
 0x1bb   : > { %v472_v3 = vadd.f32 %v470_v26, %v5337_v33 }
 0x1bc   : > { %v408_v54 = vpop.permute.xlu0 %407  ;;  %v469_v63 = vmul.f32 %v451_v36, %v3283_v10  ;;  %v663_v36 = vld [vmem:[#allocation2 + $0x18] sm:$0xff] }
 0x1bd   : > { %v413_v42 = vadd.f32 %v408_v54, %v341_v22  ;;  %v430_v21 = vpop.permute.xlu1 %429  ;;  %v661_v22 = vld [vmem:[#allocation2 + $0x8] sm:$0xff] }
 0x1be   : > { %976 = vrot.lane.b32.xlu0 %v972_v28, %s3075_s8  ;;  %v434_v0 = vadd.f32 %v430_v21, %v5338_v34  ;;  %v471_v26 = vadd.f32 %v469_v63, %v3684_v8  ;;  %v662_v28 = vld [vmem:[#allocation2 + $0x10] sm:$0xff]  ;;  %v5339_v8 = vmov 0.0|0.0  }
 0x1bf   : > { %570 = vst.msk [vmem:[#allocation2] sm:$0xff] %vm569_vm0, %v413_v42  ;;  %v2946_v33 = vpack.c.bf16 %v663_v36, %v662_v28  ;;  %v1091_v28 = vmul.f32 %v3347_v43, %v3737_v20  ;;  %v5343_v36 = vld [vmem:[#allocation17_spill] sm:$0xff] }
 0x1c0   : > { %v537_v13 = vpop.permute.xlu0 %536  ;;  %v540_v11 = vadd.f32 %v535_v62, %v471_v26 }
 0x1c1   : > { %v541_v32 = vadd.f32 %v537_v13, %v472_v3  ;;  %v564_v2 = vpop.permute.xlu1 %563 }
 0x1c2   : > { %1080 = vrot.lane.b32.xlu0 %v1076_v12, %s3076_s9  ;;  %v568_v42 = vadd.f32 %v564_v2, %v3677_v9  ;;  %v5340_v9 = vld [vmem:[#allocation11_spill] sm:$0xff] }
 0x1c3   : > { %626 = vrot.lane.b32.xlu1 %v541_v32, %s3076_s9  ;;  %v985_v13 = vmul.f32 %v5316_v56, %v5340_v9  ;;  %v984_v26 = vmul.f32 %v3577_v46, %v5340_v9 }
 0x1c4   : > { %v615_v61 = vpop.permute.xlu0 %614 }
 0x1c5   : > { %620 = vst.msk [vmem:[#allocation2 + $0x50] sm:$0xff] %vm569_vm0, %v615_v61  ;;  %v4048_v18 = vpop.permute.xlu1 %1687  ;;  %v4073_v61 = vld [vmem:[%s3157_s5 + $0x28] sm:$0xff] }
 0x1c6   : > { %1525 = vrot.lane.b32.xlu0 %v4044_v4, %s3075_s8  ;;  %v660_v10 = vld [vmem:[#allocation2] sm:$0xff] }
 0x1c7   : > { %586 = vrot.lane.b32.xlu1 %v434_v0, %s3075_s8  ;;  %v2943_v57 = vpack.c.bf16 %v661_v22, %v660_v10  ;;  %v4095_v22 = vld [vmem:[%s3157_s5 + $0x20] sm:$0xff] }
 0x1c8   : > { %v635_v54 = vpop.permute.xlu0 %634 }
 0x1c9   : > { %640 = vst.msk [vmem:[#allocation2 + $0x70] sm:$0xff] %vm569_vm0, %v635_v54  ;;  %v4056_v21 = vpop.permute.xlu1 %873  ;;  %2944 = vmatpush1.bf16.msra.mxu1 %v2943_v57  ;;  %v4099_v57 = vmul.f32 %v4095_v22, %v3800_v19 }
 0x1ca   : > { %624 = vrot.lane.b32.xlu0 %v540_v11, %s3076_s9  ;;  %2945 = vmatprep.subr.bf16.mxu1 %v5339_v8 }
 0x1cb   : > { %646 = vrot.lane.b32.xlu1 %v568_v42, %s3074_s7  ;;  %5342 = vst [vmem:[#allocation26_spill] sm:$0xff] %v4099_v57 }
 0x1cc   : > { %v428_v3 = vpop.permute.xlu0 %427 }
 0x1cd   : > { %v433_v62 = vadd.f32 %v428_v3, %v3658_v51  ;;  %v4062_v12 = vpop.permute.xlu1 %2335  ;;  %2947 = vmatpush1.bf16.msra.mxu1 %v2946_v33  ;;  %v4077_v51 = vmul.f32 %v4073_v61, %v3800_v19  ;;  %v5344_v3 = vld [vmem:[#allocation10_spill] sm:$0xff] }
 0x1ce   : > { %2948 = vmatprep.subr.bf16.mxu1 %v5339_v8 }
 0x1cf   : > { %990 = vrot.lane.b32.xlu1 %v985_v13, %s3075_s8  ;;  %584 = vrot.lane.b32.xlu0 %v433_v62, %s3075_s8  ;;  %5341 = vst [vmem:[#allocation25_spill] sm:$0xff] %v4077_v51  ;;  %v2143_v13 = vmul.f32 %v4002_v15, %v3754_v27 }
 0x1d0   : > { %v562_v32 = vpop.permute.xlu0 %561 }
 0x1d1   : > { %v567_v2 = vadd.f32 %v562_v32, %v3694_v23  ;;  %v4070_v63 = vpop.permute.xlu1 %911  ;;  %v1092_v23 = vmul.f32 %v3363_v50, %v3737_v20 }
 0x1d3   : > { %1603 = vrot.lane.b32.xlu1 %v4077_v51, %s3075_s8  ;;  %644 = vrot.lane.b32.xlu0 %v567_v2, %s3074_s7 }
 0x1d4   : > { %v4082_v34 = vpop.permute.xlu0 %860 }
 0x1d5   : > { %v4084_v0 = vpop.permute.xlu1 %1703 }
 0x1d7   : > { %1097 = vrot.lane.b32.xlu1 %v1092_v23, %s3076_s9  ;;  %988 = vrot.lane.b32.xlu0 %v984_v26, %s3075_s8  ;;  %v5347_v23 = vld [vmem:[#allocation20_spill] sm:$0xff] }
 0x1d8   : > { %v4092_v10 = vpop.permute.xlu0 %2323  ;;  %v1059_v26 = vadd.f32 %v3728_v24, %v5347_v23 }
 0x1d9   : > { %v4101_v11 = vpop.permute.xlu1 %2350 }
 0x1db   : > { %1625 = vrot.lane.b32.xlu1 %v5328_v35, %s3069_s24  ;;  %1601 = vrot.lane.b32.xlu0 %v4099_v57, %s3075_s8  ;;  %v1060_v35 = vadd.f32 %v3809_v6, %v5343_v36  ;;  %v1482_v36 = vmul.f32 %v4073_v61, %v3844_v52 }
 0x1dc   : > { %v4107_v50 = vpop.permute.xlu0 %875 }
 0x1dd   : > { %v4109_v54 = vpop.permute.xlu1 %2433  ;;  %v1075_v43 = vadd.f32 %v3744_v59, %v1060_v35 }
 0x1df   : > { %2134 = vrot.lane.b32.xlu1 %v3219_v53, %s3069_s24  ;;  %1095 = vrot.lane.b32.xlu0 %v1091_v28, %s3076_s9  ;;  %v1104_v32 = vmul.f32 %v3737_v20, %v1075_v43  ;;  %v1074_v28 = vadd.f32 %v3825_v37, %v1059_v26  ;;  %v2142_v43 = vmul.f32 %v4040_v1, %v3754_v27  ;;  %v4169_v26 = vld [vmem:[%s3157_s5 + $0x18] sm:$0xff] }
 0x1e0   : > { %v4116_v42 = vpop.permute.xlu0 %2337  ;;  %v1568_v37 = vmul.f32 %v4002_v15, %v3835_v25 }
 0x1e1   : > { %v4120_v33 = vpop.permute.xlu1 %773 }
 0x1e3   : > { %2075 = vrot.lane.b32.xlu1 %v5344_v3, %s3066_s21  ;;  %1470 = vrot.lane.b32.xlu0 %v3501_v31, %s3066_s21  ;;  %v1567_v31 = vmul.f32 %v4040_v1, %v3835_v25 }
 0x1e4   : > { %v4126_v62 = vpop.permute.xlu0 %1701 }
 0x1e5   : > { %v4129_v9 = vpop.permute.xlu1 %816 }
 0x1e6   : > { %5345 = vst [vmem:[#allocation27_spill] sm:$0xff] %v4129_v9 }
 0x1e7   : > { %2148 = vrot.lane.b32.xlu1 %v2143_v13, %s3075_s8  ;;  %2055 = vrot.lane.b32.xlu0 %v3202_v47, %s3066_s21  ;;  %v1103_v13 = vmul.f32 %v3737_v20, %v1074_v28  ;;  %v1481_v20 = vmul.f32 %v4095_v22, %v3844_v52 }
 0x1e8   : > { %v4136_v6 = vpop.permute.xlu0 %1791 }
 0x1e9   : > { %v4139_v2 = vpop.permute.xlu1 %1773 }
 0x1ea   : > { %5346 = vst [vmem:[#allocation30_spill] sm:$0xff] %v4139_v2 }
 0x1eb   : > { %1109 = vrot.lane.b32.xlu1 %v1104_v32, %s3076_s9  ;;  %1495 = vrot.lane.b32.xlu0 %v3207_v48, %s3066_s21  ;;  %v4191_v48 = vld [vmem:[%s3157_s5 + $0x10] sm:$0xff] }
 0x1ec   : > { %v4146_v59 = vpop.permute.xlu0 %2352  ;;  %v1536_v52 = vmul.f32 %v4191_v48, %v3835_v25 }
 0x1ed   : > { %5348 = vst [vmem:[#allocation31_spill] sm:$0xff] %v4146_v59  ;;  %v4151_v35 = vpop.permute.xlu1 %2445 }
 0x1ef   : > { %1487 = vrot.lane.b32.xlu1 %v1482_v36, %s3075_s8  ;;  %2146 = vrot.lane.b32.xlu0 %v2142_v43, %s3075_s8  ;;  %v4173_v36 = vmul.f32 %v4169_v26, %v3770_v14 }
 0x1f0   : > { %v4157_v24 = vpop.permute.xlu0 %2435 }
 0x1f1   : > { %5349 = vst [vmem:[#allocation38_spill] sm:$0xff] %v4157_v24  ;;  %v4160_v32 = vpop.permute.xlu1 %826 }
 0x1f2   : > { %5350 = vst [vmem:[#allocation11_spill] sm:$0xff] %v4160_v32  ;;  %v1538_v32 = vadd.f32 %v1536_v52, %v4044_v4  ;;  %v1610_v4 = vmul.f32 %v5316_v56, %v3835_v25  ;;  %v4221_v52 = vld [vmem:[%s3157_s5 + $0x18] sm:$0xff] }
 0x1f3   : > { %1573 = vrot.lane.b32.xlu1 %v1568_v37, %s3076_s9  ;;  %1107 = vrot.lane.b32.xlu0 %v1103_v13, %s3076_s9  ;;  %v2241_v37 = vmul.f32 %v4073_v61, %v3754_v27 }
 0x1f4   : > { %v4166_v23 = vpop.permute.xlu0 %814  ;;  %v1612_v2 = vadd.f32 %v1610_v4, %v4077_v51 }
 0x1f5   : > { %5351 = vst [vmem:[#allocation17_spill] sm:$0xff] %v4166_v23  ;;  %v4177_v28 = vpop.permute.xlu1 %926 }
 0x1f6   : > { %5352 = vst [vmem:[#allocation10_spill] sm:$0xff] %v4177_v28 }
 0x1f7   : > { %2163 = vrot.lane.b32.xlu1 %v4173_v36, %s3075_s8  ;;  %1485 = vrot.lane.b32.xlu0 %v1481_v20, %s3075_s8 }
 0x1f8   : > { %v4182_v43 = vpop.permute.xlu0 %1771 }
 0x1f9   : > { %v4184_v13 = vpop.permute.xlu1 %2365 }
 0x1fa   : > { %5353 = vst [vmem:[#allocation20_spill] sm:$0xff] %v4184_v13  ;;  %v2157_v13 = vmul.f32 %v4191_v48, %v3770_v14 }
 0x1fb   : > { %2246 = vrot.lane.b32.xlu1 %v2241_v37, %s3075_s8  ;;  %1571 = vrot.lane.b32.xlu0 %v1567_v31, %s3076_s9  ;;  %v1553_v37 = vadd.f32 %v3854_v5, %v1538_v32  ;;  %v4212_v31 = vmul.f32 %v3577_v46, %v3770_v14 }
 0x1fc   : > { %v4197_v20 = vpop.permute.xlu0 %2388 }
 0x1fd   : > { %v4201_v9 = vpop.permute.xlu1 %2380  ;;  %5356 = vst [vmem:[#allocation57_spill] sm:$0xff] %v4212_v31  ;;  %v1579_v32 = vmul.f32 %v1553_v37, %v3835_v25  ;;  %v4243_v37 = vadd.f32 %v3788_v16, %v1612_v2 }
 0x1fe   : > { %5354 = vst [vmem:[#allocation55_spill] sm:$0xff] %v4201_v9  ;;  %v2240_v9 = vmul.f32 %v4095_v22, %v3754_v27 }
 0x1ff   : > { %1642 = vrot.lane.b32.xlu1 %v4077_v51, %s3076_s9  ;;  %2161 = vrot.lane.b32.xlu0 %v2157_v13, %s3075_s8  ;;  %5359 = vst [vmem:[#allocation60_spill] sm:$0xff] %v4243_v37  ;;  %v4261_v16 = vmul.f32 %v4243_v37, %v3800_v19 }
 0x200   : > { %v4207_v24 = vpop.permute.xlu0 %2447 }
 0x201   : > { %5355 = vst [vmem:[#allocation56_spill] sm:$0xff] %v4207_v24  ;;  %v4214_v28 = vpop.permute.xlu1 %2457  ;;  %5361 = vst [vmem:[#allocation62_spill] sm:$0xff] %v4261_v16 }
 0x202   : > { %5357 = vst [vmem:[#allocation58_spill] sm:$0xff] %v4214_v28  ;;  %v1537_v28 = vmul.f32 %v4221_v52, %v3835_v25 }
 0x203   : > { %2256 = vrot.lane.b32.xlu1 %v4212_v31, %s3075_s8  ;;  %2244 = vrot.lane.b32.xlu0 %v2240_v9, %s3075_s8 }
 0x204   : > { %v4226_v5 = vpop.permute.xlu0 %828  ;;  %v1539_v9 = vadd.f32 %v1537_v28, %v4006_v39 }
 0x205   : > { %5358 = vst [vmem:[#allocation59_spill] sm:$0xff] %v4226_v5  ;;  %v4231_v24 = vpop.permute.xlu1 %2489  ;;  %v1609_v5 = vmul.f32 %v3577_v46, %v3835_v25 }
 0x206   : > { %v1554_v2 = vadd.f32 %v3779_v30, %v1539_v9  ;;  %v2109_v9 = vmul.f32 %v3577_v46, %v3798_v41 }
 0x207   : > { %1583 = vrot.lane.b32.xlu1 %v1579_v32, %s3076_s9  ;;  %1640 = vrot.lane.b32.xlu0 %v4099_v57, %s3076_s9  ;;  %v4255_v32 = vmul.f32 %v5316_v56, %v3770_v14  ;;  %v1611_v28 = vadd.f32 %v1609_v5, %v4099_v57 }
 0x208   : > { %v4237_v23 = vpop.permute.xlu0 %928  ;;  %v1580_v30 = vmul.f32 %v1554_v2, %v3835_v25  ;;  %v2093_v2 = vmul.f32 %v4095_v22, %v3886_v55 }
 0x209   : > { %v4240_v59 = vpop.permute.xlu1 %940  ;;  %5360 = vst [vmem:[#allocation61_spill] sm:$0xff] %v4255_v32  ;;  %v4272_v56 = vadd.f32 %v3863_v60, %v1611_v28 }
 0x20b   : > { %2288 = vrot.lane.b32.xlu1 %v5344_v3, %s3069_s24  ;;  %2199 = vrot.lane.b32.xlu0 %v3202_v47, %s3069_s24  ;;  %5362 = vst [vmem:[#allocation63_spill] sm:$0xff] %v4272_v56  ;;  %v2094_v3 = vmul.f32 %v4073_v61, %v3886_v55  ;;  %v4287_v60 = vmul.f32 %v4272_v56, %v3800_v19 }
 0x20c   : > { %v4251_v4 = vpop.permute.xlu0 %2367  ;;  %v2182_v19 = vadd.f32 %v3898_v49, %v2157_v13  ;;  %v4319_v49 = vld [vmem:[%s3157_s5 + $0x38] sm:$0xff] }
 0x20d   : > { %v4257_v39 = vpop.permute.xlu1 %2471  ;;  %5364 = vst [vmem:[#allocation65_spill] sm:$0xff] %v4287_v60  ;;  %v2110_v13 = vmul.f32 %v4319_v49, %v3798_v41  ;;  %v1668_v41 = vmul.f32 %v4191_v48, %v3852_v58 }
 0x20f   : > { %1654 = vrot.lane.b32.xlu1 %v4261_v16, %s3076_s9  ;;  %2258 = vrot.lane.b32.xlu0 %v4255_v32, %s3075_s8  ;;  %v2197_v16 = vadd.f32 %v3910_v17, %v2182_v19  ;;  %v1663_v19 = vmul.f32 %v4040_v1, %v3951_v7 }
 0x210   : > { %v4269_v47 = vpop.permute.xlu0 %2382 }
 0x211   : > { %v4276_v51 = vpop.permute.xlu1 %954  ;;  %v2226_v17 = vmul.f32 %v2197_v16, %v3754_v27  ;;  %v1670_v56 = vadd.f32 %v1668_v41, %v1663_v19 }
 0x212   : > { %5363 = vst [vmem:[#allocation64_spill] sm:$0xff] %v4276_v51 }
 0x213   : > { %2099 = vrot.lane.b32.xlu1 %v2094_v3, %s3075_s8  ;;  %1585 = vrot.lane.b32.xlu0 %v1580_v30, %s3076_s9  ;;  %v2214_v30 = vmul.f32 %v4191_v48, %v3754_v27  ;;  %v1685_v41 = vadd.f32 %v3959_v45, %v1670_v56  ;;  %v5379_v45 = vld [vmem:[#allocation3_spill] sm:$0xff] }
 0x214   : > { %v4281_v5 = vpop.permute.xlu0 %2459 }
 0x215   : > { %v4289_v28 = vpop.permute.xlu1 %966 }
 0x216   : > { %5365 = vst [vmem:[#allocation66_spill] sm:$0xff] %v4289_v28  ;;  %v1747_v28 = vmul.f32 %v3577_v46, %v3852_v58 }
 0x217   : > { %2113 = vrot.lane.b32.xlu1 %v2109_v9, %s3075_s8  ;;  %1652 = vrot.lane.b32.xlu0 %v4287_v60, %s3076_s9  ;;  %v2274_v60 = vadd.f32 %v3923_v44, %v4212_v31 }
 0x218   : > { %v4294_v25 = vpop.permute.xlu0 %938 }
 0x219   : > { %v4298_v3 = vpop.permute.xlu1 %1506 }
 0x21b   : > { %2218 = vrot.lane.b32.xlu1 %v2214_v30, %s3076_s9  ;;  %2097 = vrot.lane.b32.xlu0 %v2093_v2, %s3075_s8  ;;  %v4325_v2 = vadd.f32 %v3935_v40, %v2274_v60  ;;  %v2215_v40 = vmul.f32 %v4169_v26, %v3754_v27  ;;  %v5370_v60 = vld [vmem:[#allocation46_spill] sm:$0xff] }
 0x21c   : > { %v4305_v9 = vpop.permute.xlu0 %2469 }
 0x21d   : > { %v4310_v37 = vpop.permute.xlu1 %1454  ;;  %5367 = vst [vmem:[#allocation68_spill] sm:$0xff] %v4325_v2  ;;  %v4333_v30 = vmul.f32 %v4325_v2, %v3770_v14  ;;  %v5372_v2 = vld [vmem:[#allocation49_spill] sm:$0xff] }
 0x21e   : > { %5366 = vst [vmem:[#allocation67_spill] sm:$0xff] %v4310_v37 }
 0x21f   : > { %2303 = vrot.lane.b32.xlu1 %v4212_v31, %s3076_s9  ;;  %2123 = vrot.lane.b32.xlu0 %v3219_v53, %s3066_s21  ;;  %5368 = vst [vmem:[#allocation69_spill] sm:$0xff] %v4333_v30  ;;  %v5371_v53 = vld [vmem:[#allocation15_spill] sm:$0xff] }
 0x220   : > { %v4316_v55 = vpop.permute.xlu0 %952  ;;  %v786_v31 = vmul.f32 %v4095_v22, %v5371_v53 }
 0x221   : > { %v4339_v16 = vpop.permute.xlu1 %978 }
 0x222   : > { %5369 = vst [vmem:[#allocation70_spill] sm:$0xff] %v4339_v16  ;;  %v1745_v16 = vmul.f32 %v4095_v22, %v3951_v7 }
 0x223   : > { %2230 = vrot.lane.b32.xlu1 %v2226_v17, %s3076_s9  ;;  %2115 = vrot.lane.b32.xlu0 %v2110_v13, %s3075_s8  ;;  %v2183_v13 = vadd.f32 %v5370_v60, %v4173_v36  ;;  %v5373_v36 = vld [vmem:[#allocation50_spill] sm:$0xff] }
 0x224   : > { %v4329_v44 = vpop.permute.xlu0 %964  ;;  %v2275_v60 = vadd.f32 %v5373_v36, %v4255_v32  ;;  %v1749_v36 = vadd.f32 %v1747_v28, %v1745_v16  ;;  %v1669_v28 = vmul.f32 %v4221_v52, %v3852_v58  ;;  %v849_v16 = vmul.f32 %v4191_v48, %v3975_v38 }
 0x225   : > { %v2198_v57 = vadd.f32 %v5372_v2, %v2183_v13  ;;  %v5376_v13 = vld [vmem:[#allocation13_spill] sm:$0xff] }
 0x226   : > { %v4373_v37 = vmul.f32 %v3577_v46, %v5376_v13  ;;  %v1761_v56 = vadd.f32 %v5379_v45, %v1749_v36  ;;  %v1664_v46 = vmul.f32 %v4002_v15, %v3951_v7  ;;  %v1748_v45 = vmul.f32 %v4319_v49, %v3852_v58 }
 0x227   : > { %2315 = vrot.lane.b32.xlu1 %v4333_v30, %s3076_s9  ;;  %2220 = vrot.lane.b32.xlu0 %v2215_v40, %s3076_s9  ;;  %v4359_v30 = vpop.permute.xlu1 %1082  ;;  %v5374_v40 = vld [vmem:[#allocation51_spill] sm:$0xff]  ;;  %v2227_v19 = vmul.f32 %v2198_v57, %v3754_v27  ;;  %v1709_v27 = vmul.f32 %v1685_v41, %v3852_v58  ;;  %v787_v41 = vmul.f32 %v4073_v61, %v5371_v53 }
 0x228   : > { %v4348_v17 = vpop.permute.xlu0 %996  ;;  %v4365_v51 = vadd.f32 %v5374_v40, %v2275_v60  ;;  %v1671_v36 = vadd.f32 %v1669_v28, %v1664_v46  ;;  %v1721_v28 = vmul.f32 %v4040_v1, %v4048_v18 }
 0x22a   : > { %5375 = vst [vmem:[#allocation46_spill] sm:$0xff] %v4365_v51 }
 0x22b   : > { %790 = vrot.lane.b32.xlu1 %v786_v31, %s3075_s8  ;;  %2305 = vrot.lane.b32.xlu0 %v4255_v32, %s3076_s9  ;;  %v4380_v31 = vmul.f32 %v4365_v51, %v3770_v14  ;;  %v4385_v57 = vpop.permute.xlu1 %1527  ;;  %v4414_v32 = vmul.f32 %v4319_v49, %v5376_v13  ;;  %v5381_v13 = vld [vmem:[#allocation9_spill] sm:$0xff] }
 0x22c   : > { %v4367_v2 = vpop.permute.xlu0 %1511  ;;  %5378 = vst [vmem:[#allocation49_spill] sm:$0xff] %v4385_v57 }
 0x22d   : > { %5377 = vst [vmem:[#allocation15_spill] sm:$0xff] %v4380_v31 }
 0x22f   : > { %802 = vrot.lane.b32.xlu1 %v4373_v37, %s3075_s8  ;;  %2232 = vrot.lane.b32.xlu0 %v2227_v19, %s3076_s9  ;;  %v1779_v19 = vmul.f32 %v1761_v56, %v3951_v7  ;;  %v864_v56 = vadd.f32 %v3896_v29, %v849_v16 }
 0x230   : > { %v4382_v60 = vpop.permute.xlu0 %976 }
 0x233   : > { %1713 = vrot.lane.b32.xlu1 %v1709_v27, %s3076_s9  ;;  %2317 = vrot.lane.b32.xlu0 %v4380_v31, %s3076_s9  ;;  %v1746_v27 = vmul.f32 %v4073_v61, %v3951_v7 }
 0x234   : > { %v4395_v14 = vpop.permute.xlu0 %1080 }
 0x235   : > { %v627_v40 = vpop.permute.xlu1 %626  ;;  %v1750_v57 = vadd.f32 %v1748_v45, %v1746_v27  ;;  %v2326_v45 = vmul.f32 %v4191_v48, %v4092_v10 }
 0x236   : > { %631 = vst.msk [vmem:[#allocation2 + $0x68] sm:$0xff] %vm569_vm0, %v627_v40  ;;  %v5380_v40 = vld [vmem:[#allocation52_spill] sm:$0xff] }
 0x237   : > { %1783 = vrot.lane.b32.xlu1 %v1779_v19, %s3076_s9  ;;  %792 = vrot.lane.b32.xlu0 %v787_v41, %s3075_s8  ;;  %v1686_v51 = vadd.f32 %v5380_v40, %v1671_v36  ;;  %v4421_v19 = vadd.f32 %v4056_v21, %v864_v56  ;;  %v1690_v41 = vmul.f32 %v4191_v48, %v4048_v18  ;;  %v5382_v56 = vld [vmem:[#allocation34_spill] sm:$0xff] }
 0x238   : > { %v4409_v31 = vpop.permute.xlu0 %1525  ;;  %v1762_v16 = vadd.f32 %v5381_v13, %v1750_v57  ;;  %v2341_v13 = vadd.f32 %v4062_v12, %v2326_v45  ;;  %v1722_v12 = vmul.f32 %v4002_v15, %v4048_v18 }
 0x239   : > { %v587_v46 = vpop.permute.xlu1 %586  ;;  %v4431_v36 = vmul.f32 %v4070_v63, %v4421_v19  ;;  %v1710_v21 = vmul.f32 %v1686_v51, %v3852_v58 }
 0x23a   : > { %591 = vst.msk [vmem:[#allocation2 + $0x28] sm:$0xff] %vm569_vm0, %v587_v46  ;;  %v1692_v46 = vadd.f32 %v1690_v41, %v5382_v56  ;;  %v1780_v57 = vmul.f32 %v1762_v16, %v3951_v7  ;;  %v2356_v45 = vadd.f32 %v4101_v11, %v2341_v13 }
 0x23b   : > { %1725 = vrot.lane.b32.xlu1 %v1721_v28, %s3076_s9  ;;  %804 = vrot.lane.b32.xlu0 %v4414_v32, %s3075_s8  ;;  %v850_v28 = vmul.f32 %v4169_v26, %v3975_v38 }
 0x23c   : > { %v625_v29 = vpop.permute.xlu0 %624  ;;  %v1707_v40 = vadd.f32 %v4126_v62, %v1692_v46  ;;  %v5385_v46 = vld [vmem:[#allocation29_spill] sm:$0xff] }
 0x23d   : > { %630 = vst.msk [vmem:[#allocation2 + $0x60] sm:$0xff] %vm569_vm0, %v625_v29  ;;  %v647_v27 = vpop.permute.xlu1 %646  ;;  %v1794_v29 = vmul.f32 %v4095_v22, %v4136_v6  ;;  %v865_v41 = vadd.f32 %v4082_v34, %v850_v28  ;;  %v1691_v34 = vmul.f32 %v4221_v52, %v4048_v18 }
 0x23e   : > { %651 = vst.msk [vmem:[#allocation2 + $0x88] sm:$0xff] %vm569_vm0, %v647_v27  ;;  %v4454_v27 = vld [vmem:[%s3157_s5 + $0x30] sm:$0xff]  ;;  %v1733_v16 = vmul.f32 %v1707_v40, %v4048_v18 }
 0x23f   : > { %918 = vrot.lane.b32.xlu1 %v4431_v36, %s3076_s9  ;;  %1715 = vrot.lane.b32.xlu0 %v1710_v21, %s3076_s9  ;;  %v1763_v7 = vmul.f32 %v4454_v27, %v4048_v18  ;;  %v4461_v62 = vadd.f32 %v4107_v50, %v865_v41  ;;  %v2427_v28 = vmul.f32 %v4454_v27, %v4092_v10 }
 0x241   : > { %v4446_v58 = vpop.permute.xlu1 %990  ;;  %v585_v51 = vpop.permute.xlu0 %584  ;;  %v4477_v50 = vmul.f32 %v4070_v63, %v4461_v62  ;;  %v665_v13 = vld [vmem:[#allocation2 + $0x28] sm:$0xff]  ;;  %v666_v63 = vld [vmem:[#allocation2 + $0x30] sm:$0xff] }
 0x242   : > { %5383 = vst [vmem:[#allocation50_spill] sm:$0xff] %v4446_v58  ;;  %590 = vst.msk [vmem:[#allocation2 + $0x20] sm:$0xff] %vm569_vm0, %v585_v51  ;;  %v2391_v51 = vmul.f32 %v4197_v20, %v2356_v45 }
 0x243   : > { %1798 = vrot.lane.b32.xlu1 %v1794_v29, %s3076_s9  ;;  %1785 = vrot.lane.b32.xlu0 %v1780_v57, %s3076_s9  ;;  %v1765_v57 = vadd.f32 %v1763_v7, %v5385_v46 }
 0x245   : > { %v4464_v21 = vpop.permute.xlu1 %1603  ;;  %v645_v56 = vpop.permute.xlu0 %644  ;;  %v1777_v40 = vadd.f32 %v4182_v43, %v1765_v57 }
 0x246   : > { %5384 = vst [vmem:[#allocation51_spill] sm:$0xff] %v4464_v21  ;;  %650 = vst.msk [vmem:[#allocation2 + $0x80] sm:$0xff] %vm569_vm0, %v645_v56  ;;  %v5391_v21 = vld [vmem:[#allocation31_spill] sm:$0xff] }
 0x247   : > { %1737 = vrot.lane.b32.xlu1 %v1733_v16, %s3076_s9  ;;  %1727 = vrot.lane.b32.xlu0 %v1722_v12, %s3076_s9  ;;  %v5388_v16 = vld [vmem:[#allocation28_spill] sm:$0xff]  ;;  %v2439_v12 = vadd.f32 %v4109_v54, %v2427_v28  ;;  %v1806_v46 = vmul.f32 %v4136_v6, %v1777_v40  ;;  %v1795_v54 = vmul.f32 %v4073_v61, %v4136_v6  ;;  %v668_v40 = vld [vmem:[#allocation2 + $0x40] sm:$0xff] }
 0x248   : > { %v1693_v56 = vadd.f32 %v1691_v34, %v5388_v16  ;;  %v667_v34 = vld [vmem:[#allocation2 + $0x38] sm:$0xff]  ;;  %v1764_v28 = vmul.f32 %v4319_v49, %v4048_v18 }
 0x249   : > { %v4483_v29 = vpop.permute.xlu1 %1097  ;;  %v4485_v11 = vpop.permute.xlu0 %988  ;;  %v664_v41 = vld [vmem:[#allocation2 + $0x20] sm:$0xff]  ;;  %v2451_v45 = vadd.f32 %v4151_v35, %v2439_v12  ;;  %v776_v35 = vmul.f32 %v4191_v48, %v4120_v33  ;;  %v838_v12 = vmul.f32 %v4454_v27, %v5371_v53 }
 0x24a   : > { %5386 = vst [vmem:[#allocation13_spill] sm:$0xff] %v4483_v29  ;;  %5387 = vst [vmem:[#allocation3_spill] sm:$0xff] %v4485_v11  ;;  %v2949_v7 = vpack.c.bf16 %v665_v13, %v664_v41  ;;  %v1708_v43 = vadd.f32 %v4084_v0, %v1693_v56  ;;  %v2327_v0 = vmul.f32 %v4169_v26, %v4092_v10  ;;  %v669_v13 = vld [vmem:[#allocation2 + $0x48] sm:$0xff] }
 0x24b   : > { %2395 = vrot.lane.b32.xlu1 %v2391_v51, %s3076_s9  ;;  %920 = vrot.lane.b32.xlu0 %v4477_v50, %s3076_s9  ;;  %v2952_v51 = vpack.c.bf16 %v667_v34, %v666_v63  ;;  %v2477_v56 = vmul.f32 %v2451_v45, %v4092_v10  ;;  %v2955_v58 = vpack.c.bf16 %v669_v13, %v668_v40  ;;  %v670_v45 = vld [vmem:[#allocation2 + $0x50] sm:$0xff]  ;;  %v5394_v11 = vld [vmem:[#allocation10_spill] sm:$0xff] }
 0x24c   : > { %2950 = vmatpush1.bf16.msra.mxu1 %v2949_v7  ;;  %v1734_v7 = vmul.f32 %v1708_v43, %v4048_v18  ;;  %v2342_v16 = vadd.f32 %v4116_v42, %v2327_v0  ;;  %v5392_v18 = vld [vmem:[#allocation17_spill] sm:$0xff]  ;;  %v840_v42 = vadd.f32 %v838_v12, %v776_v35  ;;  %v5393_v0 = vld [vmem:[#allocation30_spill] sm:$0xff]  ;;  %v2428_v29 = vmul.f32 %v4319_v49, %v4092_v10 }
 0x24d   : > { %v4495_v57 = vpop.permute.xlu1 %1625  ;;  %v4497_v41 = vpop.permute.xlu0 %1601  ;;  %2951 = vmatprep.subr.bf16.mxu1 %v5339_v8  ;;  %v820_v43 = vadd.f32 %v5392_v18, %v4373_v37  ;;  %v671_v37 = vld [vmem:[#allocation2 + $0x58] sm:$0xff]  ;;  %v672_v12 = vld [vmem:[#allocation2 + $0x60] sm:$0xff] }
 0x24e   : > { %v2958_v35 = vpack.c.bf16 %v671_v37, %v670_v45  ;;  %v5403_v37 = vld [vmem:[#allocation42_spill] sm:$0xff] }
 0x24f   : > { %1810 = vrot.lane.b32.xlu1 %v1806_v46, %s3076_s9  ;;  %1800 = vrot.lane.b32.xlu0 %v1795_v54, %s3076_s9  ;;  %v5390_v46 = vld [vmem:[#allocation37_spill] sm:$0xff] }
 0x250   : > { %2953 = vmatpush1.bf16.msra.mxu1 %v2952_v51  ;;  %v1766_v54 = vadd.f32 %v1764_v28, %v5390_v46  ;;  %v2357_v51 = vadd.f32 %v5391_v21, %v2342_v16  ;;  %v932_v28 = vadd.f32 %v5394_v11, %v840_v42  ;;  %v5398_v11 = vld [vmem:[#allocation14_spill] sm:$0xff] }
 0x251   : > { %v4515_v63 = vpop.permute.xlu1 %2134  ;;  %v4517_v34 = vpop.permute.xlu0 %1095  ;;  %2954 = vmatprep.subr.bf16.mxu1 %v5339_v8 }
 0x252   : > { %5389 = vst [vmem:[#allocation52_spill] sm:$0xff] %v4515_v63  ;;  %v1778_v63 = vadd.f32 %v5393_v0, %v1766_v54  ;;  %v2392_v40 = vmul.f32 %v4197_v20, %v2357_v51  ;;  %v5399_v20 = vld [vmem:[#allocation40_spill] sm:$0xff]  ;;  %v673_v0 = vld [vmem:[#allocation2 + $0x68] sm:$0xff] }
 0x253   : > { %2481 = vrot.lane.b32.xlu1 %v2477_v56, %s3076_s9  ;;  %1739 = vrot.lane.b32.xlu0 %v1734_v7, %s3076_s9  ;;  %v5396_v7 = vld [vmem:[#allocation38_spill] sm:$0xff]  ;;  %v753_v46 = vadd.f32 %v5399_v20, %v5398_v11  ;;  %v5400_v51 = vld [vmem:[#allocation56_spill] sm:$0xff] }
 0x254   : > { %2956 = vmatpush1.bf16.msra.mxu1 %v2955_v58  ;;  %v2440_v16 = vadd.f32 %v5396_v7, %v2428_v29  ;;  %v5397_v58 = vld [vmem:[#allocation11_spill] sm:$0xff]  ;;  %v1807_v54 = vmul.f32 %v4136_v6, %v1778_v63  ;;  %v839_v7 = vmul.f32 %v4319_v49, %v5371_v53  ;;  %v675_v20 = vld [vmem:[#allocation2 + $0x78] sm:$0xff] }
 0x255   : > { %v4531_v21 = vpop.permute.xlu1 %2075  ;;  %v4533_v13 = vpop.permute.xlu0 %1470  ;;  %2957 = vmatprep.subr.bf16.mxu1 %v5339_v8  ;;  %v832_v56 = vadd.f32 %v5397_v58, %v820_v43  ;;  %v5402_v29 = vld [vmem:[#allocation19_spill] sm:$0xff] }
 0x256   : > { %5395 = vst [vmem:[#allocation9_spill] sm:$0xff] %v4533_v13  ;;  %v2452_v18 = vadd.f32 %v5400_v51, %v2440_v16  ;;  %v2403_v43 = vmul.f32 %v4191_v48, %v5402_v29  ;;  %v674_v63 = vld [vmem:[#allocation2 + $0x70] sm:$0xff] }
 0x257   : > { %1119 = vrot.lane.b32.xlu1 %v932_v28, %s3075_s8  ;;  %2397 = vrot.lane.b32.xlu0 %v2392_v40, %s3076_s9  ;;  %v777_v28 = vmul.f32 %v4169_v26, %v4120_v33  ;;  %v2961_v40 = vpack.c.bf16 %v673_v0, %v672_v12  ;;  %v842_v6 = vmul.f32 %v832_v56, %v5371_v53  ;;  %v5405_v51 = vld [vmem:[#allocation27_spill] sm:$0xff] }
 0x258   : > { %2959 = vmatpush1.bf16.msra.mxu1 %v2958_v35  ;;  %v769_v35 = vadd.f32 %v5403_v37, %v753_v46  ;;  %v2478_v16 = vmul.f32 %v2452_v18, %v4092_v10  ;;  %v2492_v56 = vmul.f32 %v4454_v27, %v4231_v24  ;;  %v5406_v0 = vld [vmem:[#allocation43_spill] sm:$0xff]  ;;  %v676_v37 = vld [vmem:[#allocation2 + $0x80] sm:$0xff] }
 0x259   : > { %v4544_v42 = vpop.permute.xlu1 %2148  ;;  %v4546_v45 = vpop.permute.xlu0 %2055  ;;  %2960 = vmatprep.subr.bf16.mxu1 %v5339_v8  ;;  %v841_v46 = vadd.f32 %v839_v7, %v777_v28 }
 0x25a   : > { %5401 = vst [vmem:[#allocation34_spill] sm:$0xff] %v4544_v42  ;;  %v778_v58 = vmul.f32 %v4120_v33, %v769_v35  ;;  %v5408_v35 = vld [vmem:[#allocation55_spill] sm:$0xff] }
 0x25b   : > { %2407 = vrot.lane.b32.xlu1 %v2403_v43, %s3076_s9  ;;  %1812 = vrot.lane.b32.xlu0 %v1807_v54, %s3076_s9  ;;  %v2964_v54 = vpack.c.bf16 %v675_v20, %v674_v63  ;;  %v821_v43 = vadd.f32 %v5405_v51, %v4414_v32  ;;  %v933_v28 = vadd.f32 %v4237_v23, %v841_v46  ;;  %v5413_v51 = vld [vmem:[#allocation58_spill] sm:$0xff] }
 0x25c   : > { %2962 = vmatpush1.bf16.msra.mxu1 %v2961_v40  ;;  %v5407_v40 = vld [vmem:[#allocation20_spill] sm:$0xff]  ;;  %v844_v18 = vadd.f32 %v842_v6, %v778_v58  ;;  %v677_v6 = vld [vmem:[#allocation2 + $0x88] sm:$0xff]  ;;  %v2404_v23 = vmul.f32 %v4169_v26, %v5402_v29 }
 0x25d   : > { %v4561_v11 = vpop.permute.xlu1 %1109  ;;  %v4563_v12 = vpop.permute.xlu0 %1495  ;;  %2963 = vmatprep.subr.bf16.mxu1 %v5339_v8  ;;  %v2371_v10 = vadd.f32 %v5407_v40, %v5406_v0  ;;  %v2967_v58 = vpack.c.bf16 %v677_v6, %v676_v37 }
 0x25e   : > { %5404 = vst [vmem:[#allocation29_spill] sm:$0xff] %v4561_v11  ;;  %v5409_v11 = vld [vmem:[#allocation59_spill] sm:$0xff]  ;;  %v944_v63 = vadd.f32 %v4294_v25, %v844_v18  ;;  %v5414_v25 = vld [vmem:[#allocation45_spill] sm:$0xff] }
 0x25f   : > { %2496 = vrot.lane.b32.xlu1 %v2492_v56, %s3076_s9  ;;  %2483 = vrot.lane.b32.xlu0 %v2478_v16, %s3076_s9  ;;  %v2386_v42 = vadd.f32 %v5408_v35, %v2371_v10  ;;  %v833_v13 = vadd.f32 %v5409_v11, %v821_v43  ;;  %v5410_v56 = vld [vmem:[#allocation16_spill] sm:$0xff] }
 0x260   : > { %2965 = vmatpush1.bf16.msra.mxu1 %v2964_v54  ;;  %v5411_v16 = vld [vmem:[#allocation36_spill] sm:$0xff] }
 0x261   : > { %v4578_v7 = vpop.permute.xlu1 %1487  ;;  %v4580_v32 = vpop.permute.xlu0 %2146  ;;  %2966 = vmatprep.subr.bf16.mxu1 %v5339_v8  ;;  %v754_v20 = vadd.f32 %v5411_v16, %v5410_v56  ;;  %v5412_v54 = vld [vmem:[#allocation48_spill] sm:$0xff]  ;;  %v2415_v46 = vmul.f32 %v2386_v42, %v5402_v29  ;;  %v843_v43 = vmul.f32 %v833_v13, %v5371_v53  ;;  %v5415_v13 = vld [vmem:[#allocation47_spill] sm:$0xff] }
 0x262   : > { %v2463_v0 = vadd.f32 %v5413_v51, %v5412_v54 }
 0x263   : > { %1129 = vrot.lane.b32.xlu1 %v944_v63, %s3075_s8  ;;  %1121 = vrot.lane.b32.xlu0 %v933_v28, %s3075_s8  ;;  %v770_v11 = vadd.f32 %v5414_v25, %v754_v20  ;;  %v2372_v63 = vadd.f32 %v4251_v4, %v5415_v13  ;;  %v1509_v25 = vmul.f32 %v4040_v1, %v4298_v3 }
 0x264   : > { %2968 = vmatpush1.bf16.msra.mxu1 %v2967_v58  ;;  %v2475_v40 = vadd.f32 %v4305_v9, %v2463_v0  ;;  %v2493_v9 = vmul.f32 %v4319_v49, %v4231_v24  ;;  %v5416_v58 = vld [vmem:[#allocation24_spill] sm:$0xff] }
 0x265   : > { %v4595_v10 = vpop.permute.xlu1 %1573  ;;  %v4597_v18 = vpop.permute.xlu0 %1107  ;;  %2996 = vmatprep.subr.bf16.mxu1 %v5339_v8  ;;  %v779_v37 = vmul.f32 %v4120_v33, %v770_v11  ;;  %v2387_v6 = vadd.f32 %v4269_v47, %v2372_v63  ;;  %v2464_v56 = vadd.f32 %v4281_v5, %v5416_v58  ;;  %v5417_v11 = vld [vmem:[#allocation21_spill] sm:$0xff] }
 0x266   : > { %v2504_v28 = vmul.f32 %v4231_v24, %v2475_v40  ;;  %v947_v40 = vmul.f32 %v4319_v49, %v3975_v38 }
 0x267   : > { %2419 = vrot.lane.b32.xlu1 %v2415_v46, %s3076_s9  ;;  %2409 = vrot.lane.b32.xlu0 %v2404_v23, %s3076_s9  ;;  %v845_v35 = vadd.f32 %v843_v43, %v779_v37  ;;  %v2416_v4 = vmul.f32 %v2387_v6, %v5402_v29  ;;  %v2476_v54 = vadd.f32 %v4257_v39, %v2464_v56  ;;  %v5421_v6 = vld [vmem:[#allocation66_spill] sm:$0xff] }
 0x268   : > { %v1591_v56 = vmul.f32 %v4095_v22, %v4298_v3 }
 0x269   : > { %v4604_v42 = vpop.permute.xlu1 %2163  ;;  %v4606_v53 = vpop.permute.xlu0 %1485  ;;  %v945_v33 = vadd.f32 %v4240_v59, %v845_v35  ;;  %v946_v59 = vmul.f32 %v4454_v27, %v3975_v38  ;;  %v5419_v35 = vld [vmem:[#allocation64_spill] sm:$0xff]  ;;  %v5420_v38 = vld [vmem:[#allocation18_spill] sm:$0xff] }
 0x26b   : > { %2508 = vrot.lane.b32.xlu1 %v2504_v28, %s3076_s9  ;;  %2498 = vrot.lane.b32.xlu0 %v2493_v9, %s3076_s9  ;;  %v958_v5 = vadd.f32 %v4316_v55, %v946_v59  ;;  %v1514_v55 = vmul.f32 %v4191_v48, %v4367_v2  ;;  %v959_v28 = vadd.f32 %v5419_v35, %v947_v40 }
 0x26d   : > { %v4618_v16 = vpop.permute.xlu1 %2246  ;;  %v4620_v20 = vpop.permute.xlu0 %1571  ;;  %v970_v29 = vadd.f32 %v4329_v44, %v958_v5  ;;  %v1516_v37 = vadd.f32 %v1514_v55, %v1509_v25  ;;  %v971_v58 = vadd.f32 %v5421_v6, %v959_v28  ;;  %v1515_v5 = vmul.f32 %v4221_v52, %v4367_v2  ;;  %v5423_v25 = vld [vmem:[#allocation4_spill] sm:$0xff]  ;;  %v5425_v28 = vld [vmem:[#allocation49_spill] sm:$0xff] }
 0x26f   : > { %1139 = vrot.lane.b32.xlu1 %v4421_v19, %s3076_s9  ;;  %1131 = vrot.lane.b32.xlu0 %v945_v33, %s3075_s8  ;;  %v2505_v19 = vmul.f32 %v4231_v24, %v2476_v54  ;;  %v999_v23 = vmul.f32 %v4348_v17, %v970_v29  ;;  %v5418_v24 = vld [vmem:[#allocation67_spill] sm:$0xff]  ;;  %v1531_v13 = vadd.f32 %v4409_v31, %v1516_v37  ;;  %v5422_v29 = vld [vmem:[#allocation41_spill] sm:$0xff]  ;;  %v5424_v37 = vld [vmem:[#allocation12_spill] sm:$0xff] }
 0x270   : > { %v4653_v44 = vmul.f32 %v4095_v22, %v5418_v24  ;;  %v1510_v31 = vmul.f32 %v4002_v15, %v4298_v3  ;;  %v4699_v15 = vmul.f32 %v4073_v61, %v5418_v24  ;;  %v982_v24 = vadd.f32 %v4382_v60, %v5424_v37 }
 0x271   : > { %v4629_v47 = vpop.permute.xlu1 %1642  ;;  %v4631_v51 = vpop.permute.xlu0 %2161  ;;  %v1001_v1 = vadd.f32 %v999_v23, %v4431_v36  ;;  %v1003_v36 = vmul.f32 %v4454_v27, %v5420_v38  ;;  %v1592_v60 = vmul.f32 %v4073_v61, %v4298_v3 }
 0x273   : > { %1149 = vrot.lane.b32.xlu1 %v4191_v48, %s3074_s7  ;;  %2421 = vrot.lane.b32.xlu0 %v2416_v4, %s3076_s9  ;;  %v1086_v9 = vadd.f32 %v4395_v14, %v1001_v1  ;;  %v1000_v14 = vmul.f32 %v4348_v17, %v971_v58  ;;  %v1555_v4 = vmul.f32 %v1531_v13, %v4367_v2 }
 0x274   : > { %v1005_v23 = vadd.f32 %v1003_v36, %v5422_v29  ;;  %v1517_v1 = vadd.f32 %v1515_v5, %v1510_v31  ;;  %v1004_v13 = vmul.f32 %v4319_v49, %v5420_v38  ;;  %v5426_v36 = vld [vmem:[#allocation3_spill] sm:$0xff]  ;;  %v1594_v58 = vmul.f32 %v4319_v49, %v4367_v2 }
 0x275   : > { %v4639_v0 = vpop.permute.xlu1 %2256  ;;  %v4641_v39 = vpop.permute.xlu0 %2244  ;;  %v1002_v17 = vadd.f32 %v1000_v14, %v4477_v50  ;;  %v994_v6 = vadd.f32 %v5426_v36, %v982_v24  ;;  %v5427_v14 = vld [vmem:[#allocation44_spill] sm:$0xff]  ;;  %v5431_v24 = vld [vmem:[#allocation22_spill] sm:$0xff]  ;;  %v1498_v36 = vmul.f32 %v4095_v22, %v4563_v12 }
 0x276   : > { %v1596_v3 = vadd.f32 %v1594_v58, %v1592_v60  ;;  %v5433_v58 = vld [vmem:[#allocation50_spill] sm:$0xff] }
 0x277   : > { %1159 = vrot.lane.b32.xlu1 %v5417_v11, %s3074_s7  ;;  %2510 = vrot.lane.b32.xlu0 %v2505_v19, %s3076_s9  ;;  %v1101_v11 = vadd.f32 %v4517_v34, %v1005_v23  ;;  %v1087_v35 = vadd.f32 %v4359_v30, %v1002_v17  ;;  %v2058_v30 = vmul.f32 %v4095_v22, %v4546_v45 }
 0x278   : > { %v1007_v5 = vmul.f32 %v994_v6, %v5420_v38  ;;  %v4749_v23 = vmul.f32 %v4454_v27, %v4531_v21  ;;  %v2059_v22 = vmul.f32 %v4073_v61, %v4546_v45  ;;  %v4802_v45 = vmul.f32 %v4319_v49, %v4531_v21 }
 0x279   : > { %v4655_v46 = vpop.permute.xlu1 %1583  ;;  %v4657_v43 = vpop.permute.xlu0 %1640 }
 0x27b   : > { %1461 = vrot.lane.b32.xlu1 %v4653_v44, %s3075_s8  ;;  %1141 = vrot.lane.b32.xlu0 %v4461_v62, %s3076_s9  ;;  %v1593_v62 = vmul.f32 %v4454_v27, %v4367_v2 }
 0x27d   : > { %v4669_v63 = vpop.permute.xlu1 %2288  ;;  %v4671_v33 = vpop.permute.xlu0 %2199  ;;  %v1595_v19 = vadd.f32 %v1593_v62, %v1591_v56 }
 0x27f   : > { %1169 = vrot.lane.b32.xlu1 %v1086_v9, %s3076_s9  ;;  %1151 = vrot.lane.b32.xlu0 %v4169_v26, %s3074_s7  ;;  %v4703_v55 = vadd.f32 %v4497_v41, %v1595_v19  ;;  %v1532_v9 = vadd.f32 %v5425_v28, %v1517_v1  ;;  %v5428_v19 = vld [vmem:[#allocation13_spill] sm:$0xff]  ;;  %v5430_v1 = vld [vmem:[#allocation54_spill] sm:$0xff] }
 0x280   : > { %v1009_v37 = vadd.f32 %v1007_v5, %v5430_v1 }
 0x281   : > { %v4687_v54 = vpop.permute.xlu1 %1654  ;;  %v4689_v59 = vpop.permute.xlu0 %2258  ;;  %v4717_v50 = vmul.f32 %v4495_v57, %v4703_v55  ;;  %v1556_v31 = vmul.f32 %v1532_v9, %v4367_v2  ;;  %v5429_v2 = vld [vmem:[#allocation51_spill] sm:$0xff] }
 0x283   : > { %1559 = vrot.lane.b32.xlu1 %v1555_v4, %s3076_s9  ;;  %1161 = vrot.lane.b32.xlu0 %v5423_v25, %s3074_s7  ;;  %v1006_v4 = vadd.f32 %v1004_v13, %v5427_v14  ;;  %v1113_v13 = vadd.f32 %v4597_v18, %v1009_v37 }
 0x285   : > { %v4706_v52 = vpop.permute.xlu1 %2099  ;;  %v4708_v40 = vpop.permute.xlu0 %1585  ;;  %v1102_v29 = vadd.f32 %v5428_v19, %v1006_v4  ;;  %v5435_v4 = vld [vmem:[#allocation52_spill] sm:$0xff] }
 0x286   : > { %v2137_v5 = vmul.f32 %v4191_v48, %v5435_v4 }
 0x287   : > { %1463 = vrot.lane.b32.xlu0 %v4699_v15, %s3075_s8  ;;  %1179 = vrot.lane.b32.xlu1 %v1101_v11, %s3074_s7  ;;  %v4756_v11 = vadd.f32 %v5429_v2, %v1596_v3  ;;  %v2238_v3 = vmul.f32 %v4454_v27, %v5435_v4 }
 0x288   : > { %v2152_v18 = vadd.f32 %v4580_v32, %v2137_v5  ;;  %v5438_v5 = vld [vmem:[#allocation6_spill] sm:$0xff] }
 0x289   : > { %v4719_v41 = vpop.permute.xlu1 %2113  ;;  %v4721_v34 = vpop.permute.xlu0 %1652  ;;  %v4766_v9 = vmul.f32 %v4495_v57, %v4756_v11  ;;  %v1577_v57 = vadd.f32 %v4620_v20, %v1498_v36  ;;  %v1499_v36 = vmul.f32 %v4073_v61, %v4563_v12 }
 0x28a   : > { %v2167_v37 = vadd.f32 %v4631_v51, %v2152_v18 }
 0x28b   : > { %1171 = vrot.lane.b32.xlu0 %v1087_v35, %s3076_s9  ;;  %1632 = vrot.lane.b32.xlu1 %v4717_v50, %s3076_s9  ;;  %v5432_v35 = vld [vmem:[#allocation70_spill] sm:$0xff]  ;;  %v1646_v19 = vadd.f32 %v4657_v43, %v1577_v57  ;;  %v784_v57 = vmul.f32 %v4454_v27, %v5438_v5 }
 0x28c   : > { %v983_v28 = vadd.f32 %v5432_v35, %v5431_v24  ;;  %v2250_v24 = vadd.f32 %v4641_v39, %v2238_v3  ;;  %v2202_v43 = vmul.f32 %v4671_v33, %v2167_v37  ;;  %v5437_v39 = vld [vmem:[#allocation29_spill] sm:$0xff]  ;;  %v2239_v3 = vmul.f32 %v4319_v49, %v5435_v4 }
 0x28d   : > { %v4737_v56 = vpop.permute.xlu1 %2218  ;;  %v4739_v62 = vpop.permute.xlu0 %2097 }
 0x28e   : > { %v4810_v51 = vadd.f32 %v4639_v0, %v2250_v24 }
 0x28f   : > { %1561 = vrot.lane.b32.xlu0 %v1556_v31, %s3076_s9  ;;  %2062 = vrot.lane.b32.xlu1 %v2058_v30, %s3075_s8  ;;  %v995_v30 = vadd.f32 %v5433_v58, %v983_v28  ;;  %v5434_v31 = vld [vmem:[#allocation9_spill] sm:$0xff] }
 0x290   : > { %v1473_v14 = vmul.f32 %v4454_v27, %v5434_v31  ;;  %v1474_v21 = vmul.f32 %v4319_v49, %v5434_v31  ;;  %v4825_v0 = vmul.f32 %v4669_v63, %v4810_v51  ;;  %v698_v31 = vmul.f32 %v4191_v48, %v5438_v5  ;;  %v2856_v48 = vld [vmem:[%s5193_s2 + $0x48] sm:$0xff] }
 0x291   : > { %v4751_v25 = vpop.permute.xlu1 %2303  ;;  %v4753_v17 = vpop.permute.xlu0 %2123  ;;  %v1008_v20 = vmul.f32 %v995_v30, %v5420_v38  ;;  %2863 = vmatprep.mubr.msk.f32.mxu0 %vm1224_vm1, %v2856_v48 }
 0x292   : > { %v1475_v1 = vadd.f32 %v1473_v14, %v4653_v44  ;;  %v5436_v44 = vld [vmem:[#allocation53_spill] sm:$0xff]  ;;  %v1476_v61 = vadd.f32 %v1474_v21, %v4699_v15 }
 0x293   : > { %1181 = vrot.lane.b32.xlu0 %v1102_v29, %s3074_s7  ;;  %2082 = vrot.lane.b32.xlu1 %v4749_v23, %s3075_s8  ;;  %v1010_v28 = vadd.f32 %v1008_v20, %v5436_v44 }
 0x294   : > { %v1491_v32 = vadd.f32 %v4606_v53, %v1475_v1  ;;  %v2138_v53 = vmul.f32 %v4169_v26, %v5435_v4  ;;  %v2126_v1 = vmul.f32 %v4454_v27, %v4753_v17  ;;  %v5440_v4 = vld [vmem:[#allocation35_spill] sm:$0xff] }
 0x295   : > { %v4771_v6 = vpop.permute.xlu1 %2230  ;;  %v4773_v60 = vpop.permute.xlu0 %2115  ;;  %v718_v24 = vadd.f32 %v5440_v4, %v698_v31  ;;  %v699_v31 = vmul.f32 %v4169_v26, %v5438_v5 }
 0x296   : > { %v1500_v58 = vmul.f32 %v4563_v12, %v1491_v32 }
 0x297   : > { %1634 = vrot.lane.b32.xlu0 %v4766_v9, %s3076_s9  ;;  %1189 = vrot.lane.b32.xlu1 %v1113_v13, %s3074_s7  ;;  %v1114_v13 = vadd.f32 %v5437_v39, %v1010_v28  ;;  %v5441_v39 = vld [vmem:[#allocation32_spill] sm:$0xff] }
 0x298   : > { %v1589_v18 = vadd.f32 %v4655_v46, %v1500_v58 }
 0x299   : > { %v4790_v29 = vpop.permute.xlu1 %2315  ;;  %v4792_v2 = vpop.permute.xlu0 %2220 }
 0x29a   : > { %v1658_v46 = vadd.f32 %v4721_v34, %v1589_v18  ;;  %v5443_v18 = vld [vmem:[#allocation39_spill] sm:$0xff] }
 0x29b   : > { %2064 = vrot.lane.b32.xlu0 %v2059_v22, %s3075_s8  ;;  %1822 = vrot.lane.b32.xlu1 %v1646_v19, %s3075_s8  ;;  %v1578_v22 = vadd.f32 %v4595_v10, %v1499_v36  ;;  %v5439_v19 = vld [vmem:[#allocation34_spill] sm:$0xff] }
 0x29c   : > { %v2153_v20 = vadd.f32 %v5439_v19, %v2138_v53  ;;  %v2103_v53 = vadd.f32 %v4739_v62, %v4749_v23 }
 0x29d   : > { %v791_v35 = vpop.permute.xlu1 %790  ;;  %v4806_v38 = vpop.permute.xlu0 %2305  ;;  %v1647_v10 = vadd.f32 %v4629_v47, %v1578_v22  ;;  %v2251_v47 = vadd.f32 %v4618_v16, %v2239_v3  ;;  %v738_v16 = vadd.f32 %v5441_v39, %v718_v24  ;;  %v5444_v24 = vld [vmem:[#allocation33_spill] sm:$0xff] }
 0x29e   : > { %v796_v32 = vadd.f32 %v791_v35, %v784_v57  ;;  %v2168_v44 = vadd.f32 %v4604_v42, %v2153_v20  ;;  %v2224_v42 = vadd.f32 %v4737_v56, %v2126_v1  ;;  %v2119_v23 = vadd.f32 %v4719_v41, %v2103_v53  ;;  %v4903_v20 = vld [vmem:[%s3157_s5 + $0x20] sm:$0xff] }
 0x29f   : > { %2084 = vrot.lane.b32.xlu0 %v4802_v45, %s3075_s8  ;;  %2206 = vrot.lane.b32.xlu1 %v2202_v43, %s3076_s9  ;;  %v1492_v43 = vadd.f32 %v4578_v7, %v1476_v61  ;;  %v4862_v21 = vadd.f32 %v4689_v59, %v2251_v47  ;;  %v771_v57 = vmul.f32 %v738_v16, %v5438_v5 }
 0x2a0   : > { %v2203_v28 = vmul.f32 %v4671_v33, %v2168_v44  ;;  %v5442_v33 = vld [vmem:[#allocation5_spill] sm:$0xff]  ;;  %v2128_v26 = vmul.f32 %v4753_v17, %v2119_v23  ;;  %v719_v61 = vadd.f32 %v5443_v18, %v699_v31 }
 0x2a1   : > { %v803_v30 = vpop.permute.xlu1 %802  ;;  %v4827_v14 = vpop.permute.xlu0 %2232  ;;  %v1501_v36 = vmul.f32 %v4563_v12, %v1492_v43  ;;  %v4881_v56 = vmul.f32 %v4669_v63, %v4862_v21  ;;  %v2309_v12 = vadd.f32 %v4751_v25, %v2224_v42  ;;  %v652_v63 = vld [vmem:[%s5193_s2] sm:$0xff] }
 0x2a2   : > { %v808_v34 = vadd.f32 %v803_v30, %v796_v32  ;;  %v2236_v19 = vadd.f32 %v4771_v6, %v2128_v26  ;;  %v739_v32 = vadd.f32 %v5444_v24, %v719_v61  ;;  %v2104_v6 = vadd.f32 %v4706_v52, %v4802_v45  ;;  %v5445_v52 = vld [vmem:[#allocation63_spill] sm:$0xff]  ;;  %v5450_v26 = vld [vmem:[#allocation25_spill] sm:$0xff] }
 0x2a3   : > { %1191 = vrot.lane.b32.xlu0 %v1114_v13, %s3074_s7  ;;  %2295 = vrot.lane.b32.xlu1 %v4825_v0, %s3076_s9  ;;  %v653_v13 = vld [vmem:[%s5193_s2 + $0x8] sm:$0xff]  ;;  %v1590_v62 = vadd.f32 %v4708_v40, %v1501_v36  ;;  %v5447_v36 = vld [vmem:[#allocation60_spill] sm:$0xff] }
 0x2a4   : > { %v834_v59 = vmul.f32 %v808_v34, %v5442_v33  ;;  %2867 = vmatprep.mubr.msk.f32.mxu1 %vm1224_vm1, %v653_v13  ;;  %v772_v53 = vmul.f32 %v739_v32, %v5438_v5  ;;  %v655_v32 = vld [vmem:[%s5193_s2 + $0x18] sm:$0xff] }
 0x2a5   : > { %v4849_v37 = vpop.permute.xlu1 %1713  ;;  %v4851_v15 = vpop.permute.xlu0 %2317  ;;  %1399 = vmatmul.mubr.f32.vlgmr.msra.gmra.mrb[0].mxu1 %v652_v63  ;;  %v1659_v41 = vadd.f32 %v4687_v54, %v1590_v62  ;;  %v2321_v54 = vadd.f32 %v4790_v29, %v2236_v19  ;;  %v2120_v29 = vadd.f32 %v4773_v60, %v2104_v6  ;;  %v5449_v63 = vld [vmem:[#allocation68_spill] sm:$0xff] }
 0x2a6   : > { %v836_v40 = vadd.f32 %v834_v59, %v771_v57  ;;  %v1719_v60 = vadd.f32 %v4849_v37, %v4717_v50  ;;  %2868 = vmatprep.mubr.msk.f32.mxu1 %vm1224_vm1, %v655_v32 }
 0x2a7   : > { %1824 = vrot.lane.b32.xlu0 %v1647_v10, %s3075_s8  ;;  %1832 = vrot.lane.b32.xlu1 %v1658_v46, %s3075_s8  ;;  %v2127_v46 = vmul.f32 %v4319_v49, %v4753_v17 }
 0x2a9   : > { %v4866_v35 = vpop.permute.xlu1 %1783  ;;  %v793_v7 = vpop.permute.xlu0 %792  ;;  %v2225_v43 = vadd.f32 %v4792_v2, %v2127_v46  ;;  %v5452_v46 = vld [vmem:[#allocation62_spill] sm:$0xff] }
 0x2ab   : > { %2208 = vrot.lane.b32.xlu0 %v2203_v28, %s3076_s9  ;;  %1842 = vrot.lane.b32.xlu1 %v4703_v55, %s3076_s9  ;;  %v785_v55 = vmul.f32 %v4319_v49, %v5438_v5  ;;  %v2310_v47 = vadd.f32 %v4806_v38, %v2225_v43  ;;  %v4932_v38 = vld [vmem:[%s3157_s5 + $0x28] sm:$0xff]  ;;  %v1789_v5 = vadd.f32 %v4866_v35, %v1719_v60  ;;  %v659_v60 = vld [vmem:[%s5193_s2 + $0x38] sm:$0xff] }
 0x2ad   : > { %v1726_v58 = vpop.permute.xlu1 %1725  ;;  %v805_v30 = vpop.permute.xlu0 %804  ;;  %v797_v3 = vadd.f32 %v793_v7, %v785_v55  ;;  %v5448_v55 = vld [vmem:[#allocation65_spill] sm:$0xff] }
 0x2af   : > { %2297 = vrot.lane.b32.xlu0 %v4881_v56, %s3076_s9  ;;  %2520 = vrot.lane.b32.xlu1 %v2309_v12, %s3075_s8  ;;  %v809_v10 = vadd.f32 %v805_v30, %v797_v3 }
 0x2b1   : > { %v919_v25 = vpop.permute.xlu1 %918  ;;  %v1716_v22 = vpop.permute.xlu0 %1715  ;;  %v835_v44 = vmul.f32 %v809_v10, %v5442_v33 }
 0x2b2   : > { %v924_v48 = vadd.f32 %v919_v25, %v836_v40  ;;  %v1720_v30 = vadd.f32 %v1716_v22, %v4766_v9 }
 0x2b3   : > { %1834 = vrot.lane.b32.xlu0 %v1659_v41, %s3075_s8  ;;  %1852 = vrot.lane.b32.xlu1 %v4903_v20, %s3074_s7  ;;  %v837_v2 = vadd.f32 %v835_v44, %v772_v53 }
 0x2b4   : > { %1115 = vst.msk [vmem:[#allocation2] sm:$0xff] %vm569_vm0, %v924_v48  ;;  %v5451_v48 = vld [vmem:[#allocation57_spill] sm:$0xff] }
 0x2b5   : > { %v1799_v1 = vpop.permute.xlu1 %1798  ;;  %v1786_v4 = vpop.permute.xlu0 %1785 }
 0x2b7   : > { %1844 = vrot.lane.b32.xlu0 %v4756_v11, %s3076_s9  ;;  %2530 = vrot.lane.b32.xlu1 %v2321_v54, %s3075_s8  ;;  %v2129_v11 = vmul.f32 %v4753_v17, %v2120_v29 }
 0x2b9   : > { %v1738_v34 = vpop.permute.xlu1 %1737  ;;  %v1728_v28 = vpop.permute.xlu0 %1727  ;;  %v2237_v39 = vadd.f32 %v4827_v14, %v2129_v11 }
 0x2ba   : > { %v1743_v57 = vadd.f32 %v1738_v34, %v5448_v55  ;;  %v1732_v25 = vadd.f32 %v1728_v28, %v5450_v26 }
 0x2bb   : > { %1862 = vrot.lane.b32.xlu1 %v5445_v52, %s3074_s7  ;;  %2522 = vrot.lane.b32.xlu0 %v2310_v47, %s3075_s8  ;;  %v2322_v17 = vadd.f32 %v4851_v15, %v2237_v39  ;;  %v1206_v33 = vld [vmem:[#allocation2] sm:$0xff]  ;;  %v654_v52 = vld [vmem:[%s5193_s2 + $0x10] sm:$0xff] }
 0x2bc   : > { %1404 = vmatmul.mubr.f32.gmra.mrb[2].mxu1 %v654_v52 }
 0x2bd   : > { %v2396_v45 = vpop.permute.xlu1 %2395  ;;  %v921_v7 = vpop.permute.xlu0 %920 }
 0x2be   : > { %v925_v42 = vadd.f32 %v921_v7, %v837_v2  ;;  %v2401_v22 = vadd.f32 %v2396_v45, %v4825_v0  ;;  %v657_v2 = vld [vmem:[%s5193_s2 + $0x28] sm:$0xff] }
 0x2bf   : > { %2540 = vrot.lane.b32.xlu1 %v4810_v51, %s3076_s9  ;;  %1854 = vrot.lane.b32.xlu0 %v4932_v38, %s3074_s7  ;;  %v5446_v51 = vld [vmem:[#allocation26_spill] sm:$0xff] }
 0x2c0   : > { %1116 = vst.msk [vmem:[#allocation2 + $0x8] sm:$0xff] %vm569_vm0, %v925_v42  ;;  %v1731_v37 = vadd.f32 %v1726_v58, %v5446_v51  ;;  %v1790_v58 = vadd.f32 %v1786_v4, %v1720_v30  ;;  %v5454_v4 = vld [vmem:[#allocation69_spill] sm:$0xff]  ;;  %2869 = vmatprep.mubr.msk.f32.mxu1 %vm1224_vm1, %v657_v2  ;;  %v5457_v30 = vld [vmem:[#allocation7_spill] sm:$0xff] }
 0x2c1   : > { %v1811_v16 = vpop.permute.xlu1 %1810  ;;  %v1801_v13 = vpop.permute.xlu0 %1800  ;;  %v5455_v42 = vld [vmem:[#allocation61_spill] sm:$0xff] }
 0x2c2   : > { %v1804_v35 = vadd.f32 %v1799_v1, %v1731_v37  ;;  %v1816_v40 = vadd.f32 %v1811_v16, %v1743_v57 }
 0x2c3   : > { %1872 = vrot.lane.b32.xlu1 %v1789_v5, %s3076_s9  ;;  %2532 = vrot.lane.b32.xlu0 %v2322_v17, %s3075_s8 }
 0x2c5   : > { %v2482_v50 = vpop.permute.xlu1 %2481  ;;  %v1740_v14 = vpop.permute.xlu0 %1739 }
 0x2c6   : > { %v2487_v18 = vadd.f32 %v2482_v50, %v2401_v22  ;;  %v1744_v1 = vadd.f32 %v1740_v14, %v5452_v46  ;;  %v5456_v50 = vld [vmem:[#allocation15_spill] sm:$0xff] }
 0x2c7   : > { %2550 = vrot.lane.b32.xlu1 %v4454_v27, %s3074_s7  ;;  %1864 = vrot.lane.b32.xlu0 %v5447_v36, %s3074_s7  ;;  %v1207_v15 = vld [vmem:[#allocation2 + $0x8] sm:$0xff] }
 0x2c8   : > { %v2916_v59 = vpack.c.bf16 %v1207_v15, %v1206_v33 }
 0x2c9   : > { %v1120_v62 = vpop.permute.xlu1 %1119  ;;  %v2398_v23 = vpop.permute.xlu0 %2397 }
 0x2ca   : > { %1125 = vst.msk [vmem:[#allocation2 + $0x10] sm:$0xff] %vm569_vm0, %v1120_v62  ;;  %2917 = vmatpush1.bf16.msra.mxu0 %v2916_v59  ;;  %v2402_v53 = vadd.f32 %v2398_v23, %v4881_v56  ;;  %v656_v56 = vld [vmem:[%s5193_s2 + $0x20] sm:$0xff] }
 0x2cb   : > { %1882 = vrot.lane.b32.xlu1 %v1804_v35, %s3074_s7  ;;  %2542 = vrot.lane.b32.xlu0 %v4862_v21, %s3076_s9  ;;  %v1805_v21 = vadd.f32 %v1801_v13, %v1732_v25  ;;  %v658_v13 = vld [vmem:[%s5193_s2 + $0x30] sm:$0xff]  ;;  %v2900_v35 = vld [vmem:[%s5193_s2 + $0xc8] sm:$0xff] }
 0x2cc   : > { %2918 = vmatprep.subr.bf16.mxu0 %v5339_v8  ;;  %1409 = vmatmul.mubr.f32.gmra.mrb[4].mxu1 %v656_v56  ;;  %v3057_v56 = vld [vmem:[%s3157_s5 + $0x30] sm:$0xff] }
 0x2cd   : > { %v2408_v12 = vpop.permute.xlu1 %2407  ;;  %v1813_v31 = vpop.permute.xlu0 %1812  ;;  %2870 = vmatprep.mubr.msk.f32.mxu1 %vm1224_vm1, %v659_v60 }
 0x2ce   : > { %v2413_v19 = vadd.f32 %v2408_v12, %v5451_v48  ;;  %v1817_v6 = vadd.f32 %v1813_v31, %v1744_v1  ;;  %v5458_v12 = vld [vmem:[#allocation23_spill] sm:$0xff]  ;;  %v3078_v48 = vmov 0  }
 0x2cf   : > { %2560 = vrot.lane.b32.xlu1 %v5449_v63, %s3074_s7  ;;  %1874 = vrot.lane.b32.xlu0 %v1790_v58, %s3076_s9  ;;  %v1439_v58 = vmul.f32 %v4903_v20, %v5457_v30  ;;  %v1445_v31 = vmul.f32 %v4454_v27, %v5458_v12  ;;  %v2726_v27 = vld [vmem:[%s5194_s3] sm:$0xff] }
 0x2d0   : > { %1414 = vmatmul.mubr.f32.gmra.mrb[6].mxu1 %v658_v13  ;;  %3044 = vset.pattern.permute.xlu1 %v3078_v48 }
 0x2d1   : > { %v2497_v41 = vpop.permute.xlu1 %2496  ;;  %v2484_v9 = vpop.permute.xlu0 %2483  ;;  %v1208_v29 = vld [vmem:[#allocation2 + $0x10] sm:$0xff]  ;;  %2907 = vmatprep.mubr.msk.f32.mxu1 %vm1224_vm1, %v2900_v35  ;;  %v1447_v63 = vadd.f32 %v1445_v31, %v1439_v58  ;;  %3045 = vset.pattern.permute.xlu0 %v3078_v48 }
 0x2d2   : > { %v2502_v0 = vadd.f32 %v2497_v41, %v2413_v19  ;;  %v2488_v11 = vadd.f32 %v2484_v9, %v2402_v53  ;;  %v2727_v19 = vld [vmem:[%s5194_s3 + $0x8] sm:$0xff] }
 0x2d3   : > { %1892 = vrot.lane.b32.xlu1 %v1816_v40, %s3074_s7  ;;  %2552 = vrot.lane.b32.xlu0 %v4319_v49, %s3074_s7  ;;  %v5453_v49 = vld [vmem:[#allocation46_spill] sm:$0xff] }
 0x2d5   : > { %v1130_v61 = vpop.permute.xlu1 %1129  ;;  %v1122_v3 = vpop.permute.xlu0 %1121 }
 0x2d6   : > { %1135 = vst.msk [vmem:[#allocation2 + $0x20] sm:$0xff] %vm569_vm0, %v1130_v61  ;;  %1126 = vst.msk [vmem:[#allocation2 + $0x18] sm:$0xff] %vm569_vm0, %v1122_v3 }
 0x2d7   : > { %2570 = vrot.lane.b32.xlu1 %v2487_v18, %s3076_s9  ;;  %1884 = vrot.lane.b32.xlu0 %v1805_v21, %s3074_s7  ;;  %v1440_v18 = vmul.f32 %v4932_v38, %v5457_v30  ;;  %v2728_v38 = vld [vmem:[%s5194_s3 + $0x10] sm:$0xff] }
 0x2d9   : > { %v2420_v10 = vpop.permute.xlu1 %2419  ;;  %v2410_v54 = vpop.permute.xlu0 %2409 }
 0x2da   : > { %v2425_v24 = vadd.f32 %v2420_v10, %v5454_v4  ;;  %v2414_v39 = vadd.f32 %v2410_v54, %v5455_v42  ;;  %v3056_v10 = vld [vmem:[%s3157_s5 + $0x38] sm:$0xff] }
 0x2db   : > { %2580 = vrot.lane.b32.xlu1 %v2502_v0, %s3074_s7  ;;  %2562 = vrot.lane.b32.xlu0 %v5453_v49, %s3074_s7  ;;  %v1446_v54 = vmul.f32 %v3056_v10, %v5458_v12  ;;  %v5459_v42 = vld [vmem:[#allocation8_spill] sm:$0xff] }
 0x2dd   : > { %v2509_v43 = vpop.permute.xlu1 %2508  ;;  %v2499_v44 = vpop.permute.xlu0 %2498  ;;  %v1209_v47 = vld [vmem:[#allocation2 + $0x18] sm:$0xff]  ;;  %v1210_v36 = vld [vmem:[#allocation2 + $0x20] sm:$0xff] }
 0x2de   : > { %v2514_v34 = vadd.f32 %v2509_v43, %v2425_v24  ;;  %v2919_v28 = vpack.c.bf16 %v1209_v47, %v1208_v29  ;;  %v2503_v17 = vadd.f32 %v2499_v44, %v2414_v39  ;;  %v2729_v29 = vld [vmem:[%s5194_s3 + $0x18] sm:$0xff]  ;;  %v2048_v39 = vmul.f32 %v3057_v56, %v5459_v42 }
 0x2df   : > { %1894 = vrot.lane.b32.xlu0 %v1817_v6, %s3074_s7  ;;  %v1448_v6 = vadd.f32 %v1446_v54, %v1440_v18  ;;  %v2855_v18 = vld [vmem:[%s5193_s2 + $0x40] sm:$0xff] }
 0x2e0   : > { %2590 = vrot.lane.b32.xlu1 %v2514_v34, %s3074_s7  ;;  %2920 = vmatpush1.bf16.msra.mxu0 %v2919_v28 }
 0x2e1   : > { %v1140_v45 = vpop.permute.xlu1 %1139  ;;  %v1132_v7 = vpop.permute.xlu0 %1131  ;;  %2921 = vmatprep.subr.bf16.mxu0 %v5339_v8 }
 0x2e2   : > { %1145 = vst.msk [vmem:[#allocation2 + $0x30] sm:$0xff] %vm569_vm0, %v1140_v45  ;;  %1136 = vst.msk [vmem:[#allocation2 + $0x28] sm:$0xff] %vm569_vm0, %v1132_v7 }
 0x2e3   : > { %2572 = vrot.lane.b32.xlu0 %v2488_v11, %s3076_s9 }
 0x2e4   : > { %2732 = vperm.xlu1 %3044, %v2726_v27  }
 0x2e5   : > { %v1150_v5 = vpop.permute.xlu1 %1149  ;;  %v2422_v16 = vpop.permute.xlu0 %2421 }
 0x2e6   : > { %1155 = vst.msk [vmem:[#allocation2 + $0x40] sm:$0xff] %vm569_vm0, %v1150_v5  ;;  %v2426_v14 = vadd.f32 %v2422_v16, %v5456_v50 }
 0x2e7   : > { %2582 = vrot.lane.b32.xlu0 %v2503_v17, %s3074_s7 }
 0x2e8   : > { %2742 = vperm.xlu1 %3044, %v2728_v38  }
 0x2e9   : > { %v1160_v51 = vpop.permute.xlu1 %1159  ;;  %v2511_v37 = vpop.permute.xlu0 %2510  ;;  %v1211_v33 = vld [vmem:[#allocation2 + $0x28] sm:$0xff]  ;;  %v1212_v9 = vld [vmem:[#allocation2 + $0x30] sm:$0xff] }
 0x2ea   : > { %1165 = vst.msk [vmem:[#allocation2 + $0x50] sm:$0xff] %vm569_vm0, %v1160_v51  ;;  %v2515_v15 = vadd.f32 %v2511_v37, %v2426_v14  ;;  %v2922_v59 = vpack.c.bf16 %v1211_v33, %v1210_v36 }
 0x2ec   : > { %2592 = vrot.lane.b32.xlu0 %v2515_v15, %s3074_s7  ;;  %2923 = vmatpush1.bf16.msra.mxu0 %v2922_v59 }
 0x2ed   : > { %v1462_v62 = vpop.permute.xlu1 %1461  ;;  %v1142_v23 = vpop.permute.xlu0 %1141  ;;  %2924 = vmatprep.subr.bf16.mxu0 %v5339_v8  ;;  %v1214_v22 = vld [vmem:[#allocation2 + $0x40] sm:$0xff]  ;;  %2747 = vperm.xlu1 %3044, %v2729_v29  }
 0x2ee   : > { %1146 = vst.msk [vmem:[#allocation2 + $0x38] sm:$0xff] %vm569_vm0, %v1142_v23  ;;  %v1467_v25 = vadd.f32 %v1462_v62, %v1447_v63  ;;  %v2049_v62 = vmul.f32 %v3056_v10, %v5459_v42 }
 0x2f0   : > { %v1493_v0 = vmul.f32 %v1467_v25, %v5457_v30  ;;  %2737 = vperm.xlu0 %3045, %v2727_v19   ;;  %v2858_v19 = vld [vmem:[%s5193_s2 + $0x58] sm:$0xff] }
 0x2f1   : > { %v1170_v55 = vpop.permute.xlu1 %1169  ;;  %v1152_v57 = vpop.permute.xlu0 %1151  ;;  %v1216_v24 = vld [vmem:[#allocation2 + $0x50] sm:$0xff] }
 0x2f2   : > { %1175 = vst.msk [vmem:[#allocation2 + $0x60] sm:$0xff] %vm569_vm0, %v1170_v55  ;;  %1156 = vst.msk [vmem:[#allocation2 + $0x48] sm:$0xff] %vm569_vm0, %v1152_v57 }
 0x2f5   : > { %v1560_v40 = vpop.permute.xlu1 %1559  ;;  %v1162_v41 = vpop.permute.xlu0 %1161  ;;  %v1213_v26 = vld [vmem:[#allocation2 + $0x38] sm:$0xff] }
 0x2f6   : > { %1166 = vst.msk [vmem:[#allocation2 + $0x58] sm:$0xff] %vm569_vm0, %v1162_v41  ;;  %v2925_v20 = vpack.c.bf16 %v1213_v26, %v1212_v9  ;;  %v1565_v1 = vadd.f32 %v1560_v40, %v1493_v0 }
 0x2f8   : > { %2926 = vmatpush1.bf16.msra.mxu0 %v2925_v20 }
 0x2f9   : > { %v1180_v21 = vpop.permute.xlu1 %1179  ;;  %v1464_v61 = vpop.permute.xlu0 %1463  ;;  %2927 = vmatprep.subr.bf16.mxu0 %v5339_v8  ;;  %v1215_v3 = vld [vmem:[#allocation2 + $0x48] sm:$0xff]  ;;  %v1218_v2 = vld [vmem:[#allocation2 + $0x60] sm:$0xff] }
 0x2fa   : > { %1185 = vst.msk [vmem:[#allocation2 + $0x70] sm:$0xff] %vm569_vm0, %v1180_v21  ;;  %v2928_v46 = vpack.c.bf16 %v1215_v3, %v1214_v22  ;;  %v1468_v28 = vadd.f32 %v1464_v61, %v1448_v6 }
 0x2fc   : > { %2929 = vmatpush1.bf16.msra.mxu0 %v2928_v46  ;;  %v1494_v45 = vmul.f32 %v1468_v28, %v5457_v30  ;;  %v2857_v46 = vld [vmem:[%s5193_s2 + $0x50] sm:$0xff] }
 0x2fd   : > { %v1633_v49 = vpop.permute.xlu1 %1632  ;;  %v1172_v4 = vpop.permute.xlu0 %1171  ;;  %2930 = vmatprep.subr.bf16.mxu0 %v5339_v8  ;;  %v1217_v32 = vld [vmem:[#allocation2 + $0x58] sm:$0xff]  ;;  %v2861_v28 = vld [vmem:[%s5193_s2 + $0x70] sm:$0xff] }
 0x2fe   : > { %v1638_v43 = vadd.f32 %v1633_v49, %v1565_v1  ;;  %1176 = vst.msk [vmem:[#allocation2 + $0x68] sm:$0xff] %vm569_vm0, %v1172_v4  ;;  %v2931_v44 = vpack.c.bf16 %v1217_v32, %v1216_v24  ;;  %v2860_v49 = vld [vmem:[%s5193_s2 + $0x68] sm:$0xff]  ;;  %v2859_v24 = vld [vmem:[%s5193_s2 + $0x60] sm:$0xff] }
 0x300   : > { %1818 = vst.msk [vmem:[#allocation2] sm:$0xff] %vm569_vm0, %v1638_v43  ;;  %2932 = vmatpush1.bf16.msra.mxu0 %v2931_v44  ;;  %v2862_v44 = vld [vmem:[%s5193_s2 + $0x78] sm:$0xff] }
 0x301   : > { %v2063_v47 = vpop.permute.xlu1 %2062  ;;  %v1562_v34 = vpop.permute.xlu0 %1561  ;;  %2933 = vmatprep.subr.bf16.mxu0 %v5339_v8  ;;  %v1220_v51 = vld [vmem:[#allocation2 + $0x70] sm:$0xff] }
 0x302   : > { %v1566_v60 = vadd.f32 %v1562_v34, %v1494_v45  ;;  %v2068_v13 = vadd.f32 %v2063_v47, %v2048_v39 }
 0x305   : > { %v2083_v53 = vpop.permute.xlu1 %2082  ;;  %v1182_v52 = vpop.permute.xlu0 %1181  ;;  %v1219_v11 = vld [vmem:[#allocation2 + $0x68] sm:$0xff] }
 0x306   : > { %1186 = vst.msk [vmem:[#allocation2 + $0x78] sm:$0xff] %vm569_vm0, %v1182_v52  ;;  %v2934_v7 = vpack.c.bf16 %v1219_v11, %v1218_v2  ;;  %v2088_v36 = vadd.f32 %v2083_v53, %v2068_v13  ;;  %v2880_v11 = vld [vmem:[%s5193_s2 + $0x88] sm:$0xff] }
 0x307   : > { %v1909_v31 = vld [vmem:[#allocation2] sm:$0xff] }
 0x308   : > { %2935 = vmatpush1.bf16.msra.mxu0 %v2934_v7  ;;  %v2121_v35 = vmul.f32 %v2088_v36, %v5459_v42 }
 0x309   : > { %v1190_v17 = vpop.permute.xlu1 %1189  ;;  %v1635_v5 = vpop.permute.xlu0 %1634  ;;  %2936 = vmatprep.subr.bf16.mxu0 %v5339_v8 }
 0x30a   : > { %1195 = vst.msk [vmem:[#allocation2 + $0x80] sm:$0xff] %vm569_vm0, %v1190_v17  ;;  %v1639_v16 = vadd.f32 %v1635_v5, %v1566_v60 }
 0x30c   : > { %1819 = vst.msk [vmem:[#allocation2 + $0x8] sm:$0xff] %vm569_vm0, %v1639_v16 }
 0x30d   : > { %v1823_v50 = vpop.permute.xlu1 %1822  ;;  %v2065_v14 = vpop.permute.xlu0 %2064  ;;  %v1221_v37 = vld [vmem:[#allocation2 + $0x78] sm:$0xff] }
 0x30e   : > { %1828 = vst.msk [vmem:[#allocation2 + $0x10] sm:$0xff] %vm569_vm0, %v1823_v50  ;;  %v2937_v33 = vpack.c.bf16 %v1221_v37, %v1220_v51  ;;  %v2069_v55 = vadd.f32 %v2065_v14, %v2049_v62 }
 0x310   : > { %2938 = vmatpush1.bf16.msra.mxu0 %v2937_v33 }
 0x311   : > { %v2207_v15 = vpop.permute.xlu1 %2206  ;;  %v2085_v59 = vpop.permute.xlu0 %2084  ;;  %2939 = vmatprep.subr.bf16.mxu0 %v5339_v8  ;;  %v1222_v26 = vld [vmem:[#allocation2 + $0x80] sm:$0xff] }
 0x312   : > { %v2212_v23 = vadd.f32 %v2207_v15, %v2121_v35  ;;  %v2089_v40 = vadd.f32 %v2085_v59, %v2069_v55 }
 0x313   : > { %v1910_v27 = vld [vmem:[#allocation2 + $0x8] sm:$0xff] }
 0x314   : > { %v2122_v20 = vmul.f32 %v2089_v40, %v5459_v42  ;;  %v2970_v10 = vpack.c.bf16 %v1910_v27, %v1909_v31 }
 0x315   : > { %v2296_v30 = vpop.permute.xlu1 %2295  ;;  %v1192_v58 = vpop.permute.xlu0 %1191  ;;  %v1911_v61 = vld [vmem:[#allocation2 + $0x10] sm:$0xff] }
 0x316   : > { %v2301_v12 = vadd.f32 %v2296_v30, %v2212_v23  ;;  %1196 = vst.msk [vmem:[#allocation2 + $0x88] sm:$0xff] %vm569_vm0, %v1192_v58 }
 0x318   : > { %2516 = vst.msk [vmem:[#allocation2] sm:$0xff] %vm569_vm0, %v2301_v12 }
 0x319   : > { %v1833_v57 = vpop.permute.xlu1 %1832  ;;  %v1825_v63 = vpop.permute.xlu0 %1824 }
 0x31a   : > { %1838 = vst.msk [vmem:[#allocation2 + $0x20] sm:$0xff] %vm569_vm0, %v1833_v57  ;;  %1829 = vst.msk [vmem:[#allocation2 + $0x18] sm:$0xff] %vm569_vm0, %v1825_v63 }
 0x31d   : > { %v1843_v41 = vpop.permute.xlu1 %1842  ;;  %v2209_v9 = vpop.permute.xlu0 %2208  ;;  %v1223_v25 = vld [vmem:[#allocation2 + $0x88] sm:$0xff] }
 0x31e   : > { %1848 = vst.msk [vmem:[#allocation2 + $0x30] sm:$0xff] %vm569_vm0, %v1843_v41  ;;  %v2940_v22 = vpack.c.bf16 %v1223_v25, %v1222_v26  ;;  %v2213_v21 = vadd.f32 %v2209_v9, %v2122_v20 }
 0x31f   : > { %v2607_v29 = vld [vmem:[#allocation2] sm:$0xff] }
 0x320   : > { %2941 = vmatpush1.bf16.msra.mxu0 %v2940_v22 }
 0x321   : > { %v2521_v3 = vpop.permute.xlu1 %2520  ;;  %v2298_v48 = vpop.permute.xlu0 %2297  ;;  %2969 = vmatprep.subr.bf16.mxu0 %v5339_v8  ;;  %v1912_v54 = vld [vmem:[#allocation2 + $0x18] sm:$0xff]  ;;  %v1913_v32 = vld [vmem:[#allocation2 + $0x20] sm:$0xff] }
 0x322   : > { %2526 = vst.msk [vmem:[#allocation2 + $0x10] sm:$0xff] %vm569_vm0, %v2521_v3  ;;  %v2302_v0 = vadd.f32 %v2298_v48, %v2213_v21  ;;  %v2973_v4 = vpack.c.bf16 %v1912_v54, %v1911_v61 }
 0x323   : > { %1302 = vmatmul.mubr.f32.vlgmr.msra.gmra.mrb[0].mxu0 %v2855_v18 }
 0x324   : > { %2517 = vst.msk [vmem:[#allocation2 + $0x8] sm:$0xff] %vm569_vm0, %v2302_v0  ;;  %2971 = vmatpush1.bf16.msra.mxu0 %v2970_v10  ;;  %2864 = vmatprep.mubr.msk.f32.mxu0 %vm1224_vm1, %v2858_v19 }
 0x325   : > { %v1853_v38 = vpop.permute.xlu1 %1852  ;;  %v1835_v1 = vpop.permute.xlu0 %1834  ;;  %2972 = vmatprep.subr.bf16.mxu0 %v5339_v8  ;;  %v1915_v7 = vld [vmem:[#allocation2 + $0x30] sm:$0xff] }
 0x326   : > { %1858 = vst.msk [vmem:[#allocation2 + $0x40] sm:$0xff] %vm569_vm0, %v1853_v38  ;;  %1839 = vst.msk [vmem:[#allocation2 + $0x28] sm:$0xff] %vm569_vm0, %v1835_v1 }
 0x327   : > { %1307 = vmatmul.mubr.f32.gmra.mrb[2].mxu0 %v2857_v46 }
 0x328   : > { %2974 = vmatpush1.bf16.msra.mxu0 %v2973_v4  ;;  %2865 = vmatprep.mubr.msk.f32.mxu0 %vm1224_vm1, %v2860_v49 }
 0x329   : > { %v2531_v6 = vpop.permute.xlu1 %2530  ;;  %v1845_v43 = vpop.permute.xlu0 %1844  ;;  %2975 = vmatprep.subr.bf16.mxu0 %v5339_v8  ;;  %v2609_v16 = vld [vmem:[#allocation2 + $0x10] sm:$0xff] }
 0x32a   : > { %2536 = vst.msk [vmem:[#allocation2 + $0x20] sm:$0xff] %vm569_vm0, %v2531_v6  ;;  %1849 = vst.msk [vmem:[#allocation2 + $0x38] sm:$0xff] %vm569_vm0, %v1845_v43 }
 0x32b   : > { %v2608_v47 = vld [vmem:[#allocation2 + $0x8] sm:$0xff]  ;;  %1312 = vmatmul.mubr.f32.gmra.mrb[4].mxu0 %v2859_v24 }
 0x32c   : > { %v2997_v34 = vpack.c.bf16 %v2608_v47, %v2607_v29  ;;  %2866 = vmatprep.mubr.msk.f32.mxu0 %vm1224_vm1, %v2862_v44  ;;  %v2879_v44 = vld [vmem:[%s5193_s2 + $0x80] sm:$0xff] }
 0x32d   : > { %v1863_v53 = vpop.permute.xlu1 %1862  ;;  %v2523_v52 = vpop.permute.xlu0 %2522  ;;  %v1914_v2 = vld [vmem:[#allocation2 + $0x28] sm:$0xff]  ;;  %v1917_v14 = vld [vmem:[#allocation2 + $0x40] sm:$0xff] }
 0x32e   : > { %1868 = vst.msk [vmem:[#allocation2 + $0x50] sm:$0xff] %vm569_vm0, %v1863_v53  ;;  %2527 = vst.msk [vmem:[#allocation2 + $0x18] sm:$0xff] %vm569_vm0, %v2523_v52  ;;  %2998 = vmatpush1.bf16.msra.mxu1 %v2997_v34  ;;  %v2976_v45 = vpack.c.bf16 %v1914_v2, %v1913_v32  ;;  %v2882_v34 = vld [vmem:[%s5193_s2 + $0x98] sm:$0xff]  ;;  %v2881_v52 = vld [vmem:[%s5193_s2 + $0x90] sm:$0xff] }
 0x32f   : > { %2999 = vmatprep.subr.bf16.mxu1 %v5339_v8  ;;  %1317 = vmatmul.mubr.f32.gmra.mrb[6].mxu0 %v2861_v28 }
 0x330   : > { %2977 = vmatpush1.bf16.msra.mxu0 %v2976_v45  ;;  %2887 = vmatprep.mubr.msk.f32.mxu0 %vm1224_vm1, %v2880_v11  ;;  %v2884_v45 = vld [vmem:[%s5193_s2 + $0xa8] sm:$0xff] }
 0x331   : > { %v2541_v56 = vpop.permute.xlu1 %2540  ;;  %v1855_v42 = vpop.permute.xlu0 %1854  ;;  %2978 = vmatprep.subr.bf16.mxu0 %v5339_v8  ;;  %v1916_v39 = vld [vmem:[#allocation2 + $0x38] sm:$0xff]  ;;  %v2611_v35 = vld [vmem:[#allocation2 + $0x20] sm:$0xff] }
 0x332   : > { %2546 = vst.msk [vmem:[#allocation2 + $0x30] sm:$0xff] %vm569_vm0, %v2541_v56  ;;  %1859 = vst.msk [vmem:[#allocation2 + $0x48] sm:$0xff] %vm569_vm0, %v1855_v42  ;;  %v2979_v60 = vpack.c.bf16 %v1916_v39, %v1915_v7  ;;  %v2883_v56 = vld [vmem:[%s5193_s2 + $0xa0] sm:$0xff]  ;;  %v2886_v42 = vld [vmem:[%s5193_s2 + $0xb8] sm:$0xff] }
 0x334   : > { %2980 = vmatpush1.bf16.msra.mxu0 %v2979_v60 }
 0x335   : > { %v1873_v17 = vpop.permute.xlu1 %1872  ;;  %v2533_v5 = vpop.permute.xlu0 %2532  ;;  %v2610_v13 = vld [vmem:[#allocation2 + $0x18] sm:$0xff]  ;;  %2981 = vmatprep.subr.bf16.mxu0 %v5339_v8  ;;  %v1919_v30 = vld [vmem:[#allocation2 + $0x50] sm:$0xff] }
 0x336   : > { %1878 = vst.msk [vmem:[#allocation2 + $0x60] sm:$0xff] %vm569_vm0, %v1873_v17  ;;  %2537 = vst.msk [vmem:[#allocation2 + $0x28] sm:$0xff] %vm569_vm0, %v2533_v5  ;;  %v3000_v50 = vpack.c.bf16 %v2610_v13, %v2609_v16  ;;  %v2885_v5 = vld [vmem:[%s5193_s2 + $0xb0] sm:$0xff]  ;;  %v2899_v16 = vld [vmem:[%s5193_s2 + $0xc0] sm:$0xff] }
 0x337   : > { %v2901_v13 = vld [vmem:[%s5193_s2 + $0xd0] sm:$0xff] }
 0x338   : > { %3001 = vmatpush1.bf16.msra.mxu1 %v3000_v50  ;;  %v2904_v50 = vld [vmem:[%s5193_s2 + $0xe8] sm:$0xff] }
 0x339   : > { %v2551_v51 = vpop.permute.xlu1 %2550  ;;  %v1865_v37 = vpop.permute.xlu0 %1864  ;;  %v1918_v36 = vld [vmem:[#allocation2 + $0x48] sm:$0xff]  ;;  %3002 = vmatprep.subr.bf16.mxu1 %v5339_v8  ;;  %v2613_v40 = vld [vmem:[#allocation2 + $0x30] sm:$0xff] }
 0x33a   : > { %2556 = vst.msk [vmem:[#allocation2 + $0x40] sm:$0xff] %vm569_vm0, %v2551_v51  ;;  %1869 = vst.msk [vmem:[#allocation2 + $0x58] sm:$0xff] %vm569_vm0, %v1865_v37  ;;  %v2982_v33 = vpack.c.bf16 %v1918_v36, %v1917_v14  ;;  %v2903_v14 = vld [vmem:[%s5193_s2 + $0xe0] sm:$0xff]  ;;  %v2906_v51 = vld [vmem:[%s5193_s2 + $0xf8] sm:$0xff] }
 0x33b   : > { %v2905_v37 = vld [vmem:[%s5193_s2 + $0xf0] sm:$0xff] }
 0x33c   : > { %2983 = vmatpush1.bf16.msra.mxu0 %v2982_v33 }
 0x33d   : > { %v1883_v15 = vpop.permute.xlu1 %1882  ;;  %v2543_v59 = vpop.permute.xlu0 %2542  ;;  %v2612_v62 = vld [vmem:[#allocation2 + $0x28] sm:$0xff]  ;;  %2984 = vmatprep.subr.bf16.mxu0 %v5339_v8  ;;  %v1921_v26 = vld [vmem:[#allocation2 + $0x60] sm:$0xff] }
 0x33e   : > { %1888 = vst.msk [vmem:[#allocation2 + $0x70] sm:$0xff] %vm569_vm0, %v1883_v15  ;;  %2547 = vst.msk [vmem:[#allocation2 + $0x38] sm:$0xff] %vm569_vm0, %v2543_v59  ;;  %v3003_v23 = vpack.c.bf16 %v2612_v62, %v2611_v35 }
 0x340   : > { %3004 = vmatpush1.bf16.msra.mxu1 %v3003_v23 }
 0x341   : > { %v2561_v58 = vpop.permute.xlu1 %2560  ;;  %v1875_v12 = vpop.permute.xlu0 %1874  ;;  %v1920_v31 = vld [vmem:[#allocation2 + $0x58] sm:$0xff]  ;;  %3005 = vmatprep.subr.bf16.mxu1 %v5339_v8  ;;  %v2615_v21 = vld [vmem:[#allocation2 + $0x40] sm:$0xff] }
 0x342   : > { %2566 = vst.msk [vmem:[#allocation2 + $0x50] sm:$0xff] %vm569_vm0, %v2561_v58  ;;  %1879 = vst.msk [vmem:[#allocation2 + $0x68] sm:$0xff] %vm569_vm0, %v1875_v12  ;;  %v2985_v55 = vpack.c.bf16 %v1920_v31, %v1919_v30 }
 0x344   : > { %2986 = vmatpush1.bf16.msra.mxu0 %v2985_v55 }
 0x345   : > { %v1893_v57 = vpop.permute.xlu1 %1892  ;;  %v2553_v63 = vpop.permute.xlu0 %2552  ;;  %v2614_v41 = vld [vmem:[#allocation2 + $0x38] sm:$0xff]  ;;  %2987 = vmatprep.subr.bf16.mxu0 %v5339_v8  ;;  %v1923_v18 = vld [vmem:[#allocation2 + $0x70] sm:$0xff] }
 0x346   : > { %1898 = vst.msk [vmem:[#allocation2 + $0x80] sm:$0xff] %vm569_vm0, %v1893_v57  ;;  %2557 = vst.msk [vmem:[#allocation2 + $0x48] sm:$0xff] %vm569_vm0, %v2553_v63  ;;  %v3006_v9 = vpack.c.bf16 %v2614_v41, %v2613_v40 }
 0x348   : > { %3007 = vmatpush1.bf16.msra.mxu1 %v3006_v9 }
 0x349   : > { %v2571_v25 = vpop.permute.xlu1 %2570  ;;  %v1885_v20 = vpop.permute.xlu0 %1884  ;;  %v1922_v22 = vld [vmem:[#allocation2 + $0x68] sm:$0xff]  ;;  %3008 = vmatprep.subr.bf16.mxu1 %v5339_v8  ;;  %v2617_v49 = vld [vmem:[#allocation2 + $0x50] sm:$0xff] }
 0x34a   : > { %2576 = vst.msk [vmem:[#allocation2 + $0x60] sm:$0xff] %vm569_vm0, %v2571_v25  ;;  %1889 = vst.msk [vmem:[#allocation2 + $0x78] sm:$0xff] %vm569_vm0, %v1885_v20  ;;  %v2988_v27 = vpack.c.bf16 %v1922_v22, %v1921_v26 }
 0x34c   : > { %2989 = vmatpush1.bf16.msra.mxu0 %v2988_v27 }
 0x34d   : > { %v2581_v61 = vpop.permute.xlu1 %2580  ;;  %v2563_v3 = vpop.permute.xlu0 %2562  ;;  %v2616_v48 = vld [vmem:[#allocation2 + $0x48] sm:$0xff]  ;;  %2990 = vmatprep.subr.bf16.mxu0 %v5339_v8  ;;  %v1925_v54 = vld [vmem:[#allocation2 + $0x80] sm:$0xff] }
 0x34e   : > { %2586 = vst.msk [vmem:[#allocation2 + $0x70] sm:$0xff] %vm569_vm0, %v2581_v61  ;;  %2567 = vst.msk [vmem:[#allocation2 + $0x58] sm:$0xff] %vm569_vm0, %v2563_v3  ;;  %v3009_v19 = vpack.c.bf16 %v2616_v48, %v2615_v21 }
 0x350   : > { %3010 = vmatpush1.bf16.msra.mxu1 %v3009_v19 }
 0x351   : > { %v1895_v0 = vpop.permute.xlu0 %1894  ;;  %v1924_v10 = vld [vmem:[#allocation2 + $0x78] sm:$0xff]  ;;  %3011 = vmatprep.subr.bf16.mxu1 %v5339_v8  ;;  %v2619_v29 = vld [vmem:[#allocation2 + $0x60] sm:$0xff] }
 0x352   : > { %1899 = vst.msk [vmem:[#allocation2 + $0x88] sm:$0xff] %vm569_vm0, %v1895_v0  ;;  %v2591_v46 = vpop.permute.xlu1 %2590  ;;  %v2991_v38 = vpack.c.bf16 %v1924_v10, %v1923_v18 }
 0x353   : > { %2596 = vst.msk [vmem:[#allocation2 + $0x80] sm:$0xff] %vm569_vm0, %v2591_v46 }
 0x354   : > { %2992 = vmatpush1.bf16.msra.mxu0 %v2991_v38 }
 0x355   : > { %v2573_v1 = vpop.permute.xlu0 %2572  ;;  %v2618_v4 = vld [vmem:[#allocation2 + $0x58] sm:$0xff]  ;;  %2993 = vmatprep.subr.bf16.mxu0 %v5339_v8  ;;  %v2621_v2 = vld [vmem:[#allocation2 + $0x70] sm:$0xff] }
 0x356   : > { %2577 = vst.msk [vmem:[#allocation2 + $0x68] sm:$0xff] %vm569_vm0, %v2573_v1  ;;  %v3012_v24 = vpack.c.bf16 %v2618_v4, %v2617_v49 }
 0x358   : > { %3013 = vmatpush1.bf16.msra.mxu1 %v3012_v24 }
 0x359   : > { %v2583_v32 = vpop.permute.xlu0 %2582  ;;  %v1926_v6 = vld [vmem:[#allocation2 + $0x88] sm:$0xff]  ;;  %3014 = vmatprep.subr.bf16.mxu1 %v5339_v8 }
 0x35a   : > { %2587 = vst.msk [vmem:[#allocation2 + $0x78] sm:$0xff] %vm569_vm0, %v2583_v32  ;;  %v2994_v43 = vpack.c.bf16 %v1926_v6, %v1925_v54  ;;  %v2623_v39 = vld [vmem:[#allocation2 + $0x80] sm:$0xff] }
 0x35c   : > { %2995 = vmatpush1.bf16.msra.mxu0 %v2994_v43 }
 0x35d   : > { %v2620_v47 = vld [vmem:[#allocation2 + $0x68] sm:$0xff] }
 0x35e   : > { %v2593_v28 = vpop.permute.xlu0 %2592  ;;  %v3015_v53 = vpack.c.bf16 %v2620_v47, %v2619_v29 }
 0x35f   : > { %2597 = vst.msk [vmem:[#allocation2 + $0x88] sm:$0xff] %vm569_vm0, %v2593_v28  ;;  %2004 = vmatmul.mubr.f32.vlgmr.msra.gmra.mrb[8].mxu0 %v2879_v44 }
 0x360   : > { %3016 = vmatpush1.bf16.msra.mxu1 %v3015_v53  ;;  %2888 = vmatprep.mubr.msk.f32.mxu0 %vm1224_vm1, %v2882_v34 }
 0x361   : > { %3017 = vmatprep.subr.bf16.mxu1 %v5339_v8  ;;  %v2622_v11 = vld [vmem:[#allocation2 + $0x78] sm:$0xff] }
 0x362   : > { %v3018_v7 = vpack.c.bf16 %v2622_v11, %v2621_v2 }
 0x363   : > { %2009 = vmatmul.mubr.f32.gmra.mrb[10].mxu0 %v2881_v52  ;;  %v2733_v4 = vpop.permute.xlu1 %2732 }
 0x364   : > { %3019 = vmatpush1.bf16.msra.mxu1 %v3018_v7  ;;  %2889 = vmatprep.mubr.msk.f32.mxu0 %vm1224_vm1, %v2884_v45 }
 0x365   : > { %3020 = vmatprep.subr.bf16.mxu1 %v5339_v8  ;;  %v2902_v8 = vld [vmem:[%s5193_s2 + $0xd8] sm:$0xff] }
 0x366   : > { %v2624_v60 = vld [vmem:[#allocation2 + $0x88] sm:$0xff] }
 0x367   : > { %2014 = vmatmul.mubr.f32.gmra.mrb[12].mxu0 %v2883_v56  ;;  %v3021_v17 = vpack.c.bf16 %v2624_v60, %v2623_v39  ;;  %v2743_v34 = vpop.permute.xlu1 %2742 }
 0x368   : > { %2890 = vmatprep.mubr.msk.f32.mxu0 %vm1224_vm1, %v2886_v42 }
 0x369   : > { %3022 = vmatpush1.bf16.msra.mxu1 %v3021_v17 }
 0x36b   : > { %2019 = vmatmul.mubr.f32.gmra.mrb[14].mxu0 %v2885_v5 }
 0x36c   : > { %2702 = vmatmul.mubr.f32.vlgmr.msra.gmra.mrb[8].mxu1 %v2899_v16  ;;  %v2748_v39 = vpop.permute.xlu1 %2747 }
 0x36d   : > { %2908 = vmatprep.mubr.msk.f32.mxu1 %vm1224_vm1, %v2902_v8 }
 0x36f   : > { %v2738_v6 = vpop.permute.xlu0 %2737 }
 0x370   : > { %2707 = vmatmul.mubr.f32.gmra.mrb[10].mxu1 %v2901_v13 }
 0x371   : > { %2909 = vmatprep.mubr.msk.f32.mxu1 %vm1224_vm1, %v2904_v50 }
 0x374   : > { %2712 = vmatmul.mubr.f32.gmra.mrb[12].mxu1 %v2903_v14 }
 0x375   : > { %2910 = vmatprep.mubr.msk.f32.mxu1 %vm1224_vm1, %v2906_v51 }
 0x378   : > { %2717 = vmatmul.mubr.f32.gmra.mrb[14].mxu1 %v2905_v37  ;;  %v1400_v36 = vpop.f32.mrb[0].mxu1 }
 0x379   : > { %v1402_v33 = vpop.f32.mrb[1].mxu1 }
 0x38f   : > { %v1405_v15 = vpop.f32.mrb[2].mxu1 }
 0x390   : > { %v1407_v59 = vpop.f32.mrb[3].mxu1 }
 0x39f   : > { %v1410_v35 = vpop.f32.mrb[4].mxu1 }
 0x3a0   : > { %v1412_v62 = vpop.f32.mrb[5].mxu1 }
 0x3a3   : > { %v1415_v23 = vpop.f32.mrb[6].mxu1 }
 0x3a4   : > { %v1417_v30 = vpop.f32.mrb[7].mxu1 }
 0x3f6   : > { %v1303_v58 = vpop.f32.mrb[0].mxu0 }
 0x3f7   : > { %v1305_v12 = vpop.f32.mrb[1].mxu0  ;;  %v1401_v31 = vadd.f32 %v1400_v36, %v1303_v58 }
 0x3fa   : > { %v1308_v55 = vpop.f32.mrb[2].mxu0 }
 0x3fb   : > { %v1310_v57 = vpop.f32.mrb[3].mxu0  ;;  %v1406_v63 = vadd.f32 %v1405_v15, %v1308_v55 }
 0x3fe   : > { %v1313_v40 = vpop.f32.mrb[4].mxu0 }
 0x3ff   : > { %v1315_v41 = vpop.f32.mrb[5].mxu0  ;;  %v1411_v9 = vadd.f32 %v1410_v35, %v1313_v40 }
 0x402   : > { %v1318_v26 = vpop.f32.mrb[6].mxu0 }
 0x403   : > { %v1320_v25 = vpop.f32.mrb[7].mxu0  ;;  %v1416_v20 = vadd.f32 %v1415_v23, %v1318_v26 }
 0x432   : > { %v2005_v22 = vpop.f32.mrb[8].mxu0 }
 0x433   : > { %v2024_v27 = vadd.f32 %v2005_v22, %v1401_v31  ;;  %v2007_v21 = vpop.f32.mrb[9].mxu0 }
 0x436   : > { %v2010_v18 = vpop.f32.mrb[10].mxu0 }
 0x437   : > { %v2025_v61 = vadd.f32 %v2010_v18, %v1406_v63  ;;  %v2012_v3 = vpop.f32.mrb[11].mxu0 }
 0x43a   : > { %v2015_v48 = vpop.f32.mrb[12].mxu0 }
 0x43b   : > { %v2026_v19 = vadd.f32 %v2015_v48, %v1411_v9  ;;  %v2017_v0 = vpop.f32.mrb[13].mxu0 }
 0x43e   : > { %v2020_v10 = vpop.f32.mrb[14].mxu0 }
 0x43f   : > { %v2027_v54 = vadd.f32 %v2020_v10, %v1416_v20  ;;  %v2703_v46 = vpop.f32.mrb[8].mxu1  ;;  %v2022_v38 = vpop.f32.mrb[15].mxu0 }
 0x440   : > { %v2722_v1 = vadd.f32 %v2703_v46, %v2024_v27  ;;  %v2705_v49 = vpop.f32.mrb[9].mxu1 }
 0x442   : > { %v2750_v24 = vadd.f32 %v2733_v4, %v2722_v1 }
 0x443   : > { %v2708_v32 = vpop.f32.mrb[10].mxu1 }
 0x444   : > { %v2754_v43 = vmax.f32 %v2750_v24, 0.0  ;;  %v2723_v44 = vadd.f32 %v2708_v32, %v2025_v61  ;;  %v2710_v29 = vpop.f32.mrb[11].mxu1 }
 0x446   : > { %2758 = vst.msk [vmem:[%s214_s14] sm:$0xff] %vm569_vm0, %v2754_v43  ;;  %v2751_v47 = vadd.f32 %v2738_v6, %v2723_v44 }
 0x447   : > { %v2713_v28 = vpop.f32.mrb[12].mxu1 }
 0x448   : > { %v2755_v53 = vmax.f32 %v2751_v47, 0.0  ;;  %v2724_v52 = vadd.f32 %v2713_v28, %v2026_v19  ;;  %v2715_v2 = vpop.f32.mrb[13].mxu1 }
 0x44a   : > { %2759 = vst.msk [vmem:[%s214_s14 + $0x8] sm:$0xff] %vm569_vm0, %v2755_v53  ;;  %v2752_v11 = vadd.f32 %v2743_v34, %v2724_v52 }
 0x44b   : > { %v2718_v45 = vpop.f32.mrb[14].mxu1 }
 0x44c   : > { %v2756_v7 = vmax.f32 %v2752_v11, 0.0  ;;  %v2725_v56 = vadd.f32 %v2718_v45, %v2027_v54  ;;  %v2720_v42 = vpop.f32.mrb[15].mxu1 }
 0x44e   : > { %2760 = vst.msk [vmem:[%s214_s14 + $0x10] sm:$0xff] %vm569_vm0, %v2756_v7  ;;  %v2753_v60 = vadd.f32 %v2748_v39, %v2725_v56 }
 0x450   : > { %v2757_v17 = vmax.f32 %v2753_v60, 0.0 }
 0x452   : > { %2761 = vst.msk [vmem:[%s214_s14 + $0x18] sm:$0xff] %vm569_vm0, %v2757_v17 }
 0x453 PF: > { %s14_s15 = sadd.s32 1, %s3064_s15  }
 0x454   : > { %p11_p4 = scmp.ge.s32.totalorder %s14_s15, 4  }
 0x456   :  { %13 = sbr.rel (!%p11_p4) target bundleno = 1 (0x1), region = 75 }

</bundles_post_ra>
